<compile_context>
chip_gen: v6e
topology: v6e:2x2x1
jax: 0.10.0
libtpu: 0.0.40
codegen_flags: <defaults>
</compile_context>

<pallas_src>
import functools

import jax
import jax.numpy as jnp
from jax import lax
from jax.experimental import pallas as pl
from jax.experimental.pallas import tpu as pltpu

EPS = 1e-5  # nn.InstanceNorm2d default eps


def _instance_norm(y, hw):
    """InstanceNorm2d(affine=False) over the pixel axis of a (HW, C) tile.
    One-pass stats: var = E[y^2] - E[y]^2 (biased, matching PyTorch)."""
    s = jnp.sum(y, axis=0, keepdims=True)
    ss = jnp.sum(y * y, axis=0, keepdims=True)
    mean = s * (1.0 / hw)
    var = jnp.maximum(ss * (1.0 / hw) - mean * mean, 0.0)
    return (y - mean) * lax.rsqrt(var + EPS)


def _resnet_block_kernel(x_ref, w1_ref, w2_ref, o_ref, pad_ref, col_ref, *, H, W):
    """Fused ResnetBlock forward for one batch sample (NHWC, channel-padded).

    x_ref  : (1, H, W, Cp) f32   input tile (also the residual branch)
    w*_ref : (9*Cp, Cp)    bf16  im2col-flattened conv weights
    o_ref  : (1, H, W, Cp) f32   output tile
    pad_ref: VMEM (H+2, W+2, Cp) f32  reflect-padded activation scratch
    col_ref: VMEM (H*W, 9*Cp)   bf16  im2col scratch (matmul LHS)
    """
    Cp = o_ref.shape[-1]
    HW = H * W

    def conv3x3_instance_norm(img, w_ref):
        # --- ReflectionPad2d(1) built in VMEM scratch ---
        pad_ref[1:H + 1, 1:W + 1, :] = img
        pad_ref[0:1, 1:W + 1, :] = img[1:2, :, :]                   # top    <- row 1
        pad_ref[H + 1:H + 2, 1:W + 1, :] = img[H - 2:H - 1, :, :]   # bottom <- row H-2
        pad_ref[:, 0:1, :] = pad_ref[:, 2:3, :]                     # left   <- col 1
        pad_ref[:, W + 1:W + 2, :] = pad_ref[:, W - 1:W, :]         # right  <- col W-2

        # --- im2col into VMEM scratch: 9 lane-aligned (HW, Cp) column blocks ---
        t = 0
        for dy in range(3):
            for dx in range(3):
                col_ref[:, t * Cp:(t + 1) * Cp] = (
                    pad_ref[dy:dy + H, dx:dx + W, :]
                    .reshape(HW, Cp).astype(jnp.bfloat16))
                t += 1

        # --- one deep MXU matmul (bf16 in, f32 accumulate) ---
        y = jnp.dot(col_ref[...], w_ref[...],
                    preferred_element_type=jnp.float32)             # (HW, Cp) f32
        return _instance_norm(y, HW)

    x = x_ref[0]                                                    # (H, W, Cp) f32
    # conv1 -> InstanceNorm -> ReLU  (bias dropped: cancelled by IN mean-subtract)
    y1 = jnp.maximum(conv3x3_instance_norm(x, w1_ref), 0.0)
    # conv2 -> InstanceNorm -> residual add
    y2 = conv3x3_instance_norm(y1.reshape(H, W, Cp), w2_ref)
    o_ref[0] = x + y2.reshape(H, W, Cp)


def resnet_block_forward(x_nchw, w1, b1, w2, b2):
    """ResnetBlock forward.  x_nchw: (N, C, H, W) f32; w1, w2: PyTorch Conv2d
    weights (C, C, 3, 3).  b1, b2 are accepted for interface parity but are
    mathematically inert: a bias feeding InstanceNorm(affine=False) is exactly
    cancelled by the mean subtraction."""
    del b1, b2
    N, C, H, W = x_nchw.shape
    HW = H * W
    Cp = ((C + 127) // 128) * 128      # lane-dense channel count (no-op if C % 128 == 0)

    # NCHW -> NHWC (channels on the 128-lane axis), zero-pad channels to Cp.
    # TODO(synk): in a full network keep activations NHWC across blocks so these
    # transposes are paid once per model, not once per block.
    x = jnp.transpose(x_nchw, (0, 2, 3, 1)).astype(jnp.float32)
    if Cp != C:
        x = jnp.pad(x, ((0, 0), (0, 0), (0, 0), (0, Cp - C)))

    def prep_w(w):
        # (C_out, C_in, ky, kx) -> (ky, kx, C_in, C_out) -> zero-pad -> (9*Cp, Cp) bf16
        w = jnp.transpose(w, (2, 3, 1, 0)).astype(jnp.float32)
        if Cp != C:
            w = jnp.pad(w, ((0, 0), (0, 0), (0, Cp - C), (0, Cp - C)))
        return w.reshape(9 * Cp, Cp).astype(jnp.bfloat16)

    kernel = functools.partial(_resnet_block_kernel, H=H, W=W)

    grid_spec = pltpu.PrefetchScalarGridSpec(
        num_scalar_prefetch=0,
        grid=(N,),                                     # one grid step per sample
        in_specs=[
            pl.BlockSpec((1, H, W, Cp), lambda n: (n, 0, 0, 0)),
            # Constant index_map: weight blocks stay resident across grid steps.
            pl.BlockSpec((9 * Cp, Cp), lambda n: (0, 0)),
            pl.BlockSpec((9 * Cp, Cp), lambda n: (0, 0)),
        ],
        out_specs=pl.BlockSpec((1, H, W, Cp), lambda n: (n, 0, 0, 0)),
        scratch_shapes=[
            pltpu.VMEM((H + 2, W + 2, Cp), jnp.float32),   # reflect-padded tile
            pltpu.VMEM((HW, 9 * Cp), jnp.bfloat16),        # im2col matrix
        ],
    )

    # Explicit scoped-VMEM budget (blocks + double buffers + weights + scratch),
    # so the default 16/32 MiB limits don't throttle larger shapes; capped for v7x.
    io_bytes = 2 * 2 * HW * Cp * 4                    # x + out blocks, double-buffered
    w_bytes = 2 * 2 * 9 * Cp * Cp * 2                 # w1 + w2, double-buffered, bf16
    scratch_bytes = (H + 2) * (W + 2) * Cp * 4 + HW * 9 * Cp * 2
    tmp_bytes = 6 * HW * Cp * 4                       # conv / IN value temporaries
    vmem_limit = int(min(56 * 2 ** 20,
                         max(8 * 2 ** 20,
                             io_bytes + w_bytes + scratch_bytes + 2 * tmp_bytes)))

    # TODO(synk): for production shapes (C>=256, H=W>=128) this per-sample
    # full-image block exceeds v7x's 64 MiB VMEM: add a spatial row-band grid
    # axis (1-row halo + cross-band InstanceNorm stat accumulation), which also
    # feeds both v7x TensorCores at batch size 1.
    out = pl.pallas_call(
        kernel,
        out_shape=jax.ShapeDtypeStruct((N, H, W, Cp), jnp.float32),
        grid_spec=grid_spec,
        compiler_params=pltpu.CompilerParams(
            dimension_semantics=("parallel",),
            vmem_limit_bytes=vmem_limit,
        ),
    )(x, prep_w(w1), prep_w(w2))

    out = out[..., :C]                                # drop padded channels
    return jnp.transpose(out, (0, 3, 1, 2))           # back to NCHW


def init_params(key, dim):
    """Deterministic synthetic parameters in PyTorch Conv2d layout."""
    k1, k2, k3, k4 = jax.random.split(key, 4)
    bound = 1.0 / jnp.sqrt(dim * 9)
    w1 = jax.random.uniform(k1, (dim, dim, 3, 3), jnp.float32, -bound, bound)
    w2 = jax.random.uniform(k2, (dim, dim, 3, 3), jnp.float32, -bound, bound)
    b1 = jax.random.uniform(k3, (dim,), jnp.float32, -bound, bound)
    b2 = jax.random.uniform(k4, (dim,), jnp.float32, -bound, bound)
    return w1, b1, w2, b2


if __name__ == "__main__":
    key = jax.random.PRNGKey(0)
    kx, kp = jax.random.split(key)

    N, C, H, W = 2, 4, 16, 16   # small shapes consistent with Conv2d(dim, dim, 3)
    x = jax.random.normal(kx, (N, C, H, W), jnp.float32)
    w1, b1, w2, b2 = init_params(kp, C)

    out = jax.jit(resnet_block_forward)(x, w1, b1, w2, b2)
    jax.block_until_ready(out)
    assert out.shape == (N, C, H, W)
    print("KERNEL_OK")
</pallas_src>

<mosaic_0001>
module attributes {stable_mosaic.version = 11 : i64} {
  func.func @_resnet_block_kernel(%arg0: i32, %arg1: memref<1x16x16x128xf32, #tpu.memory_space<vmem>>, %arg2: memref<1152x128xbf16, #tpu.memory_space<vmem>>, %arg3: memref<1152x128xbf16, #tpu.memory_space<vmem>>, %arg4: memref<1x16x16x128xf32, #tpu.memory_space<vmem>>, %arg5: memref<18x18x128xf32, #tpu.memory_space<vmem>>, %arg6: memref<256x1152xbf16, #tpu.memory_space<vmem>>) attributes {dimension_semantics = [#tpu.dimension_semantics<parallel>], iteration_bounds = array<i64: 2>, scalar_prefetch = 0 : i64, scratch_operands = 2 : i64, tpu.core_type = #tpu.core_type<tc>, window_params = [{transform_indices = @transform_0, window_bounds = array<i64: 1, 16, 16, 128>}, {pipeline_mode = #tpu.pipeline_mode<synchronous>, transform_indices = @transform_1, window_bounds = array<i64: 1152, 128>}, {pipeline_mode = #tpu.pipeline_mode<synchronous>, transform_indices = @transform_2, window_bounds = array<i64: 1152, 128>}, {transform_indices = @transform_3, window_bounds = array<i64: 1, 16, 16, 128>}]} {
    %c0 = arith.constant 0 : index
    %c0_0 = arith.constant 0 : index
    %c0_1 = arith.constant 0 : index
    %c0_2 = arith.constant 0 : index
    %0 = vector.load %arg1[%c0, %c0_0, %c0_1, %c0_2] : memref<1x16x16x128xf32, #tpu.memory_space<vmem>>, vector<1x16x16x128xf32>
    %1 = vector.shape_cast %0 : vector<1x16x16x128xf32> to vector<16x16x128xf32>
    %c1 = arith.constant 1 : index
    %c1_3 = arith.constant 1 : index
    %c0_4 = arith.constant 0 : index
    %2 = vector.load %arg5[%c1, %c1_3, %c0_4] : memref<18x18x128xf32, #tpu.memory_space<vmem>>, vector<16x16x128xf32>
    tpu.vector_store %arg5[%c1, %c1_3, %c0_4], %1 {strides = array<i32>} : memref<18x18x128xf32, #tpu.memory_space<vmem>>, vector<16x16x128xf32>,
    %3 = vector.extract_strided_slice %1 {offsets = [1, 0, 0], sizes = [1, 16, 128], strides = [1, 1, 1]} : vector<16x16x128xf32> to vector<1x16x128xf32>
    %c0_5 = arith.constant 0 : index
    %c1_6 = arith.constant 1 : index
    %c0_7 = arith.constant 0 : index
    %4 = vector.load %arg5[%c0_5, %c1_6, %c0_7] : memref<18x18x128xf32, #tpu.memory_space<vmem>>, vector<1x16x128xf32>
    tpu.vector_store %arg5[%c0_5, %c1_6, %c0_7], %3 {strides = array<i32>} : memref<18x18x128xf32, #tpu.memory_space<vmem>>, vector<1x16x128xf32>,
    %5 = vector.extract_strided_slice %1 {offsets = [14, 0, 0], sizes = [1, 16, 128], strides = [1, 1, 1]} : vector<16x16x128xf32> to vector<1x16x128xf32>
    %c17 = arith.constant 17 : index
    %c1_8 = arith.constant 1 : index
    %c0_9 = arith.constant 0 : index
    %6 = vector.load %arg5[%c17, %c1_8, %c0_9] : memref<18x18x128xf32, #tpu.memory_space<vmem>>, vector<1x16x128xf32>
    tpu.vector_store %arg5[%c17, %c1_8, %c0_9], %5 {strides = array<i32>} : memref<18x18x128xf32, #tpu.memory_space<vmem>>, vector<1x16x128xf32>,
    %c0_10 = arith.constant 0 : index
    %c2 = arith.constant 2 : index
    %c0_11 = arith.constant 0 : index
    %7 = vector.load %arg5[%c0_10, %c2, %c0_11] : memref<18x18x128xf32, #tpu.memory_space<vmem>>, vector<18x1x128xf32>
    %c0_12 = arith.constant 0 : index
    %c0_13 = arith.constant 0 : index
    %c0_14 = arith.constant 0 : index
    %8 = vector.load %arg5[%c0_12, %c0_13, %c0_14] : memref<18x18x128xf32, #tpu.memory_space<vmem>>, vector<18x1x128xf32>
    tpu.vector_store %arg5[%c0_12, %c0_13, %c0_14], %7 {strides = array<i32>} : memref<18x18x128xf32, #tpu.memory_space<vmem>>, vector<18x1x128xf32>,
    %c0_15 = arith.constant 0 : index
    %c15 = arith.constant 15 : index
    %c0_16 = arith.constant 0 : index
    %9 = vector.load %arg5[%c0_15, %c15, %c0_16] : memref<18x18x128xf32, #tpu.memory_space<vmem>>, vector<18x1x128xf32>
    %c0_17 = arith.constant 0 : index
    %c17_18 = arith.constant 17 : index
    %c0_19 = arith.constant 0 : index
    %10 = vector.load %arg5[%c0_17, %c17_18, %c0_19] : memref<18x18x128xf32, #tpu.memory_space<vmem>>, vector<18x1x128xf32>
    tpu.vector_store %arg5[%c0_17, %c17_18, %c0_19], %9 {strides = array<i32>} : memref<18x18x128xf32, #tpu.memory_space<vmem>>, vector<18x1x128xf32>,
    %c0_20 = arith.constant 0 : index
    %c0_21 = arith.constant 0 : index
    %c0_22 = arith.constant 0 : index
    %11 = vector.load %arg5[%c0_20, %c0_21, %c0_22] : memref<18x18x128xf32, #tpu.memory_space<vmem>>, vector<16x16x128xf32>
    %12 = vector.shape_cast %11 : vector<16x16x128xf32> to vector<256x128xf32>
    %13 = arith.truncf %12 : vector<256x128xf32> to vector<256x128xbf16>
    %c0_23 = arith.constant 0 : index
    %c0_24 = arith.constant 0 : index
    %14 = vector.load %arg6[%c0_23, %c0_24] : memref<256x1152xbf16, #tpu.memory_space<vmem>>, vector<256x128xbf16>
    tpu.vector_store %arg6[%c0_23, %c0_24], %13 {strides = array<i32>} : memref<256x1152xbf16, #tpu.memory_space<vmem>>, vector<256x128xbf16>,
    %c0_25 = arith.constant 0 : index
    %c1_26 = arith.constant 1 : index
    %c0_27 = arith.constant 0 : index
    %15 = vector.load %arg5[%c0_25, %c1_26, %c0_27] : memref<18x18x128xf32, #tpu.memory_space<vmem>>, vector<16x16x128xf32>
    %16 = vector.shape_cast %15 : vector<16x16x128xf32> to vector<256x128xf32>
    %17 = arith.truncf %16 : vector<256x128xf32> to vector<256x128xbf16>
    %c0_28 = arith.constant 0 : index
    %c128 = arith.constant 128 : index
    %18 = vector.load %arg6[%c0_28, %c128] : memref<256x1152xbf16, #tpu.memory_space<vmem>>, vector<256x128xbf16>
    tpu.vector_store %arg6[%c0_28, %c128], %17 {strides = array<i32>} : memref<256x1152xbf16, #tpu.memory_space<vmem>>, vector<256x128xbf16>,
    %c0_29 = arith.constant 0 : index
    %c2_30 = arith.constant 2 : index
    %c0_31 = arith.constant 0 : index
    %19 = vector.load %arg5[%c0_29, %c2_30, %c0_31] : memref<18x18x128xf32, #tpu.memory_space<vmem>>, vector<16x16x128xf32>
    %20 = vector.shape_cast %19 : vector<16x16x128xf32> to vector<256x128xf32>
    %21 = arith.truncf %20 : vector<256x128xf32> to vector<256x128xbf16>
    %c0_32 = arith.constant 0 : index
    %c256 = arith.constant 256 : index
    %22 = vector.load %arg6[%c0_32, %c256] : memref<256x1152xbf16, #tpu.memory_space<vmem>>, vector<256x128xbf16>
    tpu.vector_store %arg6[%c0_32, %c256], %21 {strides = array<i32>} : memref<256x1152xbf16, #tpu.memory_space<vmem>>, vector<256x128xbf16>,
    %c1_33 = arith.constant 1 : index
    %c0_34 = arith.constant 0 : index
    %c0_35 = arith.constant 0 : index
    %23 = vector.load %arg5[%c1_33, %c0_34, %c0_35] : memref<18x18x128xf32, #tpu.memory_space<vmem>>, vector<16x16x128xf32>
    %24 = vector.shape_cast %23 : vector<16x16x128xf32> to vector<256x128xf32>
    %25 = arith.truncf %24 : vector<256x128xf32> to vector<256x128xbf16>
    %c0_36 = arith.constant 0 : index
    %c384 = arith.constant 384 : index
    %26 = vector.load %arg6[%c0_36, %c384] : memref<256x1152xbf16, #tpu.memory_space<vmem>>, vector<256x128xbf16>
    tpu.vector_store %arg6[%c0_36, %c384], %25 {strides = array<i32>} : memref<256x1152xbf16, #tpu.memory_space<vmem>>, vector<256x128xbf16>,
    %c1_37 = arith.constant 1 : index
    %c1_38 = arith.constant 1 : index
    %c0_39 = arith.constant 0 : index
    %27 = vector.load %arg5[%c1_37, %c1_38, %c0_39] : memref<18x18x128xf32, #tpu.memory_space<vmem>>, vector<16x16x128xf32>
    %28 = vector.shape_cast %27 : vector<16x16x128xf32> to vector<256x128xf32>
    %29 = arith.truncf %28 : vector<256x128xf32> to vector<256x128xbf16>
    %c0_40 = arith.constant 0 : index
    %c512 = arith.constant 512 : index
    %30 = vector.load %arg6[%c0_40, %c512] : memref<256x1152xbf16, #tpu.memory_space<vmem>>, vector<256x128xbf16>
    tpu.vector_store %arg6[%c0_40, %c512], %29 {strides = array<i32>} : memref<256x1152xbf16, #tpu.memory_space<vmem>>, vector<256x128xbf16>,
    %c1_41 = arith.constant 1 : index
    %c2_42 = arith.constant 2 : index
    %c0_43 = arith.constant 0 : index
    %31 = vector.load %arg5[%c1_41, %c2_42, %c0_43] : memref<18x18x128xf32, #tpu.memory_space<vmem>>, vector<16x16x128xf32>
    %32 = vector.shape_cast %31 : vector<16x16x128xf32> to vector<256x128xf32>
    %33 = arith.truncf %32 : vector<256x128xf32> to vector<256x128xbf16>
    %c0_44 = arith.constant 0 : index
    %c640 = arith.constant 640 : index
    %34 = vector.load %arg6[%c0_44, %c640] : memref<256x1152xbf16, #tpu.memory_space<vmem>>, vector<256x128xbf16>
    tpu.vector_store %arg6[%c0_44, %c640], %33 {strides = array<i32>} : memref<256x1152xbf16, #tpu.memory_space<vmem>>, vector<256x128xbf16>,
    %c2_45 = arith.constant 2 : index
    %c0_46 = arith.constant 0 : index
    %c0_47 = arith.constant 0 : index
    %35 = vector.load %arg5[%c2_45, %c0_46, %c0_47] : memref<18x18x128xf32, #tpu.memory_space<vmem>>, vector<16x16x128xf32>
    %36 = vector.shape_cast %35 : vector<16x16x128xf32> to vector<256x128xf32>
    %37 = arith.truncf %36 : vector<256x128xf32> to vector<256x128xbf16>
    %c0_48 = arith.constant 0 : index
    %c768 = arith.constant 768 : index
    %38 = vector.load %arg6[%c0_48, %c768] : memref<256x1152xbf16, #tpu.memory_space<vmem>>, vector<256x128xbf16>
    tpu.vector_store %arg6[%c0_48, %c768], %37 {strides = array<i32>} : memref<256x1152xbf16, #tpu.memory_space<vmem>>, vector<256x128xbf16>,
    %c2_49 = arith.constant 2 : index
    %c1_50 = arith.constant 1 : index
    %c0_51 = arith.constant 0 : index
    %39 = vector.load %arg5[%c2_49, %c1_50, %c0_51] : memref<18x18x128xf32, #tpu.memory_space<vmem>>, vector<16x16x128xf32>
    %40 = vector.shape_cast %39 : vector<16x16x128xf32> to vector<256x128xf32>
    %41 = arith.truncf %40 : vector<256x128xf32> to vector<256x128xbf16>
    %c0_52 = arith.constant 0 : index
    %c896 = arith.constant 896 : index
    %42 = vector.load %arg6[%c0_52, %c896] : memref<256x1152xbf16, #tpu.memory_space<vmem>>, vector<256x128xbf16>
    tpu.vector_store %arg6[%c0_52, %c896], %41 {strides = array<i32>} : memref<256x1152xbf16, #tpu.memory_space<vmem>>, vector<256x128xbf16>,
    %c2_53 = arith.constant 2 : index
    %c2_54 = arith.constant 2 : index
    %c0_55 = arith.constant 0 : index
    %43 = vector.load %arg5[%c2_53, %c2_54, %c0_55] : memref<18x18x128xf32, #tpu.memory_space<vmem>>, vector<16x16x128xf32>
    %44 = vector.shape_cast %43 : vector<16x16x128xf32> to vector<256x128xf32>
    %45 = arith.truncf %44 : vector<256x128xf32> to vector<256x128xbf16>
    %c0_56 = arith.constant 0 : index
    %c1024 = arith.constant 1024 : index
    %46 = vector.load %arg6[%c0_56, %c1024] : memref<256x1152xbf16, #tpu.memory_space<vmem>>, vector<256x128xbf16>
    tpu.vector_store %arg6[%c0_56, %c1024], %45 {strides = array<i32>} : memref<256x1152xbf16, #tpu.memory_space<vmem>>, vector<256x128xbf16>,
    %c0_57 = arith.constant 0 : index
    %c0_58 = arith.constant 0 : index
    %47 = vector.load %arg6[%c0_57, %c0_58] : memref<256x1152xbf16, #tpu.memory_space<vmem>>, vector<256x1152xbf16>
    %c0_59 = arith.constant 0 : index
    %c0_60 = arith.constant 0 : index
    %48 = vector.load %arg2[%c0_59, %c0_60] : memref<1152x128xbf16, #tpu.memory_space<vmem>>, vector<1152x128xbf16>
    %cst = arith.constant dense<0.000000e+00> : vector<256x128xf32>
    %49 = tpu.matmul %47, %48, %cst {dimension_numbers = #tpu.dot_dimension_numbers<[1], [0], [0], [1], [0, 0, 1, 1], [], []>} : vector<256x1152xbf16>, vector<1152x128xbf16>, vector<256x128xf32> -> vector<256x128xf32>
    %cst_61 = arith.constant dense<0.000000e+00> : vector<128xf32>
    %50 = vector.multi_reduction <add>, %49, %cst_61 [0] : vector<256x128xf32> to vector<128xf32>
    %51 = vector.shape_cast %50 : vector<128xf32> to vector<1x128xf32>
    %52 = arith.mulf %49, %49 : vector<256x128xf32>
    %cst_62 = arith.constant dense<0.000000e+00> : vector<128xf32>
    %53 = vector.multi_reduction <add>, %52, %cst_62 [0] : vector<256x128xf32> to vector<128xf32>
    %54 = vector.shape_cast %53 : vector<128xf32> to vector<1x128xf32>
    %cst_63 = arith.constant 3.906250e-03 : f32
    %55 = vector.broadcast %cst_63 : f32 to vector<1x128xf32>
    %56 = arith.mulf %51, %55 : vector<1x128xf32>
    %cst_64 = arith.constant 3.906250e-03 : f32
    %57 = vector.broadcast %cst_64 : f32 to vector<1x128xf32>
    %58 = arith.mulf %54, %57 : vector<1x128xf32>
    %59 = arith.mulf %56, %56 : vector<1x128xf32>
    %60 = arith.subf %58, %59 : vector<1x128xf32>
    %cst_65 = arith.constant 0.000000e+00 : f32
    %61 = vector.broadcast %cst_65 : f32 to vector<1x128xf32>
    %62 = arith.maximumf %60, %61 : vector<1x128xf32>
    %63 = vector.broadcast %56 : vector<1x128xf32> to vector<256x128xf32>
    %64 = arith.subf %49, %63 : vector<256x128xf32>
    %cst_66 = arith.constant 9.99999974E-6 : f32
    %65 = vector.broadcast %cst_66 : f32 to vector<1x128xf32>
    %66 = arith.addf %62, %65 : vector<1x128xf32>
    %67 = math.rsqrt %66 : vector<1x128xf32>
    %68 = vector.broadcast %67 : vector<1x128xf32> to vector<256x128xf32>
    %69 = arith.mulf %64, %68 : vector<256x128xf32>
    %cst_67 = arith.constant 0.000000e+00 : f32
    %70 = vector.broadcast %cst_67 : f32 to vector<256x128xf32>
    %71 = arith.maximumf %69, %70 : vector<256x128xf32>
    %72 = vector.shape_cast %71 : vector<256x128xf32> to vector<16x16x128xf32>
    %c1_68 = arith.constant 1 : index
    %c1_69 = arith.constant 1 : index
    %c0_70 = arith.constant 0 : index
    %73 = vector.load %arg5[%c1_68, %c1_69, %c0_70] : memref<18x18x128xf32, #tpu.memory_space<vmem>>, vector<16x16x128xf32>
    tpu.vector_store %arg5[%c1_68, %c1_69, %c0_70], %72 {strides = array<i32>} : memref<18x18x128xf32, #tpu.memory_space<vmem>>, vector<16x16x128xf32>,
    %74 = vector.extract_strided_slice %72 {offsets = [1, 0, 0], sizes = [1, 16, 128], strides = [1, 1, 1]} : vector<16x16x128xf32> to vector<1x16x128xf32>
    %c0_71 = arith.constant 0 : index
    %c1_72 = arith.constant 1 : index
    %c0_73 = arith.constant 0 : index
    %75 = vector.load %arg5[%c0_71, %c1_72, %c0_73] : memref<18x18x128xf32, #tpu.memory_space<vmem>>, vector<1x16x128xf32>
    tpu.vector_store %arg5[%c0_71, %c1_72, %c0_73], %74 {strides = array<i32>} : memref<18x18x128xf32, #tpu.memory_space<vmem>>, vector<1x16x128xf32>,
    %76 = vector.extract_strided_slice %72 {offsets = [14, 0, 0], sizes = [1, 16, 128], strides = [1, 1, 1]} : vector<16x16x128xf32> to vector<1x16x128xf32>
    %c17_74 = arith.constant 17 : index
    %c1_75 = arith.constant 1 : index
    %c0_76 = arith.constant 0 : index
    %77 = vector.load %arg5[%c17_74, %c1_75, %c0_76] : memref<18x18x128xf32, #tpu.memory_space<vmem>>, vector<1x16x128xf32>
    tpu.vector_store %arg5[%c17_74, %c1_75, %c0_76], %76 {strides = array<i32>} : memref<18x18x128xf32, #tpu.memory_space<vmem>>, vector<1x16x128xf32>,
    %c0_77 = arith.constant 0 : index
    %c2_78 = arith.constant 2 : index
    %c0_79 = arith.constant 0 : index
    %78 = vector.load %arg5[%c0_77, %c2_78, %c0_79] : memref<18x18x128xf32, #tpu.memory_space<vmem>>, vector<18x1x128xf32>
    %c0_80 = arith.constant 0 : index
    %c0_81 = arith.constant 0 : index
    %c0_82 = arith.constant 0 : index
    %79 = vector.load %arg5[%c0_80, %c0_81, %c0_82] : memref<18x18x128xf32, #tpu.memory_space<vmem>>, vector<18x1x128xf32>
    tpu.vector_store %arg5[%c0_80, %c0_81, %c0_82], %78 {strides = array<i32>} : memref<18x18x128xf32, #tpu.memory_space<vmem>>, vector<18x1x128xf32>,
    %c0_83 = arith.constant 0 : index
    %c15_84 = arith.constant 15 : index
    %c0_85 = arith.constant 0 : index
    %80 = vector.load %arg5[%c0_83, %c15_84, %c0_85] : memref<18x18x128xf32, #tpu.memory_space<vmem>>, vector<18x1x128xf32>
    %c0_86 = arith.constant 0 : index
    %c17_87 = arith.constant 17 : index
    %c0_88 = arith.constant 0 : index
    %81 = vector.load %arg5[%c0_86, %c17_87, %c0_88] : memref<18x18x128xf32, #tpu.memory_space<vmem>>, vector<18x1x128xf32>
    tpu.vector_store %arg5[%c0_86, %c17_87, %c0_88], %80 {strides = array<i32>} : memref<18x18x128xf32, #tpu.memory_space<vmem>>, vector<18x1x128xf32>,
    %c0_89 = arith.constant 0 : index
    %c0_90 = arith.constant 0 : index
    %c0_91 = arith.constant 0 : index
    %82 = vector.load %arg5[%c0_89, %c0_90, %c0_91] : memref<18x18x128xf32, #tpu.memory_space<vmem>>, vector<16x16x128xf32>
    %83 = vector.shape_cast %82 : vector<16x16x128xf32> to vector<256x128xf32>
    %84 = arith.truncf %83 : vector<256x128xf32> to vector<256x128xbf16>
    %c0_92 = arith.constant 0 : index
    %c0_93 = arith.constant 0 : index
    %85 = vector.load %arg6[%c0_92, %c0_93] : memref<256x1152xbf16, #tpu.memory_space<vmem>>, vector<256x128xbf16>
    tpu.vector_store %arg6[%c0_92, %c0_93], %84 {strides = array<i32>} : memref<256x1152xbf16, #tpu.memory_space<vmem>>, vector<256x128xbf16>,
    %c0_94 = arith.constant 0 : index
    %c1_95 = arith.constant 1 : index
    %c0_96 = arith.constant 0 : index
    %86 = vector.load %arg5[%c0_94, %c1_95, %c0_96] : memref<18x18x128xf32, #tpu.memory_space<vmem>>, vector<16x16x128xf32>
    %87 = vector.shape_cast %86 : vector<16x16x128xf32> to vector<256x128xf32>
    %88 = arith.truncf %87 : vector<256x128xf32> to vector<256x128xbf16>
    %c0_97 = arith.constant 0 : index
    %c128_98 = arith.constant 128 : index
    %89 = vector.load %arg6[%c0_97, %c128_98] : memref<256x1152xbf16, #tpu.memory_space<vmem>>, vector<256x128xbf16>
    tpu.vector_store %arg6[%c0_97, %c128_98], %88 {strides = array<i32>} : memref<256x1152xbf16, #tpu.memory_space<vmem>>, vector<256x128xbf16>,
    %c0_99 = arith.constant 0 : index
    %c2_100 = arith.constant 2 : index
    %c0_101 = arith.constant 0 : index
    %90 = vector.load %arg5[%c0_99, %c2_100, %c0_101] : memref<18x18x128xf32, #tpu.memory_space<vmem>>, vector<16x16x128xf32>
    %91 = vector.shape_cast %90 : vector<16x16x128xf32> to vector<256x128xf32>
    %92 = arith.truncf %91 : vector<256x128xf32> to vector<256x128xbf16>
    %c0_102 = arith.constant 0 : index
    %c256_103 = arith.constant 256 : index
    %93 = vector.load %arg6[%c0_102, %c256_103] : memref<256x1152xbf16, #tpu.memory_space<vmem>>, vector<256x128xbf16>
    tpu.vector_store %arg6[%c0_102, %c256_103], %92 {strides = array<i32>} : memref<256x1152xbf16, #tpu.memory_space<vmem>>, vector<256x128xbf16>,
    %c1_104 = arith.constant 1 : index
    %c0_105 = arith.constant 0 : index
    %c0_106 = arith.constant 0 : index
    %94 = vector.load %arg5[%c1_104, %c0_105, %c0_106] : memref<18x18x128xf32, #tpu.memory_space<vmem>>, vector<16x16x128xf32>
    %95 = vector.shape_cast %94 : vector<16x16x128xf32> to vector<256x128xf32>
    %96 = arith.truncf %95 : vector<256x128xf32> to vector<256x128xbf16>
    %c0_107 = arith.constant 0 : index
    %c384_108 = arith.constant 384 : index
    %97 = vector.load %arg6[%c0_107, %c384_108] : memref<256x1152xbf16, #tpu.memory_space<vmem>>, vector<256x128xbf16>
    tpu.vector_store %arg6[%c0_107, %c384_108], %96 {strides = array<i32>} : memref<256x1152xbf16, #tpu.memory_space<vmem>>, vector<256x128xbf16>,
    %c1_109 = arith.constant 1 : index
    %c1_110 = arith.constant 1 : index
    %c0_111 = arith.constant 0 : index
    %98 = vector.load %arg5[%c1_109, %c1_110, %c0_111] : memref<18x18x128xf32, #tpu.memory_space<vmem>>, vector<16x16x128xf32>
    %99 = vector.shape_cast %98 : vector<16x16x128xf32> to vector<256x128xf32>
    %100 = arith.truncf %99 : vector<256x128xf32> to vector<256x128xbf16>
    %c0_112 = arith.constant 0 : index
    %c512_113 = arith.constant 512 : index
    %101 = vector.load %arg6[%c0_112, %c512_113] : memref<256x1152xbf16, #tpu.memory_space<vmem>>, vector<256x128xbf16>
    tpu.vector_store %arg6[%c0_112, %c512_113], %100 {strides = array<i32>} : memref<256x1152xbf16, #tpu.memory_space<vmem>>, vector<256x128xbf16>,
    %c1_114 = arith.constant 1 : index
    %c2_115 = arith.constant 2 : index
    %c0_116 = arith.constant 0 : index
    %102 = vector.load %arg5[%c1_114, %c2_115, %c0_116] : memref<18x18x128xf32, #tpu.memory_space<vmem>>, vector<16x16x128xf32>
    %103 = vector.shape_cast %102 : vector<16x16x128xf32> to vector<256x128xf32>
    %104 = arith.truncf %103 : vector<256x128xf32> to vector<256x128xbf16>
    %c0_117 = arith.constant 0 : index
    %c640_118 = arith.constant 640 : index
    %105 = vector.load %arg6[%c0_117, %c640_118] : memref<256x1152xbf16, #tpu.memory_space<vmem>>, vector<256x128xbf16>
    tpu.vector_store %arg6[%c0_117, %c640_118], %104 {strides = array<i32>} : memref<256x1152xbf16, #tpu.memory_space<vmem>>, vector<256x128xbf16>,
    %c2_119 = arith.constant 2 : index
    %c0_120 = arith.constant 0 : index
    %c0_121 = arith.constant 0 : index
    %106 = vector.load %arg5[%c2_119, %c0_120, %c0_121] : memref<18x18x128xf32, #tpu.memory_space<vmem>>, vector<16x16x128xf32>
    %107 = vector.shape_cast %106 : vector<16x16x128xf32> to vector<256x128xf32>
    %108 = arith.truncf %107 : vector<256x128xf32> to vector<256x128xbf16>
    %c0_122 = arith.constant 0 : index
    %c768_123 = arith.constant 768 : index
    %109 = vector.load %arg6[%c0_122, %c768_123] : memref<256x1152xbf16, #tpu.memory_space<vmem>>, vector<256x128xbf16>
    tpu.vector_store %arg6[%c0_122, %c768_123], %108 {strides = array<i32>} : memref<256x1152xbf16, #tpu.memory_space<vmem>>, vector<256x128xbf16>,
    %c2_124 = arith.constant 2 : index
    %c1_125 = arith.constant 1 : index
    %c0_126 = arith.constant 0 : index
    %110 = vector.load %arg5[%c2_124, %c1_125, %c0_126] : memref<18x18x128xf32, #tpu.memory_space<vmem>>, vector<16x16x128xf32>
    %111 = vector.shape_cast %110 : vector<16x16x128xf32> to vector<256x128xf32>
    %112 = arith.truncf %111 : vector<256x128xf32> to vector<256x128xbf16>
    %c0_127 = arith.constant 0 : index
    %c896_128 = arith.constant 896 : index
    %113 = vector.load %arg6[%c0_127, %c896_128] : memref<256x1152xbf16, #tpu.memory_space<vmem>>, vector<256x128xbf16>
    tpu.vector_store %arg6[%c0_127, %c896_128], %112 {strides = array<i32>} : memref<256x1152xbf16, #tpu.memory_space<vmem>>, vector<256x128xbf16>,
    %c2_129 = arith.constant 2 : index
    %c2_130 = arith.constant 2 : index
    %c0_131 = arith.constant 0 : index
    %114 = vector.load %arg5[%c2_129, %c2_130, %c0_131] : memref<18x18x128xf32, #tpu.memory_space<vmem>>, vector<16x16x128xf32>
    %115 = vector.shape_cast %114 : vector<16x16x128xf32> to vector<256x128xf32>
    %116 = arith.truncf %115 : vector<256x128xf32> to vector<256x128xbf16>
    %c0_132 = arith.constant 0 : index
    %c1024_133 = arith.constant 1024 : index
    %117 = vector.load %arg6[%c0_132, %c1024_133] : memref<256x1152xbf16, #tpu.memory_space<vmem>>, vector<256x128xbf16>
    tpu.vector_store %arg6[%c0_132, %c1024_133], %116 {strides = array<i32>} : memref<256x1152xbf16, #tpu.memory_space<vmem>>, vector<256x128xbf16>,
    %c0_134 = arith.constant 0 : index
    %c0_135 = arith.constant 0 : index
    %118 = vector.load %arg6[%c0_134, %c0_135] : memref<256x1152xbf16, #tpu.memory_space<vmem>>, vector<256x1152xbf16>
    %c0_136 = arith.constant 0 : index
    %c0_137 = arith.constant 0 : index
    %119 = vector.load %arg3[%c0_136, %c0_137] : memref<1152x128xbf16, #tpu.memory_space<vmem>>, vector<1152x128xbf16>
    %cst_138 = arith.constant dense<0.000000e+00> : vector<256x128xf32>
    %120 = tpu.matmul %118, %119, %cst_138 {dimension_numbers = #tpu.dot_dimension_numbers<[1], [0], [0], [1], [0, 0, 1, 1], [], []>} : vector<256x1152xbf16>, vector<1152x128xbf16>, vector<256x128xf32> -> vector<256x128xf32>
    %cst_139 = arith.constant dense<0.000000e+00> : vector<128xf32>
    %121 = vector.multi_reduction <add>, %120, %cst_139 [0] : vector<256x128xf32> to vector<128xf32>
    %122 = vector.shape_cast %121 : vector<128xf32> to vector<1x128xf32>
    %123 = arith.mulf %120, %120 : vector<256x128xf32>
    %cst_140 = arith.constant dense<0.000000e+00> : vector<128xf32>
    %124 = vector.multi_reduction <add>, %123, %cst_140 [0] : vector<256x128xf32> to vector<128xf32>
    %125 = vector.shape_cast %124 : vector<128xf32> to vector<1x128xf32>
    %cst_141 = arith.constant 3.906250e-03 : f32
    %126 = vector.broadcast %cst_141 : f32 to vector<1x128xf32>
    %127 = arith.mulf %122, %126 : vector<1x128xf32>
    %cst_142 = arith.constant 3.906250e-03 : f32
    %128 = vector.broadcast %cst_142 : f32 to vector<1x128xf32>
    %129 = arith.mulf %125, %128 : vector<1x128xf32>
    %130 = arith.mulf %127, %127 : vector<1x128xf32>
    %131 = arith.subf %129, %130 : vector<1x128xf32>
    %cst_143 = arith.constant 0.000000e+00 : f32
    %132 = vector.broadcast %cst_143 : f32 to vector<1x128xf32>
    %133 = arith.maximumf %131, %132 : vector<1x128xf32>
    %134 = vector.broadcast %127 : vector<1x128xf32> to vector<256x128xf32>
    %135 = arith.subf %120, %134 : vector<256x128xf32>
    %cst_144 = arith.constant 9.99999974E-6 : f32
    %136 = vector.broadcast %cst_144 : f32 to vector<1x128xf32>
    %137 = arith.addf %133, %136 : vector<1x128xf32>
    %138 = math.rsqrt %137 : vector<1x128xf32>
    %139 = vector.broadcast %138 : vector<1x128xf32> to vector<256x128xf32>
    %140 = arith.mulf %135, %139 : vector<256x128xf32>
    %141 = vector.shape_cast %140 : vector<256x128xf32> to vector<16x16x128xf32>
    %142 = arith.addf %1, %141 : vector<16x16x128xf32>
    %c0_145 = arith.constant 0 : index
    %c0_146 = arith.constant 0 : index
    %c0_147 = arith.constant 0 : index
    %c0_148 = arith.constant 0 : index
    %143 = vector.load %arg4[%c0_145, %c0_146, %c0_147, %c0_148] : memref<1x16x16x128xf32, #tpu.memory_space<vmem>>, vector<1x16x16x128xf32>
    %144 = vector.shape_cast %143 : vector<1x16x16x128xf32> to vector<16x16x128xf32>
    %145 = vector.shape_cast %142 : vector<16x16x128xf32> to vector<1x16x16x128xf32>
    tpu.vector_store %arg4[%c0_145, %c0_146, %c0_147, %c0_148], %145 {strides = array<i32>} : memref<1x16x16x128xf32, #tpu.memory_space<vmem>>, vector<1x16x16x128xf32>,
    return
  }
  func.func @transform_0(%arg0: i32) -> (i32, i32, i32, i32) {
    %c0_i32 = arith.constant 0 : i32
    %c0_i32_0 = arith.constant 0 : i32
    %c0_i32_1 = arith.constant 0 : i32
    %c0_i32_2 = arith.constant 0 : i32
    return %arg0, %c0_i32, %c0_i32_0, %c0_i32_1 : i32, i32, i32, i32
  }
  func.func @transform_1(%arg0: i32) -> (i32, i32) {
    %c0_i32 = arith.constant 0 : i32
    %c0_i32_0 = arith.constant 0 : i32
    %c0_i32_1 = arith.constant 0 : i32
    return %c0_i32, %c0_i32_0 : i32, i32
  }
  func.func @transform_2(%arg0: i32) -> (i32, i32) {
    %c0_i32 = arith.constant 0 : i32
    %c0_i32_0 = arith.constant 0 : i32
    %c0_i32_1 = arith.constant 0 : i32
    return %c0_i32, %c0_i32_0 : i32, i32
  }
  func.func @transform_3(%arg0: i32) -> (i32, i32, i32, i32) {
    %c0_i32 = arith.constant 0 : i32
    %c0_i32_0 = arith.constant 0 : i32
    %c0_i32_1 = arith.constant 0 : i32
    %c0_i32_2 = arith.constant 0 : i32
    return %arg0, %c0_i32, %c0_i32_0, %c0_i32_1 : i32, i32, i32, i32
  }
}

</mosaic_0001>

<bundles_post_ra>
// kernel: resnet_block_forward.1
= control target key start
LH: loop header
LB: loop body
LE: loop exit
PB: predicated region body
PF: predicated region fallthrough
CT: control target
= control target key end

     0   :  { %s12159_s12 = smov 0   ;;  %s14212_s0 = inlined_call_operand.vmem [shape: f32[2,16,16,128], index: 0, kind: input, shape index: {}]   ;;  %s14213_s1 = inlined_call_operand.vmem [shape: bf16[1152,128], index: 1, kind: input, shape index: {}]   ;;  %s14214_s2 = inlined_call_operand.vmem [shape: bf16[1152,128], index: 2, kind: input, shape index: {}]   ;;  %s14215_s3 = inlined_call_operand.vmem [shape: f32[2,16,16,128], index: 3, kind: output, shape index: {}]  }
   0x1 LB: > { %s8938_s13 = sadd.s32 4294967295, %s12137_s12   ;;  %p8942_p0 = scmp.ge.s32.totalorder %s12137_s12, 1  ;;  %s12137_s12 = sphi %s12159_s12, %s13_s12  }
   0x2   : > { %p137_p1 = scmp.lt.s32.totalorder %s12137_s12, 3 }
   0x4   : > { %p138_p2 = pnand %p8942_p0, %p137_p1 }
   0x6   : > { %141 = sbr.rel (%p138_p2) target bundleno = 1265 (0x4f1), region = 32 }
   0xb   : > { %v11583_v0 = vld [vmem:[%s14213_s1 + $0x78] sm:$0xff]   ;;  %v11587_v4 = vld [vmem:[%s14213_s1 + $0x70] sm:$0xff]   ;;  %v11591_v8 = vld [vmem:[%s14213_s1 + $0x68] sm:$0xff]   ;;  %p161_p3 = scmp.lt.s32.totalorder %s8938_s13, 1 }
   0xc   : > { %v11584_v1 = vld [vmem:[%s14213_s1 + $0x38] sm:$0xff]   ;;  %10535 = vmatprep.subr.bf16.mxu0 %v11583_v0  ;;  %v11588_v5 = vld [vmem:[%s14213_s1 + $0x30] sm:$0xff]   ;;  %v11592_v9 = vld [vmem:[%s14213_s1 + $0x28] sm:$0xff]  }
   0xd   : > { %v11585_v2 = vld [vmem:[%s14213_s1 + $0xf8] sm:$0xff]   ;;  %10536 = vmatpush3.bf16.msra.mxu0 %v11584_v1  ;;  %v11589_v6 = vld [vmem:[%s14213_s1 + $0xf0] sm:$0xff]   ;;  %v11593_v10 = vld [vmem:[%s14213_s1 + $0xe8] sm:$0xff]   ;;  %s14427_s13 = smov (!%p161_p3, %s8938_s13), 1 }
   0xe   : > { %v11586_v3 = vld [vmem:[%s14213_s1 + $0xb8] sm:$0xff]   ;;  %10647 = vmatprep.subr.bf16.mxu1 %v11585_v2  ;;  %10537 = vmatprep.subr.bf16.mxu0 %v11587_v4  ;;  %v11590_v7 = vld [vmem:[%s14213_s1 + $0xb0] sm:$0xff]   ;;  %v11594_v11 = vld [vmem:[%s14213_s1 + $0xa8] sm:$0xff]   ;;  %s9957_s18 = sshll.u32 %s14427_s13, 8 }
   0xf   : > { %10648 = vmatpush3.bf16.msra.mxu1 %v11586_v3  ;;  %v11595_v12 = vld [vmem:[%s14213_s1 + $0x60] sm:$0xff]   ;;  %v11599_v16 = vld [vmem:[%s14213_s1 + $0x58] sm:$0xff]   ;;  %v11603_v20 = vld [vmem:[%s14213_s1 + $0x50] sm:$0xff]   ;;  %s12269_s27 = scalar_lea.vmem %s14212_s0, %s9957_s18 }
  0x10   : > { %10649 = vmatprep.subr.bf16.mxu1 %v11589_v6  ;;  %v11596_v13 = vld [vmem:[%s14213_s1 + $0x20] sm:$0xff]   ;;  %v11600_v17 = vld [vmem:[%s14213_s1 + $0x18] sm:$0xff]   ;;  %v11604_v21 = vld [vmem:[%s14213_s1 + $0x10] sm:$0xff]  }
  0x11   : > { %10538 = vmatpush3.bf16.msra.mxu0 %v11588_v5  ;;  %v11597_v14 = vld [vmem:[%s14213_s1 + $0xe0] sm:$0xff]   ;;  %v11601_v18 = vld [vmem:[%s14213_s1 + $0xd8] sm:$0xff]   ;;  %v11605_v22 = vld [vmem:[%s14213_s1 + $0xd0] sm:$0xff]  }
  0x12   : > { %10539 = vmatprep.subr.bf16.mxu0 %v11591_v8  ;;  %v11598_v15 = vld [vmem:[%s14213_s1 + $0xa0] sm:$0xff]   ;;  %v11602_v19 = vld [vmem:[%s14213_s1 + $0x98] sm:$0xff]   ;;  %v11606_v23 = vld [vmem:[%s14213_s1 + $0x90] sm:$0xff]  }
  0x13   : > { %10650 = vmatpush3.bf16.msra.mxu1 %v11590_v7  ;;  %v11607_v24 = vld [vmem:[%s14213_s1 + $0x48] sm:$0xff]   ;;  %v11611_v28 = vld [vmem:[%s14213_s1 + $0x40] sm:$0xff]   ;;  %v12278_v32 = vld [vmem:[%s12269_s27 + $0x10] sm:$0xff] }
  0x14   : > { %10651 = vmatprep.subr.bf16.mxu1 %v11593_v10  ;;  %v11608_v25 = vld [vmem:[%s14213_s1 + $0x8] sm:$0xff]   ;;  %v11612_v29 = vld [vmem:[%s14213_s1] sm:$0xff]   ;;  %14248 = vst [vmem:[#allocation4_spill] sm:$0xff] %v12278_v32  ;;  %v12281_v33 = vld [vmem:[%s12269_s27 + $0x18] sm:$0xff]  ;;  %v9991_v35 = vpack.c.bf16 %v12278_v32, %v12278_v32 }
  0x15   : > { %10540 = vmatpush3.bf16.msra.mxu0 %v11592_v9  ;;  %v11609_v26 = vld [vmem:[%s14213_s1 + $0xc8] sm:$0xff]   ;;  %v11613_v30 = vld [vmem:[%s14213_s1 + $0xc0] sm:$0xff]   ;;  %14249 = vst [vmem:[#allocation5_spill] sm:$0xff] %v12281_v33  ;;  %207 = vst [vmem:[#allocation2 + $0x31] sm:$0xff] %v12278_v32  ;;  %v9992_v36 = vpack.c.bf16 %v12281_v33, %v12281_v33 }
  0x16   : > { %10541 = vmatprep.subr.bf16.mxu0 %v11595_v12  ;;  %v11610_v27 = vld [vmem:[%s14213_s1 + $0x88] sm:$0xff]   ;;  %v11614_v31 = vld [vmem:[%s14213_s1 + $0x80] sm:$0xff]   ;;  %208 = vst [vmem:[#allocation2 + $0x39] sm:$0xff] %v12281_v33  ;;  %237 = vst [vmem:[#allocation2 + $0x1] sm:$0xff] %v12278_v32 }
  0x17   : > { %10652 = vmatpush3.bf16.msra.mxu1 %v11594_v11  ;;  %v12284_v34 = vld [vmem:[%s12269_s27] sm:$0xff]  ;;  %238 = vst [vmem:[#allocation2 + $0x9] sm:$0xff] %v12281_v33  ;;  %v12295_v37 = vld [vmem:[%s12269_s27 + $0x8] sm:$0xff]  ;;  %v11619_v39 = vld [vmem:[%s14213_s1 + $0x178] sm:$0xff]  }
  0x18   : > { %10653 = vmatprep.subr.bf16.mxu1 %v11597_v14  ;;  %14250 = vst [vmem:[#allocation6_spill] sm:$0xff] %v12284_v34  ;;  %14251 = vst [vmem:[#allocation7_spill] sm:$0xff] %v12295_v37  ;;  %v9993_v38 = vpack.c.bf16 %v12284_v34, %v12284_v34  ;;  %v9994_v40 = vpack.c.bf16 %v12295_v37, %v12295_v37  ;;  %v12307_v41 = vld [vmem:[%s12269_s27 + $0x20] sm:$0xff]  ;;  %v12310_v42 = vld [vmem:[%s12269_s27 + $0x28] sm:$0xff] }
  0x19   : > { %10542 = vmatpush3.bf16.msra.mxu0 %v11596_v13  ;;  %205 = vst [vmem:[#allocation2 + $0x19] sm:$0xff] %v12284_v34  ;;  %206 = vst [vmem:[#allocation2 + $0x21] sm:$0xff] %v12295_v37  ;;  %v9997_v43 = vpack.c.bf16 %v12307_v41, %v12307_v41  ;;  %v9998_v44 = vpack.c.bf16 %v12310_v42, %v12310_v42  ;;  %v12319_v45 = vld [vmem:[%s12269_s27 + $0x30] sm:$0xff]  ;;  %v12322_v46 = vld [vmem:[%s12269_s27 + $0x38] sm:$0xff] }
  0x1a   : > { %10543 = vmatprep.subr.bf16.mxu0 %v11599_v16  ;;  %666 = vst [vmem:[#allocation3 + $0x4] sm:$0xf] %v9991_v35  ;;  %667 = vst [vmem:[#allocation3 + $0x28] sm:$0xf] %v9992_v36  ;;  %v12325_v47 = vld [vmem:[%s12269_s27 + $0x40] sm:$0xff]  ;;  %v9999_v48 = vpack.c.bf16 %v12319_v45, %v12319_v45  ;;  %v10000_v49 = vpack.c.bf16 %v12322_v46, %v12322_v46  ;;  %v12334_v50 = vld [vmem:[%s12269_s27 + $0x48] sm:$0xff] }
  0x1b   : > { %10654 = vmatpush3.bf16.msra.mxu1 %v11598_v15  ;;  %668 = vst [vmem:[#allocation3 + $0x4c] sm:$0xf] %v9993_v38  ;;  %670 = vst [vmem:[#allocation3 + $0x94] sm:$0xf] %v9991_v35  ;;  %v10001_v51 = vpack.c.bf16 %v12325_v47, %v12325_v47  ;;  %v10002_v55 = vpack.c.bf16 %v12334_v50, %v12334_v50 }
  0x1c   : > { %10655 = vmatprep.subr.bf16.mxu1 %v11601_v18  ;;  %671 = vst [vmem:[#allocation3 + $0xb8] sm:$0xf] %v9992_v36  ;;  %14252 = vst [vmem:[#allocation8_spill] sm:$0xff] %v12307_v41  ;;  %v244_v62 = vld [vmem:[#allocation2 + $0x32] sm:$0x1] }
  0x1d   : > { %10544 = vmatpush3.bf16.msra.mxu0 %v11600_v17  ;;  %14253 = vst [vmem:[#allocation9_spill] sm:$0xff] %v12310_v42  ;;  %669 = vst [vmem:[#allocation3 + $0x70] sm:$0xf] %v9994_v40  ;;  %v242_v52 = vld [vmem:[#allocation2 + $0x2] sm:$0x1]  ;;  %v893_v2 = vld [vmem:[#allocation2 + $0x38] sm:$0xff] }
  0x1e   : > { %10545 = vmatprep.subr.bf16.mxu0 %v11603_v20  ;;  %209 = vst [vmem:[#allocation2 + $0x49] sm:$0xff] %v12307_v41  ;;  %210 = vst [vmem:[#allocation2 + $0x51] sm:$0xff] %v12310_v42  ;;  %v315_v53 = vld [vmem:[#allocation2 + $0x8] sm:$0xff]  ;;  %v280_v4 = vld [vmem:[#allocation2 + $0x3f] sm:$0x1]  ;;  %v10058_v5 = vpack.c.bf16 %v893_v2, %v893_v2 }
  0x1f   : > { %10656 = vmatpush3.bf16.msra.mxu1 %v11602_v19  ;;  %672 = vst [vmem:[#allocation3 + $0xdc] sm:$0xf] %v9997_v43  ;;  %673 = vst [vmem:[#allocation3 + $0x100] sm:$0xf] %v9998_v44  ;;  %v9960_v56 = vpack.c.bf16 %v315_v53, %v315_v53  ;;  %v278_v57 = vld [vmem:[#allocation2 + $0xf] sm:$0x1] }
  0x20   : > { %10657 = vmatprep.subr.bf16.mxu1 %v11605_v22  ;;  %14254 = vst [vmem:[#allocation10_spill] sm:$0xff] %v12319_v45  ;;  %14255 = vst [vmem:[#allocation11_spill] sm:$0xff] %v12322_v46  ;;  %v243_v54 = vld [vmem:[#allocation2 + $0x1a] sm:$0x1]  ;;  %v698_v58 = vld [vmem:[#allocation2 + $0x2] sm:$0xff] }
  0x21   : > { %10546 = vmatpush3.bf16.msra.mxu0 %v11604_v21  ;;  %14256 = vst [vmem:[#allocation12_spill] sm:$0xff] %v12325_v47  ;;  %211 = vst [vmem:[#allocation2 + $0x61] sm:$0xff] %v12319_v45  ;;  %v891_v59 = vld [vmem:[#allocation2 + $0x20] sm:$0xff]  ;;  %v10023_v60 = vpack.c.bf16 %v698_v58, %v698_v58  ;;  %v702_v6 = vld [vmem:[#allocation2 + $0x32] sm:$0xff] }
  0x22   : > { %10547 = vmatprep.subr.bf16.mxu0 %v11607_v24  ;;  %212 = vst [vmem:[#allocation2 + $0x69] sm:$0xff] %v12322_v46  ;;  %14257 = vst [vmem:[#allocation13_spill] sm:$0xff] %v12334_v50  ;;  %v10056_v61 = vpack.c.bf16 %v891_v59, %v891_v59  ;;  %v279_v63 = vld [vmem:[#allocation2 + $0x27] sm:$0x1]  ;;  %v700_v0 = vld [vmem:[#allocation2 + $0x1a] sm:$0xff]  ;;  %v10027_v9 = vpack.c.bf16 %v702_v6, %v702_v6 }
  0x23   : > { %10658 = vmatpush3.bf16.msra.mxu1 %v11606_v23  ;;  %213 = vst [vmem:[#allocation2 + $0x79] sm:$0xff] %v12325_v47  ;;  %214 = vst [vmem:[#allocation2 + $0x81] sm:$0xff] %v12334_v50  ;;  %v10025_v1 = vpack.c.bf16 %v700_v0, %v700_v0  ;;  %v11621_v2 = vld [vmem:[%s14213_s1 + $0x138] sm:$0xff]  }
  0x24   : > { %10659 = vmatprep.subr.bf16.mxu1 %v11609_v26  ;;  %260 = vst [vmem:[#allocation2] sm:$0x1] %v242_v52  ;;  %261 = vst [vmem:[#allocation2 + $0x18] sm:$0x1] %v243_v54  ;;  %v12355_v54 = vld [vmem:[%s12269_s27 + $0x60] sm:$0xff] }
  0x25   : > { %10548 = vmatpush3.bf16.msra.mxu0 %v11608_v25  ;;  %674 = vst [vmem:[#allocation3 + $0x124] sm:$0xf] %v9999_v48  ;;  %675 = vst [vmem:[#allocation3 + $0x148] sm:$0xf] %v10000_v49  ;;  %v245_v3 = vld [vmem:[#allocation2 + $0x4a] sm:$0x1]  ;;  %v10005_v58 = vpack.c.bf16 %v12355_v54, %v12355_v54 }
  0x26   : > { %10549 = vmatprep.subr.bf16.mxu0 %v11611_v28  ;;  %676 = vst [vmem:[#allocation3 + $0x16c] sm:$0xf] %v10001_v51  ;;  %296 = vst [vmem:[#allocation2 + $0x11] sm:$0x1] %v278_v57  ;;  %v895_v7 = vld [vmem:[#allocation2 + $0x50] sm:$0xff]  ;;  %v12349_v48 = vld [vmem:[%s12269_s27 + $0x58] sm:$0xff] }
  0x27   : > { %10660 = vmatpush3.bf16.msra.mxu1 %v11610_v27  ;;  %677 = vst [vmem:[#allocation3 + $0x190] sm:$0xf] %v10002_v55  ;;  %475 = vst [vmem:[#allocation3 + $0x24] sm:$0xf] %v9960_v56  ;;  %v281_v8 = vld [vmem:[#allocation2 + $0x57] sm:$0x1]  ;;  %v10060_v10 = vpack.c.bf16 %v895_v7, %v895_v7  ;;  %v10004_v53 = vpack.c.bf16 %v12349_v48, %v12349_v48 }
  0x28   : > { %10661 = vmatprep.subr.bf16.mxu1 %v11613_v30  ;;  %262 = vst [vmem:[#allocation2 + $0x30] sm:$0x1] %v244_v62  ;;  %297 = vst [vmem:[#allocation2 + $0x29] sm:$0x1] %v279_v63  ;;  %v704_v11 = vld [vmem:[#allocation2 + $0x4a] sm:$0xff] }
  0x29   : > { %10550 = vmatpush3.bf16.msra.mxu0 %v11612_v29  ;;  %858 = vst [vmem:[#allocation3 + $0x8] sm:$0xf] %v10023_v60  ;;  %1051 = vst [vmem:[#allocation3 + $0x30] sm:$0xf] %v10056_v61  ;;  %v246_v12 = vld [vmem:[#allocation2 + $0x62] sm:$0x1]  ;;  %v10029_v13 = vpack.c.bf16 %v704_v11, %v704_v11 }
  0x2a   : > { %10759 = vmatprep.subr.bf16.mxu0 %v11619_v39  ;;  %477 = vst [vmem:[#allocation3 + $0x6c] sm:$0xf] %v10056_v61  ;;  %263 = vst [vmem:[#allocation2 + $0x48] sm:$0x1] %v245_v3  ;;  %v897_v14 = vld [vmem:[#allocation2 + $0x68] sm:$0xff]  ;;  %v899_v19 = vld [vmem:[#allocation2 + $0x80] sm:$0xff] }
  0x2b   : > { %10662 = vmatpush3.bf16.msra.mxu1 %v11614_v31  ;;  %298 = vst [vmem:[#allocation2 + $0x41] sm:$0x1] %v280_v4  ;;  %860 = vst [vmem:[#allocation3 + $0x50] sm:$0xf] %v10025_v1  ;;  %v247_v15 = vld [vmem:[#allocation2 + $0x7a] sm:$0x1]  ;;  %v10062_v16 = vpack.c.bf16 %v897_v14, %v897_v14  ;;  %v10064_v23 = vpack.c.bf16 %v899_v19, %v899_v19 }
  0x2c   : > { %299 = vst [vmem:[#allocation2 + $0x59] sm:$0x1] %v281_v8  ;;  %1053 = vst [vmem:[#allocation3 + $0x78] sm:$0xf] %v10058_v5  ;;  %v282_v17 = vld [vmem:[#allocation2 + $0x6f] sm:$0x1] }
  0x2d   : > { %479 = vst [vmem:[#allocation3 + $0xb4] sm:$0xf] %v10058_v5  ;;  %862 = vst [vmem:[#allocation3 + $0x98] sm:$0xf] %v10027_v9  ;;  %v706_v18 = vld [vmem:[#allocation2 + $0x62] sm:$0xff]  ;;  %v890_v21 = vld [vmem:[#allocation2 + $0x18] sm:$0xff] }
  0x2e   : > { %1055 = vst [vmem:[#allocation3 + $0xc0] sm:$0xf] %v10060_v10  ;;  %481 = vst [vmem:[#allocation3 + $0xfc] sm:$0xf] %v10060_v10  ;;  %v314_v20 = vld [vmem:[#allocation2] sm:$0xff]  ;;  %v10031_v22 = vpack.c.bf16 %v706_v18, %v706_v18  ;;  %v699_v25 = vld [vmem:[#allocation2 + $0xa] sm:$0xff]  ;;  %v10055_v26 = vpack.c.bf16 %v890_v21, %v890_v21 }
  0x2f   : > { %264 = vst [vmem:[#allocation2 + $0x60] sm:$0x1] %v246_v12  ;;  %265 = vst [vmem:[#allocation2 + $0x78] sm:$0x1] %v247_v15  ;;  %v9959_v24 = vpack.c.bf16 %v314_v20, %v314_v20  ;;  %v12343_v27 = vld [vmem:[%s12269_s27 + $0x50] sm:$0xff]  ;;  %v10024_v28 = vpack.c.bf16 %v699_v25, %v699_v25  ;;  %v701_v29 = vld [vmem:[#allocation2 + $0x22] sm:$0xff] }
  0x30   : > { %864 = vst [vmem:[#allocation3 + $0xe0] sm:$0xf] %v10029_v13  ;;  %300 = vst [vmem:[#allocation2 + $0x71] sm:$0x1] %v282_v17  ;;  %v892_v30 = vld [vmem:[#allocation2 + $0x30] sm:$0xff]  ;;  %v10003_v31 = vpack.c.bf16 %v12343_v27, %v12343_v27  ;;  %v10026_v35 = vpack.c.bf16 %v701_v29, %v701_v29  ;;  %v708_v52 = vld [vmem:[#allocation2 + $0x7a] sm:$0xff] }
  0x31   : > { %1057 = vst [vmem:[#allocation3 + $0x108] sm:$0xf] %v10062_v16  ;;  %483 = vst [vmem:[#allocation3 + $0x144] sm:$0xf] %v10062_v16  ;;  %v10057_v36 = vpack.c.bf16 %v892_v30, %v892_v30  ;;  %v894_v39 = vld [vmem:[#allocation2 + $0x48] sm:$0xff]  ;;  %v10033_v57 = vpack.c.bf16 %v708_v52, %v708_v52  ;;  %v2048_v63 = vld [vmem:[#allocation3 + $0x24] sm:$0xff] }
  0x32   : > { %14258 = vst [vmem:[#allocation14_spill] sm:$0xff] %v12343_v27  ;;  %866 = vst [vmem:[#allocation3 + $0x128] sm:$0xf] %v10031_v22  ;;  %v703_v38 = vld [vmem:[#allocation2 + $0x3a] sm:$0xff]  ;;  %v10059_v43 = vpack.c.bf16 %v894_v39, %v894_v39  ;;  %v283_v49 = vld [vmem:[#allocation2 + $0x87] sm:$0x1] }
  0x33   : > { %1059 = vst [vmem:[#allocation3 + $0x150] sm:$0xf] %v10064_v23  ;;  %485 = vst [vmem:[#allocation3 + $0x18c] sm:$0xf] %v10064_v23  ;;  %v10028_v40 = vpack.c.bf16 %v703_v38, %v703_v38  ;;  %v705_v44 = vld [vmem:[#allocation2 + $0x52] sm:$0xff]  ;;  %v12361_v62 = vld [vmem:[%s12269_s27 + $0x68] sm:$0xff] }
  0x34   : > { %215 = vst [vmem:[#allocation2 + $0x91] sm:$0xff] %v12343_v27  ;;  %474 = vst [vmem:[#allocation3] sm:$0xf] %v9959_v24  ;;  %v10030_v51 = vpack.c.bf16 %v705_v44, %v705_v44  ;;  %v10006_v1 = vpack.c.bf16 %v12361_v62, %v12361_v62  ;;  %v11615_v5 = vld [vmem:[#allocation3 + $0x4] ss:$36 sps:$4 sm:$0xff]   ;;  %v2058_v14 = vld [vmem:[#allocation3 + $0x6c] sm:$0xff] }
  0x35   : > { %1050 = vst [vmem:[#allocation3 + $0xc] sm:$0xf] %v10055_v26  ;;  %476 = vst [vmem:[#allocation3 + $0x48] sm:$0xf] %v10055_v26  ;;  %3547 = vmatprep.mubr.bf16.mxu0 %v11615_v5  ;;  %v11622_v9 = vld [vmem:[#allocation3 + $0x4c] ss:$36 sps:$4 sm:$0xff]  }
  0x36   : > { %859 = vst [vmem:[#allocation3 + $0x2c] sm:$0xf] %v10024_v28  ;;  %14259 = vst [vmem:[#allocation15_spill] sm:$0xff] %v12349_v48  ;;  %v896_v55 = vld [vmem:[#allocation2 + $0x60] sm:$0xff]  ;;  %v898_v56 = vld [vmem:[#allocation2 + $0x78] sm:$0xff] }
  0x37   : > { %678 = vst [vmem:[#allocation3 + $0x1b4] sm:$0xf] %v10003_v31  ;;  %861 = vst [vmem:[#allocation3 + $0x74] sm:$0xf] %v10026_v35  ;;  %v10061_v59 = vpack.c.bf16 %v896_v55, %v896_v55  ;;  %v707_v60 = vld [vmem:[#allocation2 + $0x6a] sm:$0xff]  ;;  %v10063_v61 = vpack.c.bf16 %v898_v56, %v898_v56  ;;  %v11655_v24 = vld [vmem:[%s14213_s1 + $0x160] sm:$0xff]  }
  0x38   : > { %1052 = vst [vmem:[#allocation3 + $0x54] sm:$0xf] %v10057_v36  ;;  %478 = vst [vmem:[#allocation3 + $0x90] sm:$0xf] %v10057_v36  ;;  %v10032_v0 = vpack.c.bf16 %v707_v60, %v707_v60  ;;  %v11631_v10 = vld [vmem:[%s14213_s1 + $0x170] sm:$0xff]   ;;  %v11643_v15 = vld [vmem:[%s14213_s1 + $0x168] sm:$0xff]  }
  0x39   : > { %216 = vst [vmem:[#allocation2 + $0x99] sm:$0xff] %v12349_v48  ;;  %301 = vst [vmem:[#allocation2 + $0x89] sm:$0x1] %v283_v49  ;;  %v11633_v12 = vld [vmem:[%s14213_s1 + $0x130] sm:$0xff]   ;;  %v11627_v18 = vld [vmem:[#allocation3 + $0x94] ss:$36 sps:$4 sm:$0xff]  }
  0x3a   : > { %14260 = vst [vmem:[#allocation16_spill] sm:$0xff] %v12355_v54  ;;  %863 = vst [vmem:[#allocation3 + $0xbc] sm:$0xf] %v10028_v40  ;;  %v11645_v20 = vld [vmem:[%s14213_s1 + $0x128] sm:$0xff]   ;;  %v12392_v44 = vld [vmem:[%s12269_s27 + $0x70] sm:$0xff] }
  0x3b   : > { %1054 = vst [vmem:[#allocation3 + $0x9c] sm:$0xf] %v10059_v43  ;;  %480 = vst [vmem:[#allocation3 + $0xd8] sm:$0xf] %v10059_v43  ;;  %v248_v3 = vld [vmem:[#allocation2 + $0x92] sm:$0x1]  ;;  %v10007_v56 = vpack.c.bf16 %v12392_v44, %v12392_v44 }
  0x3c   : > { %217 = vst [vmem:[#allocation2 + $0xa9] sm:$0xff] %v12355_v54  ;;  %865 = vst [vmem:[#allocation3 + $0x104] sm:$0xf] %v10030_v51  ;;  %v2043_v4 = vld [vmem:[#allocation3] sm:$0xff]  ;;  %v11617_v6 = vld [vmem:[#allocation3 + $0xc] ss:$36 sps:$4 sm:$0xff]  }
  0x3d   : > { %679 = vst [vmem:[#allocation3 + $0x1d8] sm:$0xf] %v10004_v53  ;;  %14261 = vst [vmem:[#allocation17_spill] sm:$0xff] %v12361_v62  ;;  %v9235_v7 = vcombine.low %v2043_v4, %v2048_v63  ;;  %v11620_v8 = vld [vmem:[#allocation3 + $0x8] ss:$36 sps:$4 sm:$0xff]   ;;  %3708 = vmatprep.mubr.bf16.mxu1 %v11617_v6  ;;  %v12383_v22 = vld [vmem:[#allocation3 + $0xb4] sm:$0xff] }
  0x3e   : > { %868 = vst [vmem:[#allocation3 + $0x170] sm:$0xf] %v10033_v57  ;;  %218 = vst [vmem:[#allocation2 + $0xb1] sm:$0xff] %v12361_v62  ;;  %3709 = vmatmul.mubr.bf16.vlgmr.msra.gmra.mxu1 %v11620_v8  ;;  %v2053_v13 = vld [vmem:[#allocation3 + $0x48] sm:$0xff]  ;;  %v11626_v17 = vld [vmem:[#allocation3 + $0x50] ss:$36 sps:$4 sm:$0xff]  }
  0x3f   : > { %680 = vst [vmem:[#allocation3 + $0x1fc] sm:$0xf] %v10005_v58  ;;  %1056 = vst [vmem:[#allocation3 + $0xe4] sm:$0xf] %v10061_v59  ;;  %3548 = vmatmul.mubr.bf16.vlgmr.msra.gmra.mxu0 %v9235_v7  ;;  %v11624_v11 = vld [vmem:[#allocation3 + $0x54] ss:$36 sps:$4 sm:$0xff]   ;;  %v9244_v16 = vcombine.low %v2053_v13, %v2058_v14 }
  0x40   : > { %482 = vst [vmem:[#allocation3 + $0x120] sm:$0xf] %v10061_v59  ;;  %1058 = vst [vmem:[#allocation3 + $0x12c] sm:$0xf] %v10063_v61  ;;  %10760 = vmatpush3.bf16.msra.mxu0 %v11621_v2  ;;  %3555 = vmatprep.mubr.bf16.mxu0 %v11622_v9  ;;  %v12381_v21 = vld [vmem:[#allocation3 + $0x90] sm:$0xff]  ;;  %v901_v28 = vld [vmem:[#allocation2 + $0x98] sm:$0xff] }
  0x41   : > { %484 = vst [vmem:[#allocation3 + $0x168] sm:$0xf] %v10063_v61  ;;  %867 = vst [vmem:[#allocation3 + $0x14c] sm:$0xf] %v10032_v0  ;;  %3716 = vmatprep.mubr.bf16.mxu1 %v11624_v11  ;;  %10761 = vmatprep.subr.bf16.mxu0 %v11631_v10  ;;  %v709_v23 = vld [vmem:[#allocation2 + $0x82] sm:$0xff]  ;;  %v10066_v31 = vpack.c.bf16 %v901_v28, %v901_v28  ;;  %v710_v36 = vld [vmem:[#allocation2 + $0x92] sm:$0xff]  ;;  %v9253_v57 = vcombine.low %v12381_v21, %v12383_v22 }
  0x42   : > { %266 = vst [vmem:[#allocation2 + $0x90] sm:$0x1] %v248_v3  ;;  %681 = vst [vmem:[#allocation3 + $0x220] sm:$0xf] %v10006_v1  ;;  %v11629_v19 = vld [vmem:[#allocation3 + $0x9c] ss:$36 sps:$4 sm:$0xff]   ;;  %v10034_v25 = vpack.c.bf16 %v709_v23, %v709_v23  ;;  %v10035_v39 = vpack.c.bf16 %v710_v36, %v710_v36 }
  0x43   : > { %v249_v29 = vld [vmem:[#allocation2 + $0xaa] sm:$0x1]  ;;  %v284_v35 = vld [vmem:[#allocation2 + $0x9f] sm:$0x1]  ;;  %v11657_v43 = vld [vmem:[%s14213_s1 + $0x120] sm:$0xff]   ;;  %14262 = vst [vmem:[#allocation18_spill] sm:$0xff] %v12392_v44 }
  0x44   : > { %10762 = vmatpush3.bf16.msra.mxu0 %v11633_v12  ;;  %267 = vst [vmem:[#allocation2 + $0xa8] sm:$0x1] %v249_v29  ;;  %869 = vst [vmem:[#allocation3 + $0x194] sm:$0xf] %v10034_v25  ;;  %v11632_v49 = vld [vmem:[#allocation3 + $0x98] ss:$36 sps:$4 sm:$0xff]  }
  0x45   : > { %10763 = vmatprep.subr.bf16.mxu0 %v11643_v15  ;;  %v903_v38 = vld [vmem:[#allocation2 + $0xb0] sm:$0xff]  ;;  %302 = vst [vmem:[#allocation2 + $0xa1] sm:$0x1] %v284_v35  ;;  %1061 = vst [vmem:[#allocation3 + $0x198] sm:$0xf] %v10066_v31  ;;  %v12395_v52 = vld [vmem:[%s12269_s27 + $0x78] sm:$0xff] }
  0x46   : > { %3717 = vmatmul.mubr.bf16.gmra.mxu1 %v11626_v17  ;;  %v10068_v40 = vpack.c.bf16 %v903_v38, %v903_v38  ;;  %v11634_v51 = vld [vmem:[#allocation3 + $0xdc] ss:$36 sps:$4 sm:$0xff]   ;;  %487 = vst [vmem:[#allocation3 + $0x1d4] sm:$0xf] %v10066_v31  ;;  %14263 = vst [vmem:[#allocation19_spill] sm:$0xff] %v12395_v52  ;;  %v10008_v60 = vpack.c.bf16 %v12395_v52, %v12395_v52  ;;  %v12406_v61 = vld [vmem:[%s12269_s27 + $0x80] sm:$0xff] }
  0x47   : > { %3556 = vmatmul.mubr.bf16.gmra.mxu0 %v9244_v16  ;;  %3724 = vmatprep.mubr.bf16.mxu1 %v11629_v19  ;;  %219 = vst [vmem:[#allocation2 + $0xc1] sm:$0xff] %v12392_v44  ;;  %v285_v53 = vld [vmem:[#allocation2 + $0xb7] sm:$0x1]  ;;  %v712_v55 = vld [vmem:[#allocation2 + $0xaa] sm:$0xff]  ;;  %870 = vst [vmem:[#allocation3 + $0x1b8] sm:$0xf] %v10035_v39  ;;  %v10009_v1 = vpack.c.bf16 %v12406_v61, %v12406_v61 }
  0x48   : > { %3563 = vmatprep.mubr.bf16.mxu0 %v11627_v18  ;;  %10764 = vmatpush3.bf16.msra.mxu0 %v11645_v20  ;;  %v11636_v58 = vld [vmem:[#allocation3 + $0xe4] ss:$36 sps:$4 sm:$0xff]   ;;  %1063 = vst [vmem:[#allocation3 + $0x1e0] sm:$0xf] %v10068_v40  ;;  %489 = vst [vmem:[#allocation3 + $0x21c] sm:$0xf] %v10068_v40  ;;  %v10037_v59 = vpack.c.bf16 %v712_v55, %v712_v55 }
  0x49   : > { %v900_v26 = vld [vmem:[#allocation2 + $0x90] sm:$0xff]  ;;  %10765 = vmatprep.subr.bf16.mxu0 %v11655_v24  ;;  %220 = vst [vmem:[#allocation2 + $0xc9] sm:$0xff] %v12395_v52  ;;  %303 = vst [vmem:[#allocation2 + $0xb9] sm:$0x1] %v285_v53  ;;  %v12409_v63 = vld [vmem:[%s12269_s27 + $0x88] sm:$0xff] }
  0x4a   : > { %v10065_v30 = vpack.c.bf16 %v900_v26, %v900_v26  ;;  %14264 = vst [vmem:[#allocation20_spill] sm:$0xff] %v12406_v61  ;;  %14265 = vst [vmem:[#allocation21_spill] sm:$0xff] %v12409_v63  ;;  %v11667_v0 = vld [vmem:[%s14213_s1 + $0x158] sm:$0xff]   ;;  %v10010_v2 = vpack.c.bf16 %v12409_v63, %v12409_v63  ;;  %v2073_v4 = vld [vmem:[#allocation3 + $0xd8] sm:$0xff] }
  0x4b   : > { %682 = vst [vmem:[#allocation3 + $0x244] sm:$0xf] %v10007_v56  ;;  %221 = vst [vmem:[#allocation2 + $0xd9] sm:$0xff] %v12406_v61  ;;  %v11668_v3 = vld [vmem:[%s14213_s1 + $0x1f8] sm:$0xff]   ;;  %v2078_v5 = vld [vmem:[#allocation3 + $0xfc] sm:$0xff] }
  0x4c   : > { %1060 = vst [vmem:[#allocation3 + $0x174] sm:$0xf] %v10065_v30  ;;  %486 = vst [vmem:[#allocation3 + $0x1b0] sm:$0xf] %v10065_v30  ;;  %10766 = vmatpush3.bf16.msra.mxu0 %v11657_v43  ;;  %v11670_v6 = vld [vmem:[%s14213_s1 + $0x118] sm:$0xff]   ;;  %v902_v7 = vld [vmem:[#allocation2 + $0xa8] sm:$0xff]  ;;  %10871 = vmatprep.subr.bf16.mxu1 %v11668_v3  ;;  %v9262_v17 = vcombine.low %v2073_v4, %v2078_v5 }
  0x4d   : > { %222 = vst [vmem:[#allocation2 + $0xe1] sm:$0xff] %v12409_v63  ;;  %872 = vst [vmem:[#allocation3 + $0x200] sm:$0xf] %v10037_v59  ;;  %10767 = vmatprep.subr.bf16.mxu0 %v11667_v0  ;;  %v11671_v8 = vld [vmem:[%s14213_s1 + $0x1b8] sm:$0xff]   ;;  %v10067_v10 = vpack.c.bf16 %v902_v7, %v902_v7  ;;  %v12430_v11 = vld [vmem:[%s12269_s27 + $0x90] sm:$0xff] }
  0x4e   : > { %683 = vst [vmem:[#allocation3 + $0x268] sm:$0xf] %v10008_v60  ;;  %684 = vst [vmem:[#allocation3 + $0x28c] sm:$0xf] %v10009_v1  ;;  %3725 = vmatmul.mubr.bf16.gmra.mxu1 %v11632_v49  ;;  %v711_v9 = vld [vmem:[#allocation2 + $0x9a] sm:$0xff]  ;;  %v10011_v14 = vpack.c.bf16 %v12430_v11, %v12430_v11  ;;  %v2083_v30 = vld [vmem:[#allocation3 + $0x120] sm:$0xff] }
  0x4f   : > { %685 = vst [vmem:[#allocation3 + $0x2b0] sm:$0xf] %v10010_v2  ;;  %3564 = vmatmul.mubr.bf16.gmra.mxu0 %v9253_v57  ;;  %14266 = vst [vmem:[#allocation22_spill] sm:$0xff] %v12430_v11  ;;  %v12433_v12 = vld [vmem:[%s12269_s27 + $0x98] sm:$0xff]  ;;  %3732 = vmatprep.mubr.bf16.mxu1 %v11636_v58  ;;  %v10036_v13 = vpack.c.bf16 %v711_v9, %v711_v9  ;;  %v11638_v16 = vld [vmem:[#allocation3 + $0xe0] ss:$36 sps:$4 sm:$0xff]  }
  0x50   : > { %3571 = vmatprep.mubr.bf16.mxu0 %v11634_v51  ;;  %14267 = vst [vmem:[#allocation23_spill] sm:$0xff] %v12433_v12  ;;  %10768 = vmatpush3.bf16.msra.mxu0 %v11670_v6  ;;  %223 = vst [vmem:[#allocation2 + $0xf1] sm:$0xff] %v12430_v11  ;;  %v10012_v15 = vpack.c.bf16 %v12433_v12, %v12433_v12  ;;  %v11639_v18 = vld [vmem:[#allocation3 + $0x124] ss:$36 sps:$4 sm:$0xff]   ;;  %v11641_v19 = vld [vmem:[#allocation3 + $0x12c] ss:$36 sps:$4 sm:$0xff]  }
  0x51   : > { %224 = vst [vmem:[#allocation2 + $0xf9] sm:$0xff] %v12433_v12  ;;  %1062 = vst [vmem:[#allocation3 + $0x1bc] sm:$0xf] %v10067_v10  ;;  %10872 = vmatpush3.bf16.msra.mxu1 %v11671_v8  ;;  %v250_v20 = vld [vmem:[#allocation2 + $0xc2] sm:$0x1]  ;;  %v713_v21 = vld [vmem:[#allocation2 + $0xb2] sm:$0xff] }
  0x52   : > { %488 = vst [vmem:[#allocation3 + $0x1f8] sm:$0xf] %v10067_v10  ;;  %871 = vst [vmem:[#allocation3 + $0x1dc] sm:$0xf] %v10036_v13  ;;  %v905_v22 = vld [vmem:[#allocation2 + $0xc8] sm:$0xff]  ;;  %v10038_v24 = vpack.c.bf16 %v713_v21, %v713_v21  ;;  %v2088_v31 = vld [vmem:[#allocation3 + $0x144] sm:$0xff] }
  0x53   : > { %686 = vst [vmem:[#allocation3 + $0x2d4] sm:$0xf] %v10011_v14  ;;  %687 = vst [vmem:[#allocation3 + $0x2f8] sm:$0xf] %v10012_v15  ;;  %v251_v23 = vld [vmem:[#allocation2 + $0xda] sm:$0x1]  ;;  %v10070_v25 = vpack.c.bf16 %v905_v22, %v905_v22  ;;  %v9271_v0 = vcombine.low %v2083_v30, %v2088_v31 }
  0x54   : > { %268 = vst [vmem:[#allocation2 + $0xc0] sm:$0x1] %v250_v20  ;;  %269 = vst [vmem:[#allocation2 + $0xd8] sm:$0x1] %v251_v23  ;;  %v286_v26 = vld [vmem:[#allocation2 + $0xcf] sm:$0x1] }
  0x55   : > { %v714_v28 = vld [vmem:[#allocation2 + $0xc2] sm:$0xff]  ;;  %304 = vst [vmem:[#allocation2 + $0xd1] sm:$0x1] %v286_v26  ;;  %v716_v39 = vld [vmem:[#allocation2 + $0xda] sm:$0xff]  ;;  %873 = vst [vmem:[#allocation3 + $0x224] sm:$0xf] %v10038_v24 }
  0x56   : > { %v907_v29 = vld [vmem:[#allocation2 + $0xe0] sm:$0xff]  ;;  %v10039_v35 = vpack.c.bf16 %v714_v28, %v714_v28  ;;  %1065 = vst [vmem:[#allocation3 + $0x228] sm:$0xf] %v10070_v25  ;;  %491 = vst [vmem:[#allocation3 + $0x264] sm:$0xf] %v10070_v25  ;;  %v10041_v43 = vpack.c.bf16 %v716_v39, %v716_v39  ;;  %v12445_v49 = vld [vmem:[%s12269_s27 + $0xa8] sm:$0xff]  ;;  %3733 = vmatmul.mubr.bf16.gmra.mxu1 %v11638_v16 }
  0x57   : > { %v10072_v36 = vpack.c.bf16 %v907_v29, %v907_v29  ;;  %v287_v38 = vld [vmem:[#allocation2 + $0xe7] sm:$0x1]  ;;  %3572 = vmatmul.mubr.bf16.gmra.mxu0 %v9262_v17  ;;  %14269 = vst [vmem:[#allocation25_spill] sm:$0xff] %v12445_v49  ;;  %v252_v53 = vld [vmem:[#allocation2 + $0xf2] sm:$0x1]  ;;  %226 = vst [vmem:[#allocation2 + $0x111] sm:$0xff] %v12445_v49  ;;  %v10014_v57 = vpack.c.bf16 %v12445_v49, %v12445_v49  ;;  %3740 = vmatprep.mubr.bf16.mxu1 %v11641_v19 }
  0x58   : > { %v12442_v40 = vld [vmem:[%s12269_s27 + $0xa0] sm:$0xff]  ;;  %305 = vst [vmem:[#allocation2 + $0xe9] sm:$0x1] %v287_v38  ;;  %3579 = vmatprep.mubr.bf16.mxu0 %v11639_v18  ;;  %874 = vst [vmem:[#allocation3 + $0x248] sm:$0xf] %v10039_v35  ;;  %v909_v55 = vld [vmem:[#allocation2 + $0xf8] sm:$0xff] }
  0x59   : > { %14268 = vst [vmem:[#allocation24_spill] sm:$0xff] %v12442_v40  ;;  %225 = vst [vmem:[#allocation2 + $0x109] sm:$0xff] %v12442_v40  ;;  %v10013_v51 = vpack.c.bf16 %v12442_v40, %v12442_v40  ;;  %v288_v56 = vld [vmem:[#allocation2 + $0xff] sm:$0x1]  ;;  %v10074_v58 = vpack.c.bf16 %v909_v55, %v909_v55  ;;  %v11648_v1 = vld [vmem:[#allocation3 + $0x174] ss:$36 sps:$4 sm:$0xff]  }
  0x5a   : > { %1067 = vst [vmem:[#allocation3 + $0x270] sm:$0xf] %v10072_v36  ;;  %493 = vst [vmem:[#allocation3 + $0x2ac] sm:$0xf] %v10072_v36  ;;  %v11644_v59 = vld [vmem:[#allocation3 + $0x128] ss:$36 sps:$4 sm:$0xff]  }
  0x5b   : > { %270 = vst [vmem:[#allocation2 + $0xf0] sm:$0x1] %v252_v53  ;;  %876 = vst [vmem:[#allocation3 + $0x290] sm:$0xf] %v10041_v43  ;;  %v11646_v60 = vld [vmem:[#allocation3 + $0x16c] ss:$36 sps:$4 sm:$0xff]  }
  0x5c   : > { %306 = vst [vmem:[#allocation2 + $0x101] sm:$0x1] %v288_v56  ;;  %688 = vst [vmem:[#allocation3 + $0x31c] sm:$0xf] %v10013_v51  ;;  %v904_v2 = vld [vmem:[#allocation2 + $0xc0] sm:$0xff]  ;;  %v718_v3 = vld [vmem:[#allocation2 + $0xf2] sm:$0xff] }
  0x5d   : > { %689 = vst [vmem:[#allocation3 + $0x340] sm:$0xf] %v10014_v57  ;;  %1069 = vst [vmem:[#allocation3 + $0x2b8] sm:$0xf] %v10074_v58  ;;  %v11681_v4 = vld [vmem:[%s14213_s1 + $0x150] sm:$0xff]   ;;  %v10069_v5 = vpack.c.bf16 %v904_v2, %v904_v2  ;;  %v906_v6 = vld [vmem:[#allocation2 + $0xd8] sm:$0xff]  ;;  %v10043_v7 = vpack.c.bf16 %v718_v3, %v718_v3 }
  0x5e   : > { %495 = vst [vmem:[#allocation3 + $0x2f4] sm:$0xf] %v10074_v58  ;;  %v715_v8 = vld [vmem:[#allocation2 + $0xca] sm:$0xff]  ;;  %v10071_v9 = vpack.c.bf16 %v906_v6, %v906_v6  ;;  %10769 = vmatprep.subr.bf16.mxu0 %v11681_v4  ;;  %v2098_v13 = vld [vmem:[#allocation3 + $0x18c] sm:$0xff]  ;;  %3741 = vmatmul.mubr.bf16.gmra.mxu1 %v11644_v59  ;;  %v289_v36 = vld [vmem:[#allocation2 + $0x117] sm:$0x1] }
  0x5f   : > { %v11682_v10 = vld [vmem:[%s14213_s1 + $0x1f0] sm:$0xff]   ;;  %1064 = vst [vmem:[#allocation3 + $0x204] sm:$0xf] %v10069_v5  ;;  %490 = vst [vmem:[#allocation3 + $0x240] sm:$0xf] %v10069_v5  ;;  %v10040_v14 = vpack.c.bf16 %v715_v8, %v715_v8  ;;  %v717_v15 = vld [vmem:[#allocation2 + $0xe2] sm:$0xff]  ;;  %3580 = vmatmul.mubr.bf16.gmra.mxu0 %v9271_v0  ;;  %3748 = vmatprep.mubr.bf16.mxu1 %v11648_v1 }
  0x60   : > { %878 = vst [vmem:[#allocation3 + $0x2d8] sm:$0xf] %v10043_v7  ;;  %v2093_v16 = vld [vmem:[#allocation3 + $0x168] sm:$0xff]  ;;  %1066 = vst [vmem:[#allocation3 + $0x24c] sm:$0xf] %v10071_v9  ;;  %v10042_v17 = vpack.c.bf16 %v717_v15, %v717_v15  ;;  %v911_v19 = vld [vmem:[#allocation2 + $0x110] sm:$0xff]  ;;  %10873 = vmatprep.subr.bf16.mxu1 %v11682_v10  ;;  %3587 = vmatprep.mubr.bf16.mxu0 %v11646_v60 }
  0x61   : > { %492 = vst [vmem:[#allocation3 + $0x288] sm:$0xf] %v10071_v9  ;;  %v253_v18 = vld [vmem:[#allocation2 + $0x10a] sm:$0x1]  ;;  %875 = vst [vmem:[#allocation3 + $0x26c] sm:$0xf] %v10040_v14  ;;  %v10076_v22 = vpack.c.bf16 %v911_v19, %v911_v19  ;;  %v9280_v31 = vcombine.low %v2093_v16, %v2098_v13 }
  0x62   : > { %v908_v20 = vld [vmem:[#allocation2 + $0xf0] sm:$0xff]  ;;  %271 = vst [vmem:[#allocation2 + $0x108] sm:$0x1] %v253_v18  ;;  %877 = vst [vmem:[#allocation3 + $0x2b4] sm:$0xf] %v10042_v17  ;;  %v12469_v35 = vld [vmem:[%s12269_s27 + $0xb8] sm:$0xff] }
  0x63   : > { %v719_v21 = vld [vmem:[#allocation2 + $0xfa] sm:$0xff]  ;;  %v10073_v23 = vpack.c.bf16 %v908_v20, %v908_v20  ;;  %v11684_v25 = vld [vmem:[%s14213_s1 + $0x110] sm:$0xff]   ;;  %v11651_v28 = vld [vmem:[#allocation3 + $0x1b4] ss:$36 sps:$4 sm:$0xff]   ;;  %1071 = vst [vmem:[#allocation3 + $0x300] sm:$0xf] %v10076_v22  ;;  %v10016_v51 = vpack.c.bf16 %v12469_v35, %v12469_v35 }
  0x64   : > { %v10044_v24 = vpack.c.bf16 %v719_v21, %v719_v21  ;;  %v11650_v26 = vld [vmem:[#allocation3 + $0x170] ss:$36 sps:$4 sm:$0xff]   ;;  %v11685_v29 = vld [vmem:[%s14213_s1 + $0x1b0] sm:$0xff]   ;;  %497 = vst [vmem:[#allocation3 + $0x33c] sm:$0xf] %v10076_v22  ;;  %10770 = vmatpush3.bf16.msra.mxu0 %v11684_v25  ;;  %14271 = vst [vmem:[#allocation27_spill] sm:$0xff] %v12469_v35 }
  0x65   : > { %v12466_v30 = vld [vmem:[%s12269_s27 + $0xb0] sm:$0xff]  ;;  %1068 = vst [vmem:[#allocation3 + $0x294] sm:$0xf] %v10073_v23  ;;  %494 = vst [vmem:[#allocation3 + $0x2d0] sm:$0xf] %v10073_v23  ;;  %10874 = vmatpush3.bf16.msra.mxu1 %v11685_v29  ;;  %v12478_v53 = vld [vmem:[%s12269_s27 + $0xc0] sm:$0xff] }
  0x66   : > { %14270 = vst [vmem:[#allocation26_spill] sm:$0xff] %v12466_v30  ;;  %879 = vst [vmem:[#allocation3 + $0x2fc] sm:$0xf] %v10044_v24  ;;  %v720_v38 = vld [vmem:[#allocation2 + $0x10a] sm:$0xff]  ;;  %v10015_v39 = vpack.c.bf16 %v12466_v30, %v12466_v30  ;;  %v10017_v57 = vpack.c.bf16 %v12478_v53, %v12478_v53  ;;  %3749 = vmatmul.mubr.bf16.gmra.mxu1 %v11650_v26  ;;  %v2103_v59 = vld [vmem:[#allocation3 + $0x1b0] sm:$0xff] }
  0x67   : > { %227 = vst [vmem:[#allocation2 + $0x121] sm:$0xff] %v12466_v30  ;;  %228 = vst [vmem:[#allocation2 + $0x129] sm:$0xff] %v12469_v35  ;;  %v10045_v43 = vpack.c.bf16 %v720_v38, %v720_v38  ;;  %v12481_v55 = vld [vmem:[%s12269_s27 + $0xc8] sm:$0xff]  ;;  %3588 = vmatmul.mubr.bf16.gmra.mxu0 %v9280_v31  ;;  %v11660_v5 = vld [vmem:[#allocation3 + $0x204] ss:$36 sps:$4 sm:$0xff]  }
  0x68   : > { %307 = vst [vmem:[#allocation2 + $0x119] sm:$0x1] %v289_v36  ;;  %14272 = vst [vmem:[#allocation28_spill] sm:$0xff] %v12478_v53  ;;  %v11653_v56 = vld [vmem:[#allocation3 + $0x1bc] ss:$36 sps:$4 sm:$0xff]   ;;  %v10018_v58 = vpack.c.bf16 %v12481_v55, %v12481_v55  ;;  %v2108_v60 = vld [vmem:[#allocation3 + $0x1d4] sm:$0xff]  ;;  %3595 = vmatprep.mubr.bf16.mxu0 %v11651_v28 }
  0x69   : > { %14273 = vst [vmem:[#allocation29_spill] sm:$0xff] %v12481_v55  ;;  %690 = vst [vmem:[#allocation3 + $0x364] sm:$0xf] %v10015_v39  ;;  %3756 = vmatprep.mubr.bf16.mxu1 %v11653_v56  ;;  %v910_v0 = vld [vmem:[#allocation2 + $0x108] sm:$0xff]  ;;  %v9289_v3 = vcombine.low %v2103_v59, %v2108_v60  ;;  %v12502_v25 = vld [vmem:[%s12269_s27 + $0xd0] sm:$0xff] }
  0x6a   : > { %229 = vst [vmem:[#allocation2 + $0x139] sm:$0xff] %v12478_v53  ;;  %230 = vst [vmem:[#allocation2 + $0x141] sm:$0xff] %v12481_v55  ;;  %v11658_v1 = vld [vmem:[#allocation3 + $0x1fc] ss:$36 sps:$4 sm:$0xff]   ;;  %v10075_v2 = vpack.c.bf16 %v910_v0, %v910_v0  ;;  %v12505_v26 = vld [vmem:[%s12269_s27 + $0xd8] sm:$0xff]  ;;  %v10019_v31 = vpack.c.bf16 %v12502_v25, %v12502_v25 }
  0x6b   : > { %880 = vst [vmem:[#allocation3 + $0x320] sm:$0xf] %v10045_v43  ;;  %691 = vst [vmem:[#allocation3 + $0x388] sm:$0xf] %v10016_v51  ;;  %v11656_v4 = vld [vmem:[#allocation3 + $0x1b8] ss:$36 sps:$4 sm:$0xff]   ;;  %v10020_v43 = vpack.c.bf16 %v12505_v26, %v12505_v26 }
  0x6c   : > { %692 = vst [vmem:[#allocation3 + $0x3ac] sm:$0xf] %v10017_v57  ;;  %693 = vst [vmem:[#allocation3 + $0x3d0] sm:$0xf] %v10018_v58  ;;  %v2113_v16 = vld [vmem:[#allocation3 + $0x1f8] sm:$0xff]  ;;  %v2128_v0 = vld [vmem:[#allocation3 + $0x264] sm:$0xff] }
  0x6d   : > { %1070 = vst [vmem:[#allocation3 + $0x2dc] sm:$0xf] %v10075_v2  ;;  %496 = vst [vmem:[#allocation3 + $0x318] sm:$0xf] %v10075_v2  ;;  %v2118_v17 = vld [vmem:[#allocation3 + $0x21c] sm:$0xff] }
  0x6e   : > { %v254_v6 = vld [vmem:[#allocation2 + $0x122] sm:$0x1]  ;;  %v913_v8 = vld [vmem:[#allocation2 + $0x128] sm:$0xff]  ;;  %3757 = vmatmul.mubr.bf16.gmra.mxu1 %v11656_v4  ;;  %14274 = vst [vmem:[#allocation30_spill] sm:$0xff] %v12502_v25  ;;  %14275 = vst [vmem:[#allocation31_spill] sm:$0xff] %v12505_v26  ;;  %v9298_v36 = vcombine.low %v2113_v16, %v2118_v17 }
  0x6f   : > { %v721_v7 = vld [vmem:[#allocation2 + $0x112] sm:$0xff]  ;;  %272 = vst [vmem:[#allocation2 + $0x120] sm:$0x1] %v254_v6  ;;  %v10078_v10 = vpack.c.bf16 %v913_v8, %v913_v8  ;;  %v290_v14 = vld [vmem:[#allocation2 + $0x12f] sm:$0x1]  ;;  %v722_v15 = vld [vmem:[#allocation2 + $0x122] sm:$0xff]  ;;  %3596 = vmatmul.mubr.bf16.gmra.mxu0 %v9289_v3  ;;  %3764 = vmatprep.mubr.bf16.mxu1 %v11660_v5 }
  0x70   : > { %v10046_v9 = vpack.c.bf16 %v721_v7, %v721_v7  ;;  %308 = vst [vmem:[#allocation2 + $0x131] sm:$0x1] %v290_v14  ;;  %v10047_v18 = vpack.c.bf16 %v722_v15, %v722_v15  ;;  %v11695_v20 = vld [vmem:[%s14213_s1 + $0x148] sm:$0xff]   ;;  %3603 = vmatprep.mubr.bf16.mxu0 %v11658_v1  ;;  %231 = vst [vmem:[#allocation2 + $0x151] sm:$0xff] %v12502_v25  ;;  %v11662_v38 = vld [vmem:[#allocation3 + $0x200] ss:$36 sps:$4 sm:$0xff]  }
  0x71   : > { %v255_v13 = vld [vmem:[#allocation2 + $0x13a] sm:$0x1]  ;;  %v915_v19 = vld [vmem:[#allocation2 + $0x140] sm:$0xff]  ;;  %1073 = vst [vmem:[#allocation3 + $0x348] sm:$0xf] %v10078_v10  ;;  %v11696_v22 = vld [vmem:[%s14213_s1 + $0x1e8] sm:$0xff]   ;;  %10771 = vmatprep.subr.bf16.mxu0 %v11695_v20 }
  0x72   : > { %273 = vst [vmem:[#allocation2 + $0x138] sm:$0x1] %v255_v13  ;;  %881 = vst [vmem:[#allocation3 + $0x344] sm:$0xf] %v10046_v9  ;;  %v10080_v21 = vpack.c.bf16 %v915_v19, %v915_v19  ;;  %v11698_v23 = vld [vmem:[%s14213_s1 + $0x108] sm:$0xff]   ;;  %10875 = vmatprep.subr.bf16.mxu1 %v11696_v22  ;;  %v724_v29 = vld [vmem:[#allocation2 + $0x13a] sm:$0xff] }
  0x73   : > { %499 = vst [vmem:[#allocation3 + $0x384] sm:$0xf] %v10078_v10  ;;  %882 = vst [vmem:[#allocation3 + $0x368] sm:$0xf] %v10047_v18  ;;  %v11699_v24 = vld [vmem:[%s14213_s1 + $0x1a8] sm:$0xff]   ;;  %10772 = vmatpush3.bf16.msra.mxu0 %v11698_v23  ;;  %v10049_v39 = vpack.c.bf16 %v724_v29, %v724_v29  ;;  %v11705_v3 = vld [vmem:[%s14213_s1 + $0x1e0] sm:$0xff]  }
  0x74   : > { %1075 = vst [vmem:[#allocation3 + $0x390] sm:$0xf] %v10080_v21  ;;  %501 = vst [vmem:[#allocation3 + $0x3cc] sm:$0xf] %v10080_v21  ;;  %v291_v28 = vld [vmem:[#allocation2 + $0x147] sm:$0x1]  ;;  %10876 = vmatpush3.bf16.msra.mxu1 %v11699_v24 }
  0x75   : > { %232 = vst [vmem:[#allocation2 + $0x159] sm:$0xff] %v12505_v26  ;;  %309 = vst [vmem:[#allocation2 + $0x149] sm:$0x1] %v291_v28  ;;  %v11663_v51 = vld [vmem:[#allocation3 + $0x244] ss:$36 sps:$4 sm:$0xff]   ;;  %v12517_v4 = vld [vmem:[%s12269_s27 + $0xe0] sm:$0xff]  ;;  %10877 = vmatprep.subr.bf16.mxu1 %v11705_v3 }
  0x76   : > { %v11665_v56 = vld [vmem:[#allocation3 + $0x24c] ss:$36 sps:$4 sm:$0xff]   ;;  %694 = vst [vmem:[#allocation3 + $0x3f4] sm:$0xf] %v10019_v31  ;;  %884 = vst [vmem:[#allocation3 + $0x3b0] sm:$0xf] %v10049_v39  ;;  %3765 = vmatmul.mubr.bf16.gmra.mxu1 %v11662_v38  ;;  %v10021_v7 = vpack.c.bf16 %v12517_v4, %v12517_v4 }
  0x77   : > { %v912_v57 = vld [vmem:[#allocation2 + $0x120] sm:$0xff]  ;;  %v723_v59 = vld [vmem:[#allocation2 + $0x12a] sm:$0xff]  ;;  %695 = vst [vmem:[#allocation3 + $0x418] sm:$0xf] %v10020_v43  ;;  %3604 = vmatmul.mubr.bf16.gmra.mxu0 %v9298_v36  ;;  %14276 = vst [vmem:[#allocation32_spill] sm:$0xff] %v12517_v4  ;;  %3772 = vmatprep.mubr.bf16.mxu1 %v11665_v56 }
  0x78   : > { %v10077_v58 = vpack.c.bf16 %v912_v57, %v912_v57  ;;  %v10048_v1 = vpack.c.bf16 %v723_v59, %v723_v59  ;;  %v12520_v5 = vld [vmem:[%s12269_s27 + $0xe8] sm:$0xff]  ;;  %v2123_v6 = vld [vmem:[#allocation3 + $0x240] sm:$0xff]  ;;  %3611 = vmatprep.mubr.bf16.mxu0 %v11663_v51  ;;  %233 = vst [vmem:[#allocation2 + $0x169] sm:$0xff] %v12517_v4  ;;  %240 = vst [vmem:[#allocation2 + $0x199] sm:$0xff] %v12517_v4 }
  0x79   : > { %v914_v60 = vld [vmem:[#allocation2 + $0x138] sm:$0xff]  ;;  %14277 = vst [vmem:[#allocation33_spill] sm:$0xff] %v12520_v5  ;;  %234 = vst [vmem:[#allocation2 + $0x171] sm:$0xff] %v12520_v5  ;;  %v10022_v8 = vpack.c.bf16 %v12520_v5, %v12520_v5  ;;  %v256_v9 = vld [vmem:[#allocation2 + $0x152] sm:$0x1]  ;;  %v9307_v18 = vcombine.low %v2123_v6, %v2128_v0 }
  0x7a   : > { %v10079_v2 = vpack.c.bf16 %v914_v60, %v914_v60  ;;  %1072 = vst [vmem:[#allocation3 + $0x324] sm:$0xf] %v10077_v58  ;;  %498 = vst [vmem:[#allocation3 + $0x360] sm:$0xf] %v10077_v58  ;;  %v11710_v10 = vld [vmem:[%s14213_s1 + $0x140] sm:$0xff]   ;;  %v11714_v29 = vld [vmem:[%s14213_s1 + $0x1d8] sm:$0xff]  }
  0x7b   : > { %883 = vst [vmem:[#allocation3 + $0x38c] sm:$0xf] %v10048_v1  ;;  %241 = vst [vmem:[#allocation2 + $0x1a1] sm:$0xff] %v12520_v5  ;;  %v11669_v13 = vld [vmem:[#allocation3 + $0x248] ss:$36 sps:$4 sm:$0xff]   ;;  %10773 = vmatprep.subr.bf16.mxu0 %v11710_v10  ;;  %v11711_v23 = vld [vmem:[%s14213_s1 + $0x1a0] sm:$0xff]  }
  0x7c   : > { %1074 = vst [vmem:[#allocation3 + $0x36c] sm:$0xf] %v10079_v2  ;;  %500 = vst [vmem:[#allocation3 + $0x3a8] sm:$0xf] %v10079_v2  ;;  %v11672_v14 = vld [vmem:[#allocation3 + $0x28c] ss:$36 sps:$4 sm:$0xff]   ;;  %10878 = vmatpush3.bf16.msra.mxu1 %v11711_v23 }
  0x7d   : > { %274 = vst [vmem:[#allocation2 + $0x150] sm:$0x1] %v256_v9  ;;  %v725_v15 = vld [vmem:[#allocation2 + $0x142] sm:$0xff]  ;;  %v917_v16 = vld [vmem:[#allocation2 + $0x158] sm:$0xff]  ;;  %696 = vst [vmem:[#allocation3 + $0x43c] sm:$0xf] %v10021_v7  ;;  %10879 = vmatprep.subr.bf16.mxu1 %v11714_v29 }
  0x7e   : > { %v292_v17 = vld [vmem:[#allocation2 + $0x15f] sm:$0x1]  ;;  %697 = vst [vmem:[#allocation3 + $0x460] sm:$0xf] %v10022_v8  ;;  %v11674_v19 = vld [vmem:[#allocation3 + $0x294] ss:$36 sps:$4 sm:$0xff]   ;;  %v10050_v20 = vpack.c.bf16 %v725_v15, %v725_v15  ;;  %v10082_v21 = vpack.c.bf16 %v917_v16, %v917_v16  ;;  %3773 = vmatmul.mubr.bf16.gmra.mxu1 %v11669_v13 }
  0x7f   : > { %310 = vst [vmem:[#allocation2 + $0x161] sm:$0x1] %v292_v17  ;;  %v726_v22 = vld [vmem:[#allocation2 + $0x152] sm:$0xff]  ;;  %v11713_v28 = vld [vmem:[%s14213_s1 + $0x100] sm:$0xff]   ;;  %3612 = vmatmul.mubr.bf16.gmra.mxu0 %v9307_v18  ;;  %3780 = vmatprep.mubr.bf16.mxu1 %v11674_v19  ;;  %v257_v56 = vld [vmem:[#allocation2 + $0x16a] sm:$0x1] }
  0x80   : > { %v10051_v24 = vpack.c.bf16 %v726_v22, %v726_v22  ;;  %885 = vst [vmem:[#allocation3 + $0x3d4] sm:$0xf] %v10050_v20  ;;  %1077 = vst [vmem:[#allocation3 + $0x3d8] sm:$0xf] %v10082_v21  ;;  %10774 = vmatpush3.bf16.msra.mxu0 %v11713_v28  ;;  %v2133_v31 = vld [vmem:[#allocation3 + $0x288] sm:$0xff]  ;;  %3619 = vmatprep.mubr.bf16.mxu0 %v11672_v14  ;;  %v919_v58 = vld [vmem:[#allocation2 + $0x170] sm:$0xff] }
  0x81   : > { %503 = vst [vmem:[#allocation3 + $0x414] sm:$0xf] %v10082_v21  ;;  %v2138_v36 = vld [vmem:[#allocation3 + $0x2ac] sm:$0xff]  ;;  %v11677_v43 = vld [vmem:[#allocation3 + $0x2d4] ss:$36 sps:$4 sm:$0xff]   ;;  %v10084_v0 = vpack.c.bf16 %v919_v58, %v919_v58  ;;  %v11716_v3 = vld [vmem:[%s14213_s1 + $0x1d0] sm:$0xff]  }
  0x82   : > { %886 = vst [vmem:[#allocation3 + $0x3f8] sm:$0xf] %v10051_v24  ;;  %v11676_v39 = vld [vmem:[#allocation3 + $0x290] ss:$36 sps:$4 sm:$0xff]   ;;  %v9316_v59 = vcombine.low %v2133_v31, %v2138_v36  ;;  %275 = vst [vmem:[#allocation2 + $0x168] sm:$0x1] %v257_v56 }
  0x83   : > { %v11715_v1 = vld [vmem:[%s14213_s1 + $0x198] sm:$0xff]   ;;  %v11679_v2 = vld [vmem:[#allocation3 + $0x2dc] ss:$36 sps:$4 sm:$0xff]   ;;  %1079 = vst [vmem:[#allocation3 + $0x420] sm:$0xf] %v10084_v0  ;;  %v2143_v7 = vld [vmem:[#allocation3 + $0x2d0] sm:$0xff] }
  0x84   : > { %v916_v38 = vld [vmem:[#allocation2 + $0x150] sm:$0xff]  ;;  %10880 = vmatpush3.bf16.msra.mxu1 %v11715_v1  ;;  %505 = vst [vmem:[#allocation3 + $0x45c] sm:$0xf] %v10084_v0  ;;  %v2148_v8 = vld [vmem:[#allocation3 + $0x2f4] sm:$0xff]  ;;  %v12552_v9 = vld [vmem:[%s12269_s27 + $0xf8] sm:$0xff] }
  0x85   : > { %v10081_v51 = vpack.c.bf16 %v916_v38, %v916_v38  ;;  %v12549_v6 = vld [vmem:[%s12269_s27 + $0xf0] sm:$0xff]  ;;  %14279 = vst [vmem:[#allocation35_spill] sm:$0xff] %v12552_v9  ;;  %10881 = vmatprep.subr.bf16.mxu1 %v11716_v3  ;;  %236 = vst [vmem:[#allocation2 + $0x189] sm:$0xff] %v12552_v9  ;;  %v11723_v16 = vld [vmem:[%s14213_s1 + $0x1c8] sm:$0xff]   ;;  %v9325_v19 = vcombine.low %v2143_v7, %v2148_v8  ;;  %s14143_s27 = scalar_lea.vmem %s14215_s3, %s9957_s18 }
  0x86   : > { %v727_v57 = vld [vmem:[#allocation2 + $0x15a] sm:$0xff]  ;;  %14278 = vst [vmem:[#allocation34_spill] sm:$0xff] %v12549_v6  ;;  %235 = vst [vmem:[#allocation2 + $0x181] sm:$0xff] %v12549_v6  ;;  %v293_v10 = vld [vmem:[#allocation2 + $0x177] sm:$0x1]  ;;  %3781 = vmatmul.mubr.bf16.gmra.mxu1 %v11676_v39 }
  0x87   : > { %v10052_v60 = vpack.c.bf16 %v727_v57, %v727_v57  ;;  %1076 = vst [vmem:[#allocation3 + $0x3b4] sm:$0xf] %v10081_v51  ;;  %502 = vst [vmem:[#allocation3 + $0x3f0] sm:$0xf] %v10081_v51  ;;  %v728_v13 = vld [vmem:[#allocation2 + $0x16a] sm:$0xff]  ;;  %3620 = vmatmul.mubr.bf16.gmra.mxu0 %v9316_v59  ;;  %3788 = vmatprep.mubr.bf16.mxu1 %v11679_v2  ;;  %v11725_v28 = vld [vmem:[%s14213_s1 + $0x1c0] sm:$0xff]  }
  0x88   : > { %311 = vst [vmem:[#allocation2 + $0x179] sm:$0x1] %v293_v10  ;;  %v10053_v14 = vpack.c.bf16 %v728_v13, %v728_v13  ;;  %v11721_v15 = vld [vmem:[%s14213_s1 + $0x190] sm:$0xff]   ;;  %3627 = vmatprep.mubr.bf16.mxu0 %v11677_v43  ;;  %v11724_v17 = vld [vmem:[%s14213_s1 + $0x188] sm:$0xff]   ;;  %v1082_v39 = vld [vmem:[#allocation2 + $0x19] sm:$0xff] }
  0x89   : > { %887 = vst [vmem:[#allocation3 + $0x41c] sm:$0xf] %v10052_v60  ;;  %10882 = vmatpush3.bf16.msra.mxu1 %v11721_v15  ;;  %v918_v18 = vld [vmem:[#allocation2 + $0x168] sm:$0xff]  ;;  %v11688_v23 = vld [vmem:[#allocation3 + $0x324] ss:$36 sps:$4 sm:$0xff]   ;;  %v10087_v57 = vpack.c.bf16 %v1082_v39, %v1082_v39  ;;  %v11728_v2 = vld [vmem:[%s14213_s1 + $0x180] sm:$0xff]  }
  0x8a   : > { %888 = vst [vmem:[#allocation3 + $0x440] sm:$0xf] %v10053_v14  ;;  %10883 = vmatprep.subr.bf16.mxu1 %v11723_v16  ;;  %v10083_v20 = vpack.c.bf16 %v918_v18, %v918_v18  ;;  %v11683_v21 = vld [vmem:[#allocation3 + $0x2d8] ss:$36 sps:$4 sm:$0xff]   ;;  %v1274_v58 = vld [vmem:[#allocation2 + $0x1a] sm:$0xff]  ;;  %v1467_v7 = vld [vmem:[#allocation2 + $0x30] sm:$0xff] }
  0x8b   : > { %v11686_v22 = vld [vmem:[#allocation3 + $0x31c] ss:$36 sps:$4 sm:$0xff]   ;;  %v1083_v56 = vld [vmem:[#allocation2 + $0x21] sm:$0xff]  ;;  %v10119_v0 = vpack.c.bf16 %v1274_v58, %v1274_v58  ;;  %1242 = vst [vmem:[#allocation3 + $0x10] sm:$0xf] %v10087_v57  ;;  %v12574_v3 = vld [vmem:[%s14213_s1 + $0x238] sm:$0xff]   ;;  %v10151_v14 = vpack.c.bf16 %v1467_v7, %v1467_v7 }
  0x8c   : > { %1078 = vst [vmem:[#allocation3 + $0x3fc] sm:$0xf] %v10083_v20  ;;  %504 = vst [vmem:[#allocation3 + $0x438] sm:$0xf] %v10083_v20  ;;  %v2153_v29 = vld [vmem:[#allocation3 + $0x318] sm:$0xff]  ;;  %v10088_v60 = vpack.c.bf16 %v1083_v56, %v1083_v56  ;;  %v1468_v8 = vld [vmem:[#allocation2 + $0x38] sm:$0xff]  ;;  %11479 = vmatprep.subr.bf16.mxu0 %v12574_v3 }
  0x8d   : > { %v258_v24 = vld [vmem:[#allocation2 + $0x182] sm:$0x1]  ;;  %10884 = vmatpush3.bf16.msra.mxu1 %v11724_v17  ;;  %v2158_v31 = vld [vmem:[#allocation3 + $0x33c] sm:$0xff]  ;;  %1434 = vst [vmem:[#allocation3 + $0x14] sm:$0xf] %v10119_v0  ;;  %v10152_v15 = vpack.c.bf16 %v1468_v8, %v1468_v8  ;;  %v1660_v16 = vld [vmem:[#allocation2 + $0x39] sm:$0xff] }
  0x8e   : > { %276 = vst [vmem:[#allocation2 + $0x180] sm:$0x1] %v258_v24  ;;  %v921_v38 = vld [vmem:[#allocation2 + $0x188] sm:$0xff]  ;;  %10885 = vmatprep.subr.bf16.mxu1 %v11725_v28  ;;  %3789 = vmatmul.mubr.bf16.gmra.mxu1 %v11683_v21  ;;  %1243 = vst [vmem:[#allocation3 + $0x34] sm:$0xf] %v10088_v60  ;;  %v1659_v10 = vld [vmem:[#allocation2 + $0x31] sm:$0xff]  ;;  %v9334_v13 = vcombine.low %v2153_v29, %v2158_v31 }
  0x8f   : > { %v729_v36 = vld [vmem:[#allocation2 + $0x172] sm:$0xff]  ;;  %3628 = vmatmul.mubr.bf16.gmra.mxu0 %v9325_v19  ;;  %v10086_v51 = vpack.c.bf16 %v921_v38, %v921_v38  ;;  %v1275_v59 = vld [vmem:[#allocation2 + $0x22] sm:$0xff]  ;;  %3796 = vmatprep.mubr.bf16.mxu1 %v11688_v23  ;;  %v10183_v17 = vpack.c.bf16 %v1659_v10, %v1659_v10  ;;  %v1277_v19 = vld [vmem:[#allocation2 + $0x3a] sm:$0xff]  ;;  %1627 = vst [vmem:[#allocation3 + $0x18] sm:$0xf] %v10151_v14 }
  0x90   : > { %v10054_v43 = vpack.c.bf16 %v729_v36, %v729_v36  ;;  %3635 = vmatprep.mubr.bf16.mxu0 %v11686_v22  ;;  %v10120_v1 = vpack.c.bf16 %v1275_v59, %v1275_v59  ;;  %v1276_v18 = vld [vmem:[#allocation2 + $0x32] sm:$0xff]  ;;  %v10184_v22 = vpack.c.bf16 %v1660_v16, %v1660_v16  ;;  %v10122_v24 = vpack.c.bf16 %v1277_v19, %v1277_v19  ;;  %v11693_v28 = vld [vmem:[#allocation3 + $0x36c] ss:$36 sps:$4 sm:$0xff]   ;;  %v1469_v39 = vld [vmem:[#allocation2 + $0x48] sm:$0xff] }
  0x91   : > { %1081 = vst [vmem:[#allocation3 + $0x468] sm:$0xf] %v10086_v51  ;;  %10886 = vmatpush3.bf16.msra.mxu1 %v11728_v2  ;;  %v11690_v20 = vld [vmem:[#allocation3 + $0x320] ss:$36 sps:$4 sm:$0xff]   ;;  %v10121_v23 = vpack.c.bf16 %v1276_v18, %v1276_v18  ;;  %1628 = vst [vmem:[#allocation3 + $0x3c] sm:$0xf] %v10152_v15  ;;  %v10153_v56 = vpack.c.bf16 %v1469_v39, %v1469_v39 }
  0x92   : > { %889 = vst [vmem:[#allocation3 + $0x464] sm:$0xf] %v10054_v43  ;;  %1435 = vst [vmem:[#allocation3 + $0x38] sm:$0xf] %v10120_v1  ;;  %v11691_v21 = vld [vmem:[#allocation3 + $0x364] ss:$36 sps:$4 sm:$0xff]  }
  0x93   : > { %1819 = vst [vmem:[#allocation3 + $0x1c] sm:$0xf] %v10183_v17  ;;  %1244 = vst [vmem:[#allocation3 + $0x58] sm:$0xf] %v10183_v17  ;;  %v2163_v29 = vld [vmem:[#allocation3 + $0x360] sm:$0xff]  ;;  %v1472_v15 = vld [vmem:[#allocation2 + $0x68] sm:$0xff] }
  0x94   : > { %v2168_v31 = vld [vmem:[#allocation3 + $0x384] sm:$0xff]  ;;  %1820 = vst [vmem:[#allocation3 + $0x40] sm:$0xf] %v10184_v22  ;;  %1245 = vst [vmem:[#allocation3 + $0x7c] sm:$0xf] %v10184_v22  ;;  %v1661_v51 = vld [vmem:[#allocation2 + $0x49] sm:$0xff]  ;;  %v10156_v19 = vpack.c.bf16 %v1472_v15, %v1472_v15 }
  0x95   : > { %v920_v36 = vld [vmem:[#allocation2 + $0x180] sm:$0xff]  ;;  %1436 = vst [vmem:[#allocation3 + $0x5c] sm:$0xf] %v10121_v23  ;;  %1437 = vst [vmem:[#allocation3 + $0x80] sm:$0xf] %v10122_v24  ;;  %v1470_v43 = vld [vmem:[#allocation2 + $0x50] sm:$0xff]  ;;  %v10185_v59 = vpack.c.bf16 %v1661_v51, %v1661_v51  ;;  %v9343_v14 = vcombine.low %v2163_v29, %v2168_v31 }
  0x96   : > { %v10085_v38 = vpack.c.bf16 %v920_v36, %v920_v36  ;;  %v10154_v57 = vpack.c.bf16 %v1470_v43, %v1470_v43  ;;  %v1662_v58 = vld [vmem:[#allocation2 + $0x51] sm:$0xff]  ;;  %3797 = vmatmul.mubr.bf16.gmra.mxu1 %v11690_v20  ;;  %1629 = vst [vmem:[#allocation3 + $0x60] sm:$0xf] %v10153_v56  ;;  %v11700_v10 = vld [vmem:[#allocation3 + $0x3ac] ss:$36 sps:$4 sm:$0xff]   ;;  %v1664_v18 = vld [vmem:[#allocation2 + $0x69] sm:$0xff] }
  0x97   : > { %3636 = vmatmul.mubr.bf16.gmra.mxu0 %v9334_v13  ;;  %v1278_v60 = vld [vmem:[#allocation2 + $0x4a] sm:$0xff]  ;;  %v1279_v0 = vld [vmem:[#allocation2 + $0x52] sm:$0xff]  ;;  %v10186_v1 = vpack.c.bf16 %v1662_v58, %v1662_v58  ;;  %3804 = vmatprep.mubr.bf16.mxu1 %v11693_v28  ;;  %1821 = vst [vmem:[#allocation3 + $0x64] sm:$0xf] %v10185_v59  ;;  %1246 = vst [vmem:[#allocation3 + $0xa0] sm:$0xf] %v10185_v59 }
  0x98   : > { %3643 = vmatprep.mubr.bf16.mxu0 %v11691_v21  ;;  %1080 = vst [vmem:[#allocation3 + $0x444] sm:$0xf] %v10085_v38  ;;  %v10123_v2 = vpack.c.bf16 %v1278_v60, %v1278_v60  ;;  %v10124_v7 = vpack.c.bf16 %v1279_v0, %v1279_v0  ;;  %1630 = vst [vmem:[#allocation3 + $0x84] sm:$0xf] %v10154_v57  ;;  %v11697_v8 = vld [vmem:[#allocation3 + $0x368] ss:$36 sps:$4 sm:$0xff]   ;;  %v10188_v21 = vpack.c.bf16 %v1664_v18, %v1664_v18 }
  0x99   : > { %1822 = vst [vmem:[#allocation3 + $0x88] sm:$0xf] %v10186_v1  ;;  %1247 = vst [vmem:[#allocation3 + $0xc4] sm:$0xf] %v10186_v1  ;;  %v1471_v13 = vld [vmem:[#allocation2 + $0x60] sm:$0xff]  ;;  %v1281_v23 = vld [vmem:[#allocation2 + $0x6a] sm:$0xff] }
  0x9a   : > { %1438 = vst [vmem:[#allocation3 + $0xa4] sm:$0xf] %v10123_v2  ;;  %1439 = vst [vmem:[#allocation3 + $0xc8] sm:$0xf] %v10124_v7  ;;  %v10155_v16 = vpack.c.bf16 %v1471_v13, %v1471_v13  ;;  %v1663_v17 = vld [vmem:[#allocation2 + $0x61] sm:$0xff]  ;;  %v10126_v36 = vpack.c.bf16 %v1281_v23, %v1281_v23  ;;  %v2173_v31 = vld [vmem:[#allocation3 + $0x3a8] sm:$0xff] }
  0x9b   : > { %v10187_v20 = vpack.c.bf16 %v1663_v17, %v1663_v17  ;;  %v1280_v22 = vld [vmem:[#allocation2 + $0x62] sm:$0xff]  ;;  %1632 = vst [vmem:[#allocation3 + $0xcc] sm:$0xf] %v10156_v19  ;;  %1824 = vst [vmem:[#allocation3 + $0xd0] sm:$0xf] %v10188_v21  ;;  %v1473_v38 = vld [vmem:[#allocation2 + $0x78] sm:$0xff] }
  0x9c   : > { %v11702_v24 = vld [vmem:[#allocation3 + $0x3b4] ss:$36 sps:$4 sm:$0xff]   ;;  %1631 = vst [vmem:[#allocation3 + $0xa8] sm:$0xf] %v10155_v16  ;;  %v10125_v28 = vpack.c.bf16 %v1280_v22, %v1280_v22  ;;  %1249 = vst [vmem:[#allocation3 + $0x10c] sm:$0xf] %v10188_v21  ;;  %v10157_v39 = vpack.c.bf16 %v1473_v38, %v1473_v38 }
  0x9d   : > { %1823 = vst [vmem:[#allocation3 + $0xac] sm:$0xf] %v10187_v20  ;;  %1248 = vst [vmem:[#allocation3 + $0xe8] sm:$0xf] %v10187_v20  ;;  %v2178_v29 = vld [vmem:[#allocation3 + $0x3cc] sm:$0xff]  ;;  %v1475_v16 = vld [vmem:[#allocation2 + $0x90] sm:$0xff] }
  0x9e   : > { %1440 = vst [vmem:[#allocation3 + $0xec] sm:$0xf] %v10125_v28  ;;  %1441 = vst [vmem:[#allocation3 + $0x110] sm:$0xf] %v10126_v36  ;;  %3805 = vmatmul.mubr.bf16.gmra.mxu1 %v11697_v8  ;;  %v11704_v43 = vld [vmem:[#allocation3 + $0x3b0] ss:$36 sps:$4 sm:$0xff]   ;;  %v9352_v51 = vcombine.low %v2173_v31, %v2178_v29  ;;  %v10159_v18 = vpack.c.bf16 %v1475_v16, %v1475_v16 }
  0x9f   : > { %3644 = vmatmul.mubr.bf16.gmra.mxu0 %v9343_v14  ;;  %3812 = vmatprep.mubr.bf16.mxu1 %v11702_v24  ;;  %v11706_v56 = vld [vmem:[#allocation3 + $0x3f4] ss:$36 sps:$4 sm:$0xff]   ;;  %1633 = vst [vmem:[#allocation3 + $0xf0] sm:$0xf] %v10157_v39  ;;  %v1665_v58 = vld [vmem:[#allocation2 + $0x79] sm:$0xff]  ;;  %v1667_v19 = vld [vmem:[#allocation2 + $0x91] sm:$0xff] }
  0xa0   : > { %3651 = vmatprep.mubr.bf16.mxu0 %v11700_v10  ;;  %v1474_v57 = vld [vmem:[#allocation2 + $0x80] sm:$0xff]  ;;  %v10189_v0 = vpack.c.bf16 %v1665_v58, %v1665_v58  ;;  %v11708_v7 = vld [vmem:[#allocation3 + $0x3fc] ss:$36 sps:$4 sm:$0xff]   ;;  %v1476_v17 = vld [vmem:[#allocation2 + $0x98] sm:$0xff]  ;;  %v10191_v24 = vpack.c.bf16 %v1667_v19, %v1667_v19  ;;  %1635 = vst [vmem:[#allocation3 + $0x138] sm:$0xf] %v10159_v18 }
  0xa1   : > { %v10158_v59 = vpack.c.bf16 %v1474_v57, %v1474_v57  ;;  %v1666_v60 = vld [vmem:[#allocation2 + $0x81] sm:$0xff]  ;;  %v1668_v20 = vld [vmem:[#allocation2 + $0x99] sm:$0xff]  ;;  %v11717_v22 = vld [vmem:[#allocation3 + $0x43c] ss:$36 sps:$4 sm:$0xff]   ;;  %v10160_v23 = vpack.c.bf16 %v1476_v17, %v1476_v17 }
  0xa2   : > { %v1282_v1 = vld [vmem:[#allocation2 + $0x7a] sm:$0xff]  ;;  %v1283_v2 = vld [vmem:[#allocation2 + $0x82] sm:$0xff]  ;;  %v10190_v13 = vpack.c.bf16 %v1666_v60, %v1666_v60  ;;  %1825 = vst [vmem:[#allocation3 + $0xf4] sm:$0xf] %v10189_v0  ;;  %1250 = vst [vmem:[#allocation3 + $0x130] sm:$0xf] %v10189_v0  ;;  %v10192_v28 = vpack.c.bf16 %v1668_v20, %v1668_v20 }
  0xa3   : > { %v10127_v14 = vpack.c.bf16 %v1282_v1, %v1282_v1  ;;  %v10128_v8 = vpack.c.bf16 %v1283_v2, %v1283_v2  ;;  %1634 = vst [vmem:[#allocation3 + $0x114] sm:$0xf] %v10158_v59  ;;  %v2188_v10 = vld [vmem:[#allocation3 + $0x414] sm:$0xff]  ;;  %v1284_v36 = vld [vmem:[#allocation2 + $0x92] sm:$0xff]  ;;  %v1285_v29 = vld [vmem:[#allocation2 + $0x9a] sm:$0xff] }
  0xa4   : > { %1826 = vst [vmem:[#allocation3 + $0x118] sm:$0xf] %v10190_v13  ;;  %1251 = vst [vmem:[#allocation3 + $0x154] sm:$0xf] %v10190_v13  ;;  %v2183_v15 = vld [vmem:[#allocation3 + $0x3f0] sm:$0xff]  ;;  %v1477_v31 = vld [vmem:[#allocation2 + $0xa8] sm:$0xff]  ;;  %v10129_v39 = vpack.c.bf16 %v1284_v36, %v1284_v36 }
  0xa5   : > { %1442 = vst [vmem:[#allocation3 + $0x134] sm:$0xf] %v10127_v14  ;;  %1443 = vst [vmem:[#allocation3 + $0x158] sm:$0xf] %v10128_v8  ;;  %v11712_v21 = vld [vmem:[#allocation3 + $0x3f8] ss:$36 sps:$4 sm:$0xff]   ;;  %v9361_v38 = vcombine.low %v2183_v15, %v2188_v10 }
  0xa6   : > { %3813 = vmatmul.mubr.bf16.gmra.mxu1 %v11704_v43  ;;  %v10130_v43 = vpack.c.bf16 %v1285_v29, %v1285_v29  ;;  %v1669_v57 = vld [vmem:[#allocation2 + $0xa9] sm:$0xff]  ;;  %v1670_v58 = vld [vmem:[#allocation2 + $0xb1] sm:$0xff]  ;;  %1636 = vst [vmem:[#allocation3 + $0x15c] sm:$0xf] %v10160_v23  ;;  %1827 = vst [vmem:[#allocation3 + $0x13c] sm:$0xf] %v10191_v24 }
  0xa7   : > { %3652 = vmatmul.mubr.bf16.gmra.mxu0 %v9352_v51  ;;  %3820 = vmatprep.mubr.bf16.mxu1 %v11708_v7  ;;  %v1478_v51 = vld [vmem:[#allocation2 + $0xb0] sm:$0xff]  ;;  %1828 = vst [vmem:[#allocation3 + $0x160] sm:$0xf] %v10192_v28  ;;  %1252 = vst [vmem:[#allocation3 + $0x178] sm:$0xf] %v10191_v24  ;;  %v10193_v60 = vpack.c.bf16 %v1669_v57, %v1669_v57  ;;  %v10194_v0 = vpack.c.bf16 %v1670_v58, %v1670_v58  ;;  %v2193_v10 = vld [vmem:[#allocation3 + $0x438] sm:$0xff] }
  0xa8   : > { %3659 = vmatprep.mubr.bf16.mxu0 %v11706_v56  ;;  %v10161_v56 = vpack.c.bf16 %v1477_v31, %v1477_v31  ;;  %1253 = vst [vmem:[#allocation3 + $0x19c] sm:$0xf] %v10192_v28  ;;  %v10162_v59 = vpack.c.bf16 %v1478_v51, %v1478_v51  ;;  %v1286_v1 = vld [vmem:[#allocation2 + $0xaa] sm:$0xff]  ;;  %v1287_v2 = vld [vmem:[#allocation2 + $0xb2] sm:$0xff]  ;;  %1444 = vst [vmem:[#allocation3 + $0x17c] sm:$0xf] %v10129_v39 }
  0xa9   : > { %v11719_v7 = vld [vmem:[#allocation3 + $0x444] ss:$36 sps:$4 sm:$0xff]   ;;  %1445 = vst [vmem:[#allocation3 + $0x1a0] sm:$0xf] %v10130_v43  ;;  %v10131_v13 = vpack.c.bf16 %v1286_v1, %v1286_v1  ;;  %v10132_v14 = vpack.c.bf16 %v1287_v2, %v1287_v2  ;;  %1829 = vst [vmem:[#allocation3 + $0x184] sm:$0xf] %v10193_v60 }
  0xaa   : > { %1637 = vst [vmem:[#allocation3 + $0x180] sm:$0xf] %v10161_v56  ;;  %1638 = vst [vmem:[#allocation3 + $0x1a4] sm:$0xf] %v10162_v59  ;;  %v2198_v8 = vld [vmem:[#allocation3 + $0x45c] sm:$0xff]  ;;  %v1479_v15 = vld [vmem:[#allocation2 + $0xc0] sm:$0xff] }
  0xab   : > { %1830 = vst [vmem:[#allocation3 + $0x1a8] sm:$0xf] %v10194_v0  ;;  %1254 = vst [vmem:[#allocation3 + $0x1c0] sm:$0xf] %v10193_v60  ;;  %v1480_v16 = vld [vmem:[#allocation2 + $0xc8] sm:$0xff]  ;;  %v10163_v17 = vpack.c.bf16 %v1479_v15, %v1479_v15  ;;  %v1481_v31 = vld [vmem:[#allocation2 + $0xd8] sm:$0xff]  ;;  %v9370_v39 = vcombine.low %v2193_v10, %v2198_v8 }
  0xac   : > { %1255 = vst [vmem:[#allocation3 + $0x1e4] sm:$0xf] %v10194_v0  ;;  %1446 = vst [vmem:[#allocation3 + $0x1c4] sm:$0xf] %v10131_v13  ;;  %v10164_v18 = vpack.c.bf16 %v1480_v16, %v1480_v16  ;;  %v1671_v19 = vld [vmem:[#allocation2 + $0xc1] sm:$0xff]  ;;  %v1672_v20 = vld [vmem:[#allocation2 + $0xc9] sm:$0xff] }
  0xad   : > { %1447 = vst [vmem:[#allocation3 + $0x1e8] sm:$0xf] %v10132_v14  ;;  %v1288_v23 = vld [vmem:[#allocation2 + $0xc2] sm:$0xff]  ;;  %v10195_v24 = vpack.c.bf16 %v1671_v19, %v1671_v19  ;;  %v10196_v28 = vpack.c.bf16 %v1672_v20, %v1672_v20  ;;  %v1289_v36 = vld [vmem:[#allocation2 + $0xca] sm:$0xff]  ;;  %1639 = vst [vmem:[#allocation3 + $0x1c8] sm:$0xf] %v10163_v17 }
  0xae   : > { %3821 = vmatmul.mubr.bf16.gmra.mxu1 %v11712_v21  ;;  %v10133_v29 = vpack.c.bf16 %v1288_v23, %v1288_v23  ;;  %v11726_v43 = vld [vmem:[#allocation3 + $0x14] ss:$36 sps:$4 sm:$0xff]   ;;  %1640 = vst [vmem:[#allocation3 + $0x1ec] sm:$0xf] %v10164_v18  ;;  %v10134_v21 = vpack.c.bf16 %v1289_v36, %v1289_v36  ;;  %v11722_v56 = vld [vmem:[#allocation3 + $0x440] ss:$36 sps:$4 sm:$0xff]  }
  0xaf   : > { %3660 = vmatmul.mubr.bf16.gmra.mxu0 %v9361_v38  ;;  %3828 = vmatprep.mubr.bf16.mxu1 %v11719_v7  ;;  %v1482_v38 = vld [vmem:[#allocation2 + $0xe0] sm:$0xff]  ;;  %1831 = vst [vmem:[#allocation3 + $0x1cc] sm:$0xf] %v10195_v24  ;;  %1832 = vst [vmem:[#allocation3 + $0x1f0] sm:$0xf] %v10196_v28  ;;  %v1483_v14 = vld [vmem:[#allocation2 + $0xf0] sm:$0xff] }
  0xb0   : > { %3667 = vmatprep.mubr.bf16.mxu0 %v11717_v22  ;;  %v10165_v22 = vpack.c.bf16 %v1481_v31, %v1481_v31  ;;  %v10166_v51 = vpack.c.bf16 %v1482_v38, %v1482_v38  ;;  %1256 = vst [vmem:[#allocation3 + $0x208] sm:$0xf] %v10195_v24  ;;  %1257 = vst [vmem:[#allocation3 + $0x22c] sm:$0xf] %v10196_v28  ;;  %v11731_v57 = vld [vmem:[#allocation3 + $0x1c] ss:$36 sps:$4 sm:$0xff]   ;;  %v10167_v10 = vpack.c.bf16 %v1483_v14, %v1483_v14 }
  0xb1   : > { %1448 = vst [vmem:[#allocation3 + $0x20c] sm:$0xf] %v10133_v29  ;;  %1449 = vst [vmem:[#allocation3 + $0x230] sm:$0xf] %v10134_v21  ;;  %v1673_v58 = vld [vmem:[#allocation2 + $0xd9] sm:$0xff]  ;;  %v1674_v59 = vld [vmem:[#allocation2 + $0xe1] sm:$0xff] }
  0xb2   : > { %1641 = vst [vmem:[#allocation3 + $0x210] sm:$0xf] %v10165_v22  ;;  %1642 = vst [vmem:[#allocation3 + $0x234] sm:$0xf] %v10166_v51  ;;  %v10197_v60 = vpack.c.bf16 %v1673_v58, %v1673_v58  ;;  %v10198_v0 = vpack.c.bf16 %v1674_v59, %v1674_v59  ;;  %v1290_v1 = vld [vmem:[#allocation2 + $0xda] sm:$0xff]  ;;  %v1291_v2 = vld [vmem:[#allocation2 + $0xe2] sm:$0xff] }
  0xb3   : > { %v10135_v7 = vpack.c.bf16 %v1290_v1, %v1290_v1  ;;  %v10136_v13 = vpack.c.bf16 %v1291_v2, %v1291_v2  ;;  %v11730_v8 = vld [vmem:[#allocation3 + $0x10] ss:$36 sps:$4 sm:$0xff]   ;;  %v11733_v15 = vld [vmem:[#allocation3 + $0x18] ss:$36 sps:$4 sm:$0xff]   ;;  %v11742_v16 = vld [vmem:[%s14213_s1 + $0x230] sm:$0xff]  }
  0xb4   : > { %1833 = vst [vmem:[#allocation3 + $0x214] sm:$0xf] %v10197_v60  ;;  %1834 = vst [vmem:[#allocation3 + $0x238] sm:$0xf] %v10198_v0  ;;  %v11734_v17 = vld [vmem:[#allocation3 + $0x5c] ss:$36 sps:$4 sm:$0xff]  }
  0xb5   : > { %1258 = vst [vmem:[#allocation3 + $0x250] sm:$0xf] %v10197_v60  ;;  %1259 = vst [vmem:[#allocation3 + $0x274] sm:$0xf] %v10198_v0  ;;  %v11737_v18 = vld [vmem:[#allocation3 + $0x64] ss:$36 sps:$4 sm:$0xff]  }
  0xb6   : > { %3829 = vmatmul.mubr.bf16.gmra.mxu1 %v11722_v56  ;;  %1450 = vst [vmem:[#allocation3 + $0x254] sm:$0xf] %v10135_v7  ;;  %1451 = vst [vmem:[#allocation3 + $0x278] sm:$0xf] %v10136_v13  ;;  %v1484_v19 = vld [vmem:[#allocation2 + $0xf8] sm:$0xff]  ;;  %v12583_v36 = vld [vmem:[%s14213_s1 + $0x228] sm:$0xff]  }
  0xb7   : > { %3668 = vmatmul.mubr.bf16.gmra.mxu0 %v9370_v39  ;;  %4030 = vmatprep.mubr.bf16.mxu1 %v11731_v57  ;;  %1643 = vst [vmem:[#allocation3 + $0x258] sm:$0xf] %v10167_v10  ;;  %v10168_v20 = vpack.c.bf16 %v1484_v19, %v1484_v19  ;;  %v1675_v23 = vld [vmem:[#allocation2 + $0xf1] sm:$0xff]  ;;  %v1676_v24 = vld [vmem:[#allocation2 + $0xf9] sm:$0xff]  ;;  %v1677_v57 = vld [vmem:[#allocation2 + $0x109] sm:$0xff] }
  0xb8   : > { %3869 = vmatprep.mubr.bf16.mxu0 %v11726_v43  ;;  %v1292_v28 = vld [vmem:[#allocation2 + $0xf2] sm:$0xff]  ;;  %v10199_v29 = vpack.c.bf16 %v1675_v23, %v1675_v23  ;;  %v10200_v31 = vpack.c.bf16 %v1676_v24, %v1676_v24  ;;  %v1293_v38 = vld [vmem:[#allocation2 + $0xfa] sm:$0xff]  ;;  %v1485_v43 = vld [vmem:[#allocation2 + $0x108] sm:$0xff]  ;;  %v10201_v60 = vpack.c.bf16 %v1677_v57, %v1677_v57 }
  0xb9   : > { %v10137_v39 = vpack.c.bf16 %v1292_v28, %v1292_v28  ;;  %v1486_v21 = vld [vmem:[#allocation2 + $0x110] sm:$0xff]  ;;  %1644 = vst [vmem:[#allocation3 + $0x27c] sm:$0xf] %v10168_v20  ;;  %v10138_v22 = vpack.c.bf16 %v1293_v38, %v1293_v38  ;;  %v10169_v51 = vpack.c.bf16 %v1485_v43, %v1485_v43  ;;  %v11768_v10 = vld [vmem:[%s14213_s1 + $0x220] sm:$0xff]  }
  0xba   : > { %v10170_v56 = vpack.c.bf16 %v1486_v21, %v1486_v21  ;;  %v1678_v58 = vld [vmem:[#allocation2 + $0x111] sm:$0xff]  ;;  %1835 = vst [vmem:[#allocation3 + $0x25c] sm:$0xf] %v10199_v29  ;;  %1836 = vst [vmem:[#allocation3 + $0x280] sm:$0xf] %v10200_v31  ;;  %v1680_v23 = vld [vmem:[#allocation2 + $0x129] sm:$0xff] }
  0xbb   : > { %v1294_v59 = vld [vmem:[#allocation2 + $0x10a] sm:$0xff]  ;;  %1260 = vst [vmem:[#allocation3 + $0x298] sm:$0xf] %v10199_v29  ;;  %1261 = vst [vmem:[#allocation3 + $0x2bc] sm:$0xf] %v10200_v31  ;;  %v10202_v0 = vpack.c.bf16 %v1678_v58, %v1678_v58  ;;  %v1295_v1 = vld [vmem:[#allocation2 + $0x112] sm:$0xff] }
  0xbc   : > { %1452 = vst [vmem:[#allocation3 + $0x29c] sm:$0xf] %v10137_v39  ;;  %v10139_v2 = vpack.c.bf16 %v1294_v59, %v1294_v59  ;;  %2027 = vst [vmem:[#allocation3 + $0x260] sm:$0xf] %v10137_v39  ;;  %v10140_v7 = vpack.c.bf16 %v1295_v1, %v1295_v1  ;;  %v11739_v13 = vld [vmem:[#allocation3 + $0x60] ss:$36 sps:$4 sm:$0xff]  }
  0xbd   : > { %1453 = vst [vmem:[#allocation3 + $0x2c0] sm:$0xf] %v10138_v22  ;;  %1645 = vst [vmem:[#allocation3 + $0x2a0] sm:$0xf] %v10169_v51  ;;  %v11740_v14 = vld [vmem:[#allocation3 + $0xa4] ss:$36 sps:$4 sm:$0xff]  }
  0xbe   : > { %4031 = vmatmul.mubr.bf16.vlgmr.msra.gmra.mxu1 %v11733_v15  ;;  %1646 = vst [vmem:[#allocation3 + $0x2c4] sm:$0xf] %v10170_v56  ;;  %2028 = vst [vmem:[#allocation3 + $0x284] sm:$0xf] %v10138_v22  ;;  %v1487_v15 = vld [vmem:[#allocation2 + $0x120] sm:$0xff]  ;;  %v1297_v29 = vld [vmem:[#allocation2 + $0x12a] sm:$0xff] }
  0xbf   : > { %3870 = vmatmul.mubr.bf16.vlgmr.msra.gmra.mxu0 %v11730_v8  ;;  %4038 = vmatprep.mubr.bf16.mxu1 %v11737_v18  ;;  %1837 = vst [vmem:[#allocation3 + $0x2a4] sm:$0xf] %v10201_v60  ;;  %1838 = vst [vmem:[#allocation3 + $0x2c8] sm:$0xf] %v10202_v0  ;;  %v11744_v8 = vld [vmem:[#allocation3 + $0xac] ss:$36 sps:$4 sm:$0xff]   ;;  %v10171_v19 = vpack.c.bf16 %v1487_v15, %v1487_v15  ;;  %v10142_v38 = vpack.c.bf16 %v1297_v29, %v1297_v29 }
  0xc0   : > { %11480 = vmatpush3.bf16.msra.mxu0 %v12574_v3  ;;  %3877 = vmatprep.mubr.bf16.mxu0 %v11734_v17  ;;  %v11736_v3 = vld [vmem:[#allocation3 + $0x58] ss:$36 sps:$4 sm:$0xff]   ;;  %1262 = vst [vmem:[#allocation3 + $0x2e0] sm:$0xf] %v10201_v60  ;;  %1263 = vst [vmem:[#allocation3 + $0x304] sm:$0xf] %v10202_v0 }
  0xc1   : > { %11481 = vmatprep.subr.bf16.mxu0 %v11742_v16  ;;  %1454 = vst [vmem:[#allocation3 + $0x2e4] sm:$0xf] %v10139_v2  ;;  %2029 = vst [vmem:[#allocation3 + $0x2a8] sm:$0xf] %v10139_v2  ;;  %v1488_v17 = vld [vmem:[#allocation2 + $0x128] sm:$0xff]  ;;  %v1489_v39 = vld [vmem:[#allocation2 + $0x138] sm:$0xff] }
  0xc2   : > { %1455 = vst [vmem:[#allocation3 + $0x308] sm:$0xf] %v10140_v7  ;;  %2030 = vst [vmem:[#allocation3 + $0x2cc] sm:$0xf] %v10140_v7  ;;  %v1679_v18 = vld [vmem:[#allocation2 + $0x121] sm:$0xff]  ;;  %v10172_v20 = vpack.c.bf16 %v1488_v17, %v1488_v17  ;;  %v1681_v21 = vld [vmem:[#allocation2 + $0x139] sm:$0xff]  ;;  %v10173_v22 = vpack.c.bf16 %v1489_v39, %v1489_v39 }
  0xc3   : > { %v10203_v24 = vpack.c.bf16 %v1679_v18, %v1679_v18  ;;  %v1296_v28 = vld [vmem:[#allocation2 + $0x122] sm:$0xff]  ;;  %1647 = vst [vmem:[#allocation3 + $0x2e8] sm:$0xf] %v10171_v19  ;;  %v10205_v56 = vpack.c.bf16 %v1681_v21, %v1681_v21  ;;  %1457 = vst [vmem:[#allocation3 + $0x350] sm:$0xf] %v10142_v38  ;;  %v11781_v58 = vld [vmem:[%s14213_s1 + $0x218] sm:$0xff]  }
  0xc4   : > { %11482 = vmatpush3.bf16.msra.mxu0 %v11742_v16  ;;  %v10204_v16 = vpack.c.bf16 %v1680_v23, %v1680_v23  ;;  %v10141_v31 = vpack.c.bf16 %v1296_v28, %v1296_v28  ;;  %v1490_v43 = vld [vmem:[#allocation2 + $0x140] sm:$0xff]  ;;  %1648 = vst [vmem:[#allocation3 + $0x30c] sm:$0xf] %v10172_v20  ;;  %2032 = vst [vmem:[#allocation3 + $0x314] sm:$0xf] %v10142_v38  ;;  %v11807_v19 = vld [vmem:[%s14213_s1 + $0x208] sm:$0xff]  }
  0xc5   : > { %11483 = vmatprep.subr.bf16.mxu0 %v12583_v36  ;;  %1839 = vst [vmem:[#allocation3 + $0x2ec] sm:$0xf] %v10203_v24  ;;  %1264 = vst [vmem:[#allocation3 + $0x328] sm:$0xf] %v10203_v24  ;;  %v10174_v51 = vpack.c.bf16 %v1490_v43, %v1490_v43  ;;  %v11743_v57 = vld [vmem:[#allocation3 + $0xa0] ss:$36 sps:$4 sm:$0xff]  }
  0xc6   : > { %4039 = vmatmul.mubr.bf16.gmra.mxu1 %v11739_v13  ;;  %1840 = vst [vmem:[#allocation3 + $0x310] sm:$0xf] %v10204_v16  ;;  %1265 = vst [vmem:[#allocation3 + $0x34c] sm:$0xf] %v10204_v16  ;;  %v11746_v59 = vld [vmem:[#allocation3 + $0xa8] ss:$36 sps:$4 sm:$0xff]  }
  0xc7   : > { %3878 = vmatmul.mubr.bf16.gmra.mxu0 %v11736_v3  ;;  %4046 = vmatprep.mubr.bf16.mxu1 %v11744_v8  ;;  %1456 = vst [vmem:[#allocation3 + $0x32c] sm:$0xf] %v10141_v31  ;;  %2031 = vst [vmem:[#allocation3 + $0x2f0] sm:$0xf] %v10141_v31  ;;  %v11747_v60 = vld [vmem:[#allocation3 + $0xec] ss:$36 sps:$4 sm:$0xff]  }
  0xc8   : > { %3885 = vmatprep.mubr.bf16.mxu0 %v11740_v14  ;;  %11484 = vmatpush3.bf16.msra.mxu0 %v12583_v36  ;;  %1649 = vst [vmem:[#allocation3 + $0x330] sm:$0xf] %v10173_v22  ;;  %1650 = vst [vmem:[#allocation3 + $0x354] sm:$0xf] %v10174_v51  ;;  %v11750_v0 = vld [vmem:[#allocation3 + $0xf4] ss:$36 sps:$4 sm:$0xff]  }
  0xc9   : > { %11485 = vmatprep.subr.bf16.mxu0 %v11768_v10  ;;  %1841 = vst [vmem:[#allocation3 + $0x334] sm:$0xf] %v10205_v56  ;;  %1266 = vst [vmem:[#allocation3 + $0x370] sm:$0xf] %v10205_v56  ;;  %v11794_v36 = vld [vmem:[%s14213_s1 + $0x210] sm:$0xff]   ;;  %v1682_v1 = vld [vmem:[#allocation2 + $0x141] sm:$0xff] }
  0xca   : > { %v1298_v2 = vld [vmem:[#allocation2 + $0x13a] sm:$0xff]  ;;  %v10206_v3 = vpack.c.bf16 %v1682_v1, %v1682_v1  ;;  %v1299_v7 = vld [vmem:[#allocation2 + $0x142] sm:$0xff]  ;;  %v1491_v8 = vld [vmem:[#allocation2 + $0x150] sm:$0xff] }
  0xcb   : > { %v10143_v13 = vpack.c.bf16 %v1298_v2, %v1298_v2  ;;  %v10144_v14 = vpack.c.bf16 %v1299_v7, %v1299_v7  ;;  %v10175_v15 = vpack.c.bf16 %v1491_v8, %v1491_v8  ;;  %v11752_v17 = vld [vmem:[#allocation3 + $0xf0] ss:$36 sps:$4 sm:$0xff]   ;;  %v1492_v20 = vld [vmem:[#allocation2 + $0x158] sm:$0xff]  ;;  %v11757_v23 = vld [vmem:[#allocation3 + $0x13c] ss:$36 sps:$4 sm:$0xff]  }
  0xcc   : > { %11486 = vmatpush3.bf16.msra.mxu0 %v11768_v10  ;;  %1842 = vst [vmem:[#allocation3 + $0x358] sm:$0xf] %v10206_v3  ;;  %1267 = vst [vmem:[#allocation3 + $0x394] sm:$0xf] %v10206_v3  ;;  %v11749_v10 = vld [vmem:[#allocation3 + $0xe8] ss:$36 sps:$4 sm:$0xff]   ;;  %v10176_v24 = vpack.c.bf16 %v1492_v20, %v1492_v20 }
  0xcd   : > { %11487 = vmatprep.subr.bf16.mxu0 %v11781_v58  ;;  %1458 = vst [vmem:[#allocation3 + $0x374] sm:$0xf] %v10143_v13  ;;  %2033 = vst [vmem:[#allocation3 + $0x338] sm:$0xf] %v10143_v13  ;;  %v11753_v18 = vld [vmem:[#allocation3 + $0x134] ss:$36 sps:$4 sm:$0xff]  }
  0xce   : > { %4047 = vmatmul.mubr.bf16.gmra.mxu1 %v11746_v59  ;;  %1459 = vst [vmem:[#allocation3 + $0x398] sm:$0xf] %v10144_v14  ;;  %2034 = vst [vmem:[#allocation3 + $0x35c] sm:$0xf] %v10144_v14  ;;  %v1683_v28 = vld [vmem:[#allocation2 + $0x151] sm:$0xff]  ;;  %v1684_v29 = vld [vmem:[#allocation2 + $0x159] sm:$0xff] }
  0xcf   : > { %3886 = vmatmul.mubr.bf16.gmra.mxu0 %v11743_v57  ;;  %4054 = vmatprep.mubr.bf16.mxu1 %v11750_v0  ;;  %1651 = vst [vmem:[#allocation3 + $0x378] sm:$0xf] %v10175_v15  ;;  %v1300_v16 = vld [vmem:[#allocation2 + $0x152] sm:$0xff]  ;;  %v10207_v31 = vpack.c.bf16 %v1683_v28, %v1683_v28  ;;  %v10208_v38 = vpack.c.bf16 %v1684_v29, %v1684_v29  ;;  %v1301_v39 = vld [vmem:[#allocation2 + $0x15a] sm:$0xff]  ;;  %v1493_v21 = vld [vmem:[#allocation2 + $0x168] sm:$0xff] }
  0xd0   : > { %3893 = vmatprep.mubr.bf16.mxu0 %v11747_v60  ;;  %11488 = vmatpush3.bf16.msra.mxu0 %v11781_v58  ;;  %v10145_v43 = vpack.c.bf16 %v1300_v16, %v1300_v16  ;;  %v1494_v22 = vld [vmem:[#allocation2 + $0x170] sm:$0xff]  ;;  %1652 = vst [vmem:[#allocation3 + $0x39c] sm:$0xf] %v10176_v24  ;;  %v10146_v51 = vpack.c.bf16 %v1301_v39, %v1301_v39  ;;  %v11756_v7 = vld [vmem:[#allocation3 + $0x130] ss:$36 sps:$4 sm:$0xff]  }
  0xd1   : > { %11489 = vmatprep.subr.bf16.mxu0 %v11794_v36  ;;  %v10177_v56 = vpack.c.bf16 %v1493_v21, %v1493_v21  ;;  %v10178_v57 = vpack.c.bf16 %v1494_v22, %v1494_v22  ;;  %v1685_v58 = vld [vmem:[#allocation2 + $0x169] sm:$0xff]  ;;  %v1686_v59 = vld [vmem:[#allocation2 + $0x171] sm:$0xff]  ;;  %1843 = vst [vmem:[#allocation3 + $0x37c] sm:$0xf] %v10207_v31  ;;  %1844 = vst [vmem:[#allocation3 + $0x3a0] sm:$0xf] %v10208_v38 }
  0xd2   : > { %v1302_v60 = vld [vmem:[#allocation2 + $0x16a] sm:$0xff]  ;;  %1268 = vst [vmem:[#allocation3 + $0x3b8] sm:$0xf] %v10207_v31  ;;  %1269 = vst [vmem:[#allocation3 + $0x3dc] sm:$0xf] %v10208_v38  ;;  %v10209_v0 = vpack.c.bf16 %v1685_v58, %v1685_v58  ;;  %v10210_v1 = vpack.c.bf16 %v1686_v59, %v1686_v59  ;;  %v1303_v2 = vld [vmem:[#allocation2 + $0x172] sm:$0xff] }
  0xd3   : > { %1460 = vst [vmem:[#allocation3 + $0x3bc] sm:$0xf] %v10145_v43  ;;  %v10147_v3 = vpack.c.bf16 %v1302_v60, %v1302_v60  ;;  %2035 = vst [vmem:[#allocation3 + $0x380] sm:$0xf] %v10145_v43  ;;  %v11820_v13 = vld [vmem:[%s14213_s1 + $0x200] sm:$0xff]   ;;  %v1688_v20 = vld [vmem:[#allocation2 + $0x189] sm:$0xff] }
  0xd4   : > { %11490 = vmatpush3.bf16.msra.mxu0 %v11794_v36  ;;  %1461 = vst [vmem:[#allocation3 + $0x3e0] sm:$0xf] %v10146_v51  ;;  %1653 = vst [vmem:[#allocation3 + $0x3c0] sm:$0xf] %v10177_v56  ;;  %v10148_v36 = vpack.c.bf16 %v1303_v2, %v1303_v2  ;;  %v1495_v14 = vld [vmem:[#allocation2 + $0x180] sm:$0xff]  ;;  %v10212_v29 = vpack.c.bf16 %v1688_v20, %v1688_v20  ;;  %v1851_v59 = vld [vmem:[#allocation2 + $0x32] sm:$0xff] }
  0xd5   : > { %11491 = vmatprep.subr.bf16.mxu0 %v11807_v19  ;;  %1654 = vst [vmem:[#allocation3 + $0x3e4] sm:$0xf] %v10178_v57  ;;  %2036 = vst [vmem:[#allocation3 + $0x3a4] sm:$0xf] %v10146_v51  ;;  %v11759_v8 = vld [vmem:[#allocation3 + $0x138] ss:$36 sps:$4 sm:$0xff]   ;;  %v10215_v2 = vpack.c.bf16 %v1851_v59, %v1851_v59 }
  0xd6   : > { %4055 = vmatmul.mubr.bf16.gmra.mxu1 %v11752_v17  ;;  %1845 = vst [vmem:[#allocation3 + $0x3c4] sm:$0xf] %v10209_v0  ;;  %1846 = vst [vmem:[#allocation3 + $0x3e8] sm:$0xf] %v10210_v1  ;;  %v11760_v15 = vld [vmem:[#allocation3 + $0x17c] ss:$36 sps:$4 sm:$0xff]   ;;  %v10179_v17 = vpack.c.bf16 %v1495_v14, %v1495_v14 }
  0xd7   : > { %3894 = vmatmul.mubr.bf16.gmra.mxu0 %v11749_v10  ;;  %1270 = vst [vmem:[#allocation3 + $0x400] sm:$0xf] %v10209_v0  ;;  %1271 = vst [vmem:[#allocation3 + $0x424] sm:$0xf] %v10210_v1  ;;  %4062 = vmatprep.mubr.bf16.mxu1 %v11757_v23  ;;  %v1496_v10 = vld [vmem:[#allocation2 + $0x188] sm:$0xff]  ;;  %v1498_v38 = vld [vmem:[#allocation2 + $0x1a0] sm:$0xff] }
  0xd8   : > { %3901 = vmatprep.mubr.bf16.mxu0 %v11753_v18  ;;  %1462 = vst [vmem:[#allocation3 + $0x404] sm:$0xf] %v10147_v3  ;;  %2037 = vst [vmem:[#allocation3 + $0x3c8] sm:$0xf] %v10147_v3  ;;  %11492 = vmatpush3.bf16.msra.mxu0 %v11807_v19  ;;  %v1687_v18 = vld [vmem:[#allocation2 + $0x181] sm:$0xff]  ;;  %v10180_v24 = vpack.c.bf16 %v1496_v10, %v1496_v10  ;;  %v1689_v39 = vld [vmem:[#allocation2 + $0x199] sm:$0xff]  ;;  %v10182_v22 = vpack.c.bf16 %v1498_v38, %v1498_v38 }
  0xd9   : > { %1463 = vst [vmem:[#allocation3 + $0x428] sm:$0xf] %v10148_v36  ;;  %2038 = vst [vmem:[#allocation3 + $0x3ec] sm:$0xf] %v10148_v36  ;;  %11493 = vmatprep.subr.bf16.mxu0 %v11820_v13  ;;  %v10211_v28 = vpack.c.bf16 %v1687_v18, %v1687_v18  ;;  %v294_v16 = vld [vmem:[#allocation2 + $0x18f] sm:$0x1]  ;;  %v10213_v51 = vpack.c.bf16 %v1689_v39, %v1689_v39 }
  0xda   : > { %v1304_v23 = vld [vmem:[#allocation2 + $0x182] sm:$0xff]  ;;  %v259_v19 = vld [vmem:[#allocation2 + $0x19a] sm:$0x1]  ;;  %1655 = vst [vmem:[#allocation3 + $0x408] sm:$0xf] %v10179_v17  ;;  %v1853_v36 = vld [vmem:[#allocation2 + $0x4a] sm:$0xff] }
  0xdb   : > { %312 = vst [vmem:[#allocation2 + $0x191] sm:$0x1] %v294_v16  ;;  %v10149_v31 = vpack.c.bf16 %v1304_v23, %v1304_v23  ;;  %277 = vst [vmem:[#allocation2 + $0x198] sm:$0x1] %v259_v19  ;;  %v1690_v43 = vld [vmem:[#allocation2 + $0x1a1] sm:$0xff]  ;;  %v10217_v17 = vpack.c.bf16 %v1853_v36, %v1853_v36  ;;  %v1854_v18 = vld [vmem:[#allocation2 + $0x52] sm:$0xff] }
  0xdc   : > { %v11763_v21 = vld [vmem:[#allocation3 + $0x184] ss:$36 sps:$4 sm:$0xff]   ;;  %11494 = vmatpush3.bf16.msra.mxu0 %v11820_v13  ;;  %1656 = vst [vmem:[#allocation3 + $0x42c] sm:$0xf] %v10180_v24  ;;  %1847 = vst [vmem:[#allocation3 + $0x40c] sm:$0xf] %v10211_v28  ;;  %v10214_v56 = vpack.c.bf16 %v1690_v43, %v1690_v43 }
  0xdd   : > { %1848 = vst [vmem:[#allocation3 + $0x430] sm:$0xf] %v10212_v29  ;;  %1272 = vst [vmem:[#allocation3 + $0x448] sm:$0xf] %v10211_v28  ;;  %v11762_v57 = vld [vmem:[#allocation3 + $0x178] ss:$36 sps:$4 sm:$0xff]  }
  0xde   : > { %1273 = vst [vmem:[#allocation3 + $0x46c] sm:$0xf] %v10212_v29  ;;  %1464 = vst [vmem:[#allocation3 + $0x44c] sm:$0xf] %v10149_v31  ;;  %4063 = vmatmul.mubr.bf16.gmra.mxu1 %v11759_v8  ;;  %v11765_v58 = vld [vmem:[#allocation3 + $0x180] ss:$36 sps:$4 sm:$0xff]   ;;  %v10218_v8 = vpack.c.bf16 %v1854_v18, %v1854_v18 }
  0xdf   : > { %2039 = vst [vmem:[#allocation3 + $0x410] sm:$0xf] %v10149_v31  ;;  %3902 = vmatmul.mubr.bf16.gmra.mxu0 %v11756_v7  ;;  %1658 = vst [vmem:[#allocation3 + $0x474] sm:$0xf] %v10182_v22  ;;  %4070 = vmatprep.mubr.bf16.mxu1 %v11763_v21  ;;  %v1852_v60 = vld [vmem:[#allocation2 + $0x3a] sm:$0xff]  ;;  %v1856_v20 = vld [vmem:[#allocation2 + $0x6a] sm:$0xff] }
  0xe0   : > { %1849 = vst [vmem:[#allocation3 + $0x454] sm:$0xf] %v10213_v51  ;;  %1850 = vst [vmem:[#allocation3 + $0x478] sm:$0xf] %v10214_v56  ;;  %3909 = vmatprep.mubr.bf16.mxu0 %v11760_v15  ;;  %v10216_v3 = vpack.c.bf16 %v1852_v60, %v1852_v60  ;;  %v11766_v13 = vld [vmem:[#allocation3 + $0x1c4] ss:$36 sps:$4 sm:$0xff]   ;;  %v10220_v28 = vpack.c.bf16 %v1856_v20, %v1856_v20 }
  0xe1   : > { %v11770_v7 = vld [vmem:[#allocation3 + $0x1cc] ss:$36 sps:$4 sm:$0xff]   ;;  %2011 = vst [vmem:[#allocation3 + $0x20] sm:$0xf] %v10215_v2  ;;  %2013 = vst [vmem:[#allocation3 + $0x68] sm:$0xf] %v10217_v17 }
  0xe2   : > { %v1305_v0 = vld [vmem:[#allocation2 + $0x18a] sm:$0xff]  ;;  %v1497_v1 = vld [vmem:[#allocation2 + $0x198] sm:$0xff]  ;;  %2012 = vst [vmem:[#allocation3 + $0x44] sm:$0xf] %v10216_v3  ;;  %v1855_v15 = vld [vmem:[#allocation2 + $0x62] sm:$0xff] }
  0xe3   : > { %v10150_v14 = vpack.c.bf16 %v1305_v0, %v1305_v0  ;;  %v10181_v10 = vpack.c.bf16 %v1497_v1, %v1497_v1  ;;  %v10219_v24 = vpack.c.bf16 %v1855_v15, %v1855_v15  ;;  %v1857_v29 = vld [vmem:[#allocation2 + $0x7a] sm:$0xff]  ;;  %v1858_v16 = vld [vmem:[#allocation2 + $0x82] sm:$0xff]  ;;  %v1859_v23 = vld [vmem:[#allocation2 + $0x92] sm:$0xff]  ;;  %2014 = vst [vmem:[#allocation3 + $0x8c] sm:$0xf] %v10218_v8 }
  0xe4   : > { %v10221_v19 = vpack.c.bf16 %v1857_v29, %v1857_v29  ;;  %v10222_v31 = vpack.c.bf16 %v1858_v16, %v1858_v16  ;;  %v1860_v38 = vld [vmem:[#allocation2 + $0x9a] sm:$0xff]  ;;  %v10223_v39 = vpack.c.bf16 %v1859_v23, %v1859_v23  ;;  %v1861_v43 = vld [vmem:[#allocation2 + $0xaa] sm:$0xff]  ;;  %v1862_v21 = vld [vmem:[#allocation2 + $0xb2] sm:$0xff]  ;;  %2016 = vst [vmem:[#allocation3 + $0xd4] sm:$0xf] %v10220_v28 }
  0xe5   : > { %1465 = vst [vmem:[#allocation3 + $0x470] sm:$0xf] %v10150_v14  ;;  %1657 = vst [vmem:[#allocation3 + $0x450] sm:$0xf] %v10181_v10  ;;  %v11769_v22 = vld [vmem:[#allocation3 + $0x1c0] ss:$36 sps:$4 sm:$0xff]   ;;  %v10224_v51 = vpack.c.bf16 %v1860_v38, %v1860_v38  ;;  %v10225_v56 = vpack.c.bf16 %v1861_v43, %v1861_v43 }
  0xe6   : > { %2040 = vst [vmem:[#allocation3 + $0x434] sm:$0xf] %v10150_v14  ;;  %4071 = vmatmul.mubr.bf16.gmra.mxu1 %v11765_v58  ;;  %2015 = vst [vmem:[#allocation3 + $0xb0] sm:$0xf] %v10219_v24  ;;  %v1863_v59 = vld [vmem:[#allocation2 + $0xc2] sm:$0xff]  ;;  %v1864_v60 = vld [vmem:[#allocation2 + $0xca] sm:$0xff] }
  0xe7   : > { %3910 = vmatmul.mubr.bf16.gmra.mxu0 %v11762_v57  ;;  %4078 = vmatprep.mubr.bf16.mxu1 %v11770_v7  ;;  %v10226_v57 = vpack.c.bf16 %v1862_v21, %v1862_v21  ;;  %v1865_v0 = vld [vmem:[#allocation2 + $0xda] sm:$0xff]  ;;  %2017 = vst [vmem:[#allocation3 + $0xf8] sm:$0xf] %v10221_v19  ;;  %2018 = vst [vmem:[#allocation3 + $0x11c] sm:$0xf] %v10222_v31  ;;  %v10227_v58 = vpack.c.bf16 %v1863_v59, %v1863_v59  ;;  %v1866_v2 = vld [vmem:[#allocation2 + $0xe2] sm:$0xff] }
  0xe8   : > { %3917 = vmatprep.mubr.bf16.mxu0 %v11766_v13  ;;  %2019 = vst [vmem:[#allocation3 + $0x140] sm:$0xf] %v10223_v39  ;;  %v10228_v1 = vpack.c.bf16 %v1864_v60, %v1864_v60  ;;  %v10229_v3 = vpack.c.bf16 %v1865_v0, %v1865_v0  ;;  %v11772_v36 = vld [vmem:[#allocation3 + $0x1c8] ss:$36 sps:$4 sm:$0xff]   ;;  %2020 = vst [vmem:[#allocation3 + $0x164] sm:$0xf] %v10224_v51  ;;  %v10230_v13 = vpack.c.bf16 %v1866_v2, %v1866_v2 }
  0xe9   : > { %2021 = vst [vmem:[#allocation3 + $0x188] sm:$0xf] %v10225_v56  ;;  %2022 = vst [vmem:[#allocation3 + $0x1ac] sm:$0xf] %v10226_v57  ;;  %v11773_v14 = vld [vmem:[#allocation3 + $0x20c] ss:$36 sps:$4 sm:$0xff]  }
  0xea   : > { %2023 = vst [vmem:[#allocation3 + $0x1d0] sm:$0xf] %v10227_v58  ;;  %2024 = vst [vmem:[#allocation3 + $0x1f4] sm:$0xf] %v10228_v1  ;;  %v11776_v10 = vld [vmem:[#allocation3 + $0x214] ss:$36 sps:$4 sm:$0xff]  }
  0xeb   : > { %2025 = vst [vmem:[#allocation3 + $0x218] sm:$0xf] %v10229_v3  ;;  %2026 = vst [vmem:[#allocation3 + $0x23c] sm:$0xf] %v10230_v13  ;;  %v11775_v17 = vld [vmem:[#allocation3 + $0x208] ss:$36 sps:$4 sm:$0xff]  }
  0xec   : > { %v11778_v7 = vld [vmem:[#allocation3 + $0x210] ss:$36 sps:$4 sm:$0xff]   ;;  %v11783_v8 = vld [vmem:[#allocation3 + $0x25c] ss:$36 sps:$4 sm:$0xff]   ;;  %v11789_v28 = vld [vmem:[#allocation3 + $0x2a4] ss:$36 sps:$4 sm:$0xff]  }
  0xed   : > { %v11779_v18 = vld [vmem:[#allocation3 + $0x254] ss:$36 sps:$4 sm:$0xff]   ;;  %v11786_v24 = vld [vmem:[#allocation3 + $0x29c] ss:$36 sps:$4 sm:$0xff]   ;;  %v1881_v16 = vld [vmem:[#allocation2 + $0x19a] sm:$0xff] }
  0xee   : > { %4079 = vmatmul.mubr.bf16.gmra.mxu1 %v11772_v36  ;;  %v11782_v15 = vld [vmem:[#allocation3 + $0x250] ss:$36 sps:$4 sm:$0xff]   ;;  %v11785_v20 = vld [vmem:[#allocation3 + $0x258] ss:$36 sps:$4 sm:$0xff]   ;;  %v10245_v23 = vpack.c.bf16 %v1881_v16, %v1881_v16  ;;  %v11792_v51 = vld [vmem:[#allocation3 + $0x2e4] ss:$36 sps:$4 sm:$0xff]  }
  0xef   : > { %3918 = vmatmul.mubr.bf16.gmra.mxu0 %v11769_v22  ;;  %4086 = vmatprep.mubr.bf16.mxu1 %v11776_v10  ;;  %v295_v29 = vld [vmem:[#allocation2 + $0x1a7] sm:$0x1]  ;;  %v11788_v39 = vld [vmem:[#allocation3 + $0x298] ss:$36 sps:$4 sm:$0xff]   ;;  %v11791_v22 = vld [vmem:[#allocation3 + $0x2a0] ss:$36 sps:$4 sm:$0xff]  }
  0xf0   : > { %3925 = vmatprep.mubr.bf16.mxu0 %v11773_v14  ;;  %313 = vst [vmem:[#allocation2 + $0x1a9] sm:$0x1] %v295_v29  ;;  %2041 = vst [vmem:[#allocation3 + $0x458] sm:$0xf] %v10245_v23  ;;  %v11796_v59 = vld [vmem:[#allocation3 + $0x2ec] ss:$36 sps:$4 sm:$0xff]  }
  0xf1   : > { %v11831_v9 = vld [vmem:[#allocation3 + $0x20] ss:$36 sps:$4 sm:$0xff]   ;;  %v11837_v25 = vld [vmem:[#allocation3 + $0x1d0] ss:$36 sps:$4 sm:$0xff]  }
  0xf2   : > { %v11835_v4 = vld [vmem:[#allocation3 + $0x140] ss:$36 sps:$4 sm:$0xff]   ;;  %v11841_v30 = vld [vmem:[#allocation3 + $0x2f0] ss:$36 sps:$4 sm:$0xff]  }
  0xf3   : > { %v11839_v53 = vld [vmem:[#allocation3 + $0x260] ss:$36 sps:$4 sm:$0xff]   ;;  %v11845_v11 = vld [vmem:[#allocation3 + $0x410] ss:$36 sps:$4 sm:$0xff]  }
  0xf4   : > { %v11843_v40 = vld [vmem:[#allocation3 + $0x380] ss:$36 sps:$4 sm:$0xff]  }
  0xf6   : > { %4087 = vmatmul.mubr.bf16.gmra.mxu1 %v11778_v7 }
  0xf7   : > { %3926 = vmatmul.mubr.bf16.gmra.mxu0 %v11775_v17  ;;  %4094 = vmatprep.mubr.bf16.mxu1 %v11783_v8  ;;  %v1882_v60 = vld [vmem:[#allocation2 + $0x1a2] sm:$0xff] }
  0xf8   : > { %3933 = vmatprep.mubr.bf16.mxu0 %v11779_v18  ;;  %v10246_v58 = vpack.c.bf16 %v1882_v60, %v1882_v60  ;;  %v11795_v18 = vld [vmem:[#allocation3 + $0x2e0] ss:$36 sps:$4 sm:$0xff]  }
  0xfa   : > { %2042 = vst [vmem:[#allocation3 + $0x47c] sm:$0xf] %v10246_v58  ;;  %v11805_v58 = vld [vmem:[#allocation3 + $0x374] ss:$36 sps:$4 sm:$0xff]  }
  0xfe   : > { %v10663_v31 = vpop.f32.mrf.mxu1  ;;  %4095 = vmatmul.mubr.bf16.gmra.mxu1 %v11785_v20  ;;  %v11798_v20 = vld [vmem:[#allocation3 + $0x2e8] ss:$36 sps:$4 sm:$0xff]  }
  0xff   : > { %v10551_v19 = vpop.f32.mrf.mxu0  ;;  %3934 = vmatmul.mubr.bf16.gmra.mxu0 %v11782_v15  ;;  %4102 = vmatprep.mubr.bf16.mxu1 %v11789_v28 }
 0x100   : > { %3941 = vmatprep.mubr.bf16.mxu0 %v11786_v24  ;;  %v10664_v21 = vpop.f32.mrf.mxu1  ;;  %v11799_v24 = vld [vmem:[#allocation3 + $0x32c] ss:$36 sps:$4 sm:$0xff]  }
 0x101   : > { %v10552_v38 = vpop.f32.mrf.mxu0  ;;  %v10665_v56 = vadd.f32 %v10664_v21, %v10663_v31  ;;  %v11802_v31 = vld [vmem:[#allocation3 + $0x334] ss:$36 sps:$4 sm:$0xff]  }
 0x102   : > { %v10553_v43 = vadd.f32 %v10552_v38, %v10551_v19  ;;  %v10666_v0 = vpop.f32.mrf.mxu1 }
 0x103   : > { %v10554_v57 = vpop.f32.mrf.mxu0 }
 0x104   : > { %v12603_v1 = vadd.f32 %v10665_v56, %v10553_v43  ;;  %v10667_v36 = vpop.f32.mrf.mxu1 }
 0x105   : > { %v10555_v2 = vpop.f32.mrf.mxu0  ;;  %v10668_v13 = vadd.f32 %v10667_v36, %v10666_v0  ;;  %v11804_v0 = vld [vmem:[#allocation3 + $0x330] ss:$36 sps:$4 sm:$0xff]   ;;  %v11809_v36 = vld [vmem:[#allocation3 + $0x37c] ss:$36 sps:$4 sm:$0xff]  }
 0x106   : > { %v10556_v3 = vadd.f32 %v10555_v2, %v10554_v57  ;;  %v10669_v10 = vpop.f32.mrf.mxu1  ;;  %4103 = vmatmul.mubr.bf16.gmra.mxu1 %v11791_v22  ;;  %v11801_v57 = vld [vmem:[#allocation3 + $0x328] ss:$36 sps:$4 sm:$0xff]  }
 0x107   : > { %v10557_v14 = vpop.f32.mrf.mxu0  ;;  %3942 = vmatmul.mubr.bf16.gmra.mxu0 %v11788_v39  ;;  %4110 = vmatprep.mubr.bf16.mxu1 %v11796_v59 }
 0x108   : > { %3949 = vmatprep.mubr.bf16.mxu0 %v11792_v51  ;;  %v12605_v17 = vadd.f32 %v10668_v13, %v10556_v3  ;;  %v10670_v15 = vpop.f32.mrf.mxu1 }
 0x109   : > { %v10558_v7 = vpop.f32.mrf.mxu0  ;;  %v10671_v28 = vadd.f32 %v10670_v15, %v10669_v10 }
 0x10a   : > { %v10559_v8 = vadd.f32 %v10558_v7, %v10557_v14  ;;  %v10672_v16 = vpop.f32.mrf.mxu1 }
 0x10b   : > { %v10560_v29 = vpop.f32.mrf.mxu0 }
 0x10c   : > { %v12607_v23 = vadd.f32 %v10671_v28, %v10559_v8  ;;  %v10673_v39 = vpop.f32.mrf.mxu1 }
 0x10d   : > { %v10561_v19 = vpop.f32.mrf.mxu0  ;;  %v10674_v43 = vadd.f32 %v10673_v39, %v10672_v16 }
 0x10e   : > { %v10562_v38 = vadd.f32 %v10561_v19, %v10560_v29  ;;  %v10675_v22 = vpop.f32.mrf.mxu1  ;;  %4111 = vmatmul.mubr.bf16.gmra.mxu1 %v11798_v20  ;;  %v11808_v29 = vld [vmem:[#allocation3 + $0x370] ss:$36 sps:$4 sm:$0xff]  }
 0x10f   : > { %v10563_v21 = vpop.f32.mrf.mxu0  ;;  %3950 = vmatmul.mubr.bf16.gmra.mxu0 %v11795_v18  ;;  %4118 = vmatprep.mubr.bf16.mxu1 %v11802_v31  ;;  %v11811_v31 = vld [vmem:[#allocation3 + $0x378] ss:$36 sps:$4 sm:$0xff]  }
 0x110   : > { %3957 = vmatprep.mubr.bf16.mxu0 %v11799_v24  ;;  %v12609_v51 = vadd.f32 %v10674_v43, %v10562_v38  ;;  %v10676_v60 = vpop.f32.mrf.mxu1  ;;  %v11812_v38 = vld [vmem:[#allocation3 + $0x3bc] ss:$36 sps:$4 sm:$0xff]  }
 0x111   : > { %v10564_v56 = vpop.f32.mrf.mxu0  ;;  %v10677_v2 = vadd.f32 %v10676_v60, %v10675_v22 }
 0x112   : > { %v10565_v59 = vadd.f32 %v10564_v56, %v10563_v21  ;;  %v10678_v13 = vpop.f32.mrf.mxu1  ;;  %v11815_v21 = vld [vmem:[#allocation3 + $0x3c4] ss:$36 sps:$4 sm:$0xff]  }
 0x113   : > { %v10566_v3 = vpop.f32.mrf.mxu0 }
 0x114   : > { %v12611_v14 = vadd.f32 %v10677_v2, %v10565_v59  ;;  %v10679_v18 = vpop.f32.mrf.mxu1 }
 0x115   : > { %v10567_v10 = vpop.f32.mrf.mxu0  ;;  %v10680_v8 = vadd.f32 %v10679_v18, %v10678_v13  ;;  %v11814_v13 = vld [vmem:[#allocation3 + $0x3b8] ss:$36 sps:$4 sm:$0xff]   ;;  %v11817_v18 = vld [vmem:[#allocation3 + $0x3c0] ss:$36 sps:$4 sm:$0xff]  }
 0x116   : > { %v10568_v7 = vadd.f32 %v10567_v10, %v10566_v3  ;;  %v10681_v20 = vpop.f32.mrf.mxu1  ;;  %4119 = vmatmul.mubr.bf16.gmra.mxu1 %v11804_v0 }
 0x117   : > { %v10569_v15 = vpop.f32.mrf.mxu0  ;;  %3958 = vmatmul.mubr.bf16.gmra.mxu0 %v11801_v57  ;;  %4126 = vmatprep.mubr.bf16.mxu1 %v11809_v36 }
 0x118   : > { %3965 = vmatprep.mubr.bf16.mxu0 %v11805_v58  ;;  %v12613_v24 = vadd.f32 %v10680_v8, %v10568_v7  ;;  %v10682_v19 = vpop.f32.mrf.mxu1  ;;  %v11818_v8 = vld [vmem:[#allocation3 + $0x404] ss:$36 sps:$4 sm:$0xff]  }
 0x119   : > { %v10570_v28 = vpop.f32.mrf.mxu0  ;;  %v10683_v39 = vadd.f32 %v10682_v19, %v10681_v20 }
 0x11a   : > { %v10571_v16 = vadd.f32 %v10570_v28, %v10569_v15  ;;  %v10684_v22 = vpop.f32.mrf.mxu1  ;;  %v11822_v28 = vld [vmem:[#allocation3 + $0x40c] ss:$36 sps:$4 sm:$0xff]  }
 0x11b   : > { %v10572_v43 = vpop.f32.mrf.mxu0 }
 0x11c   : > { %v12615_v56 = vadd.f32 %v10683_v39, %v10571_v16  ;;  %v10685_v60 = vpop.f32.mrf.mxu1 }
 0x11d   : > { %v10573_v59 = vpop.f32.mrf.mxu0  ;;  %v10686_v0 = vadd.f32 %v10685_v60, %v10684_v22 }
 0x11e   : > { %v10574_v57 = vadd.f32 %v10573_v59, %v10572_v43  ;;  %v10687_v2 = vpop.f32.mrf.mxu1  ;;  %4127 = vmatmul.mubr.bf16.gmra.mxu1 %v11811_v31 }
 0x11f   : > { %v10575_v58 = vpop.f32.mrf.mxu0  ;;  %3966 = vmatmul.mubr.bf16.gmra.mxu0 %v11808_v29  ;;  %4134 = vmatprep.mubr.bf16.mxu1 %v11815_v21 }
 0x120   : > { %3973 = vmatprep.mubr.bf16.mxu0 %v11812_v38  ;;  %v12617_v3 = vadd.f32 %v10686_v0, %v10574_v57  ;;  %v10688_v7 = vpop.f32.mrf.mxu1  ;;  %v11821_v57 = vld [vmem:[#allocation3 + $0x400] ss:$36 sps:$4 sm:$0xff]  }
 0x121   : > { %v10576_v36 = vpop.f32.mrf.mxu0  ;;  %v10689_v15 = vadd.f32 %v10688_v7, %v10687_v2  ;;  %v11825_v2 = vld [vmem:[#allocation3 + $0x44c] ss:$36 sps:$4 sm:$0xff]  }
 0x122   : > { %v10577_v10 = vadd.f32 %v10576_v36, %v10575_v58  ;;  %v10690_v16 = vpop.f32.mrf.mxu1  ;;  %v11824_v58 = vld [vmem:[#allocation3 + $0x408] ss:$36 sps:$4 sm:$0xff]  }
 0x123   : > { %v10578_v20 = vpop.f32.mrf.mxu0 }
 0x124   : > { %v12619_v19 = vadd.f32 %v10689_v15, %v10577_v10  ;;  %v10691_v43 = vpop.f32.mrf.mxu1 }
 0x125   : > { %v10579_v39 = vpop.f32.mrf.mxu0  ;;  %v10692_v31 = vadd.f32 %v10691_v43, %v10690_v16  ;;  %v11828_v16 = vld [vmem:[#allocation3 + $0x454] ss:$36 sps:$4 sm:$0xff]  }
 0x126   : > { %v10580_v29 = vadd.f32 %v10579_v39, %v10578_v20  ;;  %v10693_v22 = vpop.f32.mrf.mxu1  ;;  %4135 = vmatmul.mubr.bf16.gmra.mxu1 %v11817_v18 }
 0x127   : > { %v10581_v38 = vpop.f32.mrf.mxu0  ;;  %3974 = vmatmul.mubr.bf16.gmra.mxu0 %v11814_v13  ;;  %4142 = vmatprep.mubr.bf16.mxu1 %v11822_v28 }
 0x128   : > { %3981 = vmatprep.mubr.bf16.mxu0 %v11818_v8  ;;  %v12621_v21 = vadd.f32 %v10692_v31, %v10580_v29  ;;  %v10694_v0 = vpop.f32.mrf.mxu1 }
 0x129   : > { %v10582_v59 = vpop.f32.mrf.mxu0  ;;  %v10695_v36 = vadd.f32 %v10694_v0, %v10693_v22 }
 0x12a   : > { %v10583_v60 = vadd.f32 %v10582_v59, %v10581_v38  ;;  %v10696_v7 = vpop.f32.mrf.mxu1 }
 0x12b   : > { %v10584_v10 = vpop.f32.mrf.mxu0 }
 0x12c   : > { %v12623_v15 = vadd.f32 %v10695_v36, %v10583_v60  ;;  %v10697_v39 = vpop.f32.mrf.mxu1  ;;  %v11827_v60 = vld [vmem:[#allocation3 + $0x448] ss:$36 sps:$4 sm:$0xff]   ;;  %v11830_v36 = vld [vmem:[#allocation3 + $0x450] ss:$36 sps:$4 sm:$0xff]  }
 0x12d   : > { %v10585_v20 = vpop.f32.mrf.mxu0  ;;  %v10698_v18 = vadd.f32 %v10697_v39, %v10696_v7 }
 0x12e   : > { %v10586_v13 = vadd.f32 %v10585_v20, %v10584_v10  ;;  %v10699_v29 = vpop.f32.mrf.mxu1  ;;  %4143 = vmatmul.mubr.bf16.gmra.mxu1 %v11824_v58 }
 0x12f   : > { %v10587_v8 = vpop.f32.mrf.mxu0  ;;  %3982 = vmatmul.mubr.bf16.gmra.mxu0 %v11821_v57  ;;  %4150 = vmatprep.mubr.bf16.mxu1 %v11828_v16 }
 0x130   : > { %3989 = vmatprep.mubr.bf16.mxu0 %v11825_v2  ;;  %v12625_v28 = vadd.f32 %v10698_v18, %v10586_v13  ;;  %v10700_v38 = vpop.f32.mrf.mxu1 }
 0x131   : > { %v10588_v43 = vpop.f32.mrf.mxu0  ;;  %v10701_v22 = vadd.f32 %v10700_v38, %v10699_v29  ;;  %v11832_v38 = vld [vmem:[#allocation3 + $0x68] ss:$36 sps:$4 sm:$0xff]  }
 0x132   : > { %v10589_v31 = vadd.f32 %v10588_v43, %v10587_v8  ;;  %v10702_v0 = vpop.f32.mrf.mxu1 }
 0x133   : > { %v10590_v59 = vpop.f32.mrf.mxu0 }
 0x134   : > { %v12627_v10 = vadd.f32 %v10701_v22, %v10589_v31  ;;  %v10703_v57 = vpop.f32.mrf.mxu1  ;;  %v11833_v31 = vld [vmem:[#allocation3 + $0xb0] ss:$36 sps:$4 sm:$0xff]  }
 0x135   : > { %v10591_v7 = vpop.f32.mrf.mxu0  ;;  %v10704_v39 = vadd.f32 %v10703_v57, %v10702_v0 }
 0x136   : > { %v10592_v20 = vadd.f32 %v10591_v7, %v10590_v59  ;;  %v10705_v2 = vpop.f32.mrf.mxu1  ;;  %4151 = vmatmul.mubr.bf16.gmra.mxu1 %v11830_v36 }
 0x137   : > { %v10593_v58 = vpop.f32.mrf.mxu0  ;;  %3990 = vmatmul.mubr.bf16.gmra.mxu0 %v11827_v60 }
 0x138   : > { %11495 = vmatprep.mubr.bf16.mxu0 %v11831_v9  ;;  %v12629_v16 = vadd.f32 %v10704_v39, %v10592_v20  ;;  %v10706_v8 = vpop.f32.mrf.mxu1 }
 0x139   : > { %v10594_v13 = vpop.f32.mrf.mxu0  ;;  %v10707_v29 = vadd.f32 %v10706_v8, %v10705_v2  ;;  %v11834_v8 = vld [vmem:[#allocation3 + $0xf8] ss:$36 sps:$4 sm:$0xff]  }
 0x13a   : > { %v10595_v18 = vadd.f32 %v10594_v13, %v10593_v58  ;;  %v10708_v6 = vpop.f32.mrf.mxu1 }
 0x13b   : > { %v10596_v43 = vpop.f32.mrf.mxu0 }
 0x13c   : > { %v12631_v22 = vadd.f32 %v10707_v29, %v10595_v18  ;;  %v10709_v0 = vpop.f32.mrf.mxu1 }
 0x13d   : > { %v10597_v59 = vpop.f32.mrf.mxu0  ;;  %v10710_v57 = vadd.f32 %v10709_v0, %v10708_v6 }
 0x13e   : > { %v10598_v7 = vadd.f32 %v10597_v59, %v10596_v43  ;;  %v10711_v36 = vpop.f32.mrf.mxu1 }
 0x13f   : > { %v10599_v60 = vpop.f32.mrf.mxu0  ;;  %11496 = vmatmul.mubr.bf16.vlgmr.msra.gmra.mxu0 %v11832_v38 }
 0x140   : > { %11499 = vmatprep.mubr.bf16.mxu0 %v11833_v31  ;;  %v12633_v9 = vadd.f32 %v10710_v57, %v10598_v7  ;;  %v10712_v58 = vpop.f32.mrf.mxu1 }
 0x141   : > { %v10600_v20 = vpop.f32.mrf.mxu0  ;;  %v10713_v2 = vadd.f32 %v10712_v58, %v10711_v36  ;;  %v11836_v58 = vld [vmem:[#allocation3 + $0x188] ss:$36 sps:$4 sm:$0xff]  }
 0x142   : > { %v10601_v39 = vadd.f32 %v10600_v20, %v10599_v60  ;;  %v10714_v5 = vpop.f32.mrf.mxu1 }
 0x143   : > { %v10602_v13 = vpop.f32.mrf.mxu0 }
 0x144   : > { %v12635_v18 = vadd.f32 %v10713_v2, %v10601_v39  ;;  %v10715_v59 = vpop.f32.mrf.mxu1 }
 0x145   : > { %v10603_v29 = vpop.f32.mrf.mxu0  ;;  %v10716_v6 = vadd.f32 %v10715_v59, %v10714_v5 }
 0x146   : > { %v10604_v43 = vadd.f32 %v10603_v29, %v10602_v13  ;;  %v10717_v38 = vpop.f32.mrf.mxu1 }
 0x147   : > { %v10605_v0 = vpop.f32.mrf.mxu0  ;;  %11500 = vmatmul.mubr.bf16.gmra.mxu0 %v11834_v8 }
 0x148   : > { %11503 = vmatprep.mubr.bf16.mxu0 %v11835_v4  ;;  %v12637_v31 = vadd.f32 %v10716_v6, %v10604_v43  ;;  %v10718_v60 = vpop.f32.mrf.mxu1 }
 0x149   : > { %v10606_v7 = vpop.f32.mrf.mxu0  ;;  %v10719_v36 = vadd.f32 %v10718_v60, %v10717_v38  ;;  %v11838_v60 = vld [vmem:[#allocation3 + $0x218] ss:$36 sps:$4 sm:$0xff]  }
 0x14a   : > { %v10607_v57 = vadd.f32 %v10606_v7, %v10605_v0  ;;  %v10720_v26 = vpop.f32.mrf.mxu1 }
 0x14b   : > { %v10608_v20 = vpop.f32.mrf.mxu0 }
 0x14c   : > { %v12639_v39 = vadd.f32 %v10719_v36, %v10607_v57  ;;  %v10721_v29 = vpop.f32.mrf.mxu1 }
 0x14d   : > { %v10609_v2 = vpop.f32.mrf.mxu0  ;;  %v10722_v5 = vadd.f32 %v10721_v29, %v10720_v26 }
 0x14e   : > { %v10610_v13 = vadd.f32 %v10609_v2, %v10608_v20  ;;  %v10723_v8 = vpop.f32.mrf.mxu1 }
 0x14f   : > { %v10611_v59 = vpop.f32.mrf.mxu0  ;;  %11504 = vmatmul.mubr.bf16.gmra.mxu0 %v11836_v58 }
 0x150   : > { %11507 = vmatprep.mubr.bf16.mxu0 %v11837_v25  ;;  %v12641_v4 = vadd.f32 %v10722_v5, %v10610_v13  ;;  %v10724_v0 = vpop.f32.mrf.mxu1 }
 0x151   : > { %v10612_v43 = vpop.f32.mrf.mxu0  ;;  %v10725_v38 = vadd.f32 %v10724_v0, %v10723_v8  ;;  %v11840_v0 = vld [vmem:[#allocation3 + $0x2a8] ss:$36 sps:$4 sm:$0xff]  }
 0x152   : > { %v10613_v6 = vadd.f32 %v10612_v43, %v10611_v59  ;;  %v10726_v55 = vpop.f32.mrf.mxu1 }
 0x153   : > { %v10614_v7 = vpop.f32.mrf.mxu0 }
 0x154   : > { %v12643_v57 = vadd.f32 %v10725_v38, %v10613_v6  ;;  %v10727_v2 = vpop.f32.mrf.mxu1 }
 0x155   : > { %v10615_v36 = vpop.f32.mrf.mxu0  ;;  %v10728_v26 = vadd.f32 %v10727_v2, %v10726_v55 }
 0x156   : > { %v10616_v20 = vadd.f32 %v10615_v36, %v10614_v7  ;;  %v10729_v58 = vpop.f32.mrf.mxu1 }
 0x157   : > { %v10617_v29 = vpop.f32.mrf.mxu0  ;;  %11508 = vmatmul.mubr.bf16.gmra.mxu0 %v11838_v60 }
 0x158   : > { %11511 = vmatprep.mubr.bf16.mxu0 %v11839_v53  ;;  %v12645_v25 = vadd.f32 %v10728_v26, %v10616_v20  ;;  %v10730_v59 = vpop.f32.mrf.mxu1 }
 0x159   : > { %v10618_v13 = vpop.f32.mrf.mxu0  ;;  %v10731_v8 = vadd.f32 %v10730_v59, %v10729_v58  ;;  %v11842_v59 = vld [vmem:[#allocation3 + $0x338] ss:$36 sps:$4 sm:$0xff]  }
 0x15a   : > { %v10619_v5 = vadd.f32 %v10618_v13, %v10617_v29  ;;  %v10732_v35 = vpop.f32.mrf.mxu1 }
 0x15b   : > { %v10620_v43 = vpop.f32.mrf.mxu0 }
 0x15c   : > { %v12647_v6 = vadd.f32 %v10731_v8, %v10619_v5  ;;  %v10733_v36 = vpop.f32.mrf.mxu1 }
 0x15d   : > { %v10621_v38 = vpop.f32.mrf.mxu0  ;;  %v10734_v55 = vadd.f32 %v10733_v36, %v10732_v35 }
 0x15e   : > { %v10622_v7 = vadd.f32 %v10621_v38, %v10620_v43  ;;  %v10735_v60 = vpop.f32.mrf.mxu1 }
 0x15f   : > { %v10623_v2 = vpop.f32.mrf.mxu0  ;;  %11512 = vmatmul.mubr.bf16.gmra.mxu0 %v11840_v0 }
 0x160   : > { %11515 = vmatprep.mubr.bf16.mxu0 %v11841_v30  ;;  %v12649_v53 = vadd.f32 %v10734_v55, %v10622_v7  ;;  %v10736_v29 = vpop.f32.mrf.mxu1 }
 0x161   : > { %v10624_v20 = vpop.f32.mrf.mxu0  ;;  %v10737_v58 = vadd.f32 %v10736_v29, %v10735_v60  ;;  %v11844_v29 = vld [vmem:[#allocation3 + $0x3c8] ss:$36 sps:$4 sm:$0xff]  }
 0x162   : > { %v10625_v26 = vadd.f32 %v10624_v20, %v10623_v2  ;;  %v10738_v49 = vpop.f32.mrf.mxu1 }
 0x163   : > { %v10626_v13 = vpop.f32.mrf.mxu0 }
 0x164   : > { %v12651_v5 = vadd.f32 %v10737_v58, %v10625_v26  ;;  %v10739_v38 = vpop.f32.mrf.mxu1 }
 0x165   : > { %v10627_v8 = vpop.f32.mrf.mxu0  ;;  %v10740_v35 = vadd.f32 %v10739_v38, %v10738_v49 }
 0x166   : > { %v10628_v43 = vadd.f32 %v10627_v8, %v10626_v13  ;;  %v10741_v0 = vpop.f32.mrf.mxu1 }
 0x167   : > { %v10629_v36 = vpop.f32.mrf.mxu0  ;;  %11516 = vmatmul.mubr.bf16.gmra.mxu0 %v11842_v59 }
 0x168   : > { %11519 = vmatprep.mubr.bf16.mxu0 %v11843_v40  ;;  %v12653_v30 = vadd.f32 %v10740_v35, %v10628_v43  ;;  %v10742_v2 = vpop.f32.mrf.mxu1 }
 0x169   : > { %v10630_v7 = vpop.f32.mrf.mxu0  ;;  %v10743_v60 = vadd.f32 %v10742_v2, %v10741_v0  ;;  %v11846_v2 = vld [vmem:[#allocation3 + $0x458] ss:$36 sps:$4 sm:$0xff]  }
 0x16a   : > { %v10631_v55 = vadd.f32 %v10630_v7, %v10629_v36  ;;  %v10744_v12 = vpop.f32.mrf.mxu1 }
 0x16b   : > { %v10632_v20 = vpop.f32.mrf.mxu0 }
 0x16c   : > { %v12655_v26 = vadd.f32 %v10743_v60, %v10631_v55  ;;  %v10745_v8 = vpop.f32.mrf.mxu1 }
 0x16d   : > { %v10633_v58 = vpop.f32.mrf.mxu0  ;;  %v10746_v49 = vadd.f32 %v10745_v8, %v10744_v12 }
 0x16e   : > { %v10634_v13 = vadd.f32 %v10633_v58, %v10632_v20  ;;  %v10747_v59 = vpop.f32.mrf.mxu1 }
 0x16f   : > { %v10635_v38 = vpop.f32.mrf.mxu0  ;;  %11520 = vmatmul.mubr.bf16.gmra.mxu0 %v11844_v29 }
 0x170   : > { %11523 = vmatprep.mubr.bf16.mxu0 %v11845_v11  ;;  %v12657_v40 = vadd.f32 %v10746_v49, %v10634_v13  ;;  %v10748_v36 = vpop.f32.mrf.mxu1 }
 0x171   : > { %v10636_v43 = vpop.f32.mrf.mxu0  ;;  %v10749_v0 = vadd.f32 %v10748_v36, %v10747_v59 }
 0x172   : > { %v10637_v35 = vadd.f32 %v10636_v43, %v10635_v38  ;;  %v10750_v63 = vpop.f32.mrf.mxu1 }
 0x173   : > { %v10638_v7 = vpop.f32.mrf.mxu0 }
 0x174   : > { %v12659_v61 = vadd.f32 %v10749_v0, %v10637_v35  ;;  %v10751_v20 = vpop.f32.mrf.mxu1 }
 0x175   : > { %v10639_v55 = vpop.f32.mrf.mxu0  ;;  %v10752_v58 = vadd.f32 %v10751_v20, %v10750_v63 }
 0x176   : > { %v10640_v60 = vadd.f32 %v10639_v55, %v10638_v7  ;;  %v10753_v29 = vpop.f32.mrf.mxu1 }
 0x177   : > { %v10641_v12 = vpop.f32.mrf.mxu0  ;;  %11524 = vmatmul.mubr.bf16.gmra.mxu0 %v11846_v2 }
 0x178   : > { %v12661_v8 = vadd.f32 %v10752_v58, %v10640_v60  ;;  %v10754_v49 = vpop.f32.mrf.mxu1 }
 0x179   : > { %v10642_v11 = vpop.f32.mrf.mxu0  ;;  %v10755_v38 = vadd.f32 %v10754_v49, %v10753_v29 }
 0x17a   : > { %v10643_v13 = vadd.f32 %v10642_v11, %v10641_v12  ;;  %v10756_v59 = vpop.f32.mrf.mxu1 }
 0x17b   : > { %v10644_v43 = vpop.f32.mrf.mxu0 }
 0x17c   : > { %v12663_v36 = vadd.f32 %v10755_v38, %v10643_v13  ;;  %v10757_v0 = vpop.f32.mrf.mxu1 }
 0x17d   : > { %v10645_v52 = vpop.f32.mrf.mxu0  ;;  %v10758_v44 = vadd.f32 %v10757_v0, %v10756_v59 }
 0x17e   : > { %v10646_v35 = vadd.f32 %v10645_v52, %v10644_v43  ;;  %v10887_v55 = vpop.f32.mrf.mxu1 }
 0x17f   : > { %v10775_v7 = vpop.f32.mrf.mxu0 }
 0x180   : > { %v12665_v63 = vadd.f32 %v10758_v44, %v10646_v35  ;;  %v10888_v60 = vpop.f32.mrf.mxu1 }
 0x181   : > { %v10776_v2 = vpop.f32.mrf.mxu0  ;;  %v10889_v62 = vadd.f32 %v10888_v60, %v10887_v55 }
 0x182   : > { %v10777_v20 = vadd.f32 %v10776_v2, %v10775_v7  ;;  %v12668_v29 = vpop.f32.mrf.mxu1 }
 0x183   : > { %v10778_v58 = vpop.f32.mrf.mxu0 }
 0x184   : > { %v3872_v12 = vadd.f32 %v10777_v20, %v12603_v1  ;;  %v12670_v49 = vpop.f32.mrf.mxu1 }
 0x185   : > { %v10779_v11 = vpop.f32.mrf.mxu0 }
 0x186   : > { %v10780_v13 = vadd.f32 %v10779_v11, %v10778_v58  ;;  %v12672_v52 = vadd.f32 %v10889_v62, %v3872_v12  ;;  %v12677_v44 = vpop.f32.mrf.mxu1  ;;  %v11847_v12 = vld [vmem:[%s14214_s2 + $0x78] sm:$0xff]  }
 0x187   : > { %v10781_v38 = vpop.f32.mrf.mxu0  ;;  %11007 = vmatprep.subr.bf16.mxu1 %v11847_v12 }
 0x188   : > { %v12675_v43 = vadd.f32 %v10780_v13, %v12605_v17  ;;  %v12679_v0 = vpop.f32.mrf.mxu1 }
 0x189   : > { %v10782_v59 = vpop.f32.mrf.mxu0 }
 0x18a   : > { %v10783_v35 = vadd.f32 %v10782_v59, %v10781_v38  ;;  %v12684_v55 = vpop.f32.mrf.mxu1 }
 0x18b   : > { %v10784_v7 = vpop.f32.mrf.mxu0 }
 0x18c   : > { %v12682_v1 = vadd.f32 %v10783_v35, %v12607_v23  ;;  %v12686_v62 = vpop.f32.mrf.mxu1  ;;  %v11848_v23 = vld [vmem:[%s14214_s2 + $0x38] sm:$0xff]  }
 0x18d   : > { %v10785_v2 = vpop.f32.mrf.mxu0  ;;  %11008 = vmatpush3.bf16.msra.mxu1 %v11848_v23 }
 0x18e   : > { %v10786_v20 = vadd.f32 %v10785_v2, %v10784_v7  ;;  %v12691_v58 = vpop.f32.mrf.mxu1 }
 0x18f   : > { %v10787_v60 = vpop.f32.mrf.mxu0 }
 0x190   : > { %v12689_v17 = vadd.f32 %v10786_v20, %v12609_v51  ;;  %v12699_v38 = vpop.f32.mrf.mxu1 }
 0x191   : > { %v10788_v11 = vpop.f32.mrf.mxu0 }
 0x192   : > { %v10789_v13 = vadd.f32 %v10788_v11, %v10787_v60  ;;  %v12704_v35 = vpop.f32.mrf.mxu1 }
 0x193   : > { %v10790_v59 = vpop.f32.mrf.mxu0 }
 0x194   : > { %v12702_v51 = vadd.f32 %v10789_v13, %v12611_v14  ;;  %v12706_v20 = vpop.f32.mrf.mxu1 }
 0x195   : > { %v10791_v7 = vpop.f32.mrf.mxu0 }
 0x196   : > { %v10792_v2 = vadd.f32 %v10791_v7, %v10790_v59  ;;  %v12711_v27 = vpop.f32.mrf.mxu1 }
 0x197   : > { %v10793_v54 = vpop.f32.mrf.mxu0 }
 0x198   : > { %v12709_v48 = vadd.f32 %v10792_v2, %v12613_v24  ;;  %v12713_v12 = vpop.f32.mrf.mxu1 }
 0x199   : > { %v10794_v60 = vpop.f32.mrf.mxu0 }
 0x19a   : > { %v10795_v11 = vadd.f32 %v10794_v60, %v10793_v54  ;;  %v12718_v13 = vpop.f32.mrf.mxu1  ;;  %v11849_v54 = vld [vmem:[%s14214_s2 + $0x70] sm:$0xff]  }
 0x19b   : > { %v10796_v23 = vpop.f32.mrf.mxu0  ;;  %11009 = vmatprep.subr.bf16.mxu1 %v11849_v54 }
 0x19c   : > { %v12716_v14 = vadd.f32 %v10795_v11, %v12615_v56  ;;  %v12720_v7 = vpop.f32.mrf.mxu1  ;;  %v11850_v56 = vld [vmem:[%s14214_s2 + $0x30] sm:$0xff]  }
 0x19d   : > { %v10797_v50 = vpop.f32.mrf.mxu0  ;;  %11010 = vmatpush3.bf16.msra.mxu1 %v11850_v56 }
 0x19e   : > { %v10798_v59 = vadd.f32 %v10797_v50, %v10796_v23  ;;  %v12725_v2 = vpop.f32.mrf.mxu1 }
 0x19f   : > { %v10799_v47 = vpop.f32.mrf.mxu0 }
 0x1a0   : > { %v12723_v24 = vadd.f32 %v10798_v59, %v12617_v3  ;;  %v12733_v46 = vpop.f32.mrf.mxu1 }
 0x1a1   : > { %v10800_v60 = vpop.f32.mrf.mxu0 }
 0x1a2   : > { %v10801_v11 = vadd.f32 %v10800_v60, %v10799_v47  ;;  %v12738_v23 = vpop.f32.mrf.mxu1 }
 0x1a3   : > { %v10802_v50 = vpop.f32.mrf.mxu0 }
 0x1a4   : > { %v12736_v3 = vadd.f32 %v10801_v11, %v12619_v19  ;;  %v12740_v42 = vpop.f32.mrf.mxu1 }
 0x1a5   : > { %v10803_v59 = vpop.f32.mrf.mxu0 }
 0x1a6   : > { %v10804_v45 = vadd.f32 %v10803_v59, %v10802_v50  ;;  %v12745_v32 = vpop.f32.mrf.mxu1 }
 0x1a7   : > { %v10805_v41 = vpop.f32.mrf.mxu0 }
 0x1a8   : > { %v12743_v33 = vadd.f32 %v10804_v45, %v12621_v21  ;;  %v12747_v54 = vpop.f32.mrf.mxu1 }
 0x1a9   : > { %v10806_v47 = vpop.f32.mrf.mxu0 }
 0x1aa   : > { %14280 = vst [vmem:[#allocation36_spill] sm:$0xff] %v12743_v33  ;;  %v10807_v60 = vadd.f32 %v10806_v47, %v10805_v41  ;;  %v12752_v11 = vpop.f32.mrf.mxu1  ;;  %v11851_v41 = vld [vmem:[%s14214_s2 + $0x68] sm:$0xff]  }
 0x1ab   : > { %v10808_v56 = vpop.f32.mrf.mxu0  ;;  %14282 = vst [vmem:[#allocation38_spill] sm:$0xff] %v12752_v11  ;;  %11011 = vmatprep.subr.bf16.mxu1 %v11851_v41 }
 0x1ac   : > { %v12750_v19 = vadd.f32 %v10807_v60, %v12623_v15  ;;  %v12754_v59 = vpop.f32.mrf.mxu1  ;;  %v11852_v15 = vld [vmem:[%s14214_s2 + $0x28] sm:$0xff]  }
 0x1ad   : > { %v10809_v37 = vpop.f32.mrf.mxu0  ;;  %14283 = vst [vmem:[#allocation39_spill] sm:$0xff] %v12754_v59  ;;  %11012 = vmatpush3.bf16.msra.mxu1 %v11852_v15 }
 0x1ae   : > { %14281 = vst [vmem:[#allocation37_spill] sm:$0xff] %v12750_v19  ;;  %v10810_v50 = vadd.f32 %v10809_v37, %v10808_v56  ;;  %v12759_v21 = vpop.f32.mrf.mxu1 }
 0x1af   : > { %v10811_v34 = vpop.f32.mrf.mxu0  ;;  %14285 = vst [vmem:[#allocation41_spill] sm:$0xff] %v12759_v21 }
 0x1b0   : > { %v12757_v45 = vadd.f32 %v10810_v50, %v12625_v28  ;;  %v12767_v33 = vpop.f32.mrf.mxu1 }
 0x1b1   : > { %v10812_v47 = vpop.f32.mrf.mxu0 }
 0x1b2   : > { %14284 = vst [vmem:[#allocation40_spill] sm:$0xff] %v12757_v45  ;;  %v10813_v60 = vadd.f32 %v10812_v47, %v10811_v34  ;;  %v12772_v56 = vpop.f32.mrf.mxu1 }
 0x1b3   : > { %v10814_v37 = vpop.f32.mrf.mxu0 }
 0x1b4   : > { %v12770_v28 = vadd.f32 %v10813_v60, %v12627_v10  ;;  %v12774_v19 = vpop.f32.mrf.mxu1 }
 0x1b5   : > { %v10815_v50 = vpop.f32.mrf.mxu0  ;;  %14287 = vst [vmem:[#allocation43_spill] sm:$0xff] %v12774_v19 }
 0x1b6   : > { %14286 = vst [vmem:[#allocation42_spill] sm:$0xff] %v12770_v28  ;;  %v10816_v45 = vadd.f32 %v10815_v50, %v10814_v37  ;;  %v12779_v11 = vpop.f32.mrf.mxu1 }
 0x1b7   : > { %v10817_v21 = vpop.f32.mrf.mxu0 }
 0x1b8   : > { %v12777_v59 = vadd.f32 %v10816_v45, %v12629_v16  ;;  %v12781_v41 = vpop.f32.mrf.mxu1 }
 0x1b9   : > { %v10818_v34 = vpop.f32.mrf.mxu0 }
 0x1ba   : > { %14288 = vst [vmem:[#allocation44_spill] sm:$0xff] %v12777_v59  ;;  %v10819_v47 = vadd.f32 %v10818_v34, %v10817_v21  ;;  %v12786_v60 = vpop.f32.mrf.mxu1  ;;  %v11853_v21 = vld [vmem:[%s14214_s2 + $0x60] sm:$0xff]  }
 0x1bb   : > { %v10820_v15 = vpop.f32.mrf.mxu0  ;;  %14290 = vst [vmem:[#allocation46_spill] sm:$0xff] %v12786_v60  ;;  %11013 = vmatprep.subr.bf16.mxu1 %v11853_v21 }
 0x1bc   : > { %v12784_v10 = vadd.f32 %v10819_v47, %v12631_v22  ;;  %v12788_v50 = vpop.f32.mrf.mxu1  ;;  %v11854_v22 = vld [vmem:[%s14214_s2 + $0x20] sm:$0xff]  }
 0x1bd   : > { %v10821_v28 = vpop.f32.mrf.mxu0  ;;  %14291 = vst [vmem:[#allocation47_spill] sm:$0xff] %v12788_v50  ;;  %11014 = vmatpush3.bf16.msra.mxu1 %v11854_v22 }
 0x1be   : > { %14289 = vst [vmem:[#allocation45_spill] sm:$0xff] %v12784_v10  ;;  %v10822_v37 = vadd.f32 %v10821_v28, %v10820_v15  ;;  %v12793_v45 = vpop.f32.mrf.mxu1 }
 0x1bf   : > { %v10823_v19 = vpop.f32.mrf.mxu0  ;;  %14293 = vst [vmem:[#allocation49_spill] sm:$0xff] %v12793_v45 }
 0x1c0   : > { %v12791_v16 = vadd.f32 %v10822_v37, %v12633_v9  ;;  %v12801_v59 = vpop.f32.mrf.mxu1 }
 0x1c1   : > { %v10824_v34 = vpop.f32.mrf.mxu0 }
 0x1c2   : > { %14292 = vst [vmem:[#allocation48_spill] sm:$0xff] %v12791_v16  ;;  %v10825_v47 = vadd.f32 %v10824_v34, %v10823_v19  ;;  %v12806_v15 = vpop.f32.mrf.mxu1 }
 0x1c3   : > { %v10826_v28 = vpop.f32.mrf.mxu0  ;;  %14295 = vst [vmem:[#allocation51_spill] sm:$0xff] %v12806_v15 }
 0x1c4   : > { %v12804_v9 = vadd.f32 %v10825_v47, %v12635_v18  ;;  %v12808_v10 = vpop.f32.mrf.mxu1 }
 0x1c5   : > { %v10827_v37 = vpop.f32.mrf.mxu0  ;;  %14296 = vst [vmem:[#allocation52_spill] sm:$0xff] %v12808_v10 }
 0x1c6   : > { %14294 = vst [vmem:[#allocation50_spill] sm:$0xff] %v12804_v9  ;;  %v10828_v16 = vadd.f32 %v10827_v37, %v10826_v28  ;;  %v12813_v34 = vpop.f32.mrf.mxu1 }
 0x1c7   : > { %v10829_v45 = vpop.f32.mrf.mxu0 }
 0x1c8   : > { %v12811_v50 = vadd.f32 %v10828_v16, %v12637_v31  ;;  %v12818_v47 = vpop.f32.mrf.mxu1 }
 0x1c9   : > { %v10830_v60 = vpop.f32.mrf.mxu0 }
 0x1ca   : > { %14297 = vst [vmem:[#allocation53_spill] sm:$0xff] %v12811_v50  ;;  %v10831_v19 = vadd.f32 %v10830_v60, %v10829_v45  ;;  %v12823_v10 = vpop.f32.mrf.mxu1 }
 0x1cb   : > { %v10832_v21 = vpop.f32.mrf.mxu0 }
 0x1cc   : > { %v12816_v22 = vadd.f32 %v10831_v19, %v12639_v39  ;;  %v12828_v50 = vpop.f32.mrf.mxu1 }
 0x1cd   : > { %v10833_v18 = vpop.f32.mrf.mxu0 }
 0x1ce   : > { %14298 = vst [vmem:[#allocation54_spill] sm:$0xff] %v12816_v22  ;;  %v10834_v9 = vadd.f32 %v10833_v18, %v10832_v21  ;;  %v12833_v18 = vpop.f32.mrf.mxu1 }
 0x1cf   : > { %v10835_v15 = vpop.f32.mrf.mxu0 }
 0x1d0   : > { %v12821_v28 = vadd.f32 %v10834_v9, %v12641_v4 }
 0x1d1   : > { %v10836_v37 = vpop.f32.mrf.mxu0 }
 0x1d2   : > { %14299 = vst [vmem:[#allocation55_spill] sm:$0xff] %v12821_v28  ;;  %v10837_v31 = vadd.f32 %v10836_v37, %v10835_v15  ;;  %v12838_v37 = vpop.f32.mrf.mxu1 }
 0x1d3   : > { %v10838_v16 = vpop.f32.mrf.mxu0 }
 0x1d4   : > { %v12826_v60 = vadd.f32 %v10837_v31, %v12643_v57 }
 0x1d5   : > { %v10839_v45 = vpop.f32.mrf.mxu0 }
 0x1d6   : > { %14300 = vst [vmem:[#allocation56_spill] sm:$0xff] %v12826_v60  ;;  %v10840_v39 = vadd.f32 %v10839_v45, %v10838_v16  ;;  %v12843_v45 = vpop.f32.mrf.mxu1 }
 0x1d7   : > { %v10841_v19 = vpop.f32.mrf.mxu0 }
 0x1d8   : > { %v12831_v22 = vadd.f32 %v10840_v39, %v12645_v25 }
 0x1d9   : > { %v10842_v21 = vpop.f32.mrf.mxu0 }
 0x1da   : > { %14301 = vst [vmem:[#allocation57_spill] sm:$0xff] %v12831_v22  ;;  %v10843_v4 = vadd.f32 %v10842_v21, %v10841_v19  ;;  %v12848_v21 = vpop.f32.mrf.mxu1 }
 0x1db   : > { %v10844_v9 = vpop.f32.mrf.mxu0 }
 0x1dc   : > { %v12836_v28 = vadd.f32 %v10843_v4, %v12647_v6 }
 0x1dd   : > { %v10845_v15 = vpop.f32.mrf.mxu0 }
 0x1de   : > { %14302 = vst [vmem:[#allocation58_spill] sm:$0xff] %v12836_v28  ;;  %v10846_v57 = vadd.f32 %v10845_v15, %v10844_v9  ;;  %v12853_v15 = vpop.f32.mrf.mxu1 }
 0x1df   : > { %v10847_v31 = vpop.f32.mrf.mxu0 }
 0x1e0   : > { %v12841_v60 = vadd.f32 %v10846_v57, %v12649_v53 }
 0x1e1   : > { %v10848_v16 = vpop.f32.mrf.mxu0 }
 0x1e2   : > { %14303 = vst [vmem:[#allocation59_spill] sm:$0xff] %v12841_v60  ;;  %v10849_v25 = vadd.f32 %v10848_v16, %v10847_v31  ;;  %v12858_v16 = vpop.f32.mrf.mxu1 }
 0x1e3   : > { %v10850_v39 = vpop.f32.mrf.mxu0 }
 0x1e4   : > { %v12846_v22 = vadd.f32 %v10849_v25, %v12651_v5 }
 0x1e5   : > { %v10851_v19 = vpop.f32.mrf.mxu0 }
 0x1e6   : > { %14304 = vst [vmem:[#allocation60_spill] sm:$0xff] %v12846_v22  ;;  %v10852_v6 = vadd.f32 %v10851_v19, %v10850_v39  ;;  %v12863_v19 = vpop.f32.mrf.mxu1 }
 0x1e7   : > { %v10853_v4 = vpop.f32.mrf.mxu0 }
 0x1e8   : > { %v12851_v28 = vadd.f32 %v10852_v6, %v12653_v30 }
 0x1e9   : > { %v10854_v9 = vpop.f32.mrf.mxu0 }
 0x1ea   : > { %14305 = vst [vmem:[#allocation61_spill] sm:$0xff] %v12851_v28  ;;  %v10855_v53 = vadd.f32 %v10854_v9, %v10853_v4  ;;  %v12871_v9 = vpop.f32.mrf.mxu1 }
 0x1eb   : > { %v10856_v57 = vpop.f32.mrf.mxu0 }
 0x1ec   : > { %v12856_v60 = vadd.f32 %v10855_v53, %v12655_v26  ;;  %v11861_v26 = vld [vmem:[%s14214_s2 + $0xf8] sm:$0xff]  }
 0x1ed   : > { %v10857_v31 = vpop.f32.mrf.mxu0  ;;  %11119 = vmatprep.subr.bf16.mxu0 %v11861_v26  ;;  %v11865_v26 = vld [vmem:[%s14214_s2 + $0xe8] sm:$0xff]  }
 0x1ee   : > { %v10858_v5 = vadd.f32 %v10857_v31, %v10856_v57 }
 0x1ef   : > { %v10859_v25 = vpop.f32.mrf.mxu0 }
 0x1f0   : > { %v12861_v22 = vadd.f32 %v10858_v5, %v12657_v40  ;;  %v11862_v40 = vld [vmem:[%s14214_s2 + $0xb8] sm:$0xff]   ;;  %v11863_v5 = vld [vmem:[%s14214_s2 + $0xf0] sm:$0xff]  }
 0x1f1   : > { %v10860_v39 = vpop.f32.mrf.mxu0  ;;  %11120 = vmatpush3.bf16.msra.mxu0 %v11862_v40 }
 0x1f2   : > { %v10861_v30 = vadd.f32 %v10860_v39, %v10859_v25  ;;  %v12882_v25 = vpop.f32.mrf.mxu1  ;;  %11121 = vmatprep.subr.bf16.mxu0 %v11863_v5  ;;  %v10892_v5 = vadd.f32 %v12670_v49, %v12668_v29  ;;  %v11868_v29 = vld [vmem:[%s14214_s2 + $0xa0] sm:$0xff]   ;;  %v10901_v49 = vadd.f32 %v12699_v38, %v12691_v58 }
 0x1f3   : > { %v10862_v6 = vpop.f32.mrf.mxu0 }
 0x1f4   : > { %v12866_v28 = vadd.f32 %v10861_v30, %v12659_v61  ;;  %v11864_v30 = vld [vmem:[%s14214_s2 + $0xb0] sm:$0xff]   ;;  %v4036_v58 = vadd.f32 %v10892_v5, %v12675_v43  ;;  %v11872_v43 = vld [vmem:[%s14214_s2 + $0x98] sm:$0xff]  }
 0x1f5   : > { %v10863_v4 = vpop.f32.mrf.mxu0  ;;  %11122 = vmatpush3.bf16.msra.mxu0 %v11864_v30 }
 0x1f6   : > { %v10864_v53 = vadd.f32 %v10863_v4, %v10862_v6  ;;  %11123 = vmatprep.subr.bf16.mxu0 %v11865_v26 }
 0x1f7   : > { %v10865_v57 = vpop.f32.mrf.mxu0 }
 0x1f8   : > { %v12877_v31 = vadd.f32 %v10864_v53, %v12661_v8  ;;  %v12893_v53 = vpop.f32.mrf.mxu1 }
 0x1f9   : > { %v10866_v61 = vpop.f32.mrf.mxu0 }
 0x1fa   : > { %14306 = vst [vmem:[#allocation62_spill] sm:$0xff] %v12877_v31  ;;  %v10867_v39 = vadd.f32 %v10866_v61, %v10865_v57  ;;  %v11866_v57 = vld [vmem:[%s14214_s2 + $0xa8] sm:$0xff]   ;;  %v12910_v31 = vpop.f32.mrf.mxu1 }
 0x1fb   : > { %v10868_v6 = vpop.f32.mrf.mxu0  ;;  %11124 = vmatpush3.bf16.msra.mxu0 %v11866_v57 }
 0x1fc   : > { %v12888_v4 = vadd.f32 %v10867_v39, %v12663_v36  ;;  %v10895_v36 = vadd.f32 %v12679_v0, %v12677_v44  ;;  %v11855_v44 = vld [vmem:[%s14214_s2 + $0x58] sm:$0xff]   ;;  %v12934_v57 = vpop.f32.mrf.mxu1 }
 0x1fd   : > { %v10869_v8 = vpop.f32.mrf.mxu0  ;;  %v11856_v0 = vld [vmem:[%s14214_s2 + $0x18] sm:$0xff]   ;;  %11015 = vmatprep.subr.bf16.mxu1 %v11855_v44 }
 0x1fe   : > { %14307 = vst [vmem:[#allocation63_spill] sm:$0xff] %v12888_v4  ;;  %v10870_v40 = vadd.f32 %v10869_v8, %v10868_v6  ;;  %v11867_v6 = vld [vmem:[%s14214_s2 + $0xe0] sm:$0xff]   ;;  %v10898_v8 = vadd.f32 %v12686_v62, %v12684_v55  ;;  %v11857_v55 = vld [vmem:[%s14214_s2 + $0x50] sm:$0xff]   ;;  %v4041_v62 = vadd.f32 %v10895_v36, %v12682_v1  ;;  %11016 = vmatpush3.bf16.msra.mxu1 %v11856_v0 }
 0x1ff   : > { %v11497_v61 = vpop.f32.mrf.mxu0  ;;  %11125 = vmatprep.subr.bf16.mxu0 %v11867_v6  ;;  %v11873_v1 = vld [vmem:[%s14214_s2 + $0xd0] sm:$0xff]   ;;  %v4049_v36 = vadd.f32 %v10901_v49, %v12702_v51  ;;  %11017 = vmatprep.subr.bf16.mxu1 %v11857_v55  ;;  %v11875_v49 = vld [vmem:[%s14214_s2 + $0xc8] sm:$0xff]  }
 0x200   : > { %v12903_v39 = vadd.f32 %v10870_v40, %v12665_v63  ;;  %11126 = vmatpush3.bf16.msra.mxu0 %v11868_v29  ;;  %v11871_v40 = vld [vmem:[%s14214_s2 + $0xd8] sm:$0xff]   ;;  %v4044_v6 = vadd.f32 %v10898_v8, %v12689_v17  ;;  %v10907_v17 = vadd.f32 %v12713_v12, %v12711_v27  ;;  %v11874_v51 = vld [vmem:[%s14214_s2 + $0x90] sm:$0xff]  }
 0x201   : > { %v4193_v30 = vpop.f32.mrf.mxu0  ;;  %11127 = vmatprep.subr.bf16.mxu0 %v11871_v40  ;;  %v11869_v40 = vld [vmem:[%s14214_s2 + $0x40] sm:$0xff]  }
 0x202   : > { %14308 = vst [vmem:[#allocation64_spill] sm:$0xff] %v12903_v39  ;;  %v12928_v26 = vadd.f32 %v4193_v30, %v12672_v52  ;;  %v12936_v39 = vadd.f32 %v11497_v61, %v4041_v62  ;;  %v11858_v52 = vld [vmem:[%s14214_s2 + $0x10] sm:$0xff]   ;;  %v10904_v61 = vadd.f32 %v12706_v20, %v12704_v35  ;;  %v11859_v30 = vld [vmem:[%s14214_s2 + $0x48] sm:$0xff]   ;;  %v10910_v20 = vadd.f32 %v12720_v7, %v12718_v13 }
 0x203   : > { %v11498_v63 = vpop.f32.mrf.mxu0  ;;  %11018 = vmatpush3.bf16.msra.mxu1 %v11858_v52  ;;  %v11860_v13 = vld [vmem:[%s14214_s2 + $0x8] sm:$0xff]   ;;  %v10913_v7 = vadd.f32 %v12733_v46, %v12725_v2 }
 0x204   : > { %v4357_v8 = vmul.f32 %v12928_v26, %v12928_v26  ;;  %v12960_v29 = vadd.f32 %v11498_v63, %v4044_v6  ;;  %11128 = vmatpush3.bf16.msra.mxu0 %v11872_v43  ;;  %v12974_v63 = vpop.f32.mrf.mxu1  ;;  %v4359_v44 = vmul.f32 %v12936_v39, %v12936_v39  ;;  %11019 = vmatprep.subr.bf16.mxu1 %v11859_v30  ;;  %v11876_v46 = vld [vmem:[%s14214_s2 + $0x88] sm:$0xff]  }
 0x205   : > { %v4196_v38 = vpop.f32.mrf.mxu0  ;;  %11129 = vmatprep.subr.bf16.mxu0 %v11873_v1  ;;  %v4052_v1 = vadd.f32 %v10904_v61, %v12709_v48  ;;  %v4060_v2 = vadd.f32 %v10910_v20, %v12723_v24  ;;  %v11870_v24 = vld [vmem:[%s14214_s2] sm:$0xff]   ;;  %v4065_v20 = vadd.f32 %v10913_v7, %v12736_v3  ;;  %v11885_v3 = vld [vmem:[%s14214_s2 + $0x178] sm:$0xff]  }
 0x206   : > { %v12939_v4 = vadd.f32 %v4196_v38, %v4036_v58  ;;  %v4057_v58 = vadd.f32 %v10907_v17, %v12716_v14  ;;  %v4360_v6 = vmul.f32 %v12960_v29, %v12960_v29  ;;  %v13003_v30 = vpop.f32.mrf.mxu1 }
 0x207   : > { %v11501_v5 = vpop.f32.mrf.mxu0  ;;  %11020 = vmatpush3.bf16.msra.mxu1 %v11860_v13 }
 0x208   : > { %v4320_v35 = vadd.f32 %v12939_v4, %v12928_v26  ;;  %v4358_v27 = vmul.f32 %v12939_v4, %v12939_v4  ;;  %11130 = vmatpush3.bf16.msra.mxu0 %v11874_v51  ;;  %v12997_v14 = vadd.f32 %v11501_v5, %v4057_v58  ;;  %v10916_v5 = vadd.f32 %v12740_v42, %v12738_v23  ;;  %v11878_v42 = vld [vmem:[%s14214_s2 + $0x80] sm:$0xff]   ;;  %v13031_v13 = vpop.f32.mrf.mxu1 }
 0x209   : > { %v4209_v12 = vpop.f32.mrf.mxu0  ;;  %11131 = vmatprep.subr.bf16.mxu0 %v11875_v49  ;;  %11021 = vmatprep.subr.bf16.mxu1 %v11869_v40  ;;  %v14309_v23 = vld [vmem:[#allocation38_spill] sm:$0xff] }
 0x20a   : > { %v4321_v0 = vadd.f32 %v4320_v35, %v12936_v39  ;;  %v4389_v55 = vadd.f32 %v4358_v27, %v4357_v8  ;;  %v12979_v62 = vadd.f32 %v4209_v12, %v4049_v36  ;;  %v11877_v36 = vld [vmem:[%s14214_s2 + $0xc0] sm:$0xff]   ;;  %v10919_v27 = vadd.f32 %v12747_v54, %v12745_v32 }
 0x20b   : > { %v11502_v38 = vpop.f32.mrf.mxu0  ;;  %v4363_v7 = vmul.f32 %v12997_v14, %v12997_v14  ;;  %11022 = vmatpush3.bf16.msra.mxu1 %v11870_v24 }
 0x20c   : > { %v4390_v43 = vadd.f32 %v4389_v55, %v4359_v44  ;;  %v4322_v52 = vadd.f32 %v4321_v0, %v12960_v29  ;;  %v4361_v48 = vmul.f32 %v12979_v62, %v12979_v62  ;;  %v13018_v49 = vadd.f32 %v11502_v38, %v4060_v2  ;;  %11132 = vmatpush3.bf16.msra.mxu0 %v11876_v46  ;;  %v14310_v55 = vld [vmem:[#allocation39_spill] sm:$0xff] }
 0x20d   : > { %v4212_v17 = vpop.f32.mrf.mxu0  ;;  %v10922_v32 = vadd.f32 %v14310_v55, %v14309_v23  ;;  %11133 = vmatprep.subr.bf16.mxu0 %v11877_v36  ;;  %11231 = vmatprep.subr.bf16.mxu1 %v11885_v3  ;;  %v14315_v55 = vld [vmem:[#allocation43_spill] sm:$0xff] }
 0x20e   : > { %v4323_v8 = vadd.f32 %v4322_v52, %v12979_v62  ;;  %v4391_v61 = vadd.f32 %v4390_v43, %v4360_v6  ;;  %v13008_v35 = vadd.f32 %v4212_v17, %v4052_v1  ;;  %v14311_v6 = vld [vmem:[#allocation41_spill] sm:$0xff]  ;;  %v4364_v2 = vmul.f32 %v13018_v49, %v13018_v49 }
 0x20f   : > { %v11505_v51 = vpop.f32.mrf.mxu0  ;;  %v10925_v43 = vadd.f32 %v12767_v33, %v14311_v6  ;;  %v14312_v52 = vld [vmem:[#allocation37_spill] sm:$0xff]  ;;  %v14317_v6 = vld [vmem:[#allocation46_spill] sm:$0xff] }
 0x210   : > { %v4392_v12 = vadd.f32 %v4391_v61, %v4361_v48  ;;  %v4324_v44 = vadd.f32 %v4323_v8, %v13008_v35  ;;  %v4362_v0 = vmul.f32 %v13008_v35, %v13008_v35  ;;  %v4073_v1 = vadd.f32 %v10919_v27, %v14312_v52  ;;  %v14313_v8 = vld [vmem:[#allocation36_spill] sm:$0xff]  ;;  %11134 = vmatpush3.bf16.msra.mxu0 %v11878_v42  ;;  %v14316_v42 = vld [vmem:[#allocation42_spill] sm:$0xff]  ;;  %v14318_v52 = vld [vmem:[#allocation47_spill] sm:$0xff] }
 0x211   : > { %v4225_v54 = vpop.f32.mrf.mxu0  ;;  %v4068_v48 = vadd.f32 %v10916_v5, %v14313_v8  ;;  %v10931_v5 = vadd.f32 %v12781_v41, %v12779_v11  ;;  %v14320_v8 = vld [vmem:[#allocation45_spill] sm:$0xff] }
 0x212   : > { %v4325_v58 = vadd.f32 %v4324_v44, %v12997_v14  ;;  %v4393_v38 = vadd.f32 %v4392_v12, %v4362_v0  ;;  %v13036_v40 = vadd.f32 %v4225_v54, %v4065_v20  ;;  %v13045_v61 = vadd.f32 %v11505_v51, %v4073_v1  ;;  %v14314_v20 = vld [vmem:[#allocation40_spill] sm:$0xff]  ;;  %v13048_v44 = vpop.f32.mrf.mxu1 }
 0x213   : > { %v11506_v46 = vpop.f32.mrf.mxu0  ;;  %v4076_v24 = vadd.f32 %v10922_v32, %v14314_v20  ;;  %v10928_v54 = vadd.f32 %v14315_v55, %v12772_v56  ;;  %v4081_v32 = vadd.f32 %v10925_v43, %v14316_v42  ;;  %v10934_v1 = vadd.f32 %v14318_v52, %v14317_v6  ;;  %v14322_v42 = vld [vmem:[#allocation48_spill] sm:$0xff]  ;;  %v14323_v52 = vld [vmem:[#allocation51_spill] sm:$0xff] }
 0x214   : > { %v4394_v17 = vadd.f32 %v4393_v38, %v4363_v7  ;;  %v4326_v36 = vadd.f32 %v4325_v58, %v13018_v49  ;;  %v4365_v27 = vmul.f32 %v13036_v40, %v13036_v40  ;;  %v4367_v11 = vmul.f32 %v13045_v61, %v13045_v61 }
 0x215   : > { %v4228_v12 = vpop.f32.mrf.mxu0  ;;  %v13060_v7 = vadd.f32 %v11506_v46, %v4076_v24  ;;  %v14319_v46 = vld [vmem:[#allocation49_spill] sm:$0xff] }
 0x216   : > { %v4327_v33 = vadd.f32 %v4326_v36, %v13036_v40  ;;  %v4395_v0 = vadd.f32 %v4394_v17, %v4364_v2  ;;  %v13053_v23 = vadd.f32 %v4228_v12, %v4068_v48  ;;  %v13067_v17 = vpop.f32.mrf.mxu1  ;;  %v10937_v36 = vadd.f32 %v12801_v59, %v14319_v46 }
 0x217   : > { %v11509_v51 = vpop.f32.mrf.mxu0  ;;  %v4089_v48 = vadd.f32 %v10931_v5, %v14320_v8  ;;  %v4368_v24 = vmul.f32 %v13060_v7, %v13060_v7 }
 0x218   : > { %v4396_v3 = vadd.f32 %v4395_v0, %v4365_v27  ;;  %v4328_v58 = vadd.f32 %v4327_v33, %v13053_v23  ;;  %v4366_v38 = vmul.f32 %v13053_v23, %v13053_v23  ;;  %v14321_v27 = vld [vmem:[#allocation44_spill] sm:$0xff] }
 0x219   : > { %v4241_v2 = vpop.f32.mrf.mxu0  ;;  %v4084_v0 = vadd.f32 %v10928_v54, %v14321_v27  ;;  %v13081_v55 = vadd.f32 %v11509_v51, %v4089_v48  ;;  %v10943_v54 = vadd.f32 %v12818_v47, %v12813_v34 }
 0x21a   : > { %v4329_v56 = vadd.f32 %v4328_v58, %v13045_v61  ;;  %v4397_v41 = vadd.f32 %v4396_v3, %v4366_v38  ;;  %v13072_v43 = vadd.f32 %v4241_v2, %v4081_v32  ;;  %v4092_v3 = vadd.f32 %v10934_v1, %v14322_v42  ;;  %v13084_v58 = vpop.f32.mrf.mxu1  ;;  %v14324_v2 = vld [vmem:[#allocation52_spill] sm:$0xff] }
 0x21b   : > { %v11510_v20 = vpop.f32.mrf.mxu0  ;;  %v4371_v34 = vmul.f32 %v13081_v55, %v13081_v55 }
 0x21c   : > { %v4398_v12 = vadd.f32 %v4397_v41, %v4367_v11  ;;  %v4330_v33 = vadd.f32 %v4329_v56, %v13060_v7  ;;  %v4369_v5 = vmul.f32 %v13072_v43, %v13072_v43  ;;  %v10940_v11 = vadd.f32 %v14324_v2, %v14323_v52  ;;  %v14325_v56 = vld [vmem:[#allocation50_spill] sm:$0xff]  ;;  %v14328_v52 = vld [vmem:[#allocation55_spill] sm:$0xff] }
 0x21d   : > { %v4244_v32 = vpop.f32.mrf.mxu0  ;;  %v4097_v1 = vadd.f32 %v10937_v36, %v14325_v56  ;;  %v13096_v46 = vadd.f32 %v11510_v20, %v4092_v3  ;;  %v10949_v20 = vadd.f32 %v12838_v37, %v12833_v18 }
 0x21e   : > { %v4331_v59 = vadd.f32 %v4330_v33, %v13072_v43  ;;  %v4399_v38 = vadd.f32 %v4398_v12, %v4368_v24  ;;  %v13089_v6 = vadd.f32 %v4244_v32, %v4084_v0  ;;  %v10946_v24 = vadd.f32 %v12828_v50, %v12823_v10  ;;  %v13103_v33 = vpop.f32.mrf.mxu1  ;;  %v14326_v0 = vld [vmem:[#allocation54_spill] sm:$0xff] }
 0x21f   : > { %v11513_v51 = vpop.f32.mrf.mxu0  ;;  %v4105_v42 = vadd.f32 %v10943_v54, %v14326_v0  ;;  %v4372_v10 = vmul.f32 %v13096_v46, %v13096_v46  ;;  %v10958_v0 = vadd.f32 %v12871_v9, %v12863_v19 }
 0x220   : > { %v4400_v41 = vadd.f32 %v4399_v38, %v4369_v5  ;;  %v4332_v8 = vadd.f32 %v4331_v59, %v13089_v6  ;;  %v4370_v48 = vmul.f32 %v13089_v6, %v13089_v6  ;;  %v14327_v59 = vld [vmem:[#allocation53_spill] sm:$0xff]  ;;  %v4108_v2 = vadd.f32 %v10946_v24, %v14328_v52 }
 0x221   : > { %v4257_v12 = vpop.f32.mrf.mxu0  ;;  %v4100_v5 = vadd.f32 %v10940_v11, %v14327_v59  ;;  %v13117_v38 = vadd.f32 %v11513_v51, %v4105_v42  ;;  %v10955_v11 = vadd.f32 %v12858_v16, %v12853_v15 }
 0x222   : > { %v4333_v47 = vadd.f32 %v4332_v8, %v13081_v55  ;;  %v4401_v36 = vadd.f32 %v4400_v41, %v4370_v48  ;;  %v13108_v27 = vadd.f32 %v4257_v12, %v4097_v1  ;;  %v13120_v1 = vpop.f32.mrf.mxu1  ;;  %v10952_v8 = vadd.f32 %v12848_v21, %v12843_v45  ;;  %v14329_v48 = vld [vmem:[#allocation56_spill] sm:$0xff] }
 0x223   : > { %v11514_v3 = vpop.f32.mrf.mxu0  ;;  %v4113_v24 = vadd.f32 %v10949_v20, %v14329_v48  ;;  %v4375_v45 = vmul.f32 %v13117_v38, %v13117_v38  ;;  %v10961_v20 = vadd.f32 %v12893_v53, %v12882_v25 }
 0x224   : > { %v4402_v50 = vadd.f32 %v4401_v36, %v4371_v34  ;;  %v4334_v32 = vadd.f32 %v4333_v47, %v13096_v46  ;;  %v4373_v37 = vmul.f32 %v13108_v27, %v13108_v27  ;;  %v13132_v34 = vadd.f32 %v11514_v3, %v4108_v2  ;;  %v14330_v3 = vld [vmem:[#allocation58_spill] sm:$0xff] }
 0x225   : > { %v4260_v56 = vpop.f32.mrf.mxu0 }
 0x226   : > { %v4335_v18 = vadd.f32 %v4334_v32, %v13108_v27  ;;  %v4403_v54 = vadd.f32 %v4402_v50, %v4372_v10  ;;  %v13125_v41 = vadd.f32 %v4260_v56, %v4100_v5  ;;  %v10977_v10 = vpop.f32.mrf.mxu1  ;;  %v4121_v50 = vadd.f32 %v10955_v11, %v14330_v3  ;;  %v14331_v5 = vld [vmem:[#allocation57_spill] sm:$0xff]  ;;  %v14332_v56 = vld [vmem:[#allocation59_spill] sm:$0xff] }
 0x227   : > { %v11517_v51 = vpop.f32.mrf.mxu0  ;;  %v4376_v59 = vmul.f32 %v13132_v34, %v13132_v34  ;;  %v4116_v52 = vadd.f32 %v10952_v8, %v14331_v5  ;;  %v10967_v8 = vadd.f32 %v13003_v30, %v12974_v63 }
 0x228   : > { %v4404_v12 = vadd.f32 %v4403_v54, %v4373_v37  ;;  %v4336_v47 = vadd.f32 %v4335_v18, %v13125_v41  ;;  %v4374_v36 = vmul.f32 %v13125_v41, %v13125_v41  ;;  %v13151_v2 = vadd.f32 %v11517_v51, %v4121_v50  ;;  %v10978_v54 = vpop.f32.mrf.mxu1 }
 0x229   : > { %v4273_v42 = vpop.f32.mrf.mxu0  ;;  %v4124_v18 = vadd.f32 %v10958_v0, %v14332_v56  ;;  %v4137_v50 = vadd.f32 %v10967_v8, %v12856_v60 }
 0x22a   : > { %v4337_v21 = vadd.f32 %v4336_v47, %v13117_v38  ;;  %v4405_v15 = vadd.f32 %v4404_v12, %v4374_v36  ;;  %v13142_v16 = vadd.f32 %v4273_v42, %v4113_v24  ;;  %v10964_v24 = vadd.f32 %v12934_v57, %v12910_v31  ;;  %v14333_v12 = vld [vmem:[#allocation60_spill] sm:$0xff]  ;;  %v10980_v3 = vpop.f32.mrf.mxu1 }
 0x22b   : > { %v11518_v32 = vpop.f32.mrf.mxu0  ;;  %v4129_v47 = vadd.f32 %v10961_v20, %v14333_v12  ;;  %v4379_v31 = vmul.f32 %v13151_v2, %v13151_v2  ;;  %v10973_v20 = vadd.f32 %v13084_v58, %v13067_v17 }
 0x22c   : > { %v4406_v19 = vadd.f32 %v4405_v15, %v4375_v45  ;;  %v4338_v9 = vadd.f32 %v4337_v21, %v13132_v34  ;;  %v4377_v25 = vmul.f32 %v13142_v16, %v13142_v16  ;;  %v13164_v0 = vadd.f32 %v11518_v32, %v4124_v18  ;;  %v10981_v18 = vpop.f32.mrf.mxu1 }
 0x22d   : > { %v4276_v37 = vpop.f32.mrf.mxu0  ;;  %v10970_v21 = vadd.f32 %v13048_v44, %v13031_v13 }
 0x22e   : > { %v4339_v48 = vadd.f32 %v4338_v9, %v13142_v16  ;;  %v4407_v53 = vadd.f32 %v4406_v19, %v4376_v59  ;;  %v13157_v11 = vadd.f32 %v4276_v37, %v4116_v52  ;;  %v4380_v59 = vmul.f32 %v13164_v0, %v13164_v0  ;;  %v14334_v19 = vld [vmem:[#allocation61_spill] sm:$0xff] }
 0x22f   : > { %v11521_v51 = vpop.f32.mrf.mxu0  ;;  %v4132_v9 = vadd.f32 %v10964_v24, %v14334_v19  ;;  %v4140_v52 = vadd.f32 %v10970_v21, %v12861_v22  ;;  %v4145_v24 = vadd.f32 %v10973_v20, %v12866_v28  ;;  %v14337_v20 = vld [vmem:[#allocation64_spill] sm:$0xff] }
 0x230   : > { %v4408_v36 = vadd.f32 %v4407_v53, %v4377_v25  ;;  %v4340_v42 = vadd.f32 %v4339_v48, %v13157_v11  ;;  %v4378_v45 = vmul.f32 %v13157_v11, %v13157_v11  ;;  %v13183_v5 = vadd.f32 %v11521_v51, %v4137_v50 }
 0x231   : > { %v4289_v15 = vpop.f32.mrf.mxu0  ;;  %v10976_v48 = vadd.f32 %v13120_v1, %v13103_v33  ;;  %v10979_v25 = vadd.f32 %v10978_v54, %v10977_v10  ;;  %v14335_v10 = vld [vmem:[#allocation63_spill] sm:$0xff] }
 0x232   : > { %v4341_v57 = vadd.f32 %v4340_v42, %v13151_v2  ;;  %v4409_v63 = vadd.f32 %v4408_v36, %v4378_v45  ;;  %v13174_v30 = vadd.f32 %v4289_v15, %v4129_v47  ;;  %v10982_v47 = vadd.f32 %v10981_v18, %v10980_v3 }
 0x233   : > { %v11522_v32 = vpop.f32.mrf.mxu0  ;;  %v4383_v42 = vmul.f32 %v13183_v5, %v13183_v5  ;;  %v4153_v28 = vadd.f32 %v10979_v25, %v14335_v10 }
 0x234   : > { %v4410_v13 = vadd.f32 %v4409_v63, %v4379_v31  ;;  %v4342_v44 = vadd.f32 %v4341_v57, %v13164_v0  ;;  %v4381_v60 = vmul.f32 %v13174_v30, %v13174_v30  ;;  %v13194_v51 = vadd.f32 %v11522_v32, %v4140_v52  ;;  %v14336_v57 = vld [vmem:[#allocation62_spill] sm:$0xff] }
 0x235   : > { %v4292_v56 = vpop.f32.mrf.mxu0  ;;  %v4148_v3 = vadd.f32 %v10976_v48, %v14336_v57  ;;  %v4156_v50 = vadd.f32 %v10982_v47, %v14337_v20 }
 0x236   : > { %v4343_v37 = vadd.f32 %v4342_v44, %v13174_v30  ;;  %v4411_v17 = vadd.f32 %v4410_v13, %v4380_v59  ;;  %v13189_v58 = vadd.f32 %v4292_v56, %v4132_v9  ;;  %v4384_v21 = vmul.f32 %v13194_v51, %v13194_v51 }
 0x237   : > { %v11525_v53 = vpop.f32.mrf.mxu0 }
 0x238   : > { %v4412_v8 = vadd.f32 %v4411_v17, %v4381_v60  ;;  %v4344_v22 = vadd.f32 %v4343_v37, %v13189_v58  ;;  %v4382_v12 = vmul.f32 %v13189_v58, %v13189_v58  ;;  %v13209_v63 = vadd.f32 %v11525_v53, %v4153_v28 }
 0x239   : > { %v4305_v36 = vpop.f32.mrf.mxu0 }
 0x23a   : > { %v4345_v45 = vadd.f32 %v4344_v22, %v13183_v5  ;;  %v4413_v33 = vadd.f32 %v4412_v8, %v4382_v12  ;;  %v13202_v1 = vadd.f32 %v4305_v36, %v4145_v24  ;;  %v4387_v37 = vmul.f32 %v13209_v63, %v13209_v63 }
 0x23b   : > { %v11526_v54 = vpop.f32.mrf.mxu0 }
 0x23c   : > { %v4414_v15 = vadd.f32 %v4413_v33, %v4383_v42  ;;  %v4346_v31 = vadd.f32 %v4345_v45, %v13194_v51  ;;  %v4385_v13 = vmul.f32 %v13202_v1, %v13202_v1  ;;  %v13217_v52 = vadd.f32 %v11526_v54, %v4156_v50  ;;  %v11942_v42 = vld [vmem:[%s14214_s2 + $0x1f8] sm:$0xff]  }
 0x23d   : > { %v4308_v32 = vpop.f32.mrf.mxu0  ;;  %11343 = vmatprep.subr.bf16.mxu0 %v11942_v42 }
 0x23e   : > { %v4347_v59 = vadd.f32 %v4346_v31, %v13202_v1  ;;  %v4415_v44 = vadd.f32 %v4414_v15, %v4384_v21  ;;  %v13215_v19 = vadd.f32 %v4308_v32, %v4148_v3  ;;  %v4388_v48 = vmul.f32 %v13217_v52, %v13217_v52 }
 0x240   : > { %v4416_v9 = vadd.f32 %v4415_v44, %v4385_v13  ;;  %v4348_v56 = vadd.f32 %v4347_v59, %v13215_v19  ;;  %v4386_v18 = vmul.f32 %v13215_v19, %v13215_v19 }
 0x242   : > { %v4349_v60 = vadd.f32 %v4348_v56, %v13209_v63  ;;  %v4417_v17 = vadd.f32 %v4416_v9, %v4386_v18 }
 0x244   : > { %v4350_v25 = vadd.f32 %v4349_v60, %v13217_v52  ;;  %v4418_v53 = vadd.f32 %v4417_v17, %v4387_v37 }
 0x246   : > { %v4351_v24 = vrot.slane %v4350_v25, 4  ;;  %v4419_v8 = vadd.f32 %v4418_v53, %v4388_v48 }
 0x248   : > { %v4352_v22 = vadd.f32 %v4351_v24, %v4350_v25  ;;  %v4420_v12 = vrot.slane %v4419_v8, 4 }
 0x24a   : > { %v4353_v47 = vrot.slane %v4352_v22, 2  ;;  %v4421_v36 = vadd.f32 %v4420_v12, %v4419_v8 }
 0x24c   : > { %v4354_v45 = vadd.f32 %v4353_v47, %v4352_v22  ;;  %v4422_v33 = vrot.slane %v4421_v36, 2 }
 0x24e   : > { %v4355_v10 = vrot.slane %v4354_v45, 1  ;;  %v4423_v28 = vadd.f32 %v4422_v33, %v4421_v36 }
 0x250   : > { %v4356_v54 = vadd.f32 %v4355_v10, %v4354_v45  ;;  %v4424_v21 = vrot.slane %v4423_v28, 1 }
 0x252   : > { %v4425_v15 = vadd.f32 %v4424_v21, %v4423_v28  ;;  %v13231_v31 = vmul.f32 0.00390625, %v4356_v54 }
 0x254   : > { %v4427_v57 = vmul.f32 0.00390625, %v4425_v15  ;;  %v4428_v3 = vmul.f32 %v13231_v31, %v13231_v31  ;;  %v4460_v20 = vsub.f32 %v13215_v19, %v13231_v31  ;;  %v4440_v32 = vsub.f32 %v13053_v23, %v13231_v31 }
 0x255   : > { %v4443_v13 = vsub.f32 %v13072_v43, %v13231_v31  ;;  %v4444_v44 = vsub.f32 %v13089_v6, %v13231_v31  ;;  %v4445_v9 = vsub.f32 %v13081_v55, %v13231_v31  ;;  %v4446_v56 = vsub.f32 %v13096_v46, %v13231_v31 }
 0x256   : > { %v4429_v50 = vsub.f32 %v4427_v57, %v4428_v3  ;;  %v4447_v19 = vsub.f32 %v13108_v27, %v13231_v31  ;;  %v4448_v18 = vsub.f32 %v13125_v41, %v13231_v31  ;;  %v4449_v23 = vsub.f32 %v13117_v38, %v13231_v31 }
 0x257   : > { %v4450_v43 = vsub.f32 %v13132_v34, %v13231_v31  ;;  %v4451_v6 = vsub.f32 %v13142_v16, %v13231_v31  ;;  %v4452_v55 = vsub.f32 %v13157_v11, %v13231_v31  ;;  %v4453_v46 = vsub.f32 %v13151_v2, %v13231_v31 }
 0x258   : > { %v4430_v59 = vmax.f32 %v4429_v50, 0.0  ;;  %v4454_v27 = vsub.f32 %v13164_v0, %v13231_v31  ;;  %v4455_v41 = vsub.f32 %v13174_v30, %v13231_v31  ;;  %v4456_v38 = vsub.f32 %v13189_v58, %v13231_v31 }
 0x259   : > { %v4457_v34 = vsub.f32 %v13183_v5, %v13231_v31  ;;  %v4458_v16 = vsub.f32 %v13194_v51, %v13231_v31  ;;  %v4459_v11 = vsub.f32 %v13202_v1, %v13231_v31  ;;  %v4461_v2 = vsub.f32 %v13209_v63, %v13231_v31 }
 0x25a   : > { %v4463_v37 = vadd.f32 1e-05, %v4430_v59  ;;  %v4462_v0 = vsub.f32 %v13217_v52, %v13231_v31  ;;  %v4431_v30 = vsub.f32 %v12928_v26, %v13231_v31  ;;  %v4432_v58 = vsub.f32 %v12939_v4, %v13231_v31 }
 0x25b   : > { %v4433_v5 = vsub.f32 %v12936_v39, %v13231_v31  ;;  %v4434_v51 = vsub.f32 %v12960_v29, %v13231_v31  ;;  %v4435_v1 = vsub.f32 %v12979_v62, %v13231_v31  ;;  %v4436_v63 = vsub.f32 %v13008_v35, %v13231_v31 }
 0x25c   : > { %12127 = vrsqrt.f32 %v4463_v37  ;;  %v4437_v52 = vsub.f32 %v12997_v14, %v13231_v31  ;;  %v4438_v26 = vsub.f32 %v13018_v49, %v13231_v31  ;;  %v4439_v4 = vsub.f32 %v13036_v40, %v13231_v31 }
 0x25d   : > { %v4441_v39 = vsub.f32 %v13045_v61, %v13231_v31  ;;  %v4442_v29 = vsub.f32 %v13060_v7, %v13231_v31 }
 0x269   : > { %v12128_v60 = vpop.eup %12127 }
 0x26a   : > { %v4494_v62 = vmul.f32 %v12128_v60, %v4460_v20  ;;  %v4465_v17 = vmul.f32 %v12128_v60, %v4431_v30  ;;  %v4466_v48 = vmul.f32 %v12128_v60, %v4432_v58  ;;  %v4467_v35 = vmul.f32 %v12128_v60, %v4433_v5 }
 0x26b   : > { %v4468_v25 = vmul.f32 %v12128_v60, %v4434_v51  ;;  %v4469_v53 = vmul.f32 %v12128_v60, %v4435_v1  ;;  %v4470_v14 = vmul.f32 %v12128_v60, %v4436_v63  ;;  %v4471_v24 = vmul.f32 %v12128_v60, %v4437_v52 }
 0x26c   : > { %v4526_v8 = vmax.f32 %v4494_v62, 0.0  ;;  %v4472_v22 = vmul.f32 %v12128_v60, %v4438_v26  ;;  %v4473_v49 = vmul.f32 %v12128_v60, %v4439_v4  ;;  %v4474_v12 = vmul.f32 %v12128_v60, %v4440_v32 }
 0x26d   : > { %v4475_v47 = vmul.f32 %v12128_v60, %v4441_v39  ;;  %v4476_v40 = vmul.f32 %v12128_v60, %v4442_v29  ;;  %v4477_v36 = vmul.f32 %v12128_v60, %v4443_v13  ;;  %v4478_v42 = vmul.f32 %v12128_v60, %v4444_v44 }
 0x26e   : > { %4564 = vst [vmem:[#allocation2 + $0x1a1] sm:$0xff] %v4526_v8  ;;  %4558 = vst [vmem:[#allocation2 + $0x171] sm:$0xff] %v4526_v8  ;;  %v4479_v61 = vmul.f32 %v12128_v60, %v4445_v9  ;;  %v4480_v7 = vmul.f32 %v12128_v60, %v4446_v56  ;;  %v13299_v45 = vmul.f32 %v12128_v60, %v4447_v19  ;;  %v13329_v44 = vmax.f32 %v4465_v17, 0.0 }
 0x26f   : > { %v13301_v33 = vmul.f32 %v12128_v60, %v4448_v18  ;;  %v13303_v10 = vmul.f32 %v12128_v60, %v4449_v23  ;;  %v13305_v28 = vmul.f32 %v12128_v60, %v4450_v43  ;;  %v13307_v54 = vmul.f32 %v12128_v60, %v4451_v6 }
 0x270   : > { %v13309_v21 = vmul.f32 %v12128_v60, %v4452_v55  ;;  %v13311_v15 = vmul.f32 %v12128_v60, %v4453_v46  ;;  %v13313_v31 = vmul.f32 %v12128_v60, %v4454_v27  ;;  %v13315_v57 = vmul.f32 %v12128_v60, %v4455_v41  ;;  %4529 = vst [vmem:[#allocation2 + $0x19] sm:$0xff] %v13329_v44 }
 0x271   : > { %v13317_v3 = vmul.f32 %v12128_v60, %v4456_v38  ;;  %v13319_v20 = vmul.f32 %v12128_v60, %v4457_v34  ;;  %v13321_v50 = vmul.f32 %v12128_v60, %v4458_v16  ;;  %v13323_v32 = vmul.f32 %v12128_v60, %v4459_v11 }
 0x272   : > { %v13325_v59 = vmul.f32 %v12128_v60, %v4461_v2  ;;  %v13327_v13 = vmul.f32 %v12128_v60, %v4462_v0  ;;  %v13331_v9 = vmax.f32 %v4466_v48, 0.0  ;;  %v4499_v56 = vmax.f32 %v4467_v35, 0.0 }
 0x273   : > { %v4500_v19 = vmax.f32 %v4468_v25, 0.0  ;;  %v13333_v18 = vmax.f32 %v4469_v53, 0.0  ;;  %v13335_v23 = vmax.f32 %v4470_v14, 0.0  ;;  %v13337_v37 = vmax.f32 %v4471_v24, 0.0 }
 0x274   : > { %v13339_v43 = vmax.f32 %v4472_v22, 0.0  ;;  %v13341_v6 = vmax.f32 %v4473_v49, 0.0  ;;  %v13343_v55 = vmax.f32 %v4474_v12, 0.0  ;;  %v13345_v46 = vmax.f32 %v4475_v47, 0.0  ;;  %4530 = vst [vmem:[#allocation2 + $0x21] sm:$0xff] %v13331_v9  ;;  %4561 = vst [vmem:[#allocation2 + $0x1] sm:$0xff] %v4499_v56 }
 0x275   : > { %4531 = vst [vmem:[#allocation2 + $0x31] sm:$0xff] %v4499_v56  ;;  %v4618_v27 = vld [vmem:[#allocation2 + $0x1a7] sm:$0x1]  ;;  %v13349_v41 = vmax.f32 %v4476_v40, 0.0  ;;  %v13351_v38 = vmax.f32 %v4477_v36, 0.0  ;;  %v13353_v34 = vmax.f32 %v4478_v42, 0.0  ;;  %v10279_v48 = vpack.c.bf16 %v4499_v56, %v4499_v56 }
 0x276   : > { %v13355_v16 = vmax.f32 %v4479_v61, 0.0  ;;  %4562 = vst [vmem:[#allocation2 + $0x9] sm:$0xff] %v4500_v19  ;;  %4532 = vst [vmem:[#allocation2 + $0x39] sm:$0xff] %v4500_v19  ;;  %v13360_v11 = vmax.f32 %v4480_v7, 0.0  ;;  %v4513_v2 = vmax.f32 %v13299_v45, 0.0  ;;  %v4514_v0 = vmax.f32 %v13301_v33, 0.0 }
 0x277   : > { %4533 = vst [vmem:[#allocation2 + $0x49] sm:$0xff] %v13333_v18  ;;  %4534 = vst [vmem:[#allocation2 + $0x51] sm:$0xff] %v13335_v23  ;;  %v4515_v30 = vmax.f32 %v13303_v10, 0.0  ;;  %v4516_v58 = vmax.f32 %v13305_v28, 0.0  ;;  %v4517_v5 = vmax.f32 %v13307_v54, 0.0  ;;  %v4518_v51 = vmax.f32 %v13309_v21, 0.0 }
 0x278   : > { %4535 = vst [vmem:[#allocation2 + $0x61] sm:$0xff] %v13337_v37  ;;  %4636 = vst [vmem:[#allocation2 + $0x1a9] sm:$0x1] %v4618_v27  ;;  %v4519_v1 = vmax.f32 %v13311_v15, 0.0  ;;  %v4616_v63 = vld [vmem:[#allocation2 + $0x177] sm:$0x1]  ;;  %v10280_v35 = vpack.c.bf16 %v4500_v19, %v4500_v19  ;;  %v10281_v25 = vpack.c.bf16 %v13329_v44, %v13329_v44  ;;  %v10282_v53 = vpack.c.bf16 %v13331_v9, %v13331_v9 }
 0x279   : > { %4536 = vst [vmem:[#allocation2 + $0x69] sm:$0xff] %v13339_v43  ;;  %4537 = vst [vmem:[#allocation2 + $0x79] sm:$0xff] %v13341_v6  ;;  %v4520_v52 = vmax.f32 %v13313_v31, 0.0  ;;  %v4521_v60 = vmax.f32 %v13315_v57, 0.0  ;;  %v4522_v26 = vmax.f32 %v13317_v3, 0.0  ;;  %v4523_v4 = vmax.f32 %v13319_v20, 0.0 }
 0x27a   : > { %4538 = vst [vmem:[#allocation2 + $0x81] sm:$0xff] %v13343_v55  ;;  %4539 = vst [vmem:[#allocation2 + $0x91] sm:$0xff] %v13345_v46  ;;  %v4524_v39 = vmax.f32 %v13321_v50, 0.0  ;;  %v4525_v29 = vmax.f32 %v13323_v32, 0.0  ;;  %v4527_v62 = vmax.f32 %v13325_v59, 0.0  ;;  %v4528_v17 = vmax.f32 %v13327_v13, 0.0 }
 0x27b   : > { %4540 = vst [vmem:[#allocation2 + $0x99] sm:$0xff] %v13349_v41  ;;  %4541 = vst [vmem:[#allocation2 + $0xa9] sm:$0xff] %v13351_v38  ;;  %v13390_v14 = vld [vmem:[#allocation2 + $0x171] sm:$0xff]  ;;  %v4565_v24 = vld [vmem:[#allocation2 + $0x2] sm:$0x1]  ;;  %v10285_v49 = vpack.c.bf16 %v13333_v18, %v13333_v18  ;;  %v10286_v12 = vpack.c.bf16 %v13335_v23, %v13335_v23  ;;  %v10287_v47 = vpack.c.bf16 %v13337_v37, %v13337_v37 }
 0x27c   : > { %4542 = vst [vmem:[#allocation2 + $0xb1] sm:$0xff] %v13353_v34  ;;  %4543 = vst [vmem:[#allocation2 + $0xc1] sm:$0xff] %v13355_v16  ;;  %v4566_v8 = vld [vmem:[#allocation2 + $0x1a] sm:$0x1]  ;;  %v5214_v22 = vld [vmem:[#allocation2 + $0x20] sm:$0xff]  ;;  %v10288_v40 = vpack.c.bf16 %v13339_v43, %v13339_v43  ;;  %v10289_v45 = vpack.c.bf16 %v13341_v6, %v13341_v6  ;;  %v10290_v33 = vpack.c.bf16 %v13343_v55, %v13343_v55 }
 0x27d   : > { %4544 = vst [vmem:[#allocation2 + $0xc9] sm:$0xff] %v13360_v11  ;;  %4545 = vst [vmem:[#allocation2 + $0xd9] sm:$0xff] %v4513_v2  ;;  %v4601_v36 = vld [vmem:[#allocation2 + $0xf] sm:$0x1]  ;;  %v5021_v61 = vld [vmem:[#allocation2 + $0x2] sm:$0xff]  ;;  %v10344_v7 = vpack.c.bf16 %v5214_v22, %v5214_v22  ;;  %v10291_v10 = vpack.c.bf16 %v13345_v46, %v13345_v46  ;;  %v10292_v57 = vpack.c.bf16 %v13349_v41, %v13349_v41 }
 0x27e   : > { %4546 = vst [vmem:[#allocation2 + $0xe1] sm:$0xff] %v4514_v0  ;;  %4547 = vst [vmem:[#allocation2 + $0xf1] sm:$0xff] %v4515_v30  ;;  %v4638_v42 = vld [vmem:[#allocation2 + $0x8] sm:$0xff]  ;;  %v10311_v54 = vpack.c.bf16 %v5021_v61, %v5021_v61  ;;  %v4567_v21 = vld [vmem:[#allocation2 + $0x32] sm:$0x1]  ;;  %v10293_v3 = vpack.c.bf16 %v13351_v38, %v13351_v38  ;;  %v10294_v13 = vpack.c.bf16 %v13353_v34, %v13353_v34 }
 0x27f   : > { %4634 = vst [vmem:[#allocation2 + $0x179] sm:$0x1] %v4616_v63  ;;  %4548 = vst [vmem:[#allocation2 + $0xf9] sm:$0xff] %v4516_v58  ;;  %v10248_v28 = vpack.c.bf16 %v4638_v42, %v4638_v42  ;;  %v4602_v15 = vld [vmem:[#allocation2 + $0x27] sm:$0x1]  ;;  %v5023_v31 = vld [vmem:[#allocation2 + $0x1a] sm:$0xff]  ;;  %v10295_v44 = vpack.c.bf16 %v13355_v16, %v13355_v16  ;;  %v10296_v9 = vpack.c.bf16 %v13360_v11, %v13360_v11 }
 0x280   : > { %4549 = vst [vmem:[#allocation2 + $0x109] sm:$0xff] %v4517_v5  ;;  %4550 = vst [vmem:[#allocation2 + $0x111] sm:$0xff] %v4518_v51  ;;  %v10313_v20 = vpack.c.bf16 %v5023_v31, %v5023_v31  ;;  %v5216_v50 = vld [vmem:[#allocation2 + $0x38] sm:$0xff]  ;;  %v4568_v32 = vld [vmem:[#allocation2 + $0x4a] sm:$0x1]  ;;  %v10310_v37 = vpack.c.bf16 %v13390_v14, %v13390_v14 }
 0x281   : > { %4551 = vst [vmem:[#allocation2 + $0x121] sm:$0xff] %v4519_v1  ;;  %4552 = vst [vmem:[#allocation2 + $0x129] sm:$0xff] %v4520_v52  ;;  %v4603_v59 = vld [vmem:[#allocation2 + $0x3f] sm:$0x1]  ;;  %v10346_v56 = vpack.c.bf16 %v5216_v50, %v5216_v50  ;;  %v5025_v19 = vld [vmem:[#allocation2 + $0x32] sm:$0xff] }
 0x282   : > { %4553 = vst [vmem:[#allocation2 + $0x139] sm:$0xff] %v4521_v60  ;;  %4554 = vst [vmem:[#allocation2 + $0x141] sm:$0xff] %v4522_v26  ;;  %v5218_v18 = vld [vmem:[#allocation2 + $0x50] sm:$0xff]  ;;  %v4569_v23 = vld [vmem:[#allocation2 + $0x62] sm:$0x1]  ;;  %v10315_v43 = vpack.c.bf16 %v5025_v19, %v5025_v19 }
 0x283   : > { %4555 = vst [vmem:[#allocation2 + $0x151] sm:$0xff] %v4523_v4  ;;  %4559 = vst [vmem:[#allocation2 + $0x181] sm:$0xff] %v4527_v62  ;;  %v10348_v6 = vpack.c.bf16 %v5218_v18, %v5218_v18  ;;  %v4604_v55 = vld [vmem:[#allocation2 + $0x57] sm:$0x1]  ;;  %v5027_v46 = vld [vmem:[#allocation2 + $0x4a] sm:$0xff] }
 0x284   : > { %4560 = vst [vmem:[#allocation2 + $0x189] sm:$0xff] %v4528_v17  ;;  %4563 = vst [vmem:[#allocation2 + $0x199] sm:$0xff] %v4525_v29  ;;  %v5220_v27 = vld [vmem:[#allocation2 + $0x68] sm:$0xff]  ;;  %v10317_v41 = vpack.c.bf16 %v5027_v46, %v5027_v46  ;;  %v4570_v34 = vld [vmem:[#allocation2 + $0x7a] sm:$0x1] }
 0x285   : > { %4556 = vst [vmem:[#allocation2 + $0x159] sm:$0xff] %v4524_v39  ;;  %4557 = vst [vmem:[#allocation2 + $0x169] sm:$0xff] %v4525_v29  ;;  %v10350_v38 = vpack.c.bf16 %v5220_v27, %v5220_v27  ;;  %v4605_v16 = vld [vmem:[#allocation2 + $0x6f] sm:$0x1]  ;;  %v5029_v11 = vld [vmem:[#allocation2 + $0x62] sm:$0xff] }
 0x286   : > { %4583 = vst [vmem:[#allocation2] sm:$0x1] %v4565_v24  ;;  %4989 = vst [vmem:[#allocation3 + $0x4] sm:$0xf] %v10279_v48  ;;  %v10319_v0 = vpack.c.bf16 %v5029_v11, %v5029_v11  ;;  %v5222_v30 = vld [vmem:[#allocation2 + $0x80] sm:$0xff]  ;;  %v5224_v39 = vld [vmem:[#allocation2 + $0x98] sm:$0xff] }
 0x287   : > { %4990 = vst [vmem:[#allocation3 + $0x28] sm:$0xf] %v10280_v35  ;;  %4584 = vst [vmem:[#allocation2 + $0x18] sm:$0x1] %v4566_v8  ;;  %v4571_v58 = vld [vmem:[#allocation2 + $0x92] sm:$0x1]  ;;  %v10352_v1 = vpack.c.bf16 %v5222_v30, %v5222_v30 }
 0x288   : > { %4991 = vst [vmem:[#allocation3 + $0x4c] sm:$0xf] %v10281_v25  ;;  %4992 = vst [vmem:[#allocation3 + $0x70] sm:$0xf] %v10282_v53  ;;  %v4606_v63 = vld [vmem:[#allocation2 + $0x87] sm:$0x1] }
 0x289   : > { %4993 = vst [vmem:[#allocation3 + $0x94] sm:$0xf] %v10279_v48  ;;  %4994 = vst [vmem:[#allocation3 + $0xb8] sm:$0xf] %v10280_v35  ;;  %v5031_v4 = vld [vmem:[#allocation2 + $0x7a] sm:$0xff]  ;;  %v10354_v35 = vpack.c.bf16 %v5224_v39, %v5224_v39  ;;  %v5033_v42 = vld [vmem:[#allocation2 + $0x92] sm:$0xff] }
 0x28a   : > { %4619 = vst [vmem:[#allocation2 + $0x11] sm:$0x1] %v4601_v36  ;;  %4995 = vst [vmem:[#allocation3 + $0xdc] sm:$0xf] %v10285_v49  ;;  %v10321_v48 = vpack.c.bf16 %v5031_v4, %v5031_v4  ;;  %v4608_v50 = vld [vmem:[#allocation2 + $0xb7] sm:$0x1] }
 0x28b   : > { %4996 = vst [vmem:[#allocation3 + $0x100] sm:$0xf] %v10286_v12  ;;  %4997 = vst [vmem:[#allocation3 + $0x124] sm:$0xf] %v10287_v47  ;;  %v4582_v2 = vld [vmem:[#allocation2 + $0x19a] sm:$0x1] }
 0x28c   : > { %4998 = vst [vmem:[#allocation3 + $0x148] sm:$0xf] %v10288_v40  ;;  %5374 = vst [vmem:[#allocation3 + $0x30] sm:$0xf] %v10344_v7  ;;  %v4572_v12 = vld [vmem:[#allocation2 + $0xaa] sm:$0x1] }
 0x28d   : > { %4800 = vst [vmem:[#allocation3 + $0x6c] sm:$0xf] %v10344_v7  ;;  %4585 = vst [vmem:[#allocation2 + $0x30] sm:$0x1] %v4567_v21  ;;  %v4637_v5 = vld [vmem:[#allocation2] sm:$0xff]  ;;  %v5226_v21 = vld [vmem:[#allocation2 + $0xb0] sm:$0xff] }
 0x28e   : > { %4620 = vst [vmem:[#allocation2 + $0x29] sm:$0x1] %v4602_v15  ;;  %4999 = vst [vmem:[#allocation3 + $0x16c] sm:$0xf] %v10289_v45  ;;  %v5213_v51 = vld [vmem:[#allocation2 + $0x18] sm:$0xff]  ;;  %v10247_v52 = vpack.c.bf16 %v4637_v5, %v4637_v5  ;;  %v11958_v27 = vld [vmem:[%s14214_s2 + $0x1f0] sm:$0xff]  }
 0x28f   : > { %5000 = vst [vmem:[#allocation3 + $0x190] sm:$0xf] %v10290_v33  ;;  %5001 = vst [vmem:[#allocation3 + $0x1b4] sm:$0xf] %v10291_v10  ;;  %v10343_v26 = vpack.c.bf16 %v5213_v51, %v5213_v51  ;;  %v4607_v47 = vld [vmem:[#allocation2 + $0x9f] sm:$0x1]  ;;  %v10323_v33 = vpack.c.bf16 %v5033_v42, %v5033_v42 }
 0x290   : > { %4798 = vst [vmem:[#allocation3 + $0x24] sm:$0xf] %v10248_v28  ;;  %5181 = vst [vmem:[#allocation3 + $0x8] sm:$0xf] %v10311_v54  ;;  %v11886_v15 = vld [vmem:[%s14214_s2 + $0x138] sm:$0xff]   ;;  %v11928_v51 = vld [vmem:[%s14214_s2 + $0x120] sm:$0xff]  }
 0x291   : > { %4586 = vst [vmem:[#allocation2 + $0x48] sm:$0x1] %v4568_v32  ;;  %4621 = vst [vmem:[#allocation2 + $0x41] sm:$0x1] %v4603_v59  ;;  %v5022_v60 = vld [vmem:[#allocation2 + $0xa] sm:$0xff]  ;;  %v4848_v42 = vld [vmem:[#allocation2 + $0xe1] sm:$0xff] }
 0x292   : > { %5002 = vst [vmem:[#allocation3 + $0x1d8] sm:$0xf] %v10292_v57  ;;  %5003 = vst [vmem:[#allocation3 + $0x1fc] sm:$0xf] %v10293_v3  ;;  %v10312_v29 = vpack.c.bf16 %v5022_v60, %v5022_v60  ;;  %v10356_v3 = vpack.c.bf16 %v5226_v21, %v5226_v21  ;;  %v5035_v59 = vld [vmem:[#allocation2 + $0xaa] sm:$0xff] }
 0x293   : > { %5183 = vst [vmem:[#allocation3 + $0x50] sm:$0xf] %v10313_v20  ;;  %4587 = vst [vmem:[#allocation2 + $0x60] sm:$0x1] %v4569_v23  ;;  %v4573_v20 = vld [vmem:[#allocation2 + $0xc2] sm:$0x1]  ;;  %v10325_v19 = vpack.c.bf16 %v5035_v59, %v5035_v59 }
 0x294   : > { %5004 = vst [vmem:[#allocation3 + $0x220] sm:$0xf] %v10294_v13  ;;  %5005 = vst [vmem:[#allocation3 + $0x244] sm:$0xf] %v10295_v44  ;;  %v5215_v17 = vld [vmem:[#allocation2 + $0x30] sm:$0xff]  ;;  %v5228_v13 = vld [vmem:[#allocation2 + $0xc8] sm:$0xff] }
 0x295   : > { %5006 = vst [vmem:[#allocation3 + $0x268] sm:$0xf] %v10296_v9  ;;  %5376 = vst [vmem:[#allocation3 + $0x78] sm:$0xf] %v10346_v56  ;;  %v5024_v62 = vld [vmem:[#allocation2 + $0x22] sm:$0xff]  ;;  %v10345_v53 = vpack.c.bf16 %v5215_v17, %v5215_v17  ;;  %v10358_v18 = vpack.c.bf16 %v5228_v13, %v5228_v13  ;;  %v11957_v4 = vld [vmem:[%s14214_s2 + $0x150] sm:$0xff]  }
 0x296   : > { %4802 = vst [vmem:[#allocation3 + $0xb4] sm:$0xf] %v10346_v56  ;;  %4622 = vst [vmem:[#allocation2 + $0x59] sm:$0x1] %v4604_v55  ;;  %v10314_v25 = vpack.c.bf16 %v5024_v62, %v5024_v62  ;;  %v11881_v9 = vld [vmem:[#allocation3 + $0x4] ss:$36 sps:$4 sm:$0xff]  }
 0x297   : > { %5020 = vst [vmem:[#allocation3 + $0x460] sm:$0xf] %v10310_v37  ;;  %5185 = vst [vmem:[#allocation3 + $0x98] sm:$0xf] %v10315_v43  ;;  %v11899_v56 = vld [vmem:[%s14214_s2 + $0x170] sm:$0xff]   ;;  %7869 = vmatprep.mubr.bf16.mxu1 %v11881_v9  ;;  %v11975_v9 = vld [vmem:[%s14214_s2 + $0x108] sm:$0xff]  }
 0x298   : > { %5378 = vst [vmem:[#allocation3 + $0xc0] sm:$0xf] %v10348_v6  ;;  %4804 = vst [vmem:[#allocation3 + $0xfc] sm:$0xf] %v10348_v6  ;;  %v5026_v14 = vld [vmem:[#allocation2 + $0x3a] sm:$0xff]  ;;  %v5217_v24 = vld [vmem:[#allocation2 + $0x48] sm:$0xff] }
 0x299   : > { %4588 = vst [vmem:[#allocation2 + $0x78] sm:$0x1] %v4570_v34  ;;  %4623 = vst [vmem:[#allocation2 + $0x71] sm:$0x1] %v4605_v16  ;;  %v10316_v8 = vpack.c.bf16 %v5026_v14, %v5026_v14  ;;  %v10347_v22 = vpack.c.bf16 %v5217_v24, %v5217_v24  ;;  %v11900_v43 = vld [vmem:[%s14214_s2 + $0x130] sm:$0xff]   ;;  %v11944_v6 = vld [vmem:[%s14214_s2 + $0x1b8] sm:$0xff]  }
 0x29a   : > { %4600 = vst [vmem:[#allocation2 + $0x198] sm:$0x1] %v4582_v2  ;;  %5187 = vst [vmem:[#allocation3 + $0xe0] sm:$0xf] %v10317_v41  ;;  %v5219_v49 = vld [vmem:[#allocation2 + $0x60] sm:$0xff]  ;;  %v11913_v41 = vld [vmem:[%s14214_s2 + $0x168] sm:$0xff]  }
 0x29b   : > { %5380 = vst [vmem:[#allocation3 + $0x108] sm:$0xf] %v10350_v38  ;;  %4806 = vst [vmem:[#allocation3 + $0x144] sm:$0xf] %v10350_v38  ;;  %v10349_v36 = vpack.c.bf16 %v5219_v49, %v5219_v49  ;;  %v11889_v55 = vld [vmem:[#allocation3 + $0x4c] ss:$36 sps:$4 sm:$0xff]  }
 0x29c   : > { %4589 = vst [vmem:[#allocation2 + $0x90] sm:$0x1] %v4571_v58  ;;  %5189 = vst [vmem:[#allocation3 + $0x128] sm:$0xf] %v10319_v0  ;;  %v11914_v38 = vld [vmem:[%s14214_s2 + $0x128] sm:$0xff]   ;;  %v11960_v34 = vld [vmem:[%s14214_s2 + $0x1b0] sm:$0xff]  }
 0x29d   : > { %4624 = vst [vmem:[#allocation2 + $0x89] sm:$0x1] %v4606_v63  ;;  %5382 = vst [vmem:[#allocation3 + $0x150] sm:$0xf] %v10352_v1  ;;  %v5028_v40 = vld [vmem:[#allocation2 + $0x52] sm:$0xff]  ;;  %v11927_v16 = vld [vmem:[%s14214_s2 + $0x160] sm:$0xff]  }
 0x29e   : > { %4808 = vst [vmem:[#allocation3 + $0x18c] sm:$0xf] %v10352_v1  ;;  %4797 = vst [vmem:[#allocation3] sm:$0xf] %v10247_v52  ;;  %v10318_v61 = vpack.c.bf16 %v5028_v40, %v5028_v40  ;;  %v11974_v2 = vld [vmem:[%s14214_s2 + $0x1e8] sm:$0xff]   ;;  %v11941_v1 = vld [vmem:[%s14214_s2 + $0x158] sm:$0xff]  }
 0x29f   : > { %5373 = vst [vmem:[#allocation3 + $0xc] sm:$0xf] %v10343_v26  ;;  %4799 = vst [vmem:[#allocation3 + $0x48] sm:$0xf] %v10343_v26  ;;  %v11895_v0 = vld [vmem:[#allocation3 + $0x94] ss:$36 sps:$4 sm:$0xff]  }
 0x2a0   : > { %5182 = vst [vmem:[#allocation3 + $0x2c] sm:$0xf] %v10312_v29  ;;  %5191 = vst [vmem:[#allocation3 + $0x170] sm:$0xf] %v10321_v48  ;;  %v5030_v7 = vld [vmem:[#allocation2 + $0x6a] sm:$0xff]  ;;  %v5221_v45 = vld [vmem:[#allocation2 + $0x78] sm:$0xff] }
 0x2a1   : > { %5384 = vst [vmem:[#allocation3 + $0x198] sm:$0xf] %v10354_v35  ;;  %4810 = vst [vmem:[#allocation3 + $0x1d4] sm:$0xf] %v10354_v35  ;;  %v10320_v10 = vpack.c.bf16 %v5030_v7, %v5030_v7  ;;  %v10351_v28 = vpack.c.bf16 %v5221_v45, %v5221_v45  ;;  %v11976_v58 = vld [vmem:[%s14214_s2 + $0x1a8] sm:$0xff]   ;;  %v11943_v63 = vld [vmem:[%s14214_s2 + $0x118] sm:$0xff]  }
 0x2a2   : > { %5184 = vst [vmem:[#allocation3 + $0x74] sm:$0xf] %v10314_v25  ;;  %5375 = vst [vmem:[#allocation3 + $0x54] sm:$0xf] %v10345_v53  ;;  %v11903_v39 = vld [vmem:[#allocation3 + $0xdc] ss:$36 sps:$4 sm:$0xff]  }
 0x2a3   : > { %4801 = vst [vmem:[#allocation3 + $0x90] sm:$0xf] %v10345_v53  ;;  %4590 = vst [vmem:[#allocation2 + $0xa8] sm:$0x1] %v4572_v12  ;;  %v5223_v54 = vld [vmem:[#allocation2 + $0x90] sm:$0xff]  ;;  %v5230_v49 = vld [vmem:[#allocation2 + $0xe0] sm:$0xff] }
 0x2a4   : > { %4625 = vst [vmem:[#allocation2 + $0xa1] sm:$0x1] %v4607_v47  ;;  %5186 = vst [vmem:[#allocation3 + $0xbc] sm:$0xf] %v10316_v8  ;;  %v5032_v31 = vld [vmem:[#allocation2 + $0x82] sm:$0xff]  ;;  %v10353_v57 = vpack.c.bf16 %v5223_v54, %v5223_v54  ;;  %v4847_v12 = vld [vmem:[#allocation2 + $0xd9] sm:$0xff] }
 0x2a5   : > { %5377 = vst [vmem:[#allocation3 + $0x9c] sm:$0xf] %v10347_v22  ;;  %4803 = vst [vmem:[#allocation3 + $0xd8] sm:$0xf] %v10347_v22  ;;  %v10322_v32 = vpack.c.bf16 %v5032_v31, %v5032_v31  ;;  %v11879_v44 = vld [vmem:[#allocation3] ss:$36 sps:$4 sm:$0xff]  }
 0x2a6   : > { %5379 = vst [vmem:[#allocation3 + $0xe4] sm:$0xf] %v10349_v36  ;;  %4805 = vst [vmem:[#allocation3 + $0x120] sm:$0xf] %v10349_v36  ;;  %v11884_v37 = vld [vmem:[#allocation3 + $0xc] ss:$36 sps:$4 sm:$0xff]   ;;  %7870 = vmatmul.mubr.bf16.vlgmr.msra.gmra.mxu1 %v11879_v44  ;;  %v10360_v36 = vpack.c.bf16 %v5230_v49, %v5230_v49 }
 0x2a7   : > { %5188 = vst [vmem:[#allocation3 + $0x104] sm:$0xf] %v10318_v61  ;;  %5193 = vst [vmem:[#allocation3 + $0x1b8] sm:$0xf] %v10323_v33  ;;  %v11882_v23 = vld [vmem:[#allocation3 + $0x8] ss:$36 sps:$4 sm:$0xff]   ;;  %8030 = vmatprep.mubr.bf16.mxu0 %v11884_v37  ;;  %11232 = vmatpush3.bf16.msra.mxu1 %v11886_v15  ;;  %v10297_v61 = vpack.c.bf16 %v4847_v12, %v4847_v12 }
 0x2a8   : > { %5190 = vst [vmem:[#allocation3 + $0x14c] sm:$0xf] %v10320_v10  ;;  %5381 = vst [vmem:[#allocation3 + $0x12c] sm:$0xf] %v10351_v28  ;;  %8031 = vmatmul.mubr.bf16.vlgmr.msra.gmra.mxu0 %v11882_v23  ;;  %7877 = vmatprep.mubr.bf16.mxu1 %v11889_v55  ;;  %v11887_v11 = vld [vmem:[#allocation3 + $0x48] ss:$36 sps:$4 sm:$0xff]   ;;  %v10298_v10 = vpack.c.bf16 %v4848_v42, %v4848_v42 }
 0x2a9   : > { %4807 = vst [vmem:[#allocation3 + $0x168] sm:$0xf] %v10351_v28  ;;  %4591 = vst [vmem:[#allocation2 + $0xc0] sm:$0x1] %v4573_v20  ;;  %v11892_v46 = vld [vmem:[#allocation3 + $0x54] ss:$36 sps:$4 sm:$0xff]   ;;  %11233 = vmatprep.subr.bf16.mxu1 %v11899_v56  ;;  %11344 = vmatpush3.bf16.msra.mxu0 %v11944_v6 }
 0x2aa   : > { %4626 = vst [vmem:[#allocation2 + $0xb9] sm:$0x1] %v4608_v50  ;;  %5383 = vst [vmem:[#allocation3 + $0x174] sm:$0xf] %v10353_v57  ;;  %8038 = vmatprep.mubr.bf16.mxu0 %v11892_v46  ;;  %11345 = vmatprep.subr.bf16.mxu0 %v11958_v27  ;;  %v11890_v30 = vld [vmem:[#allocation3 + $0x50] ss:$36 sps:$4 sm:$0xff]  }
 0x2ab   : > { %4809 = vst [vmem:[#allocation3 + $0x1b0] sm:$0xf] %v10353_v57  ;;  %5386 = vst [vmem:[#allocation3 + $0x1e0] sm:$0xf] %v10356_v3  ;;  %11234 = vmatpush3.bf16.msra.mxu1 %v11900_v43  ;;  %v11893_v52 = vld [vmem:[#allocation3 + $0x90] ss:$36 sps:$4 sm:$0xff]  }
 0x2ac   : > { %4812 = vst [vmem:[#allocation3 + $0x21c] sm:$0xf] %v10356_v3  ;;  %5192 = vst [vmem:[#allocation3 + $0x194] sm:$0xf] %v10322_v32  ;;  %11235 = vmatprep.subr.bf16.mxu1 %v11913_v41  ;;  %v11898_v5 = vld [vmem:[#allocation3 + $0x9c] ss:$36 sps:$4 sm:$0xff]  }
 0x2ad   : > { %5195 = vst [vmem:[#allocation3 + $0x200] sm:$0xf] %v10325_v19  ;;  %5388 = vst [vmem:[#allocation3 + $0x228] sm:$0xf] %v10358_v18  ;;  %11346 = vmatpush3.bf16.msra.mxu0 %v11960_v34  ;;  %v5034_v60 = vld [vmem:[#allocation2 + $0x9a] sm:$0xff]  ;;  %v5225_v26 = vld [vmem:[#allocation2 + $0xa8] sm:$0xff] }
 0x2ae   : > { %4814 = vst [vmem:[#allocation3 + $0x264] sm:$0xf] %v10358_v18  ;;  %7878 = vmatmul.mubr.bf16.gmra.mxu1 %v11887_v11  ;;  %11347 = vmatprep.subr.bf16.mxu0 %v11974_v2  ;;  %v10324_v29 = vpack.c.bf16 %v5034_v60, %v5034_v60  ;;  %v10355_v62 = vpack.c.bf16 %v5225_v26, %v5225_v26  ;;  %v11896_v35 = vld [vmem:[#allocation3 + $0x98] ss:$36 sps:$4 sm:$0xff]   ;;  %v4574_v14 = vld [vmem:[#allocation2 + $0xda] sm:$0x1] }
 0x2af   : > { %7885 = vmatprep.mubr.bf16.mxu1 %v11895_v0  ;;  %11236 = vmatpush3.bf16.msra.mxu1 %v11914_v38  ;;  %v4609_v24 = vld [vmem:[#allocation2 + $0xcf] sm:$0x1]  ;;  %v11906_v8 = vld [vmem:[#allocation3 + $0xe4] ss:$36 sps:$4 sm:$0xff]   ;;  %4592 = vst [vmem:[#allocation2 + $0xd8] sm:$0x1] %v4574_v14 }
 0x2b0   : > { %8039 = vmatmul.mubr.bf16.gmra.mxu0 %v11890_v30  ;;  %11237 = vmatprep.subr.bf16.mxu1 %v11927_v16  ;;  %v5227_v48 = vld [vmem:[#allocation2 + $0xc0] sm:$0xff]  ;;  %5194 = vst [vmem:[#allocation3 + $0x1dc] sm:$0xf] %v10324_v29  ;;  %5385 = vst [vmem:[#allocation3 + $0x1bc] sm:$0xf] %v10355_v62  ;;  %v11959_v47 = vld [vmem:[%s14214_s2 + $0x110] sm:$0xff]  }
 0x2b1   : > { %8046 = vmatprep.mubr.bf16.mxu0 %v11898_v5  ;;  %11348 = vmatpush3.bf16.msra.mxu0 %v11976_v58  ;;  %v5036_v17 = vld [vmem:[#allocation2 + $0xb2] sm:$0xff]  ;;  %v10357_v53 = vpack.c.bf16 %v5227_v48, %v5227_v48  ;;  %4811 = vst [vmem:[#allocation3 + $0x1f8] sm:$0xf] %v10355_v62  ;;  %4627 = vst [vmem:[#allocation2 + $0xd1] sm:$0x1] %v4609_v24  ;;  %v5037_v22 = vld [vmem:[#allocation2 + $0xc2] sm:$0xff] }
 0x2b2   : > { %v10326_v25 = vpack.c.bf16 %v5036_v17, %v5036_v17  ;;  %v10327_v40 = vpack.c.bf16 %v5037_v22, %v5037_v22  ;;  %v4575_v7 = vld [vmem:[#allocation2 + $0xf2] sm:$0x1]  ;;  %v4610_v45 = vld [vmem:[#allocation2 + $0xe7] sm:$0x1]  ;;  %v11973_v33 = vld [vmem:[%s14214_s2 + $0x148] sm:$0xff]  }
 0x2b3   : > { %11238 = vmatpush3.bf16.msra.mxu1 %v11928_v51  ;;  %5387 = vst [vmem:[#allocation3 + $0x204] sm:$0xf] %v10357_v53  ;;  %4813 = vst [vmem:[#allocation3 + $0x240] sm:$0xf] %v10357_v53  ;;  %v5039_v28 = vld [vmem:[#allocation2 + $0xda] sm:$0xff]  ;;  %v4849_v21 = vld [vmem:[#allocation2 + $0xf1] sm:$0xff] }
 0x2b4   : > { %11239 = vmatprep.subr.bf16.mxu1 %v11941_v1  ;;  %5196 = vst [vmem:[#allocation3 + $0x224] sm:$0xf] %v10326_v25  ;;  %4593 = vst [vmem:[#allocation2 + $0xf0] sm:$0x1] %v4575_v7  ;;  %v5232_v54 = vld [vmem:[#allocation2 + $0xf8] sm:$0xff]  ;;  %v10329_v15 = vpack.c.bf16 %v5039_v28, %v5039_v28  ;;  %v10299_v3 = vpack.c.bf16 %v4849_v21, %v4849_v21  ;;  %v5234_v13 = vld [vmem:[#allocation2 + $0x110] sm:$0xff] }
 0x2b5   : > { %4628 = vst [vmem:[#allocation2 + $0xe9] sm:$0x1] %v4610_v45  ;;  %5197 = vst [vmem:[#allocation3 + $0x248] sm:$0xf] %v10327_v40  ;;  %v10362_v31 = vpack.c.bf16 %v5232_v54, %v5232_v54  ;;  %v4850_v57 = vld [vmem:[#allocation2 + $0xf9] sm:$0xff]  ;;  %v4851_v44 = vld [vmem:[#allocation2 + $0x109] sm:$0xff]  ;;  %v10364_v19 = vpack.c.bf16 %v5234_v13, %v5234_v13 }
 0x2b6   : > { %7886 = vmatmul.mubr.bf16.gmra.mxu1 %v11893_v52  ;;  %5390 = vst [vmem:[#allocation3 + $0x270] sm:$0xf] %v10360_v36  ;;  %4816 = vst [vmem:[#allocation3 + $0x2ac] sm:$0xf] %v10360_v36  ;;  %v4576_v20 = vld [vmem:[#allocation2 + $0x10a] sm:$0x1]  ;;  %v10300_v32 = vpack.c.bf16 %v4850_v57, %v4850_v57  ;;  %v10301_v23 = vpack.c.bf16 %v4851_v44, %v4851_v44 }
 0x2b7   : > { %7893 = vmatprep.mubr.bf16.mxu1 %v11903_v39  ;;  %11240 = vmatpush3.bf16.msra.mxu1 %v11943_v63  ;;  %5007 = vst [vmem:[#allocation3 + $0x28c] sm:$0xf] %v10297_v61  ;;  %v4611_v50 = vld [vmem:[#allocation2 + $0xff] sm:$0x1]  ;;  %5008 = vst [vmem:[#allocation3 + $0x2b0] sm:$0xf] %v10298_v10 }
 0x2b8   : > { %8047 = vmatmul.mubr.bf16.gmra.mxu0 %v11896_v35  ;;  %11241 = vmatprep.subr.bf16.mxu1 %v11957_v4  ;;  %4594 = vst [vmem:[#allocation2 + $0x108] sm:$0x1] %v4576_v20  ;;  %4629 = vst [vmem:[#allocation2 + $0x101] sm:$0x1] %v4611_v50  ;;  %v5041_v59 = vld [vmem:[#allocation2 + $0xf2] sm:$0xff]  ;;  %v5043_v55 = vld [vmem:[#allocation2 + $0x10a] sm:$0xff] }
 0x2b9   : > { %8054 = vmatprep.mubr.bf16.mxu0 %v11906_v8  ;;  %5199 = vst [vmem:[#allocation3 + $0x290] sm:$0xf] %v10329_v15  ;;  %5392 = vst [vmem:[#allocation3 + $0x2b8] sm:$0xf] %v10362_v31  ;;  %v10331_v56 = vpack.c.bf16 %v5041_v59, %v5041_v59  ;;  %v4852_v18 = vld [vmem:[#allocation2 + $0x111] sm:$0xff]  ;;  %v5236_v46 = vld [vmem:[#allocation2 + $0x128] sm:$0xff]  ;;  %v10333_v38 = vpack.c.bf16 %v5043_v55, %v5043_v55 }
 0x2ba   : > { %4818 = vst [vmem:[#allocation3 + $0x2f4] sm:$0xf] %v10362_v31  ;;  %5009 = vst [vmem:[#allocation3 + $0x2d4] sm:$0xf] %v10299_v3  ;;  %v4577_v37 = vld [vmem:[#allocation2 + $0x122] sm:$0x1]  ;;  %v10302_v6 = vpack.c.bf16 %v4852_v18, %v4852_v18  ;;  %v10366_v34 = vpack.c.bf16 %v5236_v46, %v5236_v46 }
 0x2bb   : > { %v4612_v43 = vld [vmem:[#allocation2 + $0x117] sm:$0x1]  ;;  %5010 = vst [vmem:[#allocation3 + $0x2f8] sm:$0xf] %v10300_v32  ;;  %11242 = vmatpush3.bf16.msra.mxu1 %v11959_v47  ;;  %4595 = vst [vmem:[#allocation2 + $0x120] sm:$0x1] %v4577_v37 }
 0x2bc   : > { %4630 = vst [vmem:[#allocation2 + $0x119] sm:$0x1] %v4612_v43  ;;  %v4853_v27 = vld [vmem:[#allocation2 + $0x121] sm:$0xff]  ;;  %5201 = vst [vmem:[#allocation3 + $0x2d8] sm:$0xf] %v10331_v56  ;;  %11243 = vmatprep.subr.bf16.mxu1 %v11973_v33  ;;  %v5038_v30 = vld [vmem:[#allocation2 + $0xca] sm:$0xff] }
 0x2bd   : > { %v11901_v41 = vld [vmem:[#allocation3 + $0xd8] ss:$36 sps:$4 sm:$0xff]   ;;  %5394 = vst [vmem:[#allocation3 + $0x300] sm:$0xf] %v10364_v19  ;;  %4820 = vst [vmem:[#allocation3 + $0x33c] sm:$0xf] %v10364_v19  ;;  %v10303_v16 = vpack.c.bf16 %v4853_v27, %v4853_v27  ;;  %v10328_v58 = vpack.c.bf16 %v5038_v30, %v5038_v30 }
 0x2be   : > { %5011 = vst [vmem:[#allocation3 + $0x31c] sm:$0xf] %v10301_v23  ;;  %v11909_v11 = vld [vmem:[#allocation3 + $0x124] ss:$36 sps:$4 sm:$0xff]   ;;  %5012 = vst [vmem:[#allocation3 + $0x340] sm:$0xf] %v10302_v6  ;;  %7894 = vmatmul.mubr.bf16.gmra.mxu1 %v11901_v41 }
 0x2bf   : > { %v11904_v2 = vld [vmem:[#allocation3 + $0xe0] ss:$36 sps:$4 sm:$0xff]   ;;  %5203 = vst [vmem:[#allocation3 + $0x320] sm:$0xf] %v10333_v38  ;;  %5396 = vst [vmem:[#allocation3 + $0x348] sm:$0xf] %v10366_v34  ;;  %7901 = vmatprep.mubr.bf16.mxu1 %v11909_v11  ;;  %11244 = vmatpush3.bf16.msra.mxu1 %v11975_v9 }
 0x2c0   : > { %4822 = vst [vmem:[#allocation3 + $0x384] sm:$0xf] %v10366_v34  ;;  %5013 = vst [vmem:[#allocation3 + $0x364] sm:$0xf] %v10303_v16  ;;  %v11912_v0 = vld [vmem:[#allocation3 + $0x12c] ss:$36 sps:$4 sm:$0xff]   ;;  %8055 = vmatmul.mubr.bf16.gmra.mxu0 %v11904_v2 }
 0x2c1   : > { %8062 = vmatprep.mubr.bf16.mxu0 %v11912_v0  ;;  %v5229_v5 = vld [vmem:[#allocation2 + $0xd8] sm:$0xff]  ;;  %v5040_v51 = vld [vmem:[#allocation2 + $0xe2] sm:$0xff]  ;;  %v11907_v1 = vld [vmem:[#allocation3 + $0x120] ss:$36 sps:$4 sm:$0xff]   ;;  %5198 = vst [vmem:[#allocation3 + $0x26c] sm:$0xf] %v10328_v58 }
 0x2c2   : > { %v10359_v63 = vpack.c.bf16 %v5229_v5, %v5229_v5  ;;  %v10330_v52 = vpack.c.bf16 %v5040_v51, %v5040_v51  ;;  %v5231_v60 = vld [vmem:[#allocation2 + $0xf0] sm:$0xff]  ;;  %v5042_v26 = vld [vmem:[#allocation2 + $0xfa] sm:$0xff]  ;;  %v5233_v62 = vld [vmem:[#allocation2 + $0x108] sm:$0xff] }
 0x2c3   : > { %v11917_v4 = vld [vmem:[#allocation3 + $0x16c] ss:$36 sps:$4 sm:$0xff]   ;;  %v10361_v39 = vpack.c.bf16 %v5231_v60, %v5231_v60  ;;  %v10332_v29 = vpack.c.bf16 %v5042_v26, %v5042_v26  ;;  %v5044_v17 = vld [vmem:[#allocation2 + $0x112] sm:$0xff]  ;;  %v10363_v25 = vpack.c.bf16 %v5233_v62, %v5233_v62  ;;  %v4854_v24 = vld [vmem:[#allocation2 + $0x129] sm:$0xff] }
 0x2c4   : > { %v5235_v48 = vld [vmem:[#allocation2 + $0x120] sm:$0xff]  ;;  %v11910_v35 = vld [vmem:[#allocation3 + $0x128] ss:$36 sps:$4 sm:$0xff]   ;;  %5389 = vst [vmem:[#allocation3 + $0x24c] sm:$0xf] %v10359_v63  ;;  %v10334_v53 = vpack.c.bf16 %v5044_v17, %v5044_v17  ;;  %v10304_v49 = vpack.c.bf16 %v4854_v24, %v4854_v24  ;;  %v5242_v44 = vld [vmem:[#allocation2 + $0x170] sm:$0xff] }
 0x2c5   : > { %4815 = vst [vmem:[#allocation3 + $0x288] sm:$0xf] %v10359_v63  ;;  %5200 = vst [vmem:[#allocation3 + $0x2b4] sm:$0xf] %v10330_v52  ;;  %v10365_v14 = vpack.c.bf16 %v5235_v48, %v5235_v48  ;;  %v4578_v8 = vld [vmem:[#allocation2 + $0x13a] sm:$0x1]  ;;  %v10372_v56 = vpack.c.bf16 %v5242_v44, %v5242_v44 }
 0x2c6   : > { %v11920_v22 = vld [vmem:[#allocation3 + $0x174] ss:$36 sps:$4 sm:$0xff]   ;;  %5391 = vst [vmem:[#allocation3 + $0x294] sm:$0xf] %v10361_v39  ;;  %4817 = vst [vmem:[#allocation3 + $0x2d0] sm:$0xf] %v10361_v39  ;;  %7902 = vmatmul.mubr.bf16.gmra.mxu1 %v11907_v1 }
 0x2c7   : > { %5202 = vst [vmem:[#allocation3 + $0x2fc] sm:$0xf] %v10332_v29  ;;  %4596 = vst [vmem:[#allocation2 + $0x138] sm:$0x1] %v4578_v8  ;;  %v4613_v12 = vld [vmem:[#allocation2 + $0x12f] sm:$0x1]  ;;  %7909 = vmatprep.mubr.bf16.mxu1 %v11917_v4 }
 0x2c8   : > { %v5045_v47 = vld [vmem:[#allocation2 + $0x122] sm:$0xff]  ;;  %5393 = vst [vmem:[#allocation3 + $0x2dc] sm:$0xf] %v10363_v25  ;;  %4819 = vst [vmem:[#allocation3 + $0x318] sm:$0xf] %v10363_v25  ;;  %v4855_v61 = vld [vmem:[#allocation2 + $0x139] sm:$0xff]  ;;  %8063 = vmatmul.mubr.bf16.gmra.mxu0 %v11910_v35 }
 0x2c9   : > { %v5238_v40 = vld [vmem:[#allocation2 + $0x140] sm:$0xff]  ;;  %5204 = vst [vmem:[#allocation3 + $0x344] sm:$0xf] %v10334_v53  ;;  %5395 = vst [vmem:[#allocation3 + $0x324] sm:$0xf] %v10365_v14  ;;  %v10335_v36 = vpack.c.bf16 %v5045_v47, %v5045_v47  ;;  %v10305_v33 = vpack.c.bf16 %v4855_v61, %v4855_v61  ;;  %v5240_v21 = vld [vmem:[#allocation2 + $0x158] sm:$0xff]  ;;  %8070 = vmatprep.mubr.bf16.mxu0 %v11920_v22 }
 0x2ca   : > { %4821 = vst [vmem:[#allocation3 + $0x360] sm:$0xf] %v10365_v14  ;;  %4631 = vst [vmem:[#allocation2 + $0x131] sm:$0x1] %v4613_v12  ;;  %v10368_v42 = vpack.c.bf16 %v5238_v40, %v5238_v40  ;;  %v4856_v7 = vld [vmem:[#allocation2 + $0x141] sm:$0xff]  ;;  %v10370_v31 = vpack.c.bf16 %v5240_v21, %v5240_v21  ;;  %v4857_v57 = vld [vmem:[#allocation2 + $0x151] sm:$0xff] }
 0x2cb   : > { %v4579_v45 = vld [vmem:[#allocation2 + $0x152] sm:$0x1]  ;;  %5014 = vst [vmem:[#allocation3 + $0x388] sm:$0xf] %v10304_v49  ;;  %v10306_v10 = vpack.c.bf16 %v4856_v7, %v4856_v7  ;;  %v4614_v28 = vld [vmem:[#allocation2 + $0x147] sm:$0x1]  ;;  %v10307_v50 = vpack.c.bf16 %v4857_v57, %v4857_v57 }
 0x2cc   : > { %4597 = vst [vmem:[#allocation2 + $0x150] sm:$0x1] %v4579_v45  ;;  %v5047_v54 = vld [vmem:[#allocation2 + $0x13a] sm:$0xff]  ;;  %5205 = vst [vmem:[#allocation3 + $0x368] sm:$0xf] %v10335_v36  ;;  %v5049_v13 = vld [vmem:[#allocation2 + $0x152] sm:$0xff] }
 0x2cd   : > { %5398 = vst [vmem:[#allocation3 + $0x390] sm:$0xf] %v10368_v42  ;;  %4824 = vst [vmem:[#allocation3 + $0x3cc] sm:$0xf] %v10368_v42  ;;  %v10337_v15 = vpack.c.bf16 %v5047_v54, %v5047_v54  ;;  %v4858_v3 = vld [vmem:[#allocation2 + $0x159] sm:$0xff]  ;;  %v10339_v9 = vpack.c.bf16 %v5049_v13, %v5049_v13  ;;  %v4859_v4 = vld [vmem:[#allocation2 + $0x169] sm:$0xff] }
 0x2ce   : > { %4632 = vst [vmem:[#allocation2 + $0x149] sm:$0x1] %v4614_v28  ;;  %v4580_v20 = vld [vmem:[#allocation2 + $0x16a] sm:$0x1]  ;;  %5015 = vst [vmem:[#allocation3 + $0x3ac] sm:$0xf] %v10305_v33  ;;  %v10308_v32 = vpack.c.bf16 %v4858_v3, %v4858_v3  ;;  %v10309_v29 = vpack.c.bf16 %v4859_v4, %v4859_v4 }
 0x2cf   : > { %5016 = vst [vmem:[#allocation3 + $0x3d0] sm:$0xf] %v10306_v10  ;;  %4598 = vst [vmem:[#allocation2 + $0x168] sm:$0x1] %v4580_v20  ;;  %v4615_v59 = vld [vmem:[#allocation2 + $0x15f] sm:$0x1] }
 0x2d0   : > { %5207 = vst [vmem:[#allocation3 + $0x3b0] sm:$0xf] %v10337_v15  ;;  %5400 = vst [vmem:[#allocation3 + $0x3d8] sm:$0xf] %v10370_v31  ;;  %v11989_v19 = vld [vmem:[%s14214_s2 + $0x1e0] sm:$0xff]   ;;  %v5237_v38 = vld [vmem:[#allocation2 + $0x138] sm:$0xff] }
 0x2d1   : > { %4826 = vst [vmem:[#allocation3 + $0x414] sm:$0xf] %v10370_v31  ;;  %4633 = vst [vmem:[#allocation2 + $0x161] sm:$0x1] %v4615_v59  ;;  %v11990_v18 = vld [vmem:[%s14214_s2 + $0x1a0] sm:$0xff]   ;;  %11349 = vmatprep.subr.bf16.mxu0 %v11989_v19  ;;  %v5046_v41 = vld [vmem:[#allocation2 + $0x12a] sm:$0xff]  ;;  %v10367_v11 = vpack.c.bf16 %v5237_v38, %v5237_v38 }
 0x2d2   : > { %5017 = vst [vmem:[#allocation3 + $0x3f4] sm:$0xf] %v10307_v50  ;;  %5018 = vst [vmem:[#allocation3 + $0x418] sm:$0xf] %v10308_v32  ;;  %v11915_v23 = vld [vmem:[#allocation3 + $0x168] ss:$36 sps:$4 sm:$0xff]   ;;  %11350 = vmatpush3.bf16.msra.mxu0 %v11990_v18  ;;  %v10336_v16 = vpack.c.bf16 %v5046_v41, %v5046_v41 }
 0x2d3   : > { %5209 = vst [vmem:[#allocation3 + $0x3f8] sm:$0xf] %v10339_v9  ;;  %5402 = vst [vmem:[#allocation3 + $0x420] sm:$0xf] %v10372_v56  ;;  %v11923_v37 = vld [vmem:[#allocation3 + $0x1b4] ss:$36 sps:$4 sm:$0xff]   ;;  %7910 = vmatmul.mubr.bf16.gmra.mxu1 %v11915_v23 }
 0x2d4   : > { %4828 = vst [vmem:[#allocation3 + $0x45c] sm:$0xf] %v10372_v56  ;;  %v11918_v43 = vld [vmem:[#allocation3 + $0x170] ss:$36 sps:$4 sm:$0xff]   ;;  %7917 = vmatprep.mubr.bf16.mxu1 %v11923_v37  ;;  %v11926_v6 = vld [vmem:[#allocation3 + $0x1bc] ss:$36 sps:$4 sm:$0xff]  }
 0x2d5   : > { %8071 = vmatmul.mubr.bf16.gmra.mxu0 %v11918_v43  ;;  %v11921_v55 = vld [vmem:[#allocation3 + $0x1b0] ss:$36 sps:$4 sm:$0xff]   ;;  %v11924_v46 = vld [vmem:[#allocation3 + $0x1b8] ss:$36 sps:$4 sm:$0xff]   ;;  %v11934_v34 = vld [vmem:[#allocation3 + $0x204] ss:$36 sps:$4 sm:$0xff]  }
 0x2d6   : > { %8078 = vmatprep.mubr.bf16.mxu0 %v11926_v6  ;;  %v11931_v27 = vld [vmem:[#allocation3 + $0x1fc] ss:$36 sps:$4 sm:$0xff]   ;;  %v5048_v2 = vld [vmem:[#allocation2 + $0x142] sm:$0xff]  ;;  %5206 = vst [vmem:[#allocation3 + $0x38c] sm:$0xf] %v10336_v16  ;;  %v11993_v26 = vld [vmem:[%s14214_s2 + $0x1d8] sm:$0xff]  }
 0x2d7   : > { %v5239_v0 = vld [vmem:[#allocation2 + $0x150] sm:$0xff]  ;;  %v10338_v30 = vpack.c.bf16 %v5048_v2, %v5048_v2  ;;  %v5241_v51 = vld [vmem:[#allocation2 + $0x168] sm:$0xff]  ;;  %5397 = vst [vmem:[#allocation3 + $0x36c] sm:$0xf] %v10367_v11  ;;  %4823 = vst [vmem:[#allocation3 + $0x3a8] sm:$0xf] %v10367_v11  ;;  %11351 = vmatprep.subr.bf16.mxu0 %v11993_v26 }
 0x2d8   : > { %v10369_v58 = vpack.c.bf16 %v5239_v0, %v5239_v0  ;;  %v5050_v5 = vld [vmem:[#allocation2 + $0x15a] sm:$0xff]  ;;  %v10371_v63 = vpack.c.bf16 %v5241_v51, %v5241_v51  ;;  %v4581_v39 = vld [vmem:[#allocation2 + $0x182] sm:$0x1]  ;;  %v5051_v62 = vld [vmem:[#allocation2 + $0x16a] sm:$0xff]  ;;  %5019 = vst [vmem:[#allocation3 + $0x43c] sm:$0xf] %v10309_v29 }
 0x2d9   : > { %v10340_v1 = vpack.c.bf16 %v5050_v5, %v5050_v5  ;;  %v11991_v52 = vld [vmem:[%s14214_s2 + $0x140] sm:$0xff]   ;;  %5208 = vst [vmem:[#allocation3 + $0x3d4] sm:$0xf] %v10338_v30  ;;  %4599 = vst [vmem:[#allocation2 + $0x180] sm:$0x1] %v4581_v39  ;;  %v5052_v17 = vld [vmem:[#allocation2 + $0x172] sm:$0xff]  ;;  %v10341_v25 = vpack.c.bf16 %v5051_v62, %v5051_v62 }
 0x2da   : > { %v11992_v60 = vld [vmem:[%s14214_s2 + $0x100] sm:$0xff]   ;;  %5399 = vst [vmem:[#allocation3 + $0x3b4] sm:$0xf] %v10369_v58  ;;  %4825 = vst [vmem:[#allocation3 + $0x3f0] sm:$0xf] %v10369_v58  ;;  %11245 = vmatprep.subr.bf16.mxu1 %v11991_v52  ;;  %v5244_v48 = vld [vmem:[#allocation2 + $0x188] sm:$0xff]  ;;  %v10342_v53 = vpack.c.bf16 %v5052_v17, %v5052_v17 }
 0x2db   : > { %7918 = vmatmul.mubr.bf16.gmra.mxu1 %v11921_v55  ;;  %5210 = vst [vmem:[#allocation3 + $0x41c] sm:$0xf] %v10340_v1  ;;  %5401 = vst [vmem:[#allocation3 + $0x3fc] sm:$0xf] %v10371_v63  ;;  %v11929_v35 = vld [vmem:[#allocation3 + $0x1f8] ss:$36 sps:$4 sm:$0xff]   ;;  %v10374_v14 = vpack.c.bf16 %v5244_v48, %v5244_v48 }
 0x2dc   : > { %7925 = vmatprep.mubr.bf16.mxu1 %v11931_v27  ;;  %4827 = vst [vmem:[#allocation3 + $0x438] sm:$0xf] %v10371_v63  ;;  %11246 = vmatpush3.bf16.msra.mxu1 %v11992_v60  ;;  %v12000_v24 = vld [vmem:[%s14214_s2 + $0x198] sm:$0xff]   ;;  %v12001_v8 = vld [vmem:[%s14214_s2 + $0x1d0] sm:$0xff]   ;;  %v5406_v12 = vld [vmem:[#allocation2 + $0x21] sm:$0xff] }
 0x2dd   : > { %8079 = vmatmul.mubr.bf16.gmra.mxu0 %v11924_v46  ;;  %v11937_v22 = vld [vmem:[#allocation3 + $0x244] ss:$36 sps:$4 sm:$0xff]   ;;  %5211 = vst [vmem:[#allocation3 + $0x440] sm:$0xf] %v10341_v25  ;;  %5212 = vst [vmem:[#allocation3 + $0x464] sm:$0xf] %v10342_v53  ;;  %v10376_v42 = vpack.c.bf16 %v5406_v12, %v5406_v12 }
 0x2de   : > { %8086 = vmatprep.mubr.bf16.mxu0 %v11934_v34  ;;  %v5405_v49 = vld [vmem:[#allocation2 + $0x19] sm:$0xff]  ;;  %v11932_v47 = vld [vmem:[#allocation3 + $0x200] ss:$36 sps:$4 sm:$0xff]   ;;  %5404 = vst [vmem:[#allocation3 + $0x468] sm:$0xf] %v10374_v14  ;;  %11352 = vmatpush3.bf16.msra.mxu0 %v12000_v24  ;;  %v5598_v7 = vld [vmem:[#allocation2 + $0x22] sm:$0xff] }
 0x2df   : > { %v12002_v40 = vld [vmem:[%s14214_s2 + $0x190] sm:$0xff]   ;;  %v10375_v36 = vpack.c.bf16 %v5405_v49, %v5405_v49  ;;  %v5597_v61 = vld [vmem:[#allocation2 + $0x1a] sm:$0xff]  ;;  %11353 = vmatprep.subr.bf16.mxu0 %v12001_v8  ;;  %v10408_v33 = vpack.c.bf16 %v5598_v7, %v5598_v7  ;;  %v12003_v21 = vld [vmem:[%s14214_s2 + $0x1c8] sm:$0xff]   ;;  %5566 = vst [vmem:[#allocation3 + $0x34] sm:$0xf] %v10376_v42 }
 0x2e0   : > { %v10407_v45 = vpack.c.bf16 %v5597_v61, %v5597_v61  ;;  %v5789_v10 = vld [vmem:[#allocation2 + $0x30] sm:$0xff]  ;;  %v5790_v28 = vld [vmem:[#allocation2 + $0x38] sm:$0xff]  ;;  %v12007_v20 = vld [vmem:[%s14214_s2 + $0x188] sm:$0xff]  }
 0x2e1   : > { %v5981_v54 = vld [vmem:[#allocation2 + $0x31] sm:$0xff]  ;;  %5565 = vst [vmem:[#allocation3 + $0x10] sm:$0xf] %v10375_v36  ;;  %v10439_v15 = vpack.c.bf16 %v5789_v10, %v5789_v10  ;;  %v10440_v31 = vpack.c.bf16 %v5790_v28, %v5790_v28  ;;  %v11940_v3 = vld [vmem:[#allocation3 + $0x24c] ss:$36 sps:$4 sm:$0xff]   ;;  %v5791_v46 = vld [vmem:[#allocation2 + $0x48] sm:$0xff] }
 0x2e2   : > { %v10471_v57 = vpack.c.bf16 %v5981_v54, %v5981_v54  ;;  %5757 = vst [vmem:[#allocation3 + $0x14] sm:$0xf] %v10407_v45  ;;  %5758 = vst [vmem:[#allocation3 + $0x38] sm:$0xf] %v10408_v33  ;;  %11354 = vmatpush3.bf16.msra.mxu0 %v12002_v40  ;;  %v11935_v50 = vld [vmem:[#allocation3 + $0x240] ss:$36 sps:$4 sm:$0xff]   ;;  %v10441_v34 = vpack.c.bf16 %v5791_v46, %v5791_v46 }
 0x2e3   : > { %7926 = vmatmul.mubr.bf16.gmra.mxu1 %v11929_v35  ;;  %5949 = vst [vmem:[#allocation3 + $0x18] sm:$0xf] %v10439_v15  ;;  %5950 = vst [vmem:[#allocation3 + $0x3c] sm:$0xf] %v10440_v31  ;;  %11355 = vmatprep.subr.bf16.mxu0 %v12003_v21  ;;  %v11947_v32 = vld [vmem:[#allocation3 + $0x28c] ss:$36 sps:$4 sm:$0xff]  }
 0x2e4   : > { %7933 = vmatprep.mubr.bf16.mxu1 %v11937_v22  ;;  %6141 = vst [vmem:[#allocation3 + $0x1c] sm:$0xf] %v10471_v57  ;;  %5567 = vst [vmem:[#allocation3 + $0x58] sm:$0xf] %v10471_v57  ;;  %v5243_v59 = vld [vmem:[#allocation2 + $0x180] sm:$0xff]  ;;  %v13511_v37 = vld [vmem:[%s14214_s2 + $0x238] sm:$0xff]  }
 0x2e5   : > { %8087 = vmatmul.mubr.bf16.gmra.mxu0 %v11932_v47  ;;  %v5982_v13 = vld [vmem:[#allocation2 + $0x39] sm:$0xff]  ;;  %v10373_v9 = vpack.c.bf16 %v5243_v59, %v5243_v59  ;;  %v11950_v19 = vld [vmem:[#allocation3 + $0x294] ss:$36 sps:$4 sm:$0xff]   ;;  %v5792_v27 = vld [vmem:[#allocation2 + $0x50] sm:$0xff]  ;;  %11527 = vmatprep.subr.bf16.mxu1 %v13511_v37  ;;  %5951 = vst [vmem:[#allocation3 + $0x60] sm:$0xf] %v10441_v34 }
 0x2e6   : > { %8094 = vmatprep.mubr.bf16.mxu0 %v11940_v3  ;;  %11356 = vmatpush3.bf16.msra.mxu0 %v12007_v20  ;;  %v11938_v44 = vld [vmem:[#allocation3 + $0x248] ss:$36 sps:$4 sm:$0xff]   ;;  %v10472_v56 = vpack.c.bf16 %v5982_v13, %v5982_v13  ;;  %v12011_v18 = vld [vmem:[%s14214_s2 + $0x1c0] sm:$0xff]   ;;  %v10442_v16 = vpack.c.bf16 %v5792_v27, %v5792_v27  ;;  %v5983_v11 = vld [vmem:[#allocation2 + $0x49] sm:$0xff] }
 0x2e7   : > { %5403 = vst [vmem:[#allocation3 + $0x444] sm:$0xf] %v10373_v9  ;;  %v12012_v23 = vld [vmem:[%s14214_s2 + $0x180] sm:$0xff]   ;;  %v5599_v43 = vld [vmem:[#allocation2 + $0x32] sm:$0xff]  ;;  %11357 = vmatprep.subr.bf16.mxu0 %v12011_v18  ;;  %v5601_v0 = vld [vmem:[#allocation2 + $0x4a] sm:$0xff]  ;;  %v10473_v30 = vpack.c.bf16 %v5983_v11, %v5983_v11 }
 0x2e8   : > { %6142 = vst [vmem:[#allocation3 + $0x40] sm:$0xf] %v10472_v56  ;;  %5568 = vst [vmem:[#allocation3 + $0x7c] sm:$0xf] %v10472_v56  ;;  %v5600_v6 = vld [vmem:[#allocation2 + $0x3a] sm:$0xff]  ;;  %v10409_v55 = vpack.c.bf16 %v5599_v43, %v5599_v43  ;;  %v5984_v2 = vld [vmem:[#allocation2 + $0x51] sm:$0xff]  ;;  %v10411_v51 = vpack.c.bf16 %v5601_v0, %v5601_v0 }
 0x2e9   : > { %v11945_v41 = vld [vmem:[#allocation3 + $0x288] ss:$36 sps:$4 sm:$0xff]   ;;  %v10410_v38 = vpack.c.bf16 %v5600_v6, %v5600_v6  ;;  %v10474_v58 = vpack.c.bf16 %v5984_v2, %v5984_v2  ;;  %v5793_v1 = vld [vmem:[#allocation2 + $0x60] sm:$0xff]  ;;  %v5794_v63 = vld [vmem:[#allocation2 + $0x68] sm:$0xff]  ;;  %5952 = vst [vmem:[#allocation3 + $0x84] sm:$0xf] %v10442_v16 }
 0x2ea   : > { %11358 = vmatpush3.bf16.msra.mxu0 %v12012_v23  ;;  %5759 = vst [vmem:[#allocation3 + $0x5c] sm:$0xf] %v10409_v55  ;;  %v5602_v5 = vld [vmem:[#allocation2 + $0x52] sm:$0xff]  ;;  %v11948_v52 = vld [vmem:[#allocation3 + $0x290] ss:$36 sps:$4 sm:$0xff]   ;;  %v10443_v4 = vpack.c.bf16 %v5793_v1, %v5793_v1  ;;  %v10444_v39 = vpack.c.bf16 %v5794_v63, %v5794_v63  ;;  %v5986_v62 = vld [vmem:[#allocation2 + $0x69] sm:$0xff] }
 0x2eb   : > { %7934 = vmatmul.mubr.bf16.gmra.mxu1 %v11935_v50  ;;  %v11953_v60 = vld [vmem:[#allocation3 + $0x2d4] ss:$36 sps:$4 sm:$0xff]   ;;  %5760 = vst [vmem:[#allocation3 + $0x80] sm:$0xf] %v10410_v38  ;;  %v10412_v26 = vpack.c.bf16 %v5602_v5, %v5602_v5  ;;  %6143 = vst [vmem:[#allocation3 + $0x64] sm:$0xf] %v10473_v30  ;;  %v10476_v48 = vpack.c.bf16 %v5986_v62, %v5986_v62 }
 0x2ec   : > { %7941 = vmatprep.mubr.bf16.mxu1 %v11947_v32  ;;  %v5985_v29 = vld [vmem:[#allocation2 + $0x61] sm:$0xff]  ;;  %6144 = vst [vmem:[#allocation3 + $0x88] sm:$0xf] %v10474_v58  ;;  %5569 = vst [vmem:[#allocation3 + $0xa0] sm:$0xf] %v10473_v30  ;;  %v5604_v25 = vld [vmem:[#allocation2 + $0x6a] sm:$0xff] }
 0x2ed   : > { %8095 = vmatmul.mubr.bf16.gmra.mxu0 %v11938_v44  ;;  %5570 = vst [vmem:[#allocation3 + $0xc4] sm:$0xf] %v10474_v58  ;;  %5761 = vst [vmem:[#allocation3 + $0xa4] sm:$0xf] %v10411_v51  ;;  %v10475_v17 = vpack.c.bf16 %v5985_v29, %v5985_v29  ;;  %v5603_v35 = vld [vmem:[#allocation2 + $0x62] sm:$0xff]  ;;  %v5795_v53 = vld [vmem:[#allocation2 + $0x78] sm:$0xff]  ;;  %v10414_v24 = vpack.c.bf16 %v5604_v25, %v5604_v25 }
 0x2ee   : > { %8102 = vmatprep.mubr.bf16.mxu0 %v11950_v19  ;;  %5762 = vst [vmem:[#allocation3 + $0xc8] sm:$0xf] %v10412_v26  ;;  %5953 = vst [vmem:[#allocation3 + $0xa8] sm:$0xf] %v10443_v4  ;;  %v10413_v14 = vpack.c.bf16 %v5603_v35, %v5603_v35  ;;  %v5796_v8 = vld [vmem:[#allocation2 + $0x80] sm:$0xff]  ;;  %v10445_v22 = vpack.c.bf16 %v5795_v53, %v5795_v53  ;;  %v5797_v45 = vld [vmem:[#allocation2 + $0x90] sm:$0xff] }
 0x2ef   : > { %5954 = vst [vmem:[#allocation3 + $0xcc] sm:$0xf] %v10444_v39  ;;  %v5987_v49 = vld [vmem:[#allocation2 + $0x79] sm:$0xff]  ;;  %v5988_v12 = vld [vmem:[#allocation2 + $0x81] sm:$0xff]  ;;  %v11956_v47 = vld [vmem:[#allocation3 + $0x2dc] ss:$36 sps:$4 sm:$0xff]   ;;  %v10446_v40 = vpack.c.bf16 %v5796_v8, %v5796_v8  ;;  %v10447_v54 = vpack.c.bf16 %v5797_v45, %v5797_v45 }
 0x2f0   : > { %6145 = vst [vmem:[#allocation3 + $0xac] sm:$0xf] %v10475_v17  ;;  %6146 = vst [vmem:[#allocation3 + $0xd0] sm:$0xf] %v10476_v48  ;;  %v10477_v36 = vpack.c.bf16 %v5987_v49, %v5987_v49  ;;  %v10478_v42 = vpack.c.bf16 %v5988_v12, %v5988_v12  ;;  %v5605_v61 = vld [vmem:[#allocation2 + $0x7a] sm:$0xff]  ;;  %v5606_v7 = vld [vmem:[#allocation2 + $0x82] sm:$0xff] }
 0x2f1   : > { %5571 = vst [vmem:[#allocation3 + $0xe8] sm:$0xf] %v10475_v17  ;;  %5572 = vst [vmem:[#allocation3 + $0x10c] sm:$0xf] %v10476_v48  ;;  %v10415_v33 = vpack.c.bf16 %v5605_v61, %v5605_v61  ;;  %v10416_v10 = vpack.c.bf16 %v5606_v7, %v5606_v7  ;;  %v5798_v28 = vld [vmem:[#allocation2 + $0x98] sm:$0xff]  ;;  %v5799_v23 = vld [vmem:[#allocation2 + $0xa8] sm:$0xff] }
 0x2f2   : > { %5763 = vst [vmem:[#allocation3 + $0xec] sm:$0xf] %v10413_v14  ;;  %5764 = vst [vmem:[#allocation3 + $0x110] sm:$0xf] %v10414_v24  ;;  %v5989_v21 = vld [vmem:[#allocation2 + $0x91] sm:$0xff]  ;;  %v10448_v15 = vpack.c.bf16 %v5798_v28, %v5798_v28  ;;  %v5990_v32 = vld [vmem:[#allocation2 + $0x99] sm:$0xff]  ;;  %v10449_v46 = vpack.c.bf16 %v5799_v23, %v5799_v23 }
 0x2f3   : > { %7942 = vmatmul.mubr.bf16.gmra.mxu1 %v11945_v41  ;;  %5955 = vst [vmem:[#allocation3 + $0xf0] sm:$0xf] %v10445_v22  ;;  %5956 = vst [vmem:[#allocation3 + $0x114] sm:$0xf] %v10446_v40  ;;  %v10479_v31 = vpack.c.bf16 %v5989_v21, %v5989_v21  ;;  %v11951_v57 = vld [vmem:[#allocation3 + $0x2d0] ss:$36 sps:$4 sm:$0xff]   ;;  %v10480_v13 = vpack.c.bf16 %v5990_v32, %v5990_v32 }
 0x2f4   : > { %7949 = vmatprep.mubr.bf16.mxu1 %v11953_v60  ;;  %6147 = vst [vmem:[#allocation3 + $0xf4] sm:$0xf] %v10477_v36  ;;  %6148 = vst [vmem:[#allocation3 + $0x118] sm:$0xf] %v10478_v42  ;;  %v11963_v3 = vld [vmem:[#allocation3 + $0x31c] ss:$36 sps:$4 sm:$0xff]  }
 0x2f5   : > { %8103 = vmatmul.mubr.bf16.gmra.mxu0 %v11948_v52  ;;  %5573 = vst [vmem:[#allocation3 + $0x130] sm:$0xf] %v10477_v36  ;;  %5574 = vst [vmem:[#allocation3 + $0x154] sm:$0xf] %v10478_v42  ;;  %v11954_v20 = vld [vmem:[#allocation3 + $0x2d8] ss:$36 sps:$4 sm:$0xff]  }
 0x2f6   : > { %8110 = vmatprep.mubr.bf16.mxu0 %v11956_v47  ;;  %5765 = vst [vmem:[#allocation3 + $0x134] sm:$0xf] %v10415_v33  ;;  %5766 = vst [vmem:[#allocation3 + $0x158] sm:$0xf] %v10416_v10  ;;  %v11966_v50 = vld [vmem:[#allocation3 + $0x324] ss:$36 sps:$4 sm:$0xff]  }
 0x2f7   : > { %5957 = vst [vmem:[#allocation3 + $0x138] sm:$0xf] %v10447_v54  ;;  %5958 = vst [vmem:[#allocation3 + $0x15c] sm:$0xf] %v10448_v15  ;;  %v11961_v59 = vld [vmem:[#allocation3 + $0x318] ss:$36 sps:$4 sm:$0xff]  }
 0x2f8   : > { %6149 = vst [vmem:[#allocation3 + $0x13c] sm:$0xf] %v10479_v31  ;;  %5575 = vst [vmem:[#allocation3 + $0x178] sm:$0xf] %v10479_v31  ;;  %v11964_v44 = vld [vmem:[#allocation3 + $0x320] ss:$36 sps:$4 sm:$0xff]  }
 0x2f9   : > { %v11969_v9 = vld [vmem:[#allocation3 + $0x364] ss:$36 sps:$4 sm:$0xff]   ;;  %v11972_v56 = vld [vmem:[#allocation3 + $0x36c] ss:$36 sps:$4 sm:$0xff]   ;;  %6150 = vst [vmem:[#allocation3 + $0x160] sm:$0xf] %v10480_v13 }
 0x2fa   : > { %5576 = vst [vmem:[#allocation3 + $0x19c] sm:$0xf] %v10480_v13  ;;  %v5607_v19 = vld [vmem:[#allocation2 + $0x92] sm:$0xff]  ;;  %v5608_v18 = vld [vmem:[#allocation2 + $0x9a] sm:$0xff]  ;;  %v5991_v27 = vld [vmem:[#allocation2 + $0xa9] sm:$0xff] }
 0x2fb   : > { %7950 = vmatmul.mubr.bf16.gmra.mxu1 %v11951_v57  ;;  %v10417_v43 = vpack.c.bf16 %v5607_v19, %v5607_v19  ;;  %v10418_v6 = vpack.c.bf16 %v5608_v18, %v5608_v18  ;;  %v5800_v55 = vld [vmem:[#allocation2 + $0xb0] sm:$0xff]  ;;  %v10481_v34 = vpack.c.bf16 %v5991_v27, %v5991_v27  ;;  %v5801_v0 = vld [vmem:[#allocation2 + $0xc0] sm:$0xff]  ;;  %5959 = vst [vmem:[#allocation3 + $0x180] sm:$0xf] %v10449_v46  ;;  %v5802_v5 = vld [vmem:[#allocation2 + $0xc8] sm:$0xff] }
 0x2fc   : > { %7957 = vmatprep.mubr.bf16.mxu1 %v11963_v3  ;;  %v5992_v41 = vld [vmem:[#allocation2 + $0xb1] sm:$0xff]  ;;  %v10450_v38 = vpack.c.bf16 %v5800_v55, %v5800_v55  ;;  %v10451_v51 = vpack.c.bf16 %v5801_v0, %v5801_v0  ;;  %v5993_v1 = vld [vmem:[#allocation2 + $0xc1] sm:$0xff]  ;;  %v5994_v63 = vld [vmem:[#allocation2 + $0xc9] sm:$0xff]  ;;  %v10452_v52 = vpack.c.bf16 %v5802_v5, %v5802_v5 }
 0x2fd   : > { %8111 = vmatmul.mubr.bf16.gmra.mxu0 %v11954_v20  ;;  %v10482_v16 = vpack.c.bf16 %v5992_v41, %v5992_v41  ;;  %v5609_v11 = vld [vmem:[#allocation2 + $0xaa] sm:$0xff]  ;;  %v5610_v2 = vld [vmem:[#allocation2 + $0xb2] sm:$0xff]  ;;  %5767 = vst [vmem:[#allocation3 + $0x17c] sm:$0xf] %v10417_v43  ;;  %5768 = vst [vmem:[#allocation3 + $0x1a0] sm:$0xf] %v10418_v6  ;;  %v10483_v60 = vpack.c.bf16 %v5993_v1, %v5993_v1  ;;  %v10484_v26 = vpack.c.bf16 %v5994_v63, %v5994_v63 }
 0x2fe   : > { %8118 = vmatprep.mubr.bf16.mxu0 %v11966_v50  ;;  %v10419_v30 = vpack.c.bf16 %v5609_v11, %v5609_v11  ;;  %v10420_v58 = vpack.c.bf16 %v5610_v2, %v5610_v2  ;;  %5960 = vst [vmem:[#allocation3 + $0x1a4] sm:$0xf] %v10450_v38  ;;  %6151 = vst [vmem:[#allocation3 + $0x184] sm:$0xf] %v10481_v34  ;;  %v5611_v4 = vld [vmem:[#allocation2 + $0xc2] sm:$0xff]  ;;  %v5612_v39 = vld [vmem:[#allocation2 + $0xca] sm:$0xff] }
 0x2ff   : > { %6152 = vst [vmem:[#allocation3 + $0x1a8] sm:$0xf] %v10482_v16  ;;  %5577 = vst [vmem:[#allocation3 + $0x1c0] sm:$0xf] %v10481_v34  ;;  %v10421_v29 = vpack.c.bf16 %v5611_v4, %v5611_v4  ;;  %v10422_v62 = vpack.c.bf16 %v5612_v39, %v5612_v39  ;;  %v5803_v17 = vld [vmem:[#allocation2 + $0xd8] sm:$0xff]  ;;  %v5804_v48 = vld [vmem:[#allocation2 + $0xe0] sm:$0xff] }
 0x300   : > { %5578 = vst [vmem:[#allocation3 + $0x1e4] sm:$0xf] %v10482_v16  ;;  %5769 = vst [vmem:[#allocation3 + $0x1c4] sm:$0xf] %v10419_v30  ;;  %v5995_v35 = vld [vmem:[#allocation2 + $0xd9] sm:$0xff]  ;;  %v10453_v25 = vpack.c.bf16 %v5803_v17, %v5803_v17  ;;  %v10454_v53 = vpack.c.bf16 %v5804_v48, %v5804_v48  ;;  %v5996_v14 = vld [vmem:[#allocation2 + $0xe1] sm:$0xff] }
 0x301   : > { %5770 = vst [vmem:[#allocation3 + $0x1e8] sm:$0xf] %v10420_v58  ;;  %5961 = vst [vmem:[#allocation3 + $0x1c8] sm:$0xf] %v10451_v51  ;;  %v10485_v24 = vpack.c.bf16 %v5995_v35, %v5995_v35  ;;  %v5613_v8 = vld [vmem:[#allocation2 + $0xda] sm:$0xff]  ;;  %v5614_v22 = vld [vmem:[#allocation2 + $0xe2] sm:$0xff]  ;;  %v10486_v47 = vpack.c.bf16 %v5996_v14, %v5996_v14 }
 0x302   : > { %5962 = vst [vmem:[#allocation3 + $0x1ec] sm:$0xf] %v10452_v52  ;;  %6153 = vst [vmem:[#allocation3 + $0x1cc] sm:$0xf] %v10483_v60  ;;  %v11967_v49 = vld [vmem:[#allocation3 + $0x360] ss:$36 sps:$4 sm:$0xff]   ;;  %v10423_v40 = vpack.c.bf16 %v5613_v8, %v5613_v8  ;;  %v10424_v36 = vpack.c.bf16 %v5614_v22, %v5614_v22 }
 0x303   : > { %7958 = vmatmul.mubr.bf16.gmra.mxu1 %v11961_v59  ;;  %6154 = vst [vmem:[#allocation3 + $0x1f0] sm:$0xf] %v10484_v26  ;;  %5579 = vst [vmem:[#allocation3 + $0x208] sm:$0xf] %v10483_v60  ;;  %v11979_v12 = vld [vmem:[#allocation3 + $0x3ac] ss:$36 sps:$4 sm:$0xff]  }
 0x304   : > { %7965 = vmatprep.mubr.bf16.mxu1 %v11969_v9  ;;  %5580 = vst [vmem:[#allocation3 + $0x22c] sm:$0xf] %v10484_v26  ;;  %5771 = vst [vmem:[#allocation3 + $0x20c] sm:$0xf] %v10421_v29  ;;  %v5805_v42 = vld [vmem:[#allocation2 + $0xf0] sm:$0xff]  ;;  %v5806_v61 = vld [vmem:[#allocation2 + $0xf8] sm:$0xff] }
 0x305   : > { %8119 = vmatmul.mubr.bf16.gmra.mxu0 %v11964_v44  ;;  %5772 = vst [vmem:[#allocation3 + $0x230] sm:$0xf] %v10422_v62  ;;  %5963 = vst [vmem:[#allocation3 + $0x210] sm:$0xf] %v10453_v25  ;;  %v5997_v7 = vld [vmem:[#allocation2 + $0xf1] sm:$0xff]  ;;  %v10455_v33 = vpack.c.bf16 %v5805_v42, %v5805_v42  ;;  %v10456_v10 = vpack.c.bf16 %v5806_v61, %v5806_v61  ;;  %v5998_v28 = vld [vmem:[#allocation2 + $0xf9] sm:$0xff] }
 0x306   : > { %8126 = vmatprep.mubr.bf16.mxu0 %v11972_v56  ;;  %5964 = vst [vmem:[#allocation3 + $0x234] sm:$0xf] %v10454_v53  ;;  %6155 = vst [vmem:[#allocation3 + $0x214] sm:$0xf] %v10485_v24  ;;  %v11970_v45 = vld [vmem:[#allocation3 + $0x368] ss:$36 sps:$4 sm:$0xff]   ;;  %v10487_v54 = vpack.c.bf16 %v5997_v7, %v5997_v7  ;;  %v10488_v31 = vpack.c.bf16 %v5998_v28, %v5998_v28 }
 0x307   : > { %5581 = vst [vmem:[#allocation3 + $0x250] sm:$0xf] %v10485_v24  ;;  %6156 = vst [vmem:[#allocation3 + $0x238] sm:$0xf] %v10486_v47  ;;  %v5615_v21 = vld [vmem:[#allocation2 + $0xf2] sm:$0xff]  ;;  %v5616_v59 = vld [vmem:[#allocation2 + $0xfa] sm:$0xff] }
 0x308   : > { %5582 = vst [vmem:[#allocation3 + $0x274] sm:$0xf] %v10486_v47  ;;  %5773 = vst [vmem:[#allocation3 + $0x254] sm:$0xf] %v10423_v40  ;;  %v11982_v15 = vld [vmem:[#allocation3 + $0x3b4] ss:$36 sps:$4 sm:$0xff]   ;;  %v10425_v57 = vpack.c.bf16 %v5615_v21, %v5615_v21  ;;  %v10426_v44 = vpack.c.bf16 %v5616_v59, %v5616_v59 }
 0x309   : > { %5774 = vst [vmem:[#allocation3 + $0x278] sm:$0xf] %v10424_v36  ;;  %5965 = vst [vmem:[#allocation3 + $0x258] sm:$0xf] %v10455_v33  ;;  %v11977_v3 = vld [vmem:[#allocation3 + $0x3a8] ss:$36 sps:$4 sm:$0xff]  }
 0x30a   : > { %5966 = vst [vmem:[#allocation3 + $0x27c] sm:$0xf] %v10456_v10  ;;  %6157 = vst [vmem:[#allocation3 + $0x25c] sm:$0xf] %v10487_v54  ;;  %v11985_v20 = vld [vmem:[#allocation3 + $0x3f4] ss:$36 sps:$4 sm:$0xff]  }
 0x30b   : > { %7966 = vmatmul.mubr.bf16.gmra.mxu1 %v11967_v49  ;;  %5583 = vst [vmem:[#allocation3 + $0x298] sm:$0xf] %v10487_v54  ;;  %6158 = vst [vmem:[#allocation3 + $0x280] sm:$0xf] %v10488_v31  ;;  %v11980_v50 = vld [vmem:[#allocation3 + $0x3b0] ss:$36 sps:$4 sm:$0xff]  }
 0x30c   : > { %7973 = vmatprep.mubr.bf16.mxu1 %v11979_v12  ;;  %5584 = vst [vmem:[#allocation3 + $0x2bc] sm:$0xf] %v10488_v31  ;;  %5775 = vst [vmem:[#allocation3 + $0x29c] sm:$0xf] %v10425_v57  ;;  %v11988_v32 = vld [vmem:[#allocation3 + $0x3fc] ss:$36 sps:$4 sm:$0xff]  }
 0x30d   : > { %8127 = vmatmul.mubr.bf16.gmra.mxu0 %v11970_v45  ;;  %6349 = vst [vmem:[#allocation3 + $0x260] sm:$0xf] %v10425_v57  ;;  %v11983_v13 = vld [vmem:[#allocation3 + $0x3f0] ss:$36 sps:$4 sm:$0xff]   ;;  %v5807_v9 = vld [vmem:[#allocation2 + $0x108] sm:$0xff]  ;;  %v5808_v56 = vld [vmem:[#allocation2 + $0x110] sm:$0xff] }
 0x30e   : > { %8134 = vmatprep.mubr.bf16.mxu0 %v11982_v15  ;;  %v11996_v19 = vld [vmem:[#allocation3 + $0x43c] ss:$36 sps:$4 sm:$0xff]   ;;  %v10457_v18 = vpack.c.bf16 %v5807_v9, %v5807_v9  ;;  %v10458_v23 = vpack.c.bf16 %v5808_v56, %v5808_v56  ;;  %5776 = vst [vmem:[#allocation3 + $0x2c0] sm:$0xf] %v10426_v44  ;;  %v5809_v16 = vld [vmem:[#allocation2 + $0x120] sm:$0xff]  ;;  %v5811_v26 = vld [vmem:[#allocation2 + $0x138] sm:$0xff] }
 0x30f   : > { %v5999_v43 = vld [vmem:[#allocation2 + $0x109] sm:$0xff]  ;;  %v6000_v6 = vld [vmem:[#allocation2 + $0x111] sm:$0xff]  ;;  %6350 = vst [vmem:[#allocation3 + $0x284] sm:$0xf] %v10426_v44  ;;  %v10459_v30 = vpack.c.bf16 %v5809_v16, %v5809_v16  ;;  %v6001_v5 = vld [vmem:[#allocation2 + $0x121] sm:$0xff]  ;;  %v10461_v62 = vpack.c.bf16 %v5811_v26, %v5811_v26 }
 0x310   : > { %v5617_v55 = vld [vmem:[#allocation2 + $0x10a] sm:$0xff]  ;;  %v10489_v27 = vpack.c.bf16 %v5999_v43, %v5999_v43  ;;  %v10490_v41 = vpack.c.bf16 %v6000_v6, %v6000_v6  ;;  %v5618_v38 = vld [vmem:[#allocation2 + $0x112] sm:$0xff]  ;;  %5967 = vst [vmem:[#allocation3 + $0x2a0] sm:$0xf] %v10457_v18  ;;  %5968 = vst [vmem:[#allocation3 + $0x2c4] sm:$0xf] %v10458_v23  ;;  %v10491_v1 = vpack.c.bf16 %v6001_v5, %v6001_v5 }
 0x311   : > { %v11986_v46 = vld [vmem:[#allocation3 + $0x3f8] ss:$36 sps:$4 sm:$0xff]   ;;  %v10427_v34 = vpack.c.bf16 %v5617_v55, %v5617_v55  ;;  %v11999_v2 = vld [vmem:[#allocation3 + $0x444] ss:$36 sps:$4 sm:$0xff]   ;;  %v10428_v0 = vpack.c.bf16 %v5618_v38, %v5618_v38  ;;  %5969 = vst [vmem:[#allocation3 + $0x2e8] sm:$0xf] %v10459_v30 }
 0x312   : > { %v5810_v11 = vld [vmem:[#allocation2 + $0x128] sm:$0xff]  ;;  %6159 = vst [vmem:[#allocation3 + $0x2a4] sm:$0xf] %v10489_v27  ;;  %6160 = vst [vmem:[#allocation3 + $0x2c8] sm:$0xf] %v10490_v41  ;;  %v5812_v29 = vld [vmem:[#allocation2 + $0x140] sm:$0xff] }
 0x313   : > { %7974 = vmatmul.mubr.bf16.gmra.mxu1 %v11977_v3  ;;  %v10460_v58 = vpack.c.bf16 %v5810_v11, %v5810_v11  ;;  %v6002_v51 = vld [vmem:[#allocation2 + $0x129] sm:$0xff]  ;;  %5585 = vst [vmem:[#allocation3 + $0x2e0] sm:$0xf] %v10489_v27  ;;  %5586 = vst [vmem:[#allocation3 + $0x304] sm:$0xf] %v10490_v41  ;;  %v6003_v17 = vld [vmem:[#allocation2 + $0x139] sm:$0xff]  ;;  %v10462_v35 = vpack.c.bf16 %v5812_v29, %v5812_v29 }
 0x314   : > { %7981 = vmatprep.mubr.bf16.mxu1 %v11985_v20  ;;  %5777 = vst [vmem:[#allocation3 + $0x2e4] sm:$0xf] %v10427_v34  ;;  %v10492_v63 = vpack.c.bf16 %v6002_v51, %v6002_v51  ;;  %v5619_v52 = vld [vmem:[#allocation2 + $0x122] sm:$0xff]  ;;  %v5620_v60 = vld [vmem:[#allocation2 + $0x12a] sm:$0xff]  ;;  %6351 = vst [vmem:[#allocation3 + $0x2a8] sm:$0xf] %v10427_v34  ;;  %v10493_v25 = vpack.c.bf16 %v6003_v17, %v6003_v17 }
 0x315   : > { %8135 = vmatmul.mubr.bf16.gmra.mxu0 %v11980_v50  ;;  %5778 = vst [vmem:[#allocation3 + $0x308] sm:$0xf] %v10428_v0  ;;  %5970 = vst [vmem:[#allocation3 + $0x30c] sm:$0xf] %v10460_v58  ;;  %v10429_v4 = vpack.c.bf16 %v5619_v52, %v5619_v52  ;;  %v10430_v39 = vpack.c.bf16 %v5620_v60, %v5620_v60  ;;  %v6004_v48 = vld [vmem:[#allocation2 + $0x141] sm:$0xff]  ;;  %v5813_v8 = vld [vmem:[#allocation2 + $0x150] sm:$0xff] }
 0x316   : > { %8142 = vmatprep.mubr.bf16.mxu0 %v11988_v32  ;;  %6352 = vst [vmem:[#allocation3 + $0x2cc] sm:$0xf] %v10428_v0  ;;  %6161 = vst [vmem:[#allocation3 + $0x2ec] sm:$0xf] %v10491_v1  ;;  %v10494_v53 = vpack.c.bf16 %v6004_v48, %v6004_v48  ;;  %v5621_v14 = vld [vmem:[#allocation2 + $0x13a] sm:$0xff]  ;;  %v5622_v24 = vld [vmem:[#allocation2 + $0x142] sm:$0xff]  ;;  %v10463_v47 = vpack.c.bf16 %v5813_v8, %v5813_v8 }
 0x317   : > { %6162 = vst [vmem:[#allocation3 + $0x310] sm:$0xf] %v10492_v63  ;;  %5587 = vst [vmem:[#allocation3 + $0x328] sm:$0xf] %v10491_v1  ;;  %v10431_v22 = vpack.c.bf16 %v5621_v14, %v5621_v14  ;;  %v10432_v49 = vpack.c.bf16 %v5622_v24, %v5622_v24  ;;  %v5814_v12 = vld [vmem:[#allocation2 + $0x158] sm:$0xff]  ;;  %v5815_v21 = vld [vmem:[#allocation2 + $0x168] sm:$0xff] }
 0x318   : > { %5588 = vst [vmem:[#allocation3 + $0x34c] sm:$0xf] %v10492_v63  ;;  %5779 = vst [vmem:[#allocation3 + $0x32c] sm:$0xf] %v10429_v4  ;;  %v6005_v40 = vld [vmem:[#allocation2 + $0x151] sm:$0xff]  ;;  %v6006_v36 = vld [vmem:[#allocation2 + $0x159] sm:$0xff]  ;;  %v10464_v42 = vpack.c.bf16 %v5814_v12, %v5814_v12  ;;  %v10465_v3 = vpack.c.bf16 %v5815_v21, %v5815_v21 }
 0x319   : > { %5780 = vst [vmem:[#allocation3 + $0x350] sm:$0xf] %v10430_v39  ;;  %5971 = vst [vmem:[#allocation3 + $0x330] sm:$0xf] %v10461_v62  ;;  %v10495_v61 = vpack.c.bf16 %v6005_v40, %v6005_v40  ;;  %v10496_v7 = vpack.c.bf16 %v6006_v36, %v6006_v36  ;;  %v5623_v45 = vld [vmem:[#allocation2 + $0x152] sm:$0xff]  ;;  %v5624_v33 = vld [vmem:[#allocation2 + $0x15a] sm:$0xff] }
 0x31a   : > { %6353 = vst [vmem:[#allocation3 + $0x2f0] sm:$0xf] %v10429_v4  ;;  %6354 = vst [vmem:[#allocation3 + $0x314] sm:$0xf] %v10430_v39  ;;  %v11994_v10 = vld [vmem:[#allocation3 + $0x438] ss:$36 sps:$4 sm:$0xff]   ;;  %v10433_v28 = vpack.c.bf16 %v5623_v45, %v5623_v45  ;;  %v10434_v54 = vpack.c.bf16 %v5624_v33, %v5624_v33 }
 0x31b   : > { %7982 = vmatmul.mubr.bf16.gmra.mxu1 %v11983_v13  ;;  %5972 = vst [vmem:[#allocation3 + $0x354] sm:$0xf] %v10462_v35  ;;  %6163 = vst [vmem:[#allocation3 + $0x334] sm:$0xf] %v10493_v25  ;;  %v5816_v15 = vld [vmem:[#allocation2 + $0x170] sm:$0xff]  ;;  %v13521_v18 = vld [vmem:[%s14214_s2 + $0x228] sm:$0xff]  }
 0x31c   : > { %7989 = vmatprep.mubr.bf16.mxu1 %v11996_v19  ;;  %6164 = vst [vmem:[#allocation3 + $0x358] sm:$0xf] %v10494_v53  ;;  %5589 = vst [vmem:[#allocation3 + $0x370] sm:$0xf] %v10493_v25  ;;  %v6007_v31 = vld [vmem:[#allocation2 + $0x169] sm:$0xff]  ;;  %v10466_v20 = vpack.c.bf16 %v5816_v15, %v5816_v15  ;;  %v6008_v23 = vld [vmem:[#allocation2 + $0x171] sm:$0xff] }
 0x31d   : > { %8143 = vmatmul.mubr.bf16.gmra.mxu0 %v11986_v46  ;;  %5590 = vst [vmem:[#allocation3 + $0x394] sm:$0xf] %v10494_v53  ;;  %5781 = vst [vmem:[#allocation3 + $0x374] sm:$0xf] %v10431_v22  ;;  %v12006_v57 = vld [vmem:[#allocation3 + $0x14] ss:$36 sps:$4 sm:$0xff]   ;;  %v10497_v50 = vpack.c.bf16 %v6007_v31, %v6007_v31  ;;  %v10498_v43 = vpack.c.bf16 %v6008_v23, %v6008_v23 }
 0x31e   : > { %8150 = vmatprep.mubr.bf16.mxu0 %v11999_v2  ;;  %5782 = vst [vmem:[#allocation3 + $0x398] sm:$0xf] %v10432_v49  ;;  %5973 = vst [vmem:[#allocation3 + $0x378] sm:$0xf] %v10463_v47  ;;  %v11997_v32 = vld [vmem:[#allocation3 + $0x440] ss:$36 sps:$4 sm:$0xff]  }
 0x31f   : > { %6355 = vst [vmem:[#allocation3 + $0x338] sm:$0xf] %v10431_v22  ;;  %6356 = vst [vmem:[#allocation3 + $0x35c] sm:$0xf] %v10432_v49  ;;  %v12010_v59 = vld [vmem:[#allocation3 + $0x1c] ss:$36 sps:$4 sm:$0xff]  }
 0x320   : > { %5974 = vst [vmem:[#allocation3 + $0x39c] sm:$0xf] %v10464_v42  ;;  %6165 = vst [vmem:[#allocation3 + $0x37c] sm:$0xf] %v10495_v61  ;;  %v12004_v13 = vld [vmem:[#allocation3 + $0x10] ss:$36 sps:$4 sm:$0xff]  }
 0x321   : > { %6166 = vst [vmem:[#allocation3 + $0x3a0] sm:$0xf] %v10496_v7  ;;  %5591 = vst [vmem:[#allocation3 + $0x3b8] sm:$0xf] %v10495_v61  ;;  %v12026_v44 = vld [vmem:[%s14214_s2 + $0x230] sm:$0xff]   ;;  %v5817_v41 = vld [vmem:[#allocation2 + $0x180] sm:$0xff] }
 0x322   : > { %5592 = vst [vmem:[#allocation3 + $0x3dc] sm:$0xf] %v10496_v7  ;;  %5783 = vst [vmem:[#allocation3 + $0x3bc] sm:$0xf] %v10433_v28  ;;  %v12016_v9 = vld [vmem:[#allocation3 + $0x5c] ss:$36 sps:$4 sm:$0xff]   ;;  %v10467_v11 = vpack.c.bf16 %v5817_v41, %v5817_v41 }
 0x323   : > { %5784 = vst [vmem:[#allocation3 + $0x3e0] sm:$0xf] %v10434_v54  ;;  %6357 = vst [vmem:[#allocation3 + $0x380] sm:$0xf] %v10433_v28  ;;  %7990 = vmatmul.mubr.bf16.gmra.mxu1 %v11994_v10  ;;  %v12008_v56 = vld [vmem:[#allocation3 + $0x18] ss:$36 sps:$4 sm:$0xff]  }
 0x324   : > { %6358 = vst [vmem:[#allocation3 + $0x3a4] sm:$0xf] %v10434_v54  ;;  %8191 = vmatprep.mubr.bf16.mxu1 %v12006_v57  ;;  %5975 = vst [vmem:[#allocation3 + $0x3c0] sm:$0xf] %v10465_v3  ;;  %v12019_v19 = vld [vmem:[#allocation3 + $0x64] ss:$36 sps:$4 sm:$0xff]  }
 0x325   : > { %5976 = vst [vmem:[#allocation3 + $0x3e4] sm:$0xf] %v10466_v20  ;;  %6167 = vst [vmem:[#allocation3 + $0x3c4] sm:$0xf] %v10497_v50  ;;  %8151 = vmatmul.mubr.bf16.gmra.mxu0 %v11997_v32  ;;  %v5625_v6 = vld [vmem:[#allocation2 + $0x16a] sm:$0xff]  ;;  %v5626_v55 = vld [vmem:[#allocation2 + $0x172] sm:$0xff] }
 0x326   : > { %5593 = vst [vmem:[#allocation3 + $0x400] sm:$0xf] %v10497_v50  ;;  %8352 = vmatprep.mubr.bf16.mxu0 %v12010_v59  ;;  %v10435_v46 = vpack.c.bf16 %v5625_v6, %v5625_v6  ;;  %v10436_v27 = vpack.c.bf16 %v5626_v55, %v5626_v55  ;;  %v5818_v38 = vld [vmem:[#allocation2 + $0x188] sm:$0xff]  ;;  %v13526_v16 = vld [vmem:[%s14214_s2 + $0x220] sm:$0xff]   ;;  %6168 = vst [vmem:[#allocation3 + $0x3e8] sm:$0xf] %v10498_v43 }
 0x327   : > { %v6009_v34 = vld [vmem:[#allocation2 + $0x181] sm:$0xff]  ;;  %5594 = vst [vmem:[#allocation3 + $0x424] sm:$0xf] %v10498_v43  ;;  %v10468_v2 = vpack.c.bf16 %v5818_v38, %v5818_v38  ;;  %v6010_v0 = vld [vmem:[#allocation2 + $0x189] sm:$0xff]  ;;  %v12022_v5 = vld [vmem:[#allocation3 + $0xa4] ss:$36 sps:$4 sm:$0xff]  }
 0x328   : > { %v10499_v30 = vpack.c.bf16 %v6009_v34, %v6009_v34  ;;  %v4617_v58 = vld [vmem:[#allocation2 + $0x18f] sm:$0x1]  ;;  %5785 = vst [vmem:[#allocation3 + $0x404] sm:$0xf] %v10435_v46  ;;  %5786 = vst [vmem:[#allocation3 + $0x428] sm:$0xf] %v10436_v27  ;;  %v10500_v51 = vpack.c.bf16 %v6010_v0, %v6010_v0 }
 0x329   : > { %4635 = vst [vmem:[#allocation2 + $0x191] sm:$0x1] %v4617_v58  ;;  %v5627_v1 = vld [vmem:[#allocation2 + $0x182] sm:$0xff]  ;;  %v5819_v63 = vld [vmem:[#allocation2 + $0x198] sm:$0xff]  ;;  %6359 = vst [vmem:[#allocation3 + $0x3c8] sm:$0xf] %v10435_v46 }
 0x32a   : > { %v5820_v52 = vld [vmem:[#allocation2 + $0x1a0] sm:$0xff]  ;;  %6360 = vst [vmem:[#allocation3 + $0x3ec] sm:$0xf] %v10436_v27  ;;  %v12017_v60 = vld [vmem:[#allocation3 + $0x60] ss:$36 sps:$4 sm:$0xff]   ;;  %v10437_v26 = vpack.c.bf16 %v5627_v1, %v5627_v1  ;;  %v10469_v4 = vpack.c.bf16 %v5819_v63, %v5819_v63  ;;  %v12065_v22 = vld [vmem:[%s14214_s2 + $0x218] sm:$0xff]  }
 0x32b   : > { %8192 = vmatmul.mubr.bf16.vlgmr.msra.gmra.mxu1 %v12004_v13  ;;  %5977 = vst [vmem:[#allocation3 + $0x408] sm:$0xf] %v10467_v11  ;;  %5978 = vst [vmem:[#allocation3 + $0x42c] sm:$0xf] %v10468_v2  ;;  %v10470_v39 = vpack.c.bf16 %v5820_v52, %v5820_v52  ;;  %v6011_v29 = vld [vmem:[#allocation2 + $0x199] sm:$0xff]  ;;  %v6012_v62 = vld [vmem:[#allocation2 + $0x1a1] sm:$0xff] }
 0x32c   : > { %11528 = vmatpush3.bf16.msra.mxu1 %v13511_v37  ;;  %8199 = vmatprep.mubr.bf16.mxu1 %v12016_v9  ;;  %v12014_v37 = vld [vmem:[#allocation3 + $0x58] ss:$36 sps:$4 sm:$0xff]   ;;  %6169 = vst [vmem:[#allocation3 + $0x40c] sm:$0xf] %v10499_v30  ;;  %5595 = vst [vmem:[#allocation3 + $0x448] sm:$0xf] %v10499_v30  ;;  %v10501_v35 = vpack.c.bf16 %v6011_v29, %v6011_v29  ;;  %v10502_v25 = vpack.c.bf16 %v6012_v62, %v6012_v62 }
 0x32d   : > { %8353 = vmatmul.mubr.bf16.vlgmr.msra.gmra.mxu0 %v12008_v56  ;;  %11529 = vmatprep.subr.bf16.mxu1 %v12026_v44  ;;  %v6173_v17 = vld [vmem:[#allocation2 + $0x32] sm:$0xff]  ;;  %v12025_v48 = vld [vmem:[#allocation3 + $0xac] ss:$36 sps:$4 sm:$0xff]   ;;  %6170 = vst [vmem:[#allocation3 + $0x430] sm:$0xf] %v10500_v51  ;;  %v6175_v24 = vld [vmem:[#allocation2 + $0x4a] sm:$0xff] }
 0x32e   : > { %8360 = vmatprep.mubr.bf16.mxu0 %v12019_v19  ;;  %5596 = vst [vmem:[#allocation3 + $0x46c] sm:$0xf] %v10500_v51  ;;  %v6174_v53 = vld [vmem:[#allocation2 + $0x3a] sm:$0xff]  ;;  %v10503_v14 = vpack.c.bf16 %v6173_v17, %v6173_v17  ;;  %v6176_v8 = vld [vmem:[#allocation2 + $0x52] sm:$0xff]  ;;  %5787 = vst [vmem:[#allocation3 + $0x44c] sm:$0xf] %v10437_v26  ;;  %v10505_v12 = vpack.c.bf16 %v6175_v24, %v6175_v24 }
 0x32f   : > { %5979 = vst [vmem:[#allocation3 + $0x450] sm:$0xf] %v10469_v4  ;;  %5980 = vst [vmem:[#allocation3 + $0x474] sm:$0xf] %v10470_v39  ;;  %v10504_v49 = vpack.c.bf16 %v6174_v53, %v6174_v53  ;;  %v10506_v47 = vpack.c.bf16 %v6176_v8, %v6176_v8  ;;  %v6177_v40 = vld [vmem:[#allocation2 + $0x62] sm:$0xff]  ;;  %v6178_v36 = vld [vmem:[#allocation2 + $0x6a] sm:$0xff] }
 0x330   : > { %11530 = vmatpush3.bf16.msra.mxu1 %v12026_v44  ;;  %v6179_v42 = vld [vmem:[#allocation2 + $0x7a] sm:$0xff]  ;;  %6361 = vst [vmem:[#allocation3 + $0x410] sm:$0xf] %v10437_v26  ;;  %6171 = vst [vmem:[#allocation3 + $0x454] sm:$0xf] %v10501_v35  ;;  %v10507_v61 = vpack.c.bf16 %v6177_v40, %v6177_v40  ;;  %v10508_v7 = vpack.c.bf16 %v6178_v36, %v6178_v36  ;;  %v6180_v45 = vld [vmem:[#allocation2 + $0x82] sm:$0xff] }
 0x331   : > { %11531 = vmatprep.subr.bf16.mxu1 %v13521_v18  ;;  %6172 = vst [vmem:[#allocation3 + $0x478] sm:$0xf] %v10502_v25  ;;  %6333 = vst [vmem:[#allocation3 + $0x20] sm:$0xf] %v10503_v14  ;;  %v10509_v33 = vpack.c.bf16 %v6179_v42, %v6179_v42  ;;  %v6181_v10 = vld [vmem:[#allocation2 + $0x92] sm:$0xff]  ;;  %v6182_v28 = vld [vmem:[#allocation2 + $0x9a] sm:$0xff]  ;;  %v10510_v54 = vpack.c.bf16 %v6180_v45, %v6180_v45 }
 0x332   : > { %6334 = vst [vmem:[#allocation3 + $0x44] sm:$0xf] %v10504_v49  ;;  %6335 = vst [vmem:[#allocation3 + $0x68] sm:$0xf] %v10505_v12  ;;  %v10511_v21 = vpack.c.bf16 %v6181_v10, %v6181_v10  ;;  %v10512_v15 = vpack.c.bf16 %v6182_v28, %v6182_v28  ;;  %v6183_v31 = vld [vmem:[#allocation2 + $0xaa] sm:$0xff]  ;;  %v6184_v57 = vld [vmem:[#allocation2 + $0xb2] sm:$0xff] }
 0x333   : > { %8200 = vmatmul.mubr.bf16.gmra.mxu1 %v12014_v37  ;;  %6336 = vst [vmem:[#allocation3 + $0x8c] sm:$0xf] %v10506_v47  ;;  %v6185_v3 = vld [vmem:[#allocation2 + $0xc2] sm:$0xff]  ;;  %6337 = vst [vmem:[#allocation3 + $0xb0] sm:$0xf] %v10507_v61  ;;  %v10513_v20 = vpack.c.bf16 %v6183_v31, %v6183_v31  ;;  %v10514_v50 = vpack.c.bf16 %v6184_v57, %v6184_v57  ;;  %v5628_v13 = vld [vmem:[#allocation2 + $0x18a] sm:$0xff] }
 0x334   : > { %8207 = vmatprep.mubr.bf16.mxu1 %v12022_v5  ;;  %11532 = vmatpush3.bf16.msra.mxu1 %v13521_v18  ;;  %6338 = vst [vmem:[#allocation3 + $0xd4] sm:$0xf] %v10508_v7  ;;  %6339 = vst [vmem:[#allocation3 + $0xf8] sm:$0xf] %v10509_v33  ;;  %v10515_v32 = vpack.c.bf16 %v6185_v3, %v6185_v3  ;;  %v12020_v59 = vld [vmem:[#allocation3 + $0xa0] ss:$36 sps:$4 sm:$0xff]   ;;  %v10438_v56 = vpack.c.bf16 %v5628_v13, %v5628_v13 }
 0x335   : > { %8361 = vmatmul.mubr.bf16.gmra.mxu0 %v12017_v60  ;;  %11533 = vmatprep.subr.bf16.mxu1 %v13526_v16  ;;  %6340 = vst [vmem:[#allocation3 + $0x11c] sm:$0xf] %v10510_v54  ;;  %6341 = vst [vmem:[#allocation3 + $0x140] sm:$0xf] %v10511_v21  ;;  %v12029_v44 = vld [vmem:[#allocation3 + $0xec] ss:$36 sps:$4 sm:$0xff]  }
 0x336   : > { %8368 = vmatprep.mubr.bf16.mxu0 %v12025_v48  ;;  %6342 = vst [vmem:[#allocation3 + $0x164] sm:$0xf] %v10512_v15  ;;  %6343 = vst [vmem:[#allocation3 + $0x188] sm:$0xf] %v10513_v20  ;;  %v12078_v9 = vld [vmem:[%s14214_s2 + $0x210] sm:$0xff]   ;;  %v6187_v18 = vld [vmem:[#allocation2 + $0xda] sm:$0xff] }
 0x337   : > { %6344 = vst [vmem:[#allocation3 + $0x1ac] sm:$0xf] %v10514_v50  ;;  %6345 = vst [vmem:[#allocation3 + $0x1d0] sm:$0xf] %v10515_v32  ;;  %v6186_v19 = vld [vmem:[#allocation2 + $0xca] sm:$0xff]  ;;  %v10517_v6 = vpack.c.bf16 %v6187_v18, %v6187_v18  ;;  %v12104_v41 = vld [vmem:[%s14214_s2 + $0x200] sm:$0xff]  }
 0x338   : > { %11534 = vmatpush3.bf16.msra.mxu1 %v13526_v16  ;;  %v12023_v23 = vld [vmem:[#allocation3 + $0xa8] ss:$36 sps:$4 sm:$0xff]   ;;  %5788 = vst [vmem:[#allocation3 + $0x470] sm:$0xf] %v10438_v56  ;;  %v10516_v43 = vpack.c.bf16 %v6186_v19, %v6186_v19  ;;  %6362 = vst [vmem:[#allocation3 + $0x434] sm:$0xf] %v10438_v56 }
 0x339   : > { %11535 = vmatprep.subr.bf16.mxu1 %v12065_v22  ;;  %v12032_v55 = vld [vmem:[#allocation3 + $0xf4] ss:$36 sps:$4 sm:$0xff]   ;;  %6347 = vst [vmem:[#allocation3 + $0x218] sm:$0xf] %v10517_v6  ;;  %v12027_v27 = vld [vmem:[#allocation3 + $0xe8] ss:$36 sps:$4 sm:$0xff]  }
 0x33a   : > { %v12091_v46 = vld [vmem:[%s14214_s2 + $0x208] sm:$0xff]   ;;  %6346 = vst [vmem:[#allocation3 + $0x1f4] sm:$0xf] %v10516_v43  ;;  %v12030_v34 = vld [vmem:[#allocation3 + $0xf0] ss:$36 sps:$4 sm:$0xff]  }
 0x33b   : > { %8208 = vmatmul.mubr.bf16.gmra.mxu1 %v12020_v59  ;;  %v12035_v38 = vld [vmem:[#allocation3 + $0x134] ss:$36 sps:$4 sm:$0xff]   ;;  %v12038_v16 = vld [vmem:[#allocation3 + $0x13c] ss:$36 sps:$4 sm:$0xff]   ;;  %v12045_v58 = vld [vmem:[#allocation3 + $0x184] ss:$36 sps:$4 sm:$0xff]  }
 0x33c   : > { %8215 = vmatprep.mubr.bf16.mxu1 %v12029_v44  ;;  %11536 = vmatpush3.bf16.msra.mxu1 %v12065_v22  ;;  %v6188_v37 = vld [vmem:[#allocation2 + $0xe2] sm:$0xff]  ;;  %v12042_v0 = vld [vmem:[#allocation3 + $0x17c] ss:$36 sps:$4 sm:$0xff]   ;;  %v6203_v5 = vld [vmem:[#allocation2 + $0x19a] sm:$0xff] }
 0x33d   : > { %8369 = vmatmul.mubr.bf16.gmra.mxu0 %v12023_v23  ;;  %11537 = vmatprep.subr.bf16.mxu1 %v12078_v9  ;;  %v10518_v11 = vpack.c.bf16 %v6188_v37, %v6188_v37  ;;  %v12033_v2 = vld [vmem:[#allocation3 + $0x130] ss:$36 sps:$4 sm:$0xff]   ;;  %v12036_v30 = vld [vmem:[#allocation3 + $0x138] ss:$36 sps:$4 sm:$0xff]   ;;  %v10533_v1 = vpack.c.bf16 %v6203_v5, %v6203_v5  ;;  %v12048_v60 = vld [vmem:[#allocation3 + $0x1c4] ss:$36 sps:$4 sm:$0xff]  }
 0x33e   : > { %8376 = vmatprep.mubr.bf16.mxu0 %v12032_v55  ;;  %v6204_v51 = vld [vmem:[#allocation2 + $0x1a2] sm:$0xff]  ;;  %v12043_v26 = vld [vmem:[#allocation3 + $0x180] ss:$36 sps:$4 sm:$0xff]   ;;  %v12049_v62 = vld [vmem:[#allocation3 + $0x1c8] ss:$36 sps:$4 sm:$0xff]  }
 0x33f   : > { %6348 = vst [vmem:[#allocation3 + $0x23c] sm:$0xf] %v10518_v11  ;;  %v10534_v63 = vpack.c.bf16 %v6204_v51, %v6204_v51  ;;  %6363 = vst [vmem:[#allocation3 + $0x458] sm:$0xf] %v10533_v1  ;;  %v12040_v52 = vld [vmem:[#allocation3 + $0x178] ss:$36 sps:$4 sm:$0xff]  }
 0x340   : > { %11538 = vmatpush3.bf16.msra.mxu1 %v12078_v9  ;;  %v12051_v4 = vld [vmem:[#allocation3 + $0x1cc] ss:$36 sps:$4 sm:$0xff]   ;;  %v12046_v39 = vld [vmem:[#allocation3 + $0x1c0] ss:$36 sps:$4 sm:$0xff]   ;;  %v12058_v17 = vld [vmem:[#allocation3 + $0x214] ss:$36 sps:$4 sm:$0xff]  }
 0x341   : > { %11539 = vmatprep.subr.bf16.mxu1 %v12091_v46  ;;  %6364 = vst [vmem:[#allocation3 + $0x47c] sm:$0xf] %v10534_v63  ;;  %v12055_v29 = vld [vmem:[#allocation3 + $0x20c] ss:$36 sps:$4 sm:$0xff]   ;;  %v12061_v35 = vld [vmem:[#allocation3 + $0x254] ss:$36 sps:$4 sm:$0xff]  }
 0x342   : > { %v12053_v48 = vld [vmem:[#allocation3 + $0x208] ss:$36 sps:$4 sm:$0xff]   ;;  %v12056_v25 = vld [vmem:[#allocation3 + $0x210] ss:$36 sps:$4 sm:$0xff]   ;;  %v12064_v53 = vld [vmem:[#allocation3 + $0x25c] ss:$36 sps:$4 sm:$0xff]  }
 0x343   : > { %8216 = vmatmul.mubr.bf16.gmra.mxu1 %v12027_v27  ;;  %v12059_v14 = vld [vmem:[#allocation3 + $0x250] ss:$36 sps:$4 sm:$0xff]   ;;  %v12068_v24 = vld [vmem:[#allocation3 + $0x29c] ss:$36 sps:$4 sm:$0xff]   ;;  %v12071_v49 = vld [vmem:[#allocation3 + $0x2a4] ss:$36 sps:$4 sm:$0xff]  }
 0x344   : > { %8223 = vmatprep.mubr.bf16.mxu1 %v12035_v38  ;;  %11540 = vmatpush3.bf16.msra.mxu1 %v12091_v46  ;;  %v12062_v8 = vld [vmem:[#allocation3 + $0x258] ss:$36 sps:$4 sm:$0xff]   ;;  %v12074_v54 = vld [vmem:[#allocation3 + $0x2e4] ss:$36 sps:$4 sm:$0xff]   ;;  %v12077_v3 = vld [vmem:[#allocation3 + $0x2ec] ss:$36 sps:$4 sm:$0xff]  }
 0x345   : > { %8377 = vmatmul.mubr.bf16.gmra.mxu0 %v12030_v34  ;;  %11541 = vmatprep.subr.bf16.mxu1 %v12104_v41  ;;  %v12066_v7 = vld [vmem:[#allocation3 + $0x298] ss:$36 sps:$4 sm:$0xff]   ;;  %v12069_v21 = vld [vmem:[#allocation3 + $0x2a0] ss:$36 sps:$4 sm:$0xff]   ;;  %v12081_v6 = vld [vmem:[#allocation3 + $0x32c] ss:$36 sps:$4 sm:$0xff]  }
 0x346   : > { %8384 = vmatprep.mubr.bf16.mxu0 %v12038_v16  ;;  %v12072_v56 = vld [vmem:[#allocation3 + $0x2e0] ss:$36 sps:$4 sm:$0xff]   ;;  %v12075_v55 = vld [vmem:[#allocation3 + $0x2e8] ss:$36 sps:$4 sm:$0xff]   ;;  %v12084_v38 = vld [vmem:[#allocation3 + $0x334] ss:$36 sps:$4 sm:$0xff]  }
 0x348   : > { %11542 = vmatpush3.bf16.msra.mxu1 %v12104_v41 }
 0x34b   : > { %8224 = vmatmul.mubr.bf16.gmra.mxu1 %v12033_v2 }
 0x34c   : > { %8231 = vmatprep.mubr.bf16.mxu1 %v12042_v0 }
 0x34d   : > { %8385 = vmatmul.mubr.bf16.gmra.mxu0 %v12036_v30 }
 0x34e   : > { %8392 = vmatprep.mubr.bf16.mxu0 %v12045_v58  ;;  %v12079_v58 = vld [vmem:[#allocation3 + $0x328] ss:$36 sps:$4 sm:$0xff]  }
 0x353   : > { %8232 = vmatmul.mubr.bf16.gmra.mxu1 %v12040_v52  ;;  %v12087_v52 = vld [vmem:[#allocation3 + $0x374] ss:$36 sps:$4 sm:$0xff]  }
 0x354   : > { %8239 = vmatprep.mubr.bf16.mxu1 %v12048_v60  ;;  %v12082_v60 = vld [vmem:[#allocation3 + $0x330] ss:$36 sps:$4 sm:$0xff]  }
 0x355   : > { %8393 = vmatmul.mubr.bf16.gmra.mxu0 %v12043_v26 }
 0x356   : > { %8400 = vmatprep.mubr.bf16.mxu0 %v12051_v4 }
 0x35b   : > { %8240 = vmatmul.mubr.bf16.gmra.mxu1 %v12046_v39 }
 0x35c   : > { %8247 = vmatprep.mubr.bf16.mxu1 %v12055_v29  ;;  %v12090_v29 = vld [vmem:[#allocation3 + $0x37c] ss:$36 sps:$4 sm:$0xff]  }
 0x35d   : > { %8401 = vmatmul.mubr.bf16.gmra.mxu0 %v12049_v62 }
 0x35e   : > { %8408 = vmatprep.mubr.bf16.mxu0 %v12058_v17 }
 0x363   : > { %8248 = vmatmul.mubr.bf16.gmra.mxu1 %v12053_v48 }
 0x364   : > { %8255 = vmatprep.mubr.bf16.mxu1 %v12061_v35 }
 0x365   : > { %8409 = vmatmul.mubr.bf16.gmra.mxu0 %v12056_v25 }
 0x366   : > { %8416 = vmatprep.mubr.bf16.mxu0 %v12064_v53  ;;  %v11023_v22 = vpop.f32.mrf.mxu1 }
 0x368   : > { %v11135_v12 = vpop.f32.mrf.mxu0  ;;  %v11024_v47 = vpop.f32.mrf.mxu1 }
 0x369   : > { %v11025_v40 = vadd.f32 %v11024_v47, %v11023_v22  ;;  %v12094_v47 = vld [vmem:[#allocation3 + $0x3bc] ss:$36 sps:$4 sm:$0xff]  }
 0x36a   : > { %v11136_v36 = vpop.f32.mrf.mxu0  ;;  %v11026_v42 = vpop.f32.mrf.mxu1 }
 0x36b   : > { %8256 = vmatmul.mubr.bf16.gmra.mxu1 %v12059_v14  ;;  %v11137_v61 = vadd.f32 %v11136_v36, %v11135_v12 }
 0x36c   : > { %8263 = vmatprep.mubr.bf16.mxu1 %v12068_v24  ;;  %v11138_v45 = vpop.f32.mrf.mxu0  ;;  %v11027_v33 = vpop.f32.mrf.mxu1  ;;  %v12085_v24 = vld [vmem:[#allocation3 + $0x370] ss:$36 sps:$4 sm:$0xff]  }
 0x36d   : > { %8417 = vmatmul.mubr.bf16.gmra.mxu0 %v12062_v8  ;;  %v13544_v10 = vadd.f32 %v11137_v61, %v11025_v40  ;;  %v11028_v28 = vadd.f32 %v11027_v33, %v11026_v42  ;;  %v12088_v40 = vld [vmem:[#allocation3 + $0x378] ss:$36 sps:$4 sm:$0xff]  }
 0x36e   : > { %8424 = vmatprep.mubr.bf16.mxu0 %v12071_v49  ;;  %v11139_v15 = vpop.f32.mrf.mxu0  ;;  %v11029_v31 = vpop.f32.mrf.mxu1 }
 0x36f   : > { %v11140_v57 = vadd.f32 %v11139_v15, %v11138_v45 }
 0x370   : > { %v11141_v20 = vpop.f32.mrf.mxu0  ;;  %v11030_v50 = vpop.f32.mrf.mxu1 }
 0x371   : > { %v13546_v32 = vadd.f32 %v11140_v57, %v11028_v28  ;;  %v11031_v59 = vadd.f32 %v11030_v50, %v11029_v31  ;;  %v12092_v57 = vld [vmem:[#allocation3 + $0x3b8] ss:$36 sps:$4 sm:$0xff]  }
 0x372   : > { %v11142_v13 = vpop.f32.mrf.mxu0  ;;  %v11032_v44 = vpop.f32.mrf.mxu1 }
 0x373   : > { %8264 = vmatmul.mubr.bf16.gmra.mxu1 %v12066_v7  ;;  %v11143_v9 = vadd.f32 %v11142_v13, %v11141_v20  ;;  %v12097_v7 = vld [vmem:[#allocation3 + $0x3c4] ss:$36 sps:$4 sm:$0xff]  }
 0x374   : > { %8271 = vmatprep.mubr.bf16.mxu1 %v12074_v54  ;;  %v11144_v19 = vpop.f32.mrf.mxu0  ;;  %v11033_v18 = vpop.f32.mrf.mxu1  ;;  %v12100_v13 = vld [vmem:[#allocation3 + $0x404] ss:$36 sps:$4 sm:$0xff]  }
 0x375   : > { %8425 = vmatmul.mubr.bf16.gmra.mxu0 %v12069_v21  ;;  %v13548_v23 = vadd.f32 %v11143_v9, %v11031_v59  ;;  %v11034_v43 = vadd.f32 %v11033_v18, %v11032_v44  ;;  %v12095_v44 = vld [vmem:[#allocation3 + $0x3c0] ss:$36 sps:$4 sm:$0xff]   ;;  %v12103_v18 = vld [vmem:[#allocation3 + $0x40c] ss:$36 sps:$4 sm:$0xff]  }
 0x376   : > { %8432 = vmatprep.mubr.bf16.mxu0 %v12077_v3  ;;  %v11145_v46 = vpop.f32.mrf.mxu0  ;;  %v11035_v27 = vpop.f32.mrf.mxu1 }
 0x377   : > { %v11146_v41 = vadd.f32 %v11145_v46, %v11144_v19 }
 0x378   : > { %v11147_v34 = vpop.f32.mrf.mxu0  ;;  %v11036_v37 = vpop.f32.mrf.mxu1 }
 0x379   : > { %v13550_v16 = vadd.f32 %v11146_v41, %v11034_v43  ;;  %v11037_v11 = vadd.f32 %v11036_v37, %v11035_v27 }
 0x37a   : > { %v11148_v2 = vpop.f32.mrf.mxu0  ;;  %v11038_v0 = vpop.f32.mrf.mxu1 }
 0x37b   : > { %8272 = vmatmul.mubr.bf16.gmra.mxu1 %v12072_v56  ;;  %v11149_v30 = vadd.f32 %v11148_v2, %v11147_v34  ;;  %v12098_v34 = vld [vmem:[#allocation3 + $0x400] ss:$36 sps:$4 sm:$0xff]  }
 0x37c   : > { %8279 = vmatprep.mubr.bf16.mxu1 %v12081_v6  ;;  %v11150_v5 = vpop.f32.mrf.mxu0  ;;  %v11039_v51 = vpop.f32.mrf.mxu1 }
 0x37d   : > { %8433 = vmatmul.mubr.bf16.gmra.mxu0 %v12075_v55  ;;  %v13552_v1 = vadd.f32 %v11149_v30, %v11037_v11  ;;  %v11040_v63 = vadd.f32 %v11039_v51, %v11038_v0  ;;  %v12107_v30 = vld [vmem:[#allocation3 + $0x44c] ss:$36 sps:$4 sm:$0xff]  }
 0x37e   : > { %8440 = vmatprep.mubr.bf16.mxu0 %v12084_v38  ;;  %v11151_v26 = vpop.f32.mrf.mxu0  ;;  %v11041_v4 = vpop.f32.mrf.mxu1 }
 0x37f   : > { %v11152_v39 = vadd.f32 %v11151_v26, %v11150_v5 }
 0x380   : > { %v11153_v62 = vpop.f32.mrf.mxu0  ;;  %v11042_v17 = vpop.f32.mrf.mxu1 }
 0x381   : > { %v13554_v48 = vadd.f32 %v11152_v39, %v11040_v63  ;;  %v11043_v35 = vadd.f32 %v11042_v17, %v11041_v4 }
 0x382   : > { %v11154_v25 = vpop.f32.mrf.mxu0  ;;  %v11044_v53 = vpop.f32.mrf.mxu1 }
 0x383   : > { %8280 = vmatmul.mubr.bf16.gmra.mxu1 %v12079_v58  ;;  %v11155_v14 = vadd.f32 %v11154_v25, %v11153_v62  ;;  %v12101_v58 = vld [vmem:[#allocation3 + $0x408] ss:$36 sps:$4 sm:$0xff]  }
 0x384   : > { %8287 = vmatprep.mubr.bf16.mxu1 %v12087_v52  ;;  %v11156_v8 = vpop.f32.mrf.mxu0  ;;  %v11045_v22 = vpop.f32.mrf.mxu1  ;;  %v12110_v52 = vld [vmem:[#allocation3 + $0x454] ss:$36 sps:$4 sm:$0xff]  }
 0x385   : > { %8441 = vmatmul.mubr.bf16.gmra.mxu0 %v12082_v60  ;;  %v13556_v49 = vadd.f32 %v11155_v14, %v11043_v35  ;;  %v11046_v12 = vadd.f32 %v11045_v22, %v11044_v53  ;;  %v12105_v35 = vld [vmem:[#allocation3 + $0x448] ss:$36 sps:$4 sm:$0xff]   ;;  %v12108_v22 = vld [vmem:[#allocation3 + $0x450] ss:$36 sps:$4 sm:$0xff]  }
 0x386   : > { %8448 = vmatprep.mubr.bf16.mxu0 %v12090_v29  ;;  %v11157_v36 = vpop.f32.mrf.mxu0  ;;  %v11047_v42 = vpop.f32.mrf.mxu1 }
 0x387   : > { %v11158_v61 = vadd.f32 %v11157_v36, %v11156_v8  ;;  %v12111_v8 = vld [vmem:[#allocation3 + $0x20] ss:$36 sps:$4 sm:$0xff]  }
 0x388   : > { %v11159_v45 = vpop.f32.mrf.mxu0  ;;  %v11048_v33 = vpop.f32.mrf.mxu1 }
 0x389   : > { %v13558_v28 = vadd.f32 %v11158_v61, %v11046_v12  ;;  %v11049_v54 = vadd.f32 %v11048_v33, %v11047_v42 }
 0x38a   : > { %v11160_v21 = vpop.f32.mrf.mxu0  ;;  %v11050_v15 = vpop.f32.mrf.mxu1 }
 0x38b   : > { %8288 = vmatmul.mubr.bf16.gmra.mxu1 %v12085_v24  ;;  %v11161_v31 = vadd.f32 %v11160_v21, %v11159_v45 }
 0x38c   : > { %8295 = vmatprep.mubr.bf16.mxu1 %v12094_v47  ;;  %v11162_v3 = vpop.f32.mrf.mxu0  ;;  %v11051_v20 = vpop.f32.mrf.mxu1 }
 0x38d   : > { %8449 = vmatmul.mubr.bf16.gmra.mxu0 %v12088_v40  ;;  %v13560_v50 = vadd.f32 %v11161_v31, %v11049_v54  ;;  %v11052_v59 = vadd.f32 %v11051_v20, %v11050_v15  ;;  %v12112_v31 = vld [vmem:[#allocation3 + $0x68] ss:$36 sps:$4 sm:$0xff]   ;;  %v12113_v20 = vld [vmem:[#allocation3 + $0xb0] ss:$36 sps:$4 sm:$0xff]  }
 0x38e   : > { %8456 = vmatprep.mubr.bf16.mxu0 %v12097_v7  ;;  %v11163_v9 = vpop.f32.mrf.mxu0 }
 0x38f   : > { %v11164_v19 = vadd.f32 %v11163_v9, %v11162_v3 }
 0x391   : > { %v13562_v55 = vadd.f32 %v11164_v19, %v11052_v59 }
 0x393   : > { %v11053_v56 = vpop.f32.mrf.mxu1  ;;  %8296 = vmatmul.mubr.bf16.gmra.mxu1 %v12092_v57 }
 0x394   : > { %8303 = vmatprep.mubr.bf16.mxu1 %v12100_v13 }
 0x395   : > { %v11165_v43 = vpop.f32.mrf.mxu0  ;;  %8457 = vmatmul.mubr.bf16.gmra.mxu0 %v12095_v44  ;;  %v11054_v6 = vpop.f32.mrf.mxu1 }
 0x396   : > { %8464 = vmatprep.mubr.bf16.mxu0 %v12103_v18  ;;  %v11055_v46 = vadd.f32 %v11054_v6, %v11053_v56 }
 0x397   : > { %v11166_v27 = vpop.f32.mrf.mxu0  ;;  %v11056_v41 = vpop.f32.mrf.mxu1 }
 0x398   : > { %v11167_v38 = vadd.f32 %v11166_v27, %v11165_v43 }
 0x399   : > { %v11168_v37 = vpop.f32.mrf.mxu0  ;;  %v11057_v11 = vpop.f32.mrf.mxu1 }
 0x39a   : > { %v13564_v2 = vadd.f32 %v11167_v38, %v11055_v46  ;;  %v11058_v0 = vadd.f32 %v11057_v11, %v11056_v41  ;;  %v12114_v38 = vld [vmem:[#allocation3 + $0xf8] ss:$36 sps:$4 sm:$0xff]   ;;  %v12115_v11 = vld [vmem:[#allocation3 + $0x140] ss:$36 sps:$4 sm:$0xff]  }
 0x39b   : > { %v11169_v5 = vpop.f32.mrf.mxu0  ;;  %v11059_v51 = vpop.f32.mrf.mxu1  ;;  %8304 = vmatmul.mubr.bf16.gmra.mxu1 %v12098_v34 }
 0x39c   : > { %v11170_v63 = vadd.f32 %v11169_v5, %v11168_v37  ;;  %8311 = vmatprep.mubr.bf16.mxu1 %v12107_v30 }
 0x39d   : > { %v11171_v60 = vpop.f32.mrf.mxu0  ;;  %8465 = vmatmul.mubr.bf16.gmra.mxu0 %v12101_v58  ;;  %v11060_v26 = vpop.f32.mrf.mxu1 }
 0x39e   : > { %v13566_v4 = vadd.f32 %v11170_v63, %v11058_v0  ;;  %8472 = vmatprep.mubr.bf16.mxu0 %v12110_v52  ;;  %v11061_v39 = vadd.f32 %v11060_v26, %v11059_v51 }
 0x39f   : > { %v11172_v29 = vpop.f32.mrf.mxu0  ;;  %v11062_v62 = vpop.f32.mrf.mxu1 }
 0x3a0   : > { %v11173_v17 = vadd.f32 %v11172_v29, %v11171_v60 }
 0x3a1   : > { %v11174_v25 = vpop.f32.mrf.mxu0  ;;  %v11063_v53 = vpop.f32.mrf.mxu1 }
 0x3a2   : > { %v13568_v14 = vadd.f32 %v11173_v17, %v11061_v39  ;;  %v11064_v24 = vadd.f32 %v11063_v53, %v11062_v62  ;;  %v12116_v17 = vld [vmem:[#allocation3 + $0x188] ss:$36 sps:$4 sm:$0xff]   ;;  %v12117_v53 = vld [vmem:[#allocation3 + $0x1d0] ss:$36 sps:$4 sm:$0xff]  }
 0x3a3   : > { %v11175_v12 = vpop.f32.mrf.mxu0  ;;  %v11065_v47 = vpop.f32.mrf.mxu1  ;;  %8312 = vmatmul.mubr.bf16.gmra.mxu1 %v12105_v35 }
 0x3a4   : > { %v11176_v40 = vadd.f32 %v11175_v12, %v11174_v25  ;;  %11543 = vmatprep.mubr.bf16.mxu1 %v12111_v8 }
 0x3a5   : > { %v11177_v36 = vpop.f32.mrf.mxu0  ;;  %8473 = vmatmul.mubr.bf16.gmra.mxu0 %v12108_v22  ;;  %v11066_v42 = vpop.f32.mrf.mxu1 }
 0x3a6   : > { %v13570_v61 = vadd.f32 %v11176_v40, %v11064_v24  ;;  %v11067_v7 = vadd.f32 %v11066_v42, %v11065_v47 }
 0x3a7   : > { %v11178_v45 = vpop.f32.mrf.mxu0  ;;  %v11068_v33 = vpop.f32.mrf.mxu1 }
 0x3a8   : > { %v11179_v54 = vadd.f32 %v11178_v45, %v11177_v36 }
 0x3a9   : > { %v11180_v21 = vpop.f32.mrf.mxu0  ;;  %v11069_v15 = vpop.f32.mrf.mxu1 }
 0x3aa   : > { %v13572_v57 = vadd.f32 %v11179_v54, %v11067_v7  ;;  %v11070_v3 = vadd.f32 %v11069_v15, %v11068_v33 }
 0x3ab   : > { %v11181_v59 = vpop.f32.mrf.mxu0  ;;  %v11071_v13 = vpop.f32.mrf.mxu1  ;;  %11544 = vmatmul.mubr.bf16.vlgmr.msra.gmra.mxu1 %v12112_v31 }
 0x3ac   : > { %v11182_v44 = vadd.f32 %v11181_v59, %v11180_v21  ;;  %11547 = vmatprep.mubr.bf16.mxu1 %v12113_v20  ;;  %v12118_v21 = vld [vmem:[#allocation3 + $0x218] ss:$36 sps:$4 sm:$0xff]  }
 0x3ad   : > { %v11183_v9 = vpop.f32.mrf.mxu0  ;;  %v11072_v56 = vpop.f32.mrf.mxu1 }
 0x3ae   : > { %v13574_v19 = vadd.f32 %v11182_v44, %v11070_v3  ;;  %v11073_v18 = vadd.f32 %v11072_v56, %v11071_v13  ;;  %v12119_v3 = vld [vmem:[#allocation3 + $0x260] ss:$36 sps:$4 sm:$0xff]  }
 0x3af   : > { %v11184_v43 = vpop.f32.mrf.mxu0  ;;  %v11074_v6 = vpop.f32.mrf.mxu1 }
 0x3b0   : > { %v11185_v46 = vadd.f32 %v11184_v43, %v11183_v9 }
 0x3b1   : > { %v11186_v27 = vpop.f32.mrf.mxu0  ;;  %v11075_v41 = vpop.f32.mrf.mxu1 }
 0x3b2   : > { %v13576_v34 = vadd.f32 %v11185_v46, %v11073_v18  ;;  %v11076_v37 = vadd.f32 %v11075_v41, %v11074_v6 }
 0x3b3   : > { %v11187_v0 = vpop.f32.mrf.mxu0  ;;  %v11077_v30 = vpop.f32.mrf.mxu1  ;;  %11548 = vmatmul.mubr.bf16.gmra.mxu1 %v12114_v38  ;;  %v12120_v38 = vld [vmem:[#allocation3 + $0x2a8] ss:$36 sps:$4 sm:$0xff]  }
 0x3b4   : > { %v11188_v58 = vadd.f32 %v11187_v0, %v11186_v27  ;;  %11551 = vmatprep.mubr.bf16.mxu1 %v12115_v11  ;;  %v12121_v0 = vld [vmem:[#allocation3 + $0x2f0] ss:$36 sps:$4 sm:$0xff]  }
 0x3b5   : > { %v11189_v5 = vpop.f32.mrf.mxu0  ;;  %v11078_v51 = vpop.f32.mrf.mxu1 }
 0x3b6   : > { %v13578_v63 = vadd.f32 %v11188_v58, %v11076_v37  ;;  %v11079_v52 = vadd.f32 %v11078_v51, %v11077_v30 }
 0x3b7   : > { %v11190_v60 = vpop.f32.mrf.mxu0  ;;  %v11080_v26 = vpop.f32.mrf.mxu1 }
 0x3b8   : > { %v11191_v39 = vadd.f32 %v11190_v60, %v11189_v5 }
 0x3b9   : > { %v11192_v29 = vpop.f32.mrf.mxu0  ;;  %v11081_v62 = vpop.f32.mrf.mxu1 }
 0x3ba   : > { %v13580_v35 = vadd.f32 %v11191_v39, %v11079_v52  ;;  %v11082_v25 = vadd.f32 %v11081_v62, %v11080_v26 }
 0x3bb   : > { %v11193_v24 = vpop.f32.mrf.mxu0  ;;  %v11083_v8 = vpop.f32.mrf.mxu1  ;;  %11552 = vmatmul.mubr.bf16.gmra.mxu1 %v12116_v17 }
 0x3bc   : > { %v11194_v22 = vadd.f32 %v11193_v24, %v11192_v29  ;;  %11555 = vmatprep.mubr.bf16.mxu1 %v12117_v53  ;;  %v12122_v53 = vld [vmem:[#allocation3 + $0x338] ss:$36 sps:$4 sm:$0xff]  }
 0x3bd   : > { %v11195_v12 = vpop.f32.mrf.mxu0  ;;  %v11084_v47 = vpop.f32.mrf.mxu1 }
 0x3be   : > { %v13582_v40 = vadd.f32 %v11194_v22, %v11082_v25  ;;  %v11085_v36 = vadd.f32 %v11084_v47, %v11083_v8  ;;  %v12123_v22 = vld [vmem:[#allocation3 + $0x380] ss:$36 sps:$4 sm:$0xff]  }
 0x3bf   : > { %v11196_v42 = vpop.f32.mrf.mxu0  ;;  %v11086_v7 = vpop.f32.mrf.mxu1 }
 0x3c0   : > { %v11197_v45 = vadd.f32 %v11196_v42, %v11195_v12 }
 0x3c1   : > { %v11198_v33 = vpop.f32.mrf.mxu0  ;;  %v11087_v54 = vpop.f32.mrf.mxu1 }
 0x3c2   : > { %v13584_v15 = vadd.f32 %v11197_v45, %v11085_v36  ;;  %v11088_v31 = vadd.f32 %v11087_v54, %v11086_v7 }
 0x3c3   : > { %v11199_v20 = vpop.f32.mrf.mxu0  ;;  %v11089_v59 = vpop.f32.mrf.mxu1  ;;  %11556 = vmatmul.mubr.bf16.gmra.mxu1 %v12118_v21 }
 0x3c4   : > { %v11200_v13 = vadd.f32 %v11199_v20, %v11198_v33  ;;  %11559 = vmatprep.mubr.bf16.mxu1 %v12119_v3 }
 0x3c5   : > { %v11201_v44 = vpop.f32.mrf.mxu0  ;;  %v11090_v9 = vpop.f32.mrf.mxu1 }
 0x3c6   : > { %v13586_v56 = vadd.f32 %v11200_v13, %v11088_v31  ;;  %v11091_v18 = vadd.f32 %v11090_v9, %v11089_v59  ;;  %v12124_v59 = vld [vmem:[#allocation3 + $0x3c8] ss:$36 sps:$4 sm:$0xff]   ;;  %v12125_v9 = vld [vmem:[#allocation3 + $0x410] ss:$36 sps:$4 sm:$0xff]  }
 0x3c7   : > { %v11202_v43 = vpop.f32.mrf.mxu0  ;;  %v11092_v6 = vpop.f32.mrf.mxu1 }
 0x3c8   : > { %v11203_v46 = vadd.f32 %v11202_v43, %v11201_v44 }
 0x3c9   : > { %v11204_v27 = vpop.f32.mrf.mxu0  ;;  %v11093_v41 = vpop.f32.mrf.mxu1 }
 0x3ca   : > { %v13588_v37 = vadd.f32 %v11203_v46, %v11091_v18  ;;  %v11094_v11 = vadd.f32 %v11093_v41, %v11092_v6 }
 0x3cb   : > { %v11205_v30 = vpop.f32.mrf.mxu0  ;;  %v11095_v58 = vpop.f32.mrf.mxu1  ;;  %11560 = vmatmul.mubr.bf16.gmra.mxu1 %v12120_v38 }
 0x3cc   : > { %v11206_v5 = vadd.f32 %v11205_v30, %v11204_v27  ;;  %11563 = vmatprep.mubr.bf16.mxu1 %v12121_v0 }
 0x3cd   : > { %v11207_v51 = vpop.f32.mrf.mxu0  ;;  %v11096_v52 = vpop.f32.mrf.mxu1 }
 0x3ce   : > { %v13590_v60 = vadd.f32 %v11206_v5, %v11094_v11  ;;  %v11097_v26 = vadd.f32 %v11096_v52, %v11095_v58 }
 0x3cf   : > { %v11208_v39 = vpop.f32.mrf.mxu0  ;;  %v11098_v29 = vpop.f32.mrf.mxu1 }
 0x3d0   : > { %v11209_v62 = vadd.f32 %v11208_v39, %v11207_v51  ;;  %v12126_v51 = vld [vmem:[#allocation3 + $0x458] ss:$36 sps:$4 sm:$0xff]  }
 0x3d1   : > { %v11210_v17 = vpop.f32.mrf.mxu0  ;;  %v11099_v25 = vpop.f32.mrf.mxu1 }
 0x3d2   : > { %v13592_v24 = vadd.f32 %v11209_v62, %v11097_v26  ;;  %v11100_v8 = vadd.f32 %v11099_v25, %v11098_v29 }
 0x3d3   : > { %v11211_v12 = vpop.f32.mrf.mxu0  ;;  %v11101_v47 = vpop.f32.mrf.mxu1  ;;  %11564 = vmatmul.mubr.bf16.gmra.mxu1 %v12122_v53 }
 0x3d4   : > { %v11212_v36 = vadd.f32 %v11211_v12, %v11210_v17  ;;  %11567 = vmatprep.mubr.bf16.mxu1 %v12123_v22 }
 0x3d5   : > { %v11213_v42 = vpop.f32.mrf.mxu0  ;;  %v11102_v7 = vpop.f32.mrf.mxu1 }
 0x3d6   : > { %v13594_v45 = vadd.f32 %v11212_v36, %v11100_v8  ;;  %v11103_v33 = vadd.f32 %v11102_v7, %v11101_v47 }
 0x3d7   : > { %v11214_v54 = vpop.f32.mrf.mxu0  ;;  %v11104_v21 = vpop.f32.mrf.mxu1 }
 0x3d8   : > { %v11215_v31 = vadd.f32 %v11214_v54, %v11213_v42 }
 0x3d9   : > { %v11216_v3 = vpop.f32.mrf.mxu0  ;;  %v11105_v20 = vpop.f32.mrf.mxu1 }
 0x3da   : > { %v13596_v13 = vadd.f32 %v11215_v31, %v11103_v33  ;;  %v11106_v44 = vadd.f32 %v11105_v20, %v11104_v21 }
 0x3db   : > { %v11217_v18 = vpop.f32.mrf.mxu0  ;;  %v11107_v43 = vpop.f32.mrf.mxu1  ;;  %11568 = vmatmul.mubr.bf16.gmra.mxu1 %v12124_v59 }
 0x3dc   : > { %v11218_v6 = vadd.f32 %v11217_v18, %v11216_v3  ;;  %11571 = vmatprep.mubr.bf16.mxu1 %v12125_v9 }
 0x3dd   : > { %v11219_v46 = vpop.f32.mrf.mxu0  ;;  %v11108_v27 = vpop.f32.mrf.mxu1 }
 0x3de   : > { %v13598_v41 = vadd.f32 %v11218_v6, %v11106_v44  ;;  %v11109_v38 = vadd.f32 %v11108_v27, %v11107_v43 }
 0x3df   : > { %v11220_v11 = vpop.f32.mrf.mxu0  ;;  %v11110_v0 = vpop.f32.mrf.mxu1 }
 0x3e0   : > { %v11221_v30 = vadd.f32 %v11220_v11, %v11219_v46 }
 0x3e1   : > { %v11222_v58 = vpop.f32.mrf.mxu0  ;;  %v11111_v5 = vpop.f32.mrf.mxu1 }
 0x3e2   : > { %v13600_v52 = vadd.f32 %v11221_v30, %v11109_v38  ;;  %v11112_v26 = vadd.f32 %v11111_v5, %v11110_v0 }
 0x3e3   : > { %v11223_v39 = vpop.f32.mrf.mxu0  ;;  %v11113_v29 = vpop.f32.mrf.mxu1  ;;  %11572 = vmatmul.mubr.bf16.gmra.mxu1 %v12126_v51 }
 0x3e4   : > { %v11224_v62 = vadd.f32 %v11223_v39, %v11222_v58 }
 0x3e5   : > { %v11225_v17 = vpop.f32.mrf.mxu0  ;;  %v11114_v25 = vpop.f32.mrf.mxu1 }
 0x3e6   : > { %v13602_v53 = vadd.f32 %v11224_v62, %v11112_v26  ;;  %v11115_v8 = vadd.f32 %v11114_v25, %v11113_v29 }
 0x3e7   : > { %v11226_v22 = vpop.f32.mrf.mxu0  ;;  %v11116_v12 = vpop.f32.mrf.mxu1 }
 0x3e8   : > { %v11227_v47 = vadd.f32 %v11226_v22, %v11225_v17 }
 0x3e9   : > { %v11228_v36 = vpop.f32.mrf.mxu0  ;;  %v11117_v42 = vpop.f32.mrf.mxu1 }
 0x3ea   : > { %v13604_v7 = vadd.f32 %v11227_v47, %v11115_v8  ;;  %v11118_v33 = vadd.f32 %v11117_v42, %v11116_v12 }
 0x3eb   : > { %v11229_v54 = vpop.f32.mrf.mxu0  ;;  %v11247_v21 = vpop.f32.mrf.mxu1 }
 0x3ec   : > { %v11230_v31 = vadd.f32 %v11229_v54, %v11228_v36 }
 0x3ed   : > { %v11359_v3 = vpop.f32.mrf.mxu0  ;;  %v11248_v20 = vpop.f32.mrf.mxu1 }
 0x3ee   : > { %v13606_v59 = vadd.f32 %v11230_v31, %v11118_v33  ;;  %v11249_v44 = vadd.f32 %v11248_v20, %v11247_v21 }
 0x3ef   : > { %v11360_v9 = vpop.f32.mrf.mxu0  ;;  %v11250_v18 = vpop.f32.mrf.mxu1 }
 0x3f0   : > { %v8194_v43 = vadd.f32 %v11249_v44, %v13544_v10  ;;  %v11361_v6 = vadd.f32 %v11360_v9, %v11359_v3 }
 0x3f1   : > { %v13609_v46 = vpop.f32.mrf.mxu0  ;;  %v11251_v27 = vpop.f32.mrf.mxu1 }
 0x3f2   : > { %v11252_v38 = vadd.f32 %v11251_v27, %v11250_v18  ;;  %v13611_v11 = vadd.f32 %v11361_v6, %v8194_v43 }
 0x3f3   : > { %v13613_v0 = vpop.f32.mrf.mxu0  ;;  %v11253_v30 = vpop.f32.mrf.mxu1 }
 0x3f4   : > { %v13616_v58 = vadd.f32 %v11252_v38, %v13546_v32 }
 0x3f5   : > { %v13618_v5 = vpop.f32.mrf.mxu0  ;;  %v11254_v51 = vpop.f32.mrf.mxu1 }
 0x3f6   : > { %v11255_v26 = vadd.f32 %v11254_v51, %v11253_v30 }
 0x3f7   : > { %v13620_v39 = vpop.f32.mrf.mxu0  ;;  %v11256_v10 = vpop.f32.mrf.mxu1 }
 0x3f8   : > { %v13623_v29 = vadd.f32 %v11255_v26, %v13548_v23 }
 0x3f9   : > { %v13625_v62 = vpop.f32.mrf.mxu0  ;;  %v11257_v17 = vpop.f32.mrf.mxu1 }
 0x3fa   : > { %v11258_v25 = vadd.f32 %v11257_v17, %v11256_v10 }
 0x3fb   : > { %v13627_v8 = vpop.f32.mrf.mxu0  ;;  %v11259_v22 = vpop.f32.mrf.mxu1 }
 0x3fc   : > { %v13630_v32 = vadd.f32 %v11258_v25, %v13550_v16 }
 0x3fd   : > { %v13632_v12 = vpop.f32.mrf.mxu0  ;;  %v11260_v47 = vpop.f32.mrf.mxu1 }
 0x3fe   : > { %v11261_v36 = vadd.f32 %v11260_v47, %v11259_v22 }
 0x3ff   : > { %v13634_v42 = vpop.f32.mrf.mxu0  ;;  %v11262_v33 = vpop.f32.mrf.mxu1 }
 0x400   : > { %v13637_v23 = vadd.f32 %v11261_v36, %v13552_v1 }
 0x401   : > { %v13639_v54 = vpop.f32.mrf.mxu0  ;;  %v11263_v21 = vpop.f32.mrf.mxu1 }
 0x402   : > { %v11264_v31 = vadd.f32 %v11263_v21, %v11262_v33 }
 0x403   : > { %v13641_v3 = vpop.f32.mrf.mxu0  ;;  %v11265_v20 = vpop.f32.mrf.mxu1 }
 0x404   : > { %v13644_v16 = vadd.f32 %v11264_v31, %v13554_v48 }
 0x405   : > { %v13646_v44 = vpop.f32.mrf.mxu0  ;;  %v11266_v9 = vpop.f32.mrf.mxu1 }
 0x406   : > { %v11267_v18 = vadd.f32 %v11266_v9, %v11265_v20 }
 0x407   : > { %v13648_v43 = vpop.f32.mrf.mxu0  ;;  %v11268_v6 = vpop.f32.mrf.mxu1 }
 0x408   : > { %v13651_v1 = vadd.f32 %v11267_v18, %v13556_v49 }
 0x409   : > { %v13653_v27 = vpop.f32.mrf.mxu0  ;;  %v11269_v38 = vpop.f32.mrf.mxu1 }
 0x40a   : > { %v11270_v30 = vadd.f32 %v11269_v38, %v11268_v6 }
 0x40b   : > { %v13655_v51 = vpop.f32.mrf.mxu0  ;;  %v11271_v26 = vpop.f32.mrf.mxu1 }
 0x40c   : > { %v13658_v48 = vadd.f32 %v11270_v30, %v13558_v28 }
 0x40d   : > { %v13660_v10 = vpop.f32.mrf.mxu0  ;;  %v11272_v17 = vpop.f32.mrf.mxu1 }
 0x40e   : > { %v11273_v25 = vadd.f32 %v11272_v17, %v11271_v26 }
 0x40f   : > { %v13662_v22 = vpop.f32.mrf.mxu0  ;;  %v11274_v47 = vpop.f32.mrf.mxu1 }
 0x410   : > { %v13665_v49 = vadd.f32 %v11273_v25, %v13560_v50 }
 0x411   : > { %v13667_v36 = vpop.f32.mrf.mxu0  ;;  %v11275_v33 = vpop.f32.mrf.mxu1 }
 0x412   : > { %v11276_v21 = vadd.f32 %v11275_v33, %v11274_v47 }
 0x413   : > { %v13669_v31 = vpop.f32.mrf.mxu0  ;;  %v11277_v20 = vpop.f32.mrf.mxu1 }
 0x414   : > { %v13672_v28 = vadd.f32 %v11276_v21, %v13562_v55 }
 0x415   : > { %v13674_v9 = vpop.f32.mrf.mxu0  ;;  %v11278_v18 = vpop.f32.mrf.mxu1 }
 0x416   : > { %14338 = vst [vmem:[#allocation38_spill] sm:$0xff] %v13672_v28  ;;  %v11279_v6 = vadd.f32 %v11278_v18, %v11277_v20 }
 0x417   : > { %v13676_v38 = vpop.f32.mrf.mxu0  ;;  %v11280_v30 = vpop.f32.mrf.mxu1 }
 0x418   : > { %14339 = vst [vmem:[#allocation39_spill] sm:$0xff] %v13676_v38  ;;  %v13679_v50 = vadd.f32 %v11279_v6, %v13564_v2 }
 0x419   : > { %v13681_v26 = vpop.f32.mrf.mxu0  ;;  %v11281_v17 = vpop.f32.mrf.mxu1 }
 0x41a   : > { %14340 = vst [vmem:[#allocation41_spill] sm:$0xff] %v13679_v50  ;;  %v11282_v25 = vadd.f32 %v11281_v17, %v11280_v30 }
 0x41b   : > { %v13683_v47 = vpop.f32.mrf.mxu0  ;;  %v11283_v33 = vpop.f32.mrf.mxu1 }
 0x41c   : > { %14341 = vst [vmem:[#allocation37_spill] sm:$0xff] %v13683_v47  ;;  %v13686_v55 = vadd.f32 %v11282_v25, %v13566_v4 }
 0x41d   : > { %v13688_v21 = vpop.f32.mrf.mxu0  ;;  %v11284_v28 = vpop.f32.mrf.mxu1 }
 0x41e   : > { %14342 = vst [vmem:[#allocation36_spill] sm:$0xff] %v13686_v55  ;;  %v11285_v20 = vadd.f32 %v11284_v28, %v11283_v33 }
 0x41f   : > { %v13690_v18 = vpop.f32.mrf.mxu0  ;;  %v11286_v38 = vpop.f32.mrf.mxu1 }
 0x420   : > { %14343 = vst [vmem:[#allocation40_spill] sm:$0xff] %v13690_v18  ;;  %v13693_v2 = vadd.f32 %v11285_v20, %v13568_v14 }
 0x421   : > { %v13695_v6 = vpop.f32.mrf.mxu0  ;;  %v11287_v50 = vpop.f32.mrf.mxu1 }
 0x422   : > { %14344 = vst [vmem:[#allocation43_spill] sm:$0xff] %v13695_v6  ;;  %v11288_v30 = vadd.f32 %v11287_v50, %v11286_v38 }
 0x423   : > { %v13697_v17 = vpop.f32.mrf.mxu0  ;;  %v11289_v47 = vpop.f32.mrf.mxu1 }
 0x424   : > { %14345 = vst [vmem:[#allocation42_spill] sm:$0xff] %v13697_v17  ;;  %v13700_v4 = vadd.f32 %v11288_v30, %v13570_v61 }
 0x425   : > { %v13702_v25 = vpop.f32.mrf.mxu0  ;;  %v11290_v55 = vpop.f32.mrf.mxu1 }
 0x426   : > { %14346 = vst [vmem:[#allocation46_spill] sm:$0xff] %v13700_v4  ;;  %v11291_v28 = vadd.f32 %v11290_v55, %v11289_v47 }
 0x427   : > { %v13704_v33 = vpop.f32.mrf.mxu0  ;;  %v11292_v18 = vpop.f32.mrf.mxu1 }
 0x428   : > { %14347 = vst [vmem:[#allocation47_spill] sm:$0xff] %v13704_v33  ;;  %v13707_v14 = vadd.f32 %v11291_v28, %v13572_v57 }
 0x429   : > { %v13709_v20 = vpop.f32.mrf.mxu0  ;;  %v11293_v6 = vpop.f32.mrf.mxu1 }
 0x42a   : > { %14348 = vst [vmem:[#allocation49_spill] sm:$0xff] %v13707_v14  ;;  %v11294_v38 = vadd.f32 %v11293_v6, %v11292_v18 }
 0x42b   : > { %v13711_v50 = vpop.f32.mrf.mxu0  ;;  %v11295_v17 = vpop.f32.mrf.mxu1 }
 0x42c   : > { %14349 = vst [vmem:[#allocation45_spill] sm:$0xff] %v13711_v50  ;;  %v13714_v61 = vadd.f32 %v11294_v38, %v13574_v19 }
 0x42d   : > { %v13716_v30 = vpop.f32.mrf.mxu0  ;;  %v11296_v4 = vpop.f32.mrf.mxu1 }
 0x42e   : > { %14350 = vst [vmem:[#allocation44_spill] sm:$0xff] %v13714_v61  ;;  %14351 = vst [vmem:[#allocation48_spill] sm:$0xff] %v13716_v30  ;;  %v11297_v47 = vadd.f32 %v11296_v4, %v11295_v17 }
 0x42f   : > { %v13718_v55 = vpop.f32.mrf.mxu0  ;;  %v11298_v33 = vpop.f32.mrf.mxu1 }
 0x430   : > { %v13721_v57 = vadd.f32 %v11297_v47, %v13576_v34 }
 0x431   : > { %v13723_v28 = vpop.f32.mrf.mxu0  ;;  %v11299_v14 = vpop.f32.mrf.mxu1 }
 0x432   : > { %14352 = vst [vmem:[#allocation51_spill] sm:$0xff] %v13721_v57  ;;  %14353 = vst [vmem:[#allocation52_spill] sm:$0xff] %v13723_v28  ;;  %v11300_v18 = vadd.f32 %v11299_v14, %v11298_v33 }
 0x433   : > { %v11301_v6 = vpop.f32.mrf.mxu1  ;;  %v13728_v19 = vpop.f32.mrf.mxu0 }
 0x434   : > { %v13726_v50 = vadd.f32 %v11300_v18, %v13578_v63 }
 0x435   : > { %v11302_v38 = vpop.f32.mrf.mxu1  ;;  %v13730_v17 = vpop.f32.mrf.mxu0 }
 0x436   : > { %14354 = vst [vmem:[#allocation50_spill] sm:$0xff] %v13726_v50  ;;  %v11303_v61 = vadd.f32 %v11302_v38, %v11301_v6  ;;  %14355 = vst [vmem:[#allocation54_spill] sm:$0xff] %v13730_v17 }
 0x437   : > { %v11304_v30 = vpop.f32.mrf.mxu1  ;;  %v13735_v28 = vpop.f32.mrf.mxu0 }
 0x438   : > { %v13733_v4 = vadd.f32 %v11303_v61, %v13580_v35 }
 0x439   : > { %v11305_v34 = vpop.f32.mrf.mxu1  ;;  %v13740_v50 = vpop.f32.mrf.mxu0 }
 0x43a   : > { %14356 = vst [vmem:[#allocation53_spill] sm:$0xff] %v13733_v4  ;;  %v11306_v47 = vadd.f32 %v11305_v34, %v11304_v30 }
 0x43b   : > { %v11307_v57 = vpop.f32.mrf.mxu1  ;;  %v13745_v61 = vpop.f32.mrf.mxu0 }
 0x43c   : > { %v13738_v33 = vadd.f32 %v11306_v47, %v13582_v40 }
 0x43d   : > { %v11308_v63 = vpop.f32.mrf.mxu1  ;;  %v13750_v47 = vpop.f32.mrf.mxu0 }
 0x43e   : > { %14357 = vst [vmem:[#allocation55_spill] sm:$0xff] %v13738_v33  ;;  %v11309_v14 = vadd.f32 %v11308_v63, %v11307_v57 }
 0x43f   : > { %v11310_v18 = vpop.f32.mrf.mxu1 }
 0x440   : > { %v13743_v6 = vadd.f32 %v11309_v14, %v13584_v15  ;;  %v13755_v14 = vpop.f32.mrf.mxu0 }
 0x441   : > { %v11311_v38 = vpop.f32.mrf.mxu1 }
 0x442   : > { %14358 = vst [vmem:[#allocation56_spill] sm:$0xff] %v13743_v6  ;;  %v11312_v17 = vadd.f32 %v11311_v38, %v11310_v18 }
 0x443   : > { %v11313_v35 = vpop.f32.mrf.mxu1 }
 0x444   : > { %v13748_v30 = vadd.f32 %v11312_v17, %v13586_v56  ;;  %v13760_v17 = vpop.f32.mrf.mxu0 }
 0x445   : > { %v11314_v34 = vpop.f32.mrf.mxu1 }
 0x446   : > { %14359 = vst [vmem:[#allocation58_spill] sm:$0xff] %v13748_v30  ;;  %v11315_v4 = vadd.f32 %v11314_v34, %v11313_v35 }
 0x447   : > { %v11316_v40 = vpop.f32.mrf.mxu1 }
 0x448   : > { %v13753_v57 = vadd.f32 %v11315_v4, %v13588_v37  ;;  %v13765_v4 = vpop.f32.mrf.mxu0 }
 0x449   : > { %v11317_v63 = vpop.f32.mrf.mxu1 }
 0x44a   : > { %14360 = vst [vmem:[#allocation57_spill] sm:$0xff] %v13753_v57  ;;  %v11318_v33 = vadd.f32 %v11317_v63, %v11316_v40 }
 0x44b   : > { %v11319_v15 = vpop.f32.mrf.mxu1 }
 0x44c   : > { %v13758_v18 = vadd.f32 %v11318_v33, %v13590_v60  ;;  %v13770_v33 = vpop.f32.mrf.mxu0 }
 0x44d   : > { %v11320_v38 = vpop.f32.mrf.mxu1 }
 0x44e   : > { %14361 = vst [vmem:[#allocation59_spill] sm:$0xff] %v13758_v18  ;;  %v11321_v6 = vadd.f32 %v11320_v38, %v11319_v15 }
 0x44f   : > { %v11322_v56 = vpop.f32.mrf.mxu1 }
 0x450   : > { %v13763_v35 = vadd.f32 %v11321_v6, %v13592_v24  ;;  %v13775_v6 = vpop.f32.mrf.mxu0 }
 0x451   : > { %v11323_v34 = vpop.f32.mrf.mxu1 }
 0x452   : > { %14362 = vst [vmem:[#allocation60_spill] sm:$0xff] %v13763_v35  ;;  %v11324_v30 = vadd.f32 %v11323_v34, %v11322_v56 }
 0x453   : > { %v11325_v37 = vpop.f32.mrf.mxu1 }
 0x454   : > { %v13768_v40 = vadd.f32 %v11324_v30, %v13594_v45  ;;  %v13780_v30 = vpop.f32.mrf.mxu0 }
 0x455   : > { %v11326_v63 = vpop.f32.mrf.mxu1 }
 0x456   : > { %14363 = vst [vmem:[#allocation61_spill] sm:$0xff] %v13768_v40  ;;  %v11327_v57 = vadd.f32 %v11326_v63, %v11325_v37 }
 0x457   : > { %v11328_v60 = vpop.f32.mrf.mxu1 }
 0x458   : > { %v13773_v15 = vadd.f32 %v11327_v57, %v13596_v13  ;;  %v13785_v57 = vpop.f32.mrf.mxu0 }
 0x459   : > { %v11329_v38 = vpop.f32.mrf.mxu1 }
 0x45a   : > { %14364 = vst [vmem:[#allocation63_spill] sm:$0xff] %v13773_v15  ;;  %v11330_v18 = vadd.f32 %v11329_v38, %v11328_v60 }
 0x45b   : > { %v11331_v24 = vpop.f32.mrf.mxu1 }
 0x45c   : > { %v13778_v56 = vadd.f32 %v11330_v18, %v13598_v41  ;;  %v13790_v18 = vpop.f32.mrf.mxu0 }
 0x45d   : > { %v11332_v34 = vpop.f32.mrf.mxu1 }
 0x45e   : > { %14365 = vst [vmem:[#allocation62_spill] sm:$0xff] %v13778_v56  ;;  %v11333_v35 = vadd.f32 %v11332_v34, %v11331_v24 }
 0x45f   : > { %v11334_v45 = vpop.f32.mrf.mxu1 }
 0x460   : > { %v13783_v37 = vadd.f32 %v11333_v35, %v13600_v52  ;;  %v13795_v35 = vpop.f32.mrf.mxu0 }
 0x461   : > { %v11335_v63 = vpop.f32.mrf.mxu1 }
 0x462   : > { %v11336_v40 = vadd.f32 %v11335_v63, %v11334_v45 }
 0x463   : > { %v11337_v13 = vpop.f32.mrf.mxu1 }
 0x464   : > { %v13788_v60 = vadd.f32 %v11336_v40, %v13602_v53  ;;  %v11364_v53 = vadd.f32 %v13613_v0, %v13609_v46  ;;  %v11367_v40 = vadd.f32 %v13620_v39, %v13618_v5 }
 0x465   : > { %v11338_v38 = vpop.f32.mrf.mxu1 }
 0x466   : > { %v11339_v15 = vadd.f32 %v11338_v38, %v11337_v13  ;;  %v8363_v38 = vadd.f32 %v11367_v40, %v13623_v29 }
 0x467   : > { %v11340_v41 = vpop.f32.mrf.mxu1 }
 0x468   : > { %v13793_v24 = vadd.f32 %v11339_v15, %v13604_v7  ;;  %v11370_v7 = vadd.f32 %v13627_v8, %v13625_v62  ;;  %v13806_v15 = vpop.f32.mrf.mxu0 }
 0x469   : > { %v11341_v34 = vpop.f32.mrf.mxu1 }
 0x46a   : > { %v11342_v56 = vadd.f32 %v11341_v34, %v11340_v41  ;;  %v8366_v5 = vadd.f32 %v11370_v7, %v13630_v32  ;;  %v13821_v34 = vpop.f32.mrf.mxu0  ;;  %v11376_v32 = vadd.f32 %v13641_v3, %v13639_v54 }
 0x46b   : > { %v11545_v52 = vpop.f32.mrf.mxu1 }
 0x46c   : > { %v13798_v45 = vadd.f32 %v11342_v56, %v13606_v59  ;;  %v8358_v59 = vadd.f32 %v11364_v53, %v13616_v58  ;;  %v11373_v56 = vadd.f32 %v13634_v42, %v13632_v12  ;;  %v13815_v0 = vadd.f32 %v11545_v52, %v8363_v38 }
 0x46d   : > { %v8515_v63 = vpop.f32.mrf.mxu1  ;;  %v11379_v42 = vadd.f32 %v13648_v43, %v13646_v44  ;;  %v8374_v43 = vadd.f32 %v11376_v32, %v13644_v16 }
 0x46e   : > { %v13810_v41 = vadd.f32 %v8515_v63, %v13611_v11  ;;  %v8371_v8 = vadd.f32 %v11373_v56, %v13637_v23  ;;  %v8681_v52 = vmul.f32 %v13815_v0, %v13815_v0  ;;  %v11385_v56 = vadd.f32 %v13662_v22, %v13660_v10 }
 0x46f   : > { %v11546_v13 = vpop.f32.mrf.mxu1  ;;  %v8379_v7 = vadd.f32 %v11379_v42, %v13651_v1  ;;  %v14366_v42 = vld [vmem:[#allocation39_spill] sm:$0xff] }
 0x470   : > { %v8679_v11 = vmul.f32 %v13810_v41, %v13810_v41  ;;  %v13825_v29 = vadd.f32 %v11546_v13, %v8366_v5  ;;  %v11382_v13 = vadd.f32 %v13655_v51, %v13653_v27 }
 0x471   : > { %v8518_v46 = vpop.f32.mrf.mxu1 }
 0x472   : > { %v13818_v39 = vadd.f32 %v8518_v46, %v8358_v59  ;;  %v13843_v59 = vpop.f32.mrf.mxu0  ;;  %v8682_v54 = vmul.f32 %v13825_v29, %v13825_v29  ;;  %v8382_v27 = vadd.f32 %v11382_v13, %v13658_v48 }
 0x473   : > { %v11549_v62 = vpop.f32.mrf.mxu1 }
 0x474   : > { %v8642_v58 = vadd.f32 %v13818_v39, %v13810_v41  ;;  %v8680_v12 = vmul.f32 %v13818_v39, %v13818_v39  ;;  %v13851_v46 = vadd.f32 %v11549_v62, %v8379_v7  ;;  %v13860_v16 = vpop.f32.mrf.mxu0  ;;  %v11388_v62 = vadd.f32 %v13669_v31, %v13667_v36  ;;  %v14367_v7 = vld [vmem:[#allocation37_spill] sm:$0xff] }
 0x475   : > { %v8531_v23 = vpop.f32.mrf.mxu1 }
 0x476   : > { %v8643_v63 = vadd.f32 %v8642_v58, %v13815_v0  ;;  %v8711_v53 = vadd.f32 %v8680_v12, %v8679_v11  ;;  %v13838_v40 = vadd.f32 %v8531_v23, %v8371_v8  ;;  %v8387_v12 = vadd.f32 %v11385_v56, %v13665_v49  ;;  %v14369_v56 = vld [vmem:[#allocation38_spill] sm:$0xff] }
 0x477   : > { %v11550_v38 = vpop.f32.mrf.mxu1  ;;  %v11391_v23 = vadd.f32 %v14366_v42, %v13674_v9  ;;  %v8685_v49 = vmul.f32 %v13851_v46, %v13851_v46 }
 0x478   : > { %v8712_v3 = vadd.f32 %v8711_v53, %v8681_v52  ;;  %v8644_v44 = vadd.f32 %v8643_v63, %v13825_v29  ;;  %v8683_v5 = vmul.f32 %v13838_v40, %v13838_v40  ;;  %v13862_v10 = vadd.f32 %v11550_v38, %v8382_v27 }
 0x479   : > { %v8534_v51 = vpop.f32.mrf.mxu1  ;;  %v11394_v38 = vadd.f32 %v14367_v7, %v13681_v26  ;;  %v8390_v27 = vadd.f32 %v11388_v62, %v14369_v56  ;;  %v14373_v7 = vld [vmem:[#allocation42_spill] sm:$0xff]  ;;  %v14375_v56 = vld [vmem:[#allocation45_spill] sm:$0xff] }
 0x47a   : > { %v8645_v1 = vadd.f32 %v8644_v44, %v13838_v40  ;;  %v8713_v8 = vadd.f32 %v8712_v3, %v8682_v54  ;;  %v13857_v11 = vadd.f32 %v8534_v51, %v8374_v43  ;;  %v14368_v54 = vld [vmem:[#allocation41_spill] sm:$0xff]  ;;  %v13879_v43 = vpop.f32.mrf.mxu0  ;;  %v8686_v36 = vmul.f32 %v13862_v10, %v13862_v10  ;;  %v14370_v51 = vld [vmem:[#allocation40_spill] sm:$0xff] }
 0x47b   : > { %v11553_v58 = vpop.f32.mrf.mxu1  ;;  %v8395_v3 = vadd.f32 %v11391_v23, %v14368_v54  ;;  %v14374_v54 = vld [vmem:[#allocation47_spill] sm:$0xff] }
 0x47c   : > { %v8714_v32 = vadd.f32 %v8713_v8, %v8683_v5  ;;  %v8646_v22 = vadd.f32 %v8645_v1, %v13857_v11  ;;  %v8684_v48 = vmul.f32 %v13857_v11, %v13857_v11  ;;  %v11397_v1 = vadd.f32 %v14370_v51, %v13688_v21  ;;  %v14371_v8 = vld [vmem:[#allocation36_spill] sm:$0xff]  ;;  %v13896_v62 = vpop.f32.mrf.mxu0  ;;  %v14376_v51 = vld [vmem:[#allocation49_spill] sm:$0xff] }
 0x47d   : > { %v8547_v52 = vpop.f32.mrf.mxu1  ;;  %v13887_v5 = vadd.f32 %v11553_v58, %v8395_v3  ;;  %v8398_v26 = vadd.f32 %v11394_v38, %v14371_v8  ;;  %v11403_v3 = vadd.f32 %v14374_v54, %v13702_v25 }
 0x47e   : > { %v8647_v63 = vadd.f32 %v8646_v22, %v13851_v46  ;;  %v8715_v53 = vadd.f32 %v8714_v32, %v8684_v48  ;;  %v13874_v13 = vadd.f32 %v8547_v52, %v8387_v12  ;;  %v8403_v52 = vadd.f32 %v11397_v1, %v13693_v2 }
 0x47f   : > { %v11554_v44 = vpop.f32.mrf.mxu1  ;;  %v8689_v2 = vmul.f32 %v13887_v5, %v13887_v5  ;;  %v8411_v1 = vadd.f32 %v11403_v3, %v14376_v51  ;;  %v14381_v51 = vld [vmem:[#allocation52_spill] sm:$0xff] }
 0x480   : > { %v8716_v31 = vadd.f32 %v8715_v53, %v8685_v49  ;;  %v8648_v9 = vadd.f32 %v8647_v63, %v13862_v10  ;;  %v8687_v22 = vmul.f32 %v13874_v13, %v13874_v13  ;;  %v13898_v21 = vadd.f32 %v11554_v44, %v8398_v26  ;;  %v14372_v53 = vld [vmem:[#allocation43_spill] sm:$0xff]  ;;  %v13915_v26 = vpop.f32.mrf.mxu0 }
 0x481   : > { %v8550_v12 = vpop.f32.mrf.mxu1  ;;  %v11400_v38 = vadd.f32 %v14373_v7, %v14372_v53 }
 0x482   : > { %v8649_v32 = vadd.f32 %v8648_v9, %v13874_v13  ;;  %v8717_v48 = vadd.f32 %v8716_v31, %v8686_v36  ;;  %v13893_v42 = vadd.f32 %v8550_v12, %v8390_v27  ;;  %v11406_v27 = vadd.f32 %v14375_v56, %v13709_v20 }
 0x483   : > { %v11557_v23 = vpop.f32.mrf.mxu1  ;;  %v8690_v25 = vmul.f32 %v13898_v21, %v13898_v21 }
 0x484   : > { %v8718_v49 = vadd.f32 %v8717_v48, %v8687_v22  ;;  %v8650_v58 = vadd.f32 %v8649_v32, %v13893_v42  ;;  %v8688_v63 = vmul.f32 %v13893_v42, %v13893_v42  ;;  %v14377_v22 = vld [vmem:[#allocation46_spill] sm:$0xff] }
 0x485   : > { %v8563_v36 = vpop.f32.mrf.mxu1  ;;  %v8406_v48 = vadd.f32 %v11400_v38, %v14377_v22  ;;  %v13932_v38 = vpop.f32.mrf.mxu0 }
 0x486   : > { %v8651_v31 = vadd.f32 %v8650_v58, %v13887_v5  ;;  %v8719_v9 = vadd.f32 %v8718_v49, %v8688_v63  ;;  %v13910_v44 = vadd.f32 %v8563_v36, %v8403_v52  ;;  %v14378_v58 = vld [vmem:[#allocation48_spill] sm:$0xff]  ;;  %v13923_v49 = vadd.f32 %v11557_v23, %v8411_v1 }
 0x487   : > { %v11558_v8 = vpop.f32.mrf.mxu1  ;;  %v11409_v52 = vadd.f32 %v13718_v55, %v14378_v58  ;;  %v14379_v63 = vld [vmem:[#allocation44_spill] sm:$0xff]  ;;  %v11412_v1 = vadd.f32 %v13728_v19, %v14381_v51 }
 0x488   : > { %v8720_v12 = vadd.f32 %v8719_v9, %v8689_v2  ;;  %v8652_v32 = vadd.f32 %v8651_v31, %v13898_v21  ;;  %v8414_v20 = vadd.f32 %v11406_v27, %v14379_v63  ;;  %v8691_v54 = vmul.f32 %v13910_v44, %v13910_v44  ;;  %v14380_v31 = vld [vmem:[#allocation51_spill] sm:$0xff]  ;;  %v14383_v63 = vld [vmem:[#allocation53_spill] sm:$0xff] }
 0x489   : > { %v8566_v53 = vpop.f32.mrf.mxu1  ;;  %v8419_v9 = vadd.f32 %v11409_v52, %v14380_v31  ;;  %v8693_v22 = vmul.f32 %v13923_v49, %v13923_v49  ;;  %v11418_v52 = vadd.f32 %v13745_v61, %v13740_v50 }
 0x48a   : > { %v8653_v7 = vadd.f32 %v8652_v32, %v13910_v44  ;;  %v8721_v3 = vadd.f32 %v8720_v12, %v8690_v25  ;;  %v13929_v36 = vadd.f32 %v8566_v53, %v8406_v48  ;;  %v13934_v55 = vadd.f32 %v11558_v8, %v8414_v20  ;;  %v14382_v32 = vld [vmem:[#allocation54_spill] sm:$0xff] }
 0x48b   : > { %v11561_v2 = vpop.f32.mrf.mxu1  ;;  %v11415_v25 = vadd.f32 %v13735_v28, %v14382_v32 }
 0x48c   : > { %v8722_v56 = vadd.f32 %v8721_v3, %v8691_v54  ;;  %v8654_v23 = vadd.f32 %v8653_v7, %v13929_v36  ;;  %v8692_v27 = vmul.f32 %v13929_v36, %v13929_v36  ;;  %v13951_v7 = vpop.f32.mrf.mxu0  ;;  %v8694_v28 = vmul.f32 %v13934_v55, %v13934_v55  ;;  %v14384_v3 = vld [vmem:[#allocation50_spill] sm:$0xff] }
 0x48d   : > { %v8579_v12 = vpop.f32.mrf.mxu1  ;;  %v8427_v20 = vadd.f32 %v11415_v25, %v14383_v63  ;;  %v8422_v31 = vadd.f32 %v11412_v1, %v14384_v3  ;;  %v11427_v63 = vadd.f32 %v13775_v6, %v13770_v33  ;;  %v11430_v3 = vadd.f32 %v13785_v57, %v13780_v30  ;;  %v14388_v6 = vld [vmem:[#allocation58_spill] sm:$0xff] }
 0x48e   : > { %v8655_v48 = vadd.f32 %v8654_v23, %v13923_v49  ;;  %v8723_v58 = vadd.f32 %v8722_v56, %v8692_v27  ;;  %v13946_v8 = vadd.f32 %v8579_v12, %v8419_v9  ;;  %v11421_v9 = vadd.f32 %v13755_v14, %v13750_v47  ;;  %v14385_v23 = vld [vmem:[#allocation55_spill] sm:$0xff]  ;;  %v13968_v1 = vpop.f32.mrf.mxu0 }
 0x48f   : > { %v11562_v53 = vpop.f32.mrf.mxu1  ;;  %v13959_v56 = vadd.f32 %v11561_v2, %v8427_v20  ;;  %v8430_v50 = vadd.f32 %v11418_v52, %v14385_v23  ;;  %v11424_v52 = vadd.f32 %v13765_v4, %v13760_v17 }
 0x490   : > { %v8724_v19 = vadd.f32 %v8723_v58, %v8693_v22  ;;  %v8656_v54 = vadd.f32 %v8655_v48, %v13934_v55  ;;  %v8695_v51 = vmul.f32 %v13946_v8, %v13946_v8  ;;  %v14386_v22 = vld [vmem:[#allocation56_spill] sm:$0xff] }
 0x491   : > { %v8582_v61 = vpop.f32.mrf.mxu1  ;;  %v8435_v48 = vadd.f32 %v11421_v9, %v14386_v22  ;;  %v13970_v47 = vadd.f32 %v11562_v53, %v8430_v50  ;;  %v11449_v50 = vpop.f32.mrf.mxu0 }
 0x492   : > { %v8657_v27 = vadd.f32 %v8656_v54, %v13946_v8  ;;  %v8725_v32 = vadd.f32 %v8724_v19, %v8694_v28  ;;  %v13965_v25 = vadd.f32 %v8582_v61, %v8422_v31  ;;  %v8697_v28 = vmul.f32 %v13959_v56, %v13959_v56  ;;  %v14387_v31 = vld [vmem:[#allocation57_spill] sm:$0xff] }
 0x493   : > { %v11565_v12 = vpop.f32.mrf.mxu1  ;;  %v8443_v9 = vadd.f32 %v11427_v63, %v14387_v31  ;;  %v8698_v17 = vmul.f32 %v13970_v47, %v13970_v47  ;;  %v8438_v61 = vadd.f32 %v11424_v52, %v14388_v6  ;;  %v14390_v63 = vld [vmem:[#allocation60_spill] sm:$0xff]  ;;  %v11450_v52 = vpop.f32.mrf.mxu0 }
 0x494   : > { %v8726_v58 = vadd.f32 %v8725_v32, %v8695_v51  ;;  %v8658_v14 = vadd.f32 %v8657_v27, %v13965_v25  ;;  %v8696_v2 = vmul.f32 %v13965_v25, %v13965_v25  ;;  %v11433_v27 = vadd.f32 %v13795_v35, %v13790_v18  ;;  %v14389_v32 = vld [vmem:[#allocation59_spill] sm:$0xff] }
 0x495   : > { %v8595_v20 = vpop.f32.mrf.mxu1  ;;  %v13993_v51 = vadd.f32 %v11565_v12, %v8443_v9  ;;  %v8446_v22 = vadd.f32 %v11430_v3, %v14389_v32  ;;  %v11436_v12 = vadd.f32 %v13821_v34, %v13806_v15 }
 0x496   : > { %v8659_v19 = vadd.f32 %v8658_v14, %v13959_v56  ;;  %v8727_v54 = vadd.f32 %v8726_v58, %v8696_v2  ;;  %v13982_v53 = vadd.f32 %v8595_v20, %v8435_v48  ;;  %v8451_v20 = vadd.f32 %v11433_v27, %v14390_v63  ;;  %v11452_v27 = vpop.f32.mrf.mxu0 }
 0x497   : > { %v11566_v23 = vpop.f32.mrf.mxu1  ;;  %v8701_v31 = vmul.f32 %v13993_v51, %v13993_v51 }
 0x498   : > { %v8728_v4 = vadd.f32 %v8727_v54, %v8697_v28  ;;  %v8660_v33 = vadd.f32 %v8659_v19, %v13970_v47  ;;  %v8699_v48 = vmul.f32 %v13982_v53, %v13982_v53  ;;  %v14002_v19 = vadd.f32 %v11566_v23, %v8446_v22 }
 0x499   : > { %v8598_v30 = vpop.f32.mrf.mxu1  ;;  %v11439_v54 = vadd.f32 %v13860_v16, %v13843_v59  ;;  %v14392_v16 = vld [vmem:[#allocation61_spill] sm:$0xff]  ;;  %v11445_v22 = vadd.f32 %v13932_v38, %v13915_v26 }
 0x49a   : > { %v8661_v57 = vadd.f32 %v8660_v33, %v13982_v53  ;;  %v8729_v58 = vadd.f32 %v8728_v4, %v8698_v17  ;;  %v13999_v14 = vadd.f32 %v8598_v30, %v8438_v61  ;;  %v11442_v4 = vadd.f32 %v13896_v62, %v13879_v43  ;;  %v14391_v33 = vld [vmem:[#allocation63_spill] sm:$0xff] }
 0x49b   : > { %v11569_v2 = vpop.f32.mrf.mxu1  ;;  %v8459_v6 = vadd.f32 %v11439_v54, %v14391_v33  ;;  %v8702_v15 = vmul.f32 %v14002_v19, %v14002_v19  ;;  %v8454_v32 = vadd.f32 %v11436_v12, %v14392_v16 }
 0x49c   : > { %v8730_v28 = vadd.f32 %v8729_v58, %v8699_v48  ;;  %v8662_v18 = vadd.f32 %v8661_v57, %v13999_v14  ;;  %v8700_v35 = vmul.f32 %v13999_v14, %v13999_v14  ;;  %v14393_v57 = vld [vmem:[#allocation62_spill] sm:$0xff] }
 0x49d   : > { %v8611_v3 = vpop.f32.mrf.mxu1  ;;  %v14025_v30 = vadd.f32 %v11569_v2, %v8459_v6  ;;  %v8462_v48 = vadd.f32 %v11442_v4, %v14393_v57  ;;  %v11448_v2 = vadd.f32 %v13968_v1, %v13951_v7 }
 0x49e   : > { %v8663_v9 = vadd.f32 %v8662_v18, %v13993_v51  ;;  %v8731_v17 = vadd.f32 %v8730_v28, %v8700_v35  ;;  %v14014_v23 = vadd.f32 %v8611_v3, %v8451_v20  ;;  %v8467_v18 = vadd.f32 %v11445_v22, %v13783_v37  ;;  %v11453_v35 = vpop.f32.mrf.mxu0 }
 0x49f   : > { %v11570_v61 = vpop.f32.mrf.mxu1  ;;  %v11451_v3 = vadd.f32 %v11450_v52, %v11449_v50  ;;  %v11454_v33 = vadd.f32 %v11453_v35, %v11452_v27  ;;  %v8470_v1 = vadd.f32 %v11448_v2, %v13788_v60 }
 0x4a0   : > { %v8732_v34 = vadd.f32 %v8731_v17, %v8701_v31  ;;  %v8664_v59 = vadd.f32 %v8663_v9, %v14002_v19  ;;  %v8703_v58 = vmul.f32 %v14014_v23, %v14014_v23  ;;  %v14034_v54 = vadd.f32 %v11570_v61, %v8462_v48 }
 0x4a1   : > { %v8614_v43 = vpop.f32.mrf.mxu1  ;;  %v8705_v9 = vmul.f32 %v14025_v30, %v14025_v30  ;;  %v8475_v6 = vadd.f32 %v11451_v3, %v13793_v24  ;;  %v8478_v52 = vadd.f32 %v11454_v33, %v13798_v45 }
 0x4a2   : > { %v8665_v62 = vadd.f32 %v8664_v59, %v14014_v23  ;;  %v8733_v63 = vadd.f32 %v8732_v34, %v8702_v15  ;;  %v14031_v20 = vadd.f32 %v8614_v43, %v8454_v32  ;;  %v8706_v15 = vmul.f32 %v14034_v54, %v14034_v54 }
 0x4a3   : > { %v11573_v28 = vpop.f32.mrf.mxu1 }
 0x4a4   : > { %v8734_v12 = vadd.f32 %v8733_v63, %v8703_v58  ;;  %v8666_v26 = vadd.f32 %v8665_v62, %v14031_v20  ;;  %v8704_v38 = vmul.f32 %v14031_v20, %v14031_v20  ;;  %v14051_v50 = vadd.f32 %v11573_v28, %v8475_v6 }
 0x4a5   : > { %v8627_v31 = vpop.f32.mrf.mxu1 }
 0x4a6   : > { %v8667_v17 = vadd.f32 %v8666_v26, %v14025_v30  ;;  %v8735_v37 = vadd.f32 %v8734_v12, %v8704_v38  ;;  %v14044_v4 = vadd.f32 %v8627_v31, %v8467_v18  ;;  %v8709_v45 = vmul.f32 %v14051_v50, %v14051_v50 }
 0x4a7   : > { %v11574_v61 = vpop.f32.mrf.mxu1 }
 0x4a8   : > { %v8736_v34 = vadd.f32 %v8735_v37, %v8705_v9  ;;  %v8668_v7 = vadd.f32 %v8667_v17, %v14034_v54  ;;  %v8707_v27 = vmul.f32 %v14044_v4, %v14044_v4  ;;  %v14059_v57 = vadd.f32 %v11574_v61, %v8478_v52 }
 0x4a9   : > { %v8630_v59 = vpop.f32.mrf.mxu1 }
 0x4aa   : > { %v8669_v16 = vadd.f32 %v8668_v7, %v14044_v4  ;;  %v8737_v24 = vadd.f32 %v8736_v34, %v8706_v15  ;;  %v14057_v32 = vadd.f32 %v8630_v59, %v8470_v1  ;;  %v8710_v58 = vmul.f32 %v14059_v57, %v14059_v57 }
 0x4ac   : > { %v8738_v22 = vadd.f32 %v8737_v24, %v8707_v27  ;;  %v8670_v48 = vadd.f32 %v8669_v16, %v14057_v32  ;;  %v8708_v60 = vmul.f32 %v14057_v32, %v14057_v32 }
 0x4ae   : > { %v8671_v43 = vadd.f32 %v8670_v48, %v14051_v50  ;;  %v8739_v62 = vadd.f32 %v8738_v22, %v8708_v60 }
 0x4b0   : > { %v8672_v63 = vadd.f32 %v8671_v43, %v14059_v57  ;;  %v8740_v28 = vadd.f32 %v8739_v62, %v8709_v45 }
 0x4b2   : > { %v8673_v18 = vrot.slane %v8672_v63, 4  ;;  %v8741_v35 = vadd.f32 %v8740_v28, %v8710_v58 }
 0x4b4   : > { %v8674_v12 = vadd.f32 %v8673_v18, %v8672_v63  ;;  %v8742_v26 = vrot.slane %v8741_v35, 4 }
 0x4b6   : > { %v8675_v38 = vrot.slane %v8674_v12, 2  ;;  %v8743_v2 = vadd.f32 %v8742_v26, %v8741_v35 }
 0x4b8   : > { %v8676_v3 = vadd.f32 %v8675_v38, %v8674_v12  ;;  %v8744_v31 = vrot.slane %v8743_v2, 2 }
 0x4ba   : > { %v8677_v9 = vrot.slane %v8676_v3, 1  ;;  %v8745_v17 = vadd.f32 %v8744_v31, %v8743_v2 }
 0x4bc   : > { %v8678_v37 = vadd.f32 %v8677_v9, %v8676_v3  ;;  %v8746_v33 = vrot.slane %v8745_v17, 1 }
 0x4be   : > { %v8747_v6 = vadd.f32 %v8746_v33, %v8745_v17  ;;  %v14070_v61 = vmul.f32 0.00390625, %v8678_v37 }
 0x4c0   : > { %v8749_v15 = vmul.f32 0.00390625, %v8747_v6  ;;  %v8750_v34 = vmul.f32 %v14070_v61, %v14070_v61  ;;  %v8762_v1 = vsub.f32 %v13893_v42, %v14070_v61  ;;  %v8765_v52 = vsub.f32 %v13910_v44, %v14070_v61 }
 0x4c1   : > { %v8766_v16 = vsub.f32 %v13929_v36, %v14070_v61  ;;  %v8767_v27 = vsub.f32 %v13923_v49, %v14070_v61  ;;  %v8768_v24 = vsub.f32 %v13934_v55, %v14070_v61  ;;  %v8769_v22 = vsub.f32 %v13946_v8, %v14070_v61 }
 0x4c2   : > { %v8751_v7 = vsub.f32 %v8749_v15, %v8750_v34  ;;  %v8770_v48 = vsub.f32 %v13965_v25, %v14070_v61  ;;  %v8771_v42 = vsub.f32 %v13959_v56, %v14070_v61  ;;  %v8772_v44 = vsub.f32 %v13970_v47, %v14070_v61 }
 0x4c3   : > { %v8773_v36 = vsub.f32 %v13982_v53, %v14070_v61  ;;  %v8774_v49 = vsub.f32 %v13999_v14, %v14070_v61  ;;  %v8775_v55 = vsub.f32 %v13993_v51, %v14070_v61  ;;  %v8776_v8 = vsub.f32 %v14002_v19, %v14070_v61 }
 0x4c4   : > { %v8752_v59 = vmax.f32 %v8751_v7, 0.0  ;;  %v8777_v25 = vsub.f32 %v14014_v23, %v14070_v61  ;;  %v8778_v56 = vsub.f32 %v14031_v20, %v14070_v61  ;;  %v8779_v47 = vsub.f32 %v14025_v30, %v14070_v61 }
 0x4c5   : > { %v8780_v53 = vsub.f32 %v14034_v54, %v14070_v61  ;;  %v8781_v14 = vsub.f32 %v14044_v4, %v14070_v61  ;;  %v8782_v51 = vsub.f32 %v14057_v32, %v14070_v61  ;;  %v8783_v19 = vsub.f32 %v14051_v50, %v14070_v61 }
 0x4c6   : > { %v8784_v23 = vsub.f32 %v14059_v57, %v14070_v61  ;;  %v8785_v60 = vadd.f32 1e-05, %v8752_v59  ;;  %v8753_v30 = vsub.f32 %v13810_v41, %v14070_v61  ;;  %v8754_v20 = vsub.f32 %v13818_v39, %v14070_v61 }
 0x4c7   : > { %v8755_v54 = vsub.f32 %v13815_v0, %v14070_v61  ;;  %v8756_v4 = vsub.f32 %v13825_v29, %v14070_v61  ;;  %v8757_v50 = vsub.f32 %v13838_v40, %v14070_v61  ;;  %v8758_v32 = vsub.f32 %v13857_v11, %v14070_v61 }
 0x4c8   : > { %12129 = vrsqrt.f32 %v8785_v60  ;;  %v8759_v57 = vsub.f32 %v13851_v46, %v14070_v61  ;;  %v8760_v41 = vsub.f32 %v13862_v10, %v14070_v61  ;;  %v8761_v39 = vsub.f32 %v13874_v13, %v14070_v61 }
 0x4c9   : > { %v8763_v0 = vsub.f32 %v13887_v5, %v14070_v61  ;;  %v8764_v29 = vsub.f32 %v13898_v21, %v14070_v61 }
 0x4d5   : > { %v12130_v45 = vpop.eup %12129 }
 0x4d6   : > { %v8787_v40 = vmul.f32 %v12130_v45, %v8753_v30  ;;  %v8788_v43 = vmul.f32 %v12130_v45, %v8754_v20  ;;  %v8789_v62 = vmul.f32 %v12130_v45, %v8755_v54  ;;  %v8790_v11 = vmul.f32 %v12130_v45, %v8756_v4  ;;  %v14404_v30 = vld [vmem:[#allocation14_spill] sm:$0xff]  ;;  %v14405_v54 = vld [vmem:[#allocation15_spill] sm:$0xff] }
 0x4d7   : > { %v8791_v58 = vmul.f32 %v12130_v45, %v8757_v50  ;;  %v8792_v63 = vmul.f32 %v12130_v45, %v8758_v32  ;;  %v8793_v46 = vmul.f32 %v12130_v45, %v8759_v57  ;;  %v8794_v28 = vmul.f32 %v12130_v45, %v8760_v41  ;;  %v14406_v50 = vld [vmem:[#allocation16_spill] sm:$0xff]  ;;  %v14407_v57 = vld [vmem:[#allocation17_spill] sm:$0xff]  ;;  %v14408_v41 = vld [vmem:[#allocation18_spill] sm:$0xff] }
 0x4d8   : > { %v8795_v18 = vmul.f32 %v12130_v45, %v8761_v39  ;;  %v8796_v35 = vmul.f32 %v12130_v45, %v8762_v1  ;;  %v8797_v10 = vmul.f32 %v12130_v45, %v8763_v0  ;;  %v8798_v12 = vmul.f32 %v12130_v45, %v8764_v29  ;;  %v14409_v0 = vld [vmem:[#allocation19_spill] sm:$0xff] }
 0x4d9   : > { %v8799_v26 = vmul.f32 %v12130_v45, %v8765_v52  ;;  %v8800_v13 = vmul.f32 %v12130_v45, %v8766_v16  ;;  %v8801_v38 = vmul.f32 %v12130_v45, %v8767_v27  ;;  %v8802_v5 = vmul.f32 %v12130_v45, %v8768_v24  ;;  %v14394_v16 = vld [vmem:[#allocation6_spill] sm:$0xff]  ;;  %v14395_v24 = vld [vmem:[#allocation7_spill] sm:$0xff] }
 0x4da   : > { %v8803_v2 = vmul.f32 %v12130_v45, %v8769_v22  ;;  %v8804_v3 = vmul.f32 %v12130_v45, %v8770_v48  ;;  %v8805_v21 = vmul.f32 %v12130_v45, %v8771_v42  ;;  %v8806_v31 = vmul.f32 %v12130_v45, %v8772_v44  ;;  %v14396_v48 = vld [vmem:[#allocation4_spill] sm:$0xff]  ;;  %v14397_v44 = vld [vmem:[#allocation5_spill] sm:$0xff] }
 0x4db   : > { %v8807_v9 = vmul.f32 %v12130_v45, %v8773_v36  ;;  %v8808_v17 = vmul.f32 %v12130_v45, %v8774_v49  ;;  %v8809_v37 = vmul.f32 %v12130_v45, %v8775_v55  ;;  %v8810_v33 = vmul.f32 %v12130_v45, %v8776_v8  ;;  %v14398_v49 = vld [vmem:[#allocation8_spill] sm:$0xff]  ;;  %v14399_v8 = vld [vmem:[#allocation9_spill] sm:$0xff] }
 0x4dc   : > { %v8811_v6 = vmul.f32 %v12130_v45, %v8777_v25  ;;  %v8812_v61 = vmul.f32 %v12130_v45, %v8778_v56  ;;  %v8813_v15 = vmul.f32 %v12130_v45, %v8779_v47  ;;  %v8814_v34 = vmul.f32 %v12130_v45, %v8780_v53  ;;  %v14400_v56 = vld [vmem:[#allocation10_spill] sm:$0xff]  ;;  %v14401_v53 = vld [vmem:[#allocation11_spill] sm:$0xff] }
 0x4dd   : > { %v8815_v7 = vmul.f32 %v12130_v45, %v8781_v14  ;;  %v8816_v1 = vmul.f32 %v12130_v45, %v8782_v51  ;;  %v8817_v52 = vmul.f32 %v12130_v45, %v8783_v19  ;;  %v8818_v59 = vmul.f32 %v12130_v45, %v8784_v23  ;;  %v14402_v51 = vld [vmem:[#allocation12_spill] sm:$0xff]  ;;  %v14403_v23 = vld [vmem:[#allocation13_spill] sm:$0xff] }
 0x4de   : > { %v8819_v27 = vadd.f32 %v8787_v40, %v14394_v16  ;;  %v8820_v22 = vadd.f32 %v8788_v43, %v14395_v24  ;;  %v8821_v42 = vadd.f32 %v8789_v62, %v14396_v48  ;;  %v8822_v36 = vadd.f32 %v8790_v11, %v14397_v44  ;;  %v14410_v40 = vld [vmem:[#allocation20_spill] sm:$0xff]  ;;  %v14411_v62 = vld [vmem:[#allocation21_spill] sm:$0xff]  ;;  %v14421_v16 = vld [vmem:[#allocation31_spill] sm:$0xff] }
 0x4df   : > { %v8823_v55 = vadd.f32 %v8791_v58, %v14398_v49  ;;  %v8824_v25 = vadd.f32 %v8792_v63, %v14399_v8  ;;  %v8825_v47 = vadd.f32 %v8793_v46, %v14400_v56  ;;  %v8826_v14 = vadd.f32 %v8794_v28, %v14401_v53  ;;  %v14412_v58 = vld [vmem:[#allocation22_spill] sm:$0xff]  ;;  %v14413_v46 = vld [vmem:[#allocation23_spill] sm:$0xff] }
 0x4e0   : > { %v8827_v19 = vadd.f32 %v8795_v18, %v14402_v51  ;;  %v8828_v60 = vadd.f32 %v8796_v35, %v14403_v23  ;;  %v8829_v20 = vadd.f32 %v8797_v10, %v14404_v30  ;;  %v8830_v4 = vadd.f32 %v8798_v12, %v14405_v54  ;;  %8851 = vst [vmem:[%s14143_s27] sm:$0xff] %v8819_v27  ;;  %v14414_v18 = vld [vmem:[#allocation24_spill] sm:$0xff]  ;;  %v14415_v10 = vld [vmem:[#allocation25_spill] sm:$0xff]  ;;  %v14425_v48 = vld [vmem:[#allocation35_spill] sm:$0xff] }
 0x4e1   : > { %8852 = vst [vmem:[%s14143_s27 + $0x8] sm:$0xff] %v8820_v22  ;;  %8853 = vst [vmem:[%s14143_s27 + $0x10] sm:$0xff] %v8821_v42  ;;  %v8831_v32 = vadd.f32 %v8799_v26, %v14406_v50  ;;  %v8832_v45 = vadd.f32 %v8800_v13, %v14407_v57  ;;  %v8833_v39 = vadd.f32 %v8801_v38, %v14408_v41  ;;  %v14416_v26 = vld [vmem:[#allocation26_spill] sm:$0xff]  ;;  %v14417_v38 = vld [vmem:[#allocation27_spill] sm:$0xff] }
 0x4e2   : > { %8854 = vst [vmem:[%s14143_s27 + $0x18] sm:$0xff] %v8822_v36  ;;  %v8834_v29 = vadd.f32 %v8802_v5, %v14409_v0  ;;  %8855 = vst [vmem:[%s14143_s27 + $0x20] sm:$0xff] %v8823_v55  ;;  %v8835_v43 = vadd.f32 %v8803_v2, %v14410_v40  ;;  %v8836_v11 = vadd.f32 %v8804_v3, %v14411_v62  ;;  %v14418_v2 = vld [vmem:[#allocation28_spill] sm:$0xff]  ;;  %v14423_v27 = vld [vmem:[#allocation33_spill] sm:$0xff] }
 0x4e3   : > { %8856 = vst [vmem:[%s14143_s27 + $0x28] sm:$0xff] %v8824_v25  ;;  %8857 = vst [vmem:[%s14143_s27 + $0x30] sm:$0xff] %v8825_v47  ;;  %v8837_v63 = vadd.f32 %v8805_v21, %v14412_v58  ;;  %v8838_v28 = vadd.f32 %v8806_v31, %v14413_v46  ;;  %v8839_v35 = vadd.f32 %v8807_v9, %v14414_v18  ;;  %v14419_v21 = vld [vmem:[#allocation29_spill] sm:$0xff]  ;;  %v14420_v9 = vld [vmem:[#allocation30_spill] sm:$0xff] }
 0x4e4   : > { %8858 = vst [vmem:[%s14143_s27 + $0x38] sm:$0xff] %v8826_v14  ;;  %8859 = vst [vmem:[%s14143_s27 + $0x40] sm:$0xff] %v8827_v19  ;;  %v8840_v12 = vadd.f32 %v8808_v17, %v14415_v10  ;;  %v8841_v13 = vadd.f32 %v8809_v37, %v14416_v26  ;;  %v8842_v5 = vadd.f32 %v8810_v33, %v14417_v38  ;;  %v14422_v33 = vld [vmem:[#allocation32_spill] sm:$0xff] }
 0x4e5   : > { %8860 = vst [vmem:[%s14143_s27 + $0x48] sm:$0xff] %v8828_v60  ;;  %8861 = vst [vmem:[%s14143_s27 + $0x50] sm:$0xff] %v8829_v20  ;;  %v8843_v3 = vadd.f32 %v8811_v6, %v14418_v2  ;;  %v8844_v31 = vadd.f32 %v8812_v61, %v14419_v21  ;;  %v8845_v17 = vadd.f32 %v8813_v15, %v14420_v9  ;;  %v14424_v61 = vld [vmem:[#allocation34_spill] sm:$0xff] }
 0x4e6   : > { %8862 = vst [vmem:[%s14143_s27 + $0x58] sm:$0xff] %v8830_v4  ;;  %8863 = vst [vmem:[%s14143_s27 + $0x60] sm:$0xff] %v8831_v32  ;;  %v8846_v37 = vadd.f32 %v8814_v34, %v14421_v16  ;;  %v8847_v6 = vadd.f32 %v8815_v7, %v14422_v33  ;;  %v8848_v24 = vadd.f32 %v8816_v1, %v14423_v27 }
 0x4e7   : > { %8864 = vst [vmem:[%s14143_s27 + $0x68] sm:$0xff] %v8832_v45  ;;  %8865 = vst [vmem:[%s14143_s27 + $0x70] sm:$0xff] %v8833_v39  ;;  %v8849_v22 = vadd.f32 %v8817_v52, %v14424_v61  ;;  %v8850_v15 = vadd.f32 %v8818_v59, %v14425_v48 }
 0x4e8   : > { %8866 = vst [vmem:[%s14143_s27 + $0x78] sm:$0xff] %v8834_v29  ;;  %8867 = vst [vmem:[%s14143_s27 + $0x80] sm:$0xff] %v8835_v43 }
 0x4e9   : > { %8868 = vst [vmem:[%s14143_s27 + $0x88] sm:$0xff] %v8836_v11  ;;  %8869 = vst [vmem:[%s14143_s27 + $0x90] sm:$0xff] %v8837_v63 }
 0x4ea   : > { %8870 = vst [vmem:[%s14143_s27 + $0x98] sm:$0xff] %v8838_v28  ;;  %8871 = vst [vmem:[%s14143_s27 + $0xa0] sm:$0xff] %v8839_v35 }
 0x4eb   : > { %8872 = vst [vmem:[%s14143_s27 + $0xa8] sm:$0xff] %v8840_v12  ;;  %8873 = vst [vmem:[%s14143_s27 + $0xb0] sm:$0xff] %v8841_v13 }
 0x4ec   : > { %8874 = vst [vmem:[%s14143_s27 + $0xb8] sm:$0xff] %v8842_v5  ;;  %8875 = vst [vmem:[%s14143_s27 + $0xc0] sm:$0xff] %v8843_v3 }
 0x4ed   : > { %8876 = vst [vmem:[%s14143_s27 + $0xc8] sm:$0xff] %v8844_v31  ;;  %8877 = vst [vmem:[%s14143_s27 + $0xd0] sm:$0xff] %v8845_v17 }
 0x4ee   : > { %8878 = vst [vmem:[%s14143_s27 + $0xd8] sm:$0xff] %v8846_v37  ;;  %8879 = vst [vmem:[%s14143_s27 + $0xe0] sm:$0xff] %v8847_v6 }
 0x4ef   : > { %8880 = vst [vmem:[%s14143_s27 + $0xe8] sm:$0xff] %v8848_v24  ;;  %8881 = vst [vmem:[%s14143_s27 + $0xf0] sm:$0xff] %v8849_v22 }
 0x4f0   : > { %8882 = vst [vmem:[%s14143_s27 + $0xf8] sm:$0xff] %v8850_v15 }
 0x4f1 PF: > { %s13_s12 = sadd.s32 1, %s12137_s12  }
 0x4f2   : > { %p10_p4 = scmp.ge.s32.totalorder %s13_s12, 4  }
 0x4f4   :  { %12 = sbr.rel (!%p10_p4) target bundleno = 1 (0x1), region = 65 }

</bundles_post_ra>
